<compile_context>
chip_gen: v5e
topology: v5e:2x2
jax: 0.10.0
libtpu: 0.0.40
codegen_flags: <defaults>
</compile_context>

<pallas_src>
import functools
import math

import jax
import jax.numpy as jnp
from jax import lax
from jax.experimental import pallas as pl
from jax.experimental.pallas import tpu as pltpu


def _round_up(x, m):
    return (x + m - 1) // m * m


# ----------------------------------------------------------------------------
# Kernel 1: tiled fused matmul   out = act((A @ W) * scale + bias)
# A, W are bf16 (MXU inputs); accumulation + epilogue in f32.
# Grid (i, j, k): i over M tiles, j over N tiles, k over K tiles (innermost).
# ----------------------------------------------------------------------------
def _matmul_kernel(a_ref, w_ref, s_ref, b_ref, o_ref, acc_ref, *, act):
    k = pl.program_id(2)

    @pl.when(k == 0)
    def _():
        acc_ref[...] = jnp.zeros_like(acc_ref)

    acc_ref[...] += jnp.dot(a_ref[...], w_ref[...],
                            preferred_element_type=jnp.float32)

    @pl.when(k == pl.num_programs(2) - 1)
    def _():
        y = acc_ref[...] * s_ref[...] + b_ref[...]
        if act == "leaky_relu":
            y = jnp.where(y >= 0, y, 0.2 * y)
        o_ref[...] = y.astype(o_ref.dtype)


def prep_w(w, scale=None, bias=None):
    """One-time prep of a (K, N) weight: pad K/N to 128 multiples, cast to bf16."""
    K, N = w.shape
    pK, pN = _round_up(K, 128), _round_up(N, 128)
    w_p = jnp.pad(w.astype(jnp.float32),
                  ((0, pK - K), (0, pN - N))).astype(jnp.bfloat16)
    s = jnp.ones((N,), jnp.float32) if scale is None else scale.astype(jnp.float32)
    b = jnp.zeros((N,), jnp.float32) if bias is None else bias.astype(jnp.float32)
    s_p = jnp.pad(s, (0, pN - N)).reshape(1, pN)
    b_p = jnp.pad(b, (0, pN - N)).reshape(1, pN)
    return {"w": w_p, "s": s_p, "b": b_p, "k": K, "n": N}


def pallas_matmul(a, wp, *, act="none", out_dtype=jnp.float32):
    """a: (M, K).  wp: dict from prep_w.  Returns act((a @ w) * scale + bias): (M, N)."""
    M, K = a.shape
    assert K == wp["k"], (K, wp["k"])
    N = wp["n"]
    pK, pN = wp["w"].shape

    # Tile selection: 256-wide where the padded dims allow it, bf16-friendly sublanes.
    tn = 256 if (pN >= 256 and pN % 256 == 0) else 128
    tk = 256 if (pK >= 256 and pK % 256 == 0) else 128
    pm_min = _round_up(M, 16)
    if pm_min <= 512:
        tm, pM = pm_min, pm_min
    else:
        tm, pM = 256, _round_up(M, 256)

    a_p = a.astype(jnp.bfloat16)
    if (pM, pK) != (M, K):
        a_p = jnp.pad(a_p, ((0, pM - M), (0, pK - K)))

    grid = (pM // tm, pN // tn, pK // tk)
    out = pl.pallas_call(
        functools.partial(_matmul_kernel, act=act),
        out_shape=jax.ShapeDtypeStruct((pM, pN), out_dtype),
        grid_spec=pltpu.PrefetchScalarGridSpec(
            num_scalar_prefetch=0,
            grid=grid,
            in_specs=[
                pl.BlockSpec((tm, tk), lambda i, j, k: (i, k)),
                pl.BlockSpec((tk, tn), lambda i, j, k: (k, j)),
                pl.BlockSpec((1, tn), lambda i, j, k: (0, j)),
                pl.BlockSpec((1, tn), lambda i, j, k: (0, j)),
            ],
            out_specs=pl.BlockSpec((tm, tn), lambda i, j, k: (i, j)),
            scratch_shapes=[pltpu.VMEM((tm, tn), jnp.float32)],
        ),
        compiler_params=pltpu.CompilerParams(
            dimension_semantics=("parallel", "parallel", "arbitrary")),
    )(a_p, wp["w"], wp["s"], wp["b"])
    if (pM, pN) != (M, N):
        out = out[:M, :N]
    return out


# ----------------------------------------------------------------------------
# Kernel 2: full bidirectional LSTM recurrence in one invocation.
# xg holds BOTH directions' precomputed input projections in a 128-lane-aligned
# gate layout: per direction 4 gates x Hp(=128) columns.  PyTorch gate order i,f,g,o.
# ----------------------------------------------------------------------------
def _bilstm_kernel(xg_ref, whh_ref, rec_f_ref, rec_r_ref, *, T, Hp):
    G = 4 * Hp
    B = xg_ref.shape[1]

    def gate_act(g):
        i = jax.nn.sigmoid(g[:, 0 * Hp:1 * Hp])
        f = jax.nn.sigmoid(g[:, 1 * Hp:2 * Hp])
        c = jnp.tanh(g[:, 2 * Hp:3 * Hp])
        o = jax.nn.sigmoid(g[:, 3 * Hp:4 * Hp])
        return i, f, c, o

    def step(t, carry):
        hf, cf, hr, cr = carry
        tr = T - 1 - t
        gf = xg_ref[t][:, 0:G] + jnp.dot(
            hf, whh_ref[:, 0:G], preferred_element_type=jnp.float32)
        gr = xg_ref[tr][:, G:2 * G] + jnp.dot(
            hr, whh_ref[:, G:2 * G], preferred_element_type=jnp.float32)
        i_f, f_f, g_f, o_f = gate_act(gf)
        cf = f_f * cf + i_f * g_f
        hf = o_f * jnp.tanh(cf)
        i_r, f_r, g_r, o_r = gate_act(gr)
        cr = f_r * cr + i_r * g_r
        hr = o_r * jnp.tanh(cr)
        rec_f_ref[t] = hf
        rec_r_ref[tr] = hr
        return hf, cf, hr, cr

    z = jnp.zeros((B, Hp), jnp.float32)
    lax.fori_loop(0, T, step, (z, z, z, z))


def bidirectional_lstm_block(x, p):
    """BidirectionalLSTM: x (T, B, F) -> (T, B, out_dim).
    One matmul for both directions' input gates, one Pallas kernel for the
    recurrence, one matmul for the output Linear."""
    T, B, F = x.shape
    Hp = p["Hp"]
    G = 4 * Hp
    xg = pallas_matmul(x.reshape(T * B, F), p["w_in"]).reshape(T, B, 2 * G)
    rec_f, rec_r = pl.pallas_call(
        functools.partial(_bilstm_kernel, T=T, Hp=Hp),
        out_shape=(jax.ShapeDtypeStruct((T, B, Hp), jnp.float32),
                   jax.ShapeDtypeStruct((T, B, Hp), jnp.float32)),
        grid_spec=pltpu.PrefetchScalarGridSpec(
            num_scalar_prefetch=0,
            grid=(1,),
            in_specs=[
                pl.BlockSpec((T, B, 2 * G), lambda i: (0, 0, 0)),
                pl.BlockSpec((Hp, 2 * G), lambda i: (0, 0)),
            ],
            out_specs=(pl.BlockSpec((T, B, Hp), lambda i: (0, 0, 0)),
                       pl.BlockSpec((T, B, Hp), lambda i: (0, 0, 0))),
        ),
        compiler_params=pltpu.CompilerParams(
            dimension_semantics=("arbitrary",)),
    )(xg, p["whh"])
    rec = jnp.concatenate([rec_f, rec_r], axis=-1).reshape(T * B, 2 * Hp)
    out = pallas_matmul(rec, p["w_out"])
    return out.reshape(T, B, -1)


# ----------------------------------------------------------------------------
# Kernel 3: self-attention (relation_aware=False path): scores, softmax, P @ V
# for all batch elements in a single invocation.  Q/K/V were already projected
# by one batched pallas_matmul (lane-aligned blocks of Hp columns each).
# ----------------------------------------------------------------------------
def _attention_kernel(qkv_ref, z_ref, e_ref, *, H, Hp, scale):
    q = qkv_ref[:, :, 0 * Hp:1 * Hp]
    k = qkv_ref[:, :, 1 * Hp:2 * Hp]
    v = qkv_ref[:, :, 2 * Hp:3 * Hp]
    s = jnp.einsum("btd,bsd->bts", q, k,
                   preferred_element_type=jnp.float32) * scale
    s = s - jnp.max(s, axis=-1, keepdims=True)
    p = jnp.exp(s)
    p = p * pl.reciprocal(jnp.sum(p, axis=-1, keepdims=True), approx=True)
    z = jnp.einsum("bts,bsd->btd", p, v, preferred_element_type=jnp.float32)
    z_ref[...] = z[:, :, :H].astype(z_ref.dtype)
    e_ref[...] = p.astype(e_ref.dtype)


def attention(x, p):
    """x: (B, T, H).  Returns z: (B, T, H), softmaxed energies: (B, T, T)."""
    B, T, H = x.shape
    Hp = p["Hp"]
    qkv = pallas_matmul(x.reshape(B * T, H), p["w_qkv"]).reshape(B, T, 3 * Hp)
    z, e = pl.pallas_call(
        functools.partial(_attention_kernel, H=H, Hp=Hp,
                          scale=1.0 / math.sqrt(H)),
        out_shape=(jax.ShapeDtypeStruct((B, T, H), jnp.float32),
                   jax.ShapeDtypeStruct((B, T, T), jnp.float32)),
        grid_spec=pltpu.PrefetchScalarGridSpec(
            num_scalar_prefetch=0,
            grid=(1,),
            in_specs=[pl.BlockSpec((B, T, 3 * Hp), lambda i: (0, 0, 0))],
            out_specs=(pl.BlockSpec((B, T, H), lambda i: (0, 0, 0)),
                       pl.BlockSpec((B, T, T), lambda i: (0, 0, 0))),
        ),
        compiler_params=pltpu.CompilerParams(
            dimension_semantics=("arbitrary",)),
    )(qkv)
    return z, e


# ----------------------------------------------------------------------------
# Plain-JAX glue: NHWC im2col, NHWC max pooling, parameter prep, assembly.
# ----------------------------------------------------------------------------
def im2col_nhwc(x, k, s, pad):
    # TODO(synk): fuse patch extraction into the conv matmul (k*k shifted BlockSpecs)
    # to avoid materializing the k*k-expanded patch matrix in HBM.
    B, H, W, C = x.shape
    xp = jnp.pad(x, ((0, 0), (pad, pad), (pad, pad), (0, 0)))
    Ho = (H + 2 * pad - k) // s + 1
    Wo = (W + 2 * pad - k) // s + 1
    cols = []
    for di in range(k):
        for dj in range(k):
            cols.append(xp[:, di:di + Ho * s:s, dj:dj + Wo * s:s, :])
    patches = jnp.concatenate(cols, axis=-1)            # (B, Ho, Wo, k*k*C)
    return patches.reshape(B * Ho * Wo, k * k * C), Ho, Wo


def conv_layer(x, wp, k, s, pad):
    """x: NHWC bf16.  Conv + (folded eval-mode BN) + LeakyReLU(0.2) -> NHWC bf16."""
    B = x.shape[0]
    patches, Ho, Wo = im2col_nhwc(x, k, s, pad)
    out = pallas_matmul(patches, wp, act="leaky_relu", out_dtype=jnp.bfloat16)
    return out.reshape(B, Ho, Wo, wp["n"])


def max_pool(x, k, s, pad):
    # PyTorch MaxPool2d implicit -inf padding; NHWC layout.
    kh, kw = k
    sh, sw = s
    ph, pw = pad
    return lax.reduce_window(x, jnp.array(-jnp.inf, x.dtype), lax.max,
                             (1, kh, kw, 1), (1, sh, sw, 1),
                             ((0, 0), (ph, ph), (pw, pw), (0, 0)))


def prep_lstm(p):
    """Gate-pad (128-lane-align) and merge both LSTM directions + output Linear."""
    H = p["w_hh_f"].shape[1]
    Hp = _round_up(H, 128)

    def gate_pad_cols(w_t):                              # (X, 4H) -> (X, 4*Hp)
        return jnp.concatenate(
            [jnp.pad(w_t[:, g * H:(g + 1) * H], ((0, 0), (0, Hp - H)))
             for g in range(4)], axis=1)

    w_in = jnp.concatenate([gate_pad_cols(p["w_ih_f"].T),
                            gate_pad_cols(p["w_ih_r"].T)], axis=1)
    b_in = jnp.concatenate(
        [gate_pad_cols((p["b_ih_f"] + p["b_hh_f"]).reshape(1, -1))[0],
         gate_pad_cols((p["b_ih_r"] + p["b_hh_r"]).reshape(1, -1))[0]], axis=0)
    whh = jnp.concatenate(
        [jnp.pad(gate_pad_cols(p["w_hh_f"].T), ((0, Hp - H), (0, 0))),
         jnp.pad(gate_pad_cols(p["w_hh_r"].T), ((0, Hp - H), (0, 0)))], axis=1)

    out_dim = p["lin_w"].shape[0]
    lin_in = jnp.zeros((2 * Hp, out_dim), jnp.float32)
    lin_in = lin_in.at[0:H].set(p["lin_w"][:, :H].T)
    lin_in = lin_in.at[Hp:Hp + H].set(p["lin_w"][:, H:].T)

    return {"w_in": prep_w(w_in, bias=b_in),
            "w_out": prep_w(lin_in, bias=p["lin_b"]),
            "whh": whh.astype(jnp.float32),
            "Hp": Hp}


def prepare_params(raw):
    """One-time weight transposition / padding / bf16 casting / BN folding."""
    prep = {}
    for i in range(7):
        p = raw[f"conv{i}"]
        w = p["w"]                                       # (Cout, Cin, k, k)
        cout, cin, kk = w.shape[0], w.shape[1], w.shape[2]
        wmat = w.transpose(2, 3, 1, 0).reshape(kk * kk * cin, cout)
        if "bn_gamma" in p:
            inv = p["bn_gamma"] / jnp.sqrt(p["bn_var"] + 1e-5)
            scale = inv
            bias = (p["b"] - p["bn_mean"]) * inv + p["bn_beta"]
        else:
            scale = None
            bias = p["b"]
        prep[f"conv{i}"] = prep_w(wmat, scale, bias)

    prep["rnn1"] = prep_lstm(raw["rnn1"])
    prep["rnn2"] = prep_lstm(raw["rnn2"])

    H = raw["attn"]["wq"].shape[0]
    Hp = _round_up(H, 128)
    wqkv = jnp.zeros((H, 3 * Hp), jnp.float32)
    wqkv = wqkv.at[:, 0:H].set(raw["attn"]["wq"].T)
    wqkv = wqkv.at[:, Hp:Hp + H].set(raw["attn"]["wk"].T)
    wqkv = wqkv.at[:, 2 * Hp:2 * Hp + H].set(raw["attn"]["wv"].T)
    prep["attn"] = {"w_qkv": prep_w(wqkv), "Hp": Hp}
    return prep


def attend_crnn_forward(prep, x):
    # --- CNN: NCHW input -> NHWC bf16 feature maps ---
    h = x.transpose(0, 2, 3, 1).astype(jnp.bfloat16)
    h = conv_layer(h, prep["conv0"], 3, 1, 1)
    h = max_pool(h, (2, 2), (2, 2), (0, 0))
    h = conv_layer(h, prep["conv1"], 3, 1, 1)
    h = max_pool(h, (2, 2), (2, 2), (0, 0))
    h = conv_layer(h, prep["conv2"], 3, 1, 1)            # + folded BN
    h = conv_layer(h, prep["conv3"], 3, 1, 1)
    h = max_pool(h, (2, 2), (2, 1), (0, 1))
    h = conv_layer(h, prep["conv4"], 3, 1, 1)            # + folded BN
    h = conv_layer(h, prep["conv5"], 3, 1, 1)
    h = max_pool(h, (2, 2), (2, 1), (0, 1))
    h = conv_layer(h, prep["conv6"], 2, 1, 0)            # + folded BN
    B, Hh, W, C = h.shape
    assert Hh == 1, "the height of conv must be 1"
    conv = h.reshape(B, W, C).transpose(1, 0, 2)         # (T, B, 512)

    # --- rnn1 -> attention -> rnn2 ---
    rnn = bidirectional_lstm_block(conv, prep["rnn1"])   # (T, B, hidden)
    z, energies = attention(rnn.transpose(1, 0, 2), prep["attn"])
    output = bidirectional_lstm_block(z.transpose(1, 0, 2), prep["rnn2"])
    return output, energies
    # TODO(synk): relation_aware=True branch (per-position alpha_K/alpha_V) not implemented.


# ----------------------------------------------------------------------------
# PyTorch-like parameter initialization (raw layout, prepared once afterwards).
# ----------------------------------------------------------------------------
def _uniform(key, shape, bound):
    return jax.random.uniform(key, shape, jnp.float32, -bound, bound)


def init_params(key, nc, hidden_size, num_class):
    nm = [64, 128, 256, 256, 512, 512, 512]
    ks = [3, 3, 3, 3, 3, 3, 2]
    bn = [False, False, True, False, True, False, True]
    params = {}
    keys = jax.random.split(key, 64)
    ki = iter(keys)
    for i in range(7):
        cin = nc if i == 0 else nm[i - 1]
        cout, k = nm[i], ks[i]
        bound = 1.0 / math.sqrt(cin * k * k)
        p = {"w": _uniform(next(ki), (cout, cin, k, k), bound),
             "b": _uniform(next(ki), (cout,), bound)}
        if bn[i]:
            p["bn_gamma"] = jnp.ones((cout,), jnp.float32)
            p["bn_beta"] = jnp.zeros((cout,), jnp.float32)
            p["bn_mean"] = jnp.zeros((cout,), jnp.float32)
            p["bn_var"] = jnp.ones((cout,), jnp.float32)
        params[f"conv{i}"] = p

    def lstm_block(kiter, in_dim, hidden, out_dim):
        bh = 1.0 / math.sqrt(hidden)
        p = {}
        for suf in ("f", "r"):
            p[f"w_ih_{suf}"] = _uniform(next(kiter), (4 * hidden, in_dim), bh)
            p[f"w_hh_{suf}"] = _uniform(next(kiter), (4 * hidden, hidden), bh)
            p[f"b_ih_{suf}"] = _uniform(next(kiter), (4 * hidden,), bh)
            p[f"b_hh_{suf}"] = _uniform(next(kiter), (4 * hidden,), bh)
        bl = 1.0 / math.sqrt(2 * hidden)
        p["lin_w"] = _uniform(next(kiter), (out_dim, 2 * hidden), bl)
        p["lin_b"] = _uniform(next(kiter), (out_dim,), bl)
        return p

    params["rnn1"] = lstm_block(ki, 512, hidden_size, hidden_size)
    params["rnn2"] = lstm_block(ki, hidden_size, hidden_size, num_class)

    ba = 1.0 / math.sqrt(hidden_size)
    params["attn"] = {
        "wq": _uniform(next(ki), (hidden_size, hidden_size), ba),
        "wk": _uniform(next(ki), (hidden_size, hidden_size), ba),
        "wv": _uniform(next(ki), (hidden_size, hidden_size), ba),
    }
    return params


if __name__ == "__main__":
    key = jax.random.PRNGKey(0)
    pkey, xkey = jax.random.split(key)
    nc, hidden_size, num_class = 1, 32, 8
    raw_params = init_params(pkey, nc, hidden_size, num_class)
    prep = prepare_params(raw_params)                    # one-time weight prep

    # Image height must be 32 so the CNN collapses H to 1; width 16 -> seq_len 5.
    x = jax.random.normal(xkey, (2, nc, 32, 16), jnp.float32)

    fwd = jax.jit(functools.partial(attend_crnn_forward, prep))
    output, energies = fwd(x)
    jax.block_until_ready((output, energies))

    assert output.shape == (5, 2, num_class), output.shape
    assert energies.shape == (2, 5, 5), energies.shape
    assert bool(jnp.all(jnp.isfinite(output))) and bool(jnp.all(jnp.isfinite(energies)))
    print("KERNEL_OK")
</pallas_src>

<mosaic_0001>
module attributes {stable_mosaic.version = 11 : i64} {
  func.func @_matmul_kernel(%arg0: i32, %arg1: i32, %arg2: i32, %arg3: memref<256x128xbf16, #tpu.memory_space<vmem>>, %arg4: memref<128x128xbf16, #tpu.memory_space<vmem>>, %arg5: memref<1x128xf32, #tpu.memory_space<vmem>>, %arg6: memref<1x128xf32, #tpu.memory_space<vmem>>, %arg7: memref<256x128xbf16, #tpu.memory_space<vmem>>, %arg8: memref<256x128xf32, #tpu.memory_space<vmem>>) attributes {dimension_semantics = [#tpu.dimension_semantics<parallel>, #tpu.dimension_semantics<parallel>, #tpu.dimension_semantics<arbitrary>], iteration_bounds = array<i64: 4, 1, 1>, scalar_prefetch = 0 : i64, scratch_operands = 1 : i64, tpu.core_type = #tpu.core_type<tc>, window_params = [{transform_indices = @transform_0, window_bounds = array<i64: 256, 128>}, {transform_indices = @transform_1, window_bounds = array<i64: 128, 128>}, {transform_indices = @transform_2, window_bounds = array<i64: 1, 128>}, {transform_indices = @transform_3, window_bounds = array<i64: 1, 128>}, {transform_indices = @transform_4, window_bounds = array<i64: 256, 128>}]} {
    %c0_i32 = arith.constant 0 : i32
    %0 = arith.cmpi eq, %arg2, %c0_i32 : i32
    %1 = arith.extui %0 : i1 to i32
    %c0_i32_0 = arith.constant 0 : i32
    %2 = arith.cmpi ne, %1, %c0_i32_0 : i32
    scf.if %2 {
      %cst_10 = arith.constant 0.000000e+00 : f32
      %12 = vector.broadcast %cst_10 : f32 to vector<256x128xf32>
      %c0_11 = arith.constant 0 : index
      %c0_12 = arith.constant 0 : index
      %13 = vector.load %arg8[%c0_11, %c0_12] : memref<256x128xf32, #tpu.memory_space<vmem>>, vector<256x128xf32>
      tpu.vector_store %arg8[%c0_11, %c0_12], %12 {strides = array<i32>} : memref<256x128xf32, #tpu.memory_space<vmem>>, vector<256x128xf32>,
    } else {
    }
    %c0 = arith.constant 0 : index
    %c0_1 = arith.constant 0 : index
    %3 = vector.load %arg8[%c0, %c0_1] : memref<256x128xf32, #tpu.memory_space<vmem>>, vector<256x128xf32>
    %c0_2 = arith.constant 0 : index
    %c0_3 = arith.constant 0 : index
    %4 = vector.load %arg3[%c0_2, %c0_3] : memref<256x128xbf16, #tpu.memory_space<vmem>>, vector<256x128xbf16>
    %c0_4 = arith.constant 0 : index
    %c0_5 = arith.constant 0 : index
    %5 = vector.load %arg4[%c0_4, %c0_5] : memref<128x128xbf16, #tpu.memory_space<vmem>>, vector<128x128xbf16>
    %cst = arith.constant dense<0.000000e+00> : vector<256x128xf32>
    %6 = tpu.matmul %4, %5, %cst {dimension_numbers = #tpu.dot_dimension_numbers<[1], [0], [0], [1], [0, 0, 1, 1], [], []>} : vector<256x128xbf16>, vector<128x128xbf16>, vector<256x128xf32> -> vector<256x128xf32>
    %7 = arith.addf %3, %6 : vector<256x128xf32>
    %c0_6 = arith.constant 0 : index
    %c0_7 = arith.constant 0 : index
    %8 = vector.load %arg8[%c0_6, %c0_7] : memref<256x128xf32, #tpu.memory_space<vmem>>, vector<256x128xf32>
    tpu.vector_store %arg8[%c0_6, %c0_7], %7 {strides = array<i32>} : memref<256x128xf32, #tpu.memory_space<vmem>>, vector<256x128xf32>,
    %c0_i32_8 = arith.constant 0 : i32
    %9 = arith.cmpi eq, %arg2, %c0_i32_8 : i32
    %10 = arith.extui %9 : i1 to i32
    %c0_i32_9 = arith.constant 0 : i32
    %11 = arith.cmpi ne, %10, %c0_i32_9 : i32
    scf.if %11 {
      %c0_10 = arith.constant 0 : index
      %c0_11 = arith.constant 0 : index
      %12 = vector.load %arg8[%c0_10, %c0_11] : memref<256x128xf32, #tpu.memory_space<vmem>>, vector<256x128xf32>
      %c0_12 = arith.constant 0 : index
      %c0_13 = arith.constant 0 : index
      %13 = vector.load %arg5[%c0_12, %c0_13] : memref<1x128xf32, #tpu.memory_space<vmem>>, vector<1x128xf32>
      %14 = vector.broadcast %13 : vector<1x128xf32> to vector<256x128xf32>
      %15 = arith.mulf %12, %14 : vector<256x128xf32>
      %c0_14 = arith.constant 0 : index
      %c0_15 = arith.constant 0 : index
      %16 = vector.load %arg6[%c0_14, %c0_15] : memref<1x128xf32, #tpu.memory_space<vmem>>, vector<1x128xf32>
      %17 = vector.broadcast %16 : vector<1x128xf32> to vector<256x128xf32>
      %18 = arith.addf %15, %17 : vector<256x128xf32>
      %cst_16 = arith.constant 0.000000e+00 : f32
      %19 = vector.broadcast %cst_16 : f32 to vector<256x128xf32>
      %20 = arith.cmpf oge, %18, %19 : vector<256x128xf32>
      %cst_17 = arith.constant 2.000000e-01 : f32
      %21 = vector.broadcast %cst_17 : f32 to vector<256x128xf32>
      %22 = arith.mulf %21, %18 : vector<256x128xf32>
      %23 = arith.select %20, %18, %22 : vector<256x128xi1>, vector<256x128xf32>
      %24 = arith.truncf %23 : vector<256x128xf32> to vector<256x128xbf16>
      %c0_18 = arith.constant 0 : index
      %c0_19 = arith.constant 0 : index
      %25 = vector.load %arg7[%c0_18, %c0_19] : memref<256x128xbf16, #tpu.memory_space<vmem>>, vector<256x128xbf16>
      tpu.vector_store %arg7[%c0_18, %c0_19], %24 {strides = array<i32>} : memref<256x128xbf16, #tpu.memory_space<vmem>>, vector<256x128xbf16>,
    } else {
    }
    return
  }
  func.func @transform_0(%arg0: i32, %arg1: i32, %arg2: i32) -> (i32, i32) {
    %c0_i32 = arith.constant 0 : i32
    return %arg0, %arg2 : i32, i32
  }
  func.func @transform_1(%arg0: i32, %arg1: i32, %arg2: i32) -> (i32, i32) {
    %c0_i32 = arith.constant 0 : i32
    return %arg2, %arg1 : i32, i32
  }
  func.func @transform_2(%arg0: i32, %arg1: i32, %arg2: i32) -> (i32, i32) {
    %c0_i32 = arith.constant 0 : i32
    %c0_i32_0 = arith.constant 0 : i32
    return %c0_i32, %arg1 : i32, i32
  }
  func.func @transform_3(%arg0: i32, %arg1: i32, %arg2: i32) -> (i32, i32) {
    %c0_i32 = arith.constant 0 : i32
    %c0_i32_0 = arith.constant 0 : i32
    return %c0_i32, %arg1 : i32, i32
  }
  func.func @transform_4(%arg0: i32, %arg1: i32, %arg2: i32) -> (i32, i32) {
    %c0_i32 = arith.constant 0 : i32
    return %arg0, %arg1 : i32, i32
  }
}

module attributes {stable_mosaic.version = 11 : i64} {
  func.func @_matmul_kernel(%arg0: i32, %arg1: i32, %arg2: i32, %arg3: memref<256x128xbf16, #tpu.memory_space<vmem>>, %arg4: memref<128x128xbf16, #tpu.memory_space<vmem>>, %arg5: memref<1x128xf32, #tpu.memory_space<vmem>>, %arg6: memref<1x128xf32, #tpu.memory_space<vmem>>, %arg7: memref<256x128xbf16, #tpu.memory_space<vmem>>, %arg8: memref<256x128xf32, #tpu.memory_space<vmem>>) attributes {dimension_semantics = [#tpu.dimension_semantics<parallel>, #tpu.dimension_semantics<parallel>, #tpu.dimension_semantics<arbitrary>], iteration_bounds = array<i64: 1, 1, 5>, scalar_prefetch = 0 : i64, scratch_operands = 1 : i64, tpu.core_type = #tpu.core_type<tc>, window_params = [{transform_indices = @transform_0, window_bounds = array<i64: 256, 128>}, {transform_indices = @transform_1, window_bounds = array<i64: 128, 128>}, {transform_indices = @transform_2, window_bounds = array<i64: 1, 128>}, {transform_indices = @transform_3, window_bounds = array<i64: 1, 128>}, {transform_indices = @transform_4, window_bounds = array<i64: 256, 128>}]} {
    %c0_i32 = arith.constant 0 : i32
    %0 = arith.cmpi eq, %arg2, %c0_i32 : i32
    %1 = arith.extui %0 : i1 to i32
    %c0_i32_0 = arith.constant 0 : i32
    %2 = arith.cmpi ne, %1, %c0_i32_0 : i32
    scf.if %2 {
      %cst_9 = arith.constant 0.000000e+00 : f32
      %12 = vector.broadcast %cst_9 : f32 to vector<256x128xf32>
      %c0_10 = arith.constant 0 : index
      %c0_11 = arith.constant 0 : index
      %13 = vector.load %arg8[%c0_10, %c0_11] : memref<256x128xf32, #tpu.memory_space<vmem>>, vector<256x128xf32>
      tpu.vector_store %arg8[%c0_10, %c0_11], %12 {strides = array<i32>} : memref<256x128xf32, #tpu.memory_space<vmem>>, vector<256x128xf32>,
    } else {
    }
    %c0 = arith.constant 0 : index
    %c0_1 = arith.constant 0 : index
    %3 = vector.load %arg8[%c0, %c0_1] : memref<256x128xf32, #tpu.memory_space<vmem>>, vector<256x128xf32>
    %c0_2 = arith.constant 0 : index
    %c0_3 = arith.constant 0 : index
    %4 = vector.load %arg3[%c0_2, %c0_3] : memref<256x128xbf16, #tpu.memory_space<vmem>>, vector<256x128xbf16>
    %c0_4 = arith.constant 0 : index
    %c0_5 = arith.constant 0 : index
    %5 = vector.load %arg4[%c0_4, %c0_5] : memref<128x128xbf16, #tpu.memory_space<vmem>>, vector<128x128xbf16>
    %cst = arith.constant dense<0.000000e+00> : vector<256x128xf32>
    %6 = tpu.matmul %4, %5, %cst {dimension_numbers = #tpu.dot_dimension_numbers<[1], [0], [0], [1], [0, 0, 1, 1], [], []>} : vector<256x128xbf16>, vector<128x128xbf16>, vector<256x128xf32> -> vector<256x128xf32>
    %7 = arith.addf %3, %6 : vector<256x128xf32>
    %c0_6 = arith.constant 0 : index
    %c0_7 = arith.constant 0 : index
    %8 = vector.load %arg8[%c0_6, %c0_7] : memref<256x128xf32, #tpu.memory_space<vmem>>, vector<256x128xf32>
    tpu.vector_store %arg8[%c0_6, %c0_7], %7 {strides = array<i32>} : memref<256x128xf32, #tpu.memory_space<vmem>>, vector<256x128xf32>,
    %c4_i32 = arith.constant 4 : i32
    %9 = arith.cmpi eq, %arg2, %c4_i32 : i32
    %10 = arith.extui %9 : i1 to i32
    %c0_i32_8 = arith.constant 0 : i32
    %11 = arith.cmpi ne, %10, %c0_i32_8 : i32
    scf.if %11 {
      %c0_9 = arith.constant 0 : index
      %c0_10 = arith.constant 0 : index
      %12 = vector.load %arg8[%c0_9, %c0_10] : memref<256x128xf32, #tpu.memory_space<vmem>>, vector<256x128xf32>
      %c0_11 = arith.constant 0 : index
      %c0_12 = arith.constant 0 : index
      %13 = vector.load %arg5[%c0_11, %c0_12] : memref<1x128xf32, #tpu.memory_space<vmem>>, vector<1x128xf32>
      %14 = vector.broadcast %13 : vector<1x128xf32> to vector<256x128xf32>
      %15 = arith.mulf %12, %14 : vector<256x128xf32>
      %c0_13 = arith.constant 0 : index
      %c0_14 = arith.constant 0 : index
      %16 = vector.load %arg6[%c0_13, %c0_14] : memref<1x128xf32, #tpu.memory_space<vmem>>, vector<1x128xf32>
      %17 = vector.broadcast %16 : vector<1x128xf32> to vector<256x128xf32>
      %18 = arith.addf %15, %17 : vector<256x128xf32>
      %cst_15 = arith.constant 0.000000e+00 : f32
      %19 = vector.broadcast %cst_15 : f32 to vector<256x128xf32>
      %20 = arith.cmpf oge, %18, %19 : vector<256x128xf32>
      %cst_16 = arith.constant 2.000000e-01 : f32
      %21 = vector.broadcast %cst_16 : f32 to vector<256x128xf32>
      %22 = arith.mulf %21, %18 : vector<256x128xf32>
      %23 = arith.select %20, %18, %22 : vector<256x128xi1>, vector<256x128xf32>
      %24 = arith.truncf %23 : vector<256x128xf32> to vector<256x128xbf16>
      %c0_17 = arith.constant 0 : index
      %c0_18 = arith.constant 0 : index
      %25 = vector.load %arg7[%c0_17, %c0_18] : memref<256x128xbf16, #tpu.memory_space<vmem>>, vector<256x128xbf16>
      tpu.vector_store %arg7[%c0_17, %c0_18], %24 {strides = array<i32>} : memref<256x128xbf16, #tpu.memory_space<vmem>>, vector<256x128xbf16>,
    } else {
    }
    return
  }
  func.func @transform_0(%arg0: i32, %arg1: i32, %arg2: i32) -> (i32, i32) {
    %c0_i32 = arith.constant 0 : i32
    return %arg0, %arg2 : i32, i32
  }
  func.func @transform_1(%arg0: i32, %arg1: i32, %arg2: i32) -> (i32, i32) {
    %c0_i32 = arith.constant 0 : i32
    return %arg2, %arg1 : i32, i32
  }
  func.func @transform_2(%arg0: i32, %arg1: i32, %arg2: i32) -> (i32, i32) {
    %c0_i32 = arith.constant 0 : i32
    %c0_i32_0 = arith.constant 0 : i32
    return %c0_i32, %arg1 : i32, i32
  }
  func.func @transform_3(%arg0: i32, %arg1: i32, %arg2: i32) -> (i32, i32) {
    %c0_i32 = arith.constant 0 : i32
    %c0_i32_0 = arith.constant 0 : i32
    return %c0_i32, %arg1 : i32, i32
  }
  func.func @transform_4(%arg0: i32, %arg1: i32, %arg2: i32) -> (i32, i32) {
    %c0_i32 = arith.constant 0 : i32
    return %arg0, %arg1 : i32, i32
  }
}

module attributes {stable_mosaic.version = 11 : i64} {
  func.func @_matmul_kernel(%arg0: i32, %arg1: i32, %arg2: i32, %arg3: memref<64x128xbf16, #tpu.memory_space<vmem>>, %arg4: memref<128x256xbf16, #tpu.memory_space<vmem>>, %arg5: memref<1x256xf32, #tpu.memory_space<vmem>>, %arg6: memref<1x256xf32, #tpu.memory_space<vmem>>, %arg7: memref<64x256xbf16, #tpu.memory_space<vmem>>, %arg8: memref<64x256xf32, #tpu.memory_space<vmem>>) attributes {dimension_semantics = [#tpu.dimension_semantics<parallel>, #tpu.dimension_semantics<parallel>, #tpu.dimension_semantics<arbitrary>], iteration_bounds = array<i64: 1, 1, 9>, scalar_prefetch = 0 : i64, scratch_operands = 1 : i64, tpu.core_type = #tpu.core_type<tc>, window_params = [{transform_indices = @transform_0, window_bounds = array<i64: 64, 128>}, {transform_indices = @transform_1, window_bounds = array<i64: 128, 256>}, {transform_indices = @transform_2, window_bounds = array<i64: 1, 256>}, {transform_indices = @transform_3, window_bounds = array<i64: 1, 256>}, {transform_indices = @transform_4, window_bounds = array<i64: 64, 256>}]} {
    %c0_i32 = arith.constant 0 : i32
    %0 = arith.cmpi eq, %arg2, %c0_i32 : i32
    %1 = arith.extui %0 : i1 to i32
    %c0_i32_0 = arith.constant 0 : i32
    %2 = arith.cmpi ne, %1, %c0_i32_0 : i32
    scf.if %2 {
      %cst_9 = arith.constant 0.000000e+00 : f32
      %12 = vector.broadcast %cst_9 : f32 to vector<64x256xf32>
      %c0_10 = arith.constant 0 : index
      %c0_11 = arith.constant 0 : index
      %13 = vector.load %arg8[%c0_10, %c0_11] : memref<64x256xf32, #tpu.memory_space<vmem>>, vector<64x256xf32>
      tpu.vector_store %arg8[%c0_10, %c0_11], %12 {strides = array<i32>} : memref<64x256xf32, #tpu.memory_space<vmem>>, vector<64x256xf32>,
    } else {
    }
    %c0 = arith.constant 0 : index
    %c0_1 = arith.constant 0 : index
    %3 = vector.load %arg8[%c0, %c0_1] : memref<64x256xf32, #tpu.memory_space<vmem>>, vector<64x256xf32>
    %c0_2 = arith.constant 0 : index
    %c0_3 = arith.constant 0 : index
    %4 = vector.load %arg3[%c0_2, %c0_3] : memref<64x128xbf16, #tpu.memory_space<vmem>>, vector<64x128xbf16>
    %c0_4 = arith.constant 0 : index
    %c0_5 = arith.constant 0 : index
    %5 = vector.load %arg4[%c0_4, %c0_5] : memref<128x256xbf16, #tpu.memory_space<vmem>>, vector<128x256xbf16>
    %cst = arith.constant dense<0.000000e+00> : vector<64x256xf32>
    %6 = tpu.matmul %4, %5, %cst {dimension_numbers = #tpu.dot_dimension_numbers<[1], [0], [0], [1], [0, 0, 1, 1], [], []>} : vector<64x128xbf16>, vector<128x256xbf16>, vector<64x256xf32> -> vector<64x256xf32>
    %7 = arith.addf %3, %6 : vector<64x256xf32>
    %c0_6 = arith.constant 0 : index
    %c0_7 = arith.constant 0 : index
    %8 = vector.load %arg8[%c0_6, %c0_7] : memref<64x256xf32, #tpu.memory_space<vmem>>, vector<64x256xf32>
    tpu.vector_store %arg8[%c0_6, %c0_7], %7 {strides = array<i32>} : memref<64x256xf32, #tpu.memory_space<vmem>>, vector<64x256xf32>,
    %c8_i32 = arith.constant 8 : i32
    %9 = arith.cmpi eq, %arg2, %c8_i32 : i32
    %10 = arith.extui %9 : i1 to i32
    %c0_i32_8 = arith.constant 0 : i32
    %11 = arith.cmpi ne, %10, %c0_i32_8 : i32
    scf.if %11 {
      %c0_9 = arith.constant 0 : index
      %c0_10 = arith.constant 0 : index
      %12 = vector.load %arg8[%c0_9, %c0_10] : memref<64x256xf32, #tpu.memory_space<vmem>>, vector<64x256xf32>
      %c0_11 = arith.constant 0 : index
      %c0_12 = arith.constant 0 : index
      %13 = vector.load %arg5[%c0_11, %c0_12] : memref<1x256xf32, #tpu.memory_space<vmem>>, vector<1x256xf32>
      %14 = vector.broadcast %13 : vector<1x256xf32> to vector<64x256xf32>
      %15 = arith.mulf %12, %14 : vector<64x256xf32>
      %c0_13 = arith.constant 0 : index
      %c0_14 = arith.constant 0 : index
      %16 = vector.load %arg6[%c0_13, %c0_14] : memref<1x256xf32, #tpu.memory_space<vmem>>, vector<1x256xf32>
      %17 = vector.broadcast %16 : vector<1x256xf32> to vector<64x256xf32>
      %18 = arith.addf %15, %17 : vector<64x256xf32>
      %cst_15 = arith.constant 0.000000e+00 : f32
      %19 = vector.broadcast %cst_15 : f32 to vector<64x256xf32>
      %20 = arith.cmpf oge, %18, %19 : vector<64x256xf32>
      %cst_16 = arith.constant 2.000000e-01 : f32
      %21 = vector.broadcast %cst_16 : f32 to vector<64x256xf32>
      %22 = arith.mulf %21, %18 : vector<64x256xf32>
      %23 = arith.select %20, %18, %22 : vector<64x256xi1>, vector<64x256xf32>
      %24 = arith.truncf %23 : vector<64x256xf32> to vector<64x256xbf16>
      %c0_17 = arith.constant 0 : index
      %c0_18 = arith.constant 0 : index
      %25 = vector.load %arg7[%c0_17, %c0_18] : memref<64x256xbf16, #tpu.memory_space<vmem>>, vector<64x256xbf16>
      tpu.vector_store %arg7[%c0_17, %c0_18], %24 {strides = array<i32>} : memref<64x256xbf16, #tpu.memory_space<vmem>>, vector<64x256xbf16>,
    } else {
    }
    return
  }
  func.func @transform_0(%arg0: i32, %arg1: i32, %arg2: i32) -> (i32, i32) {
    %c0_i32 = arith.constant 0 : i32
    return %arg0, %arg2 : i32, i32
  }
  func.func @transform_1(%arg0: i32, %arg1: i32, %arg2: i32) -> (i32, i32) {
    %c0_i32 = arith.constant 0 : i32
    return %arg2, %arg1 : i32, i32
  }
  func.func @transform_2(%arg0: i32, %arg1: i32, %arg2: i32) -> (i32, i32) {
    %c0_i32 = arith.constant 0 : i32
    %c0_i32_0 = arith.constant 0 : i32
    return %c0_i32, %arg1 : i32, i32
  }
  func.func @transform_3(%arg0: i32, %arg1: i32, %arg2: i32) -> (i32, i32) {
    %c0_i32 = arith.constant 0 : i32
    %c0_i32_0 = arith.constant 0 : i32
    return %c0_i32, %arg1 : i32, i32
  }
  func.func @transform_4(%arg0: i32, %arg1: i32, %arg2: i32) -> (i32, i32) {
    %c0_i32 = arith.constant 0 : i32
    return %arg0, %arg1 : i32, i32
  }
}

module attributes {stable_mosaic.version = 11 : i64} {
  func.func @_matmul_kernel(%arg0: i32, %arg1: i32, %arg2: i32, %arg3: memref<64x256xbf16, #tpu.memory_space<vmem>>, %arg4: memref<256x256xbf16, #tpu.memory_space<vmem>>, %arg5: memref<1x256xf32, #tpu.memory_space<vmem>>, %arg6: memref<1x256xf32, #tpu.memory_space<vmem>>, %arg7: memref<64x256xbf16, #tpu.memory_space<vmem>>, %arg8: memref<64x256xf32, #tpu.memory_space<vmem>>) attributes {dimension_semantics = [#tpu.dimension_semantics<parallel>, #tpu.dimension_semantics<parallel>, #tpu.dimension_semantics<arbitrary>], iteration_bounds = array<i64: 1, 1, 9>, scalar_prefetch = 0 : i64, scratch_operands = 1 : i64, tpu.core_type = #tpu.core_type<tc>, window_params = [{transform_indices = @transform_0, window_bounds = array<i64: 64, 256>}, {transform_indices = @transform_1, window_bounds = array<i64: 256, 256>}, {transform_indices = @transform_2, window_bounds = array<i64: 1, 256>}, {transform_indices = @transform_3, window_bounds = array<i64: 1, 256>}, {transform_indices = @transform_4, window_bounds = array<i64: 64, 256>}]} {
    %c0_i32 = arith.constant 0 : i32
    %0 = arith.cmpi eq, %arg2, %c0_i32 : i32
    %1 = arith.extui %0 : i1 to i32
    %c0_i32_0 = arith.constant 0 : i32
    %2 = arith.cmpi ne, %1, %c0_i32_0 : i32
    scf.if %2 {
      %cst_9 = arith.constant 0.000000e+00 : f32
      %12 = vector.broadcast %cst_9 : f32 to vector<64x256xf32>
      %c0_10 = arith.constant 0 : index
      %c0_11 = arith.constant 0 : index
      %13 = vector.load %arg8[%c0_10, %c0_11] : memref<64x256xf32, #tpu.memory_space<vmem>>, vector<64x256xf32>
      tpu.vector_store %arg8[%c0_10, %c0_11], %12 {strides = array<i32>} : memref<64x256xf32, #tpu.memory_space<vmem>>, vector<64x256xf32>,
    } else {
    }
    %c0 = arith.constant 0 : index
    %c0_1 = arith.constant 0 : index
    %3 = vector.load %arg8[%c0, %c0_1] : memref<64x256xf32, #tpu.memory_space<vmem>>, vector<64x256xf32>
    %c0_2 = arith.constant 0 : index
    %c0_3 = arith.constant 0 : index
    %4 = vector.load %arg3[%c0_2, %c0_3] : memref<64x256xbf16, #tpu.memory_space<vmem>>, vector<64x256xbf16>
    %c0_4 = arith.constant 0 : index
    %c0_5 = arith.constant 0 : index
    %5 = vector.load %arg4[%c0_4, %c0_5] : memref<256x256xbf16, #tpu.memory_space<vmem>>, vector<256x256xbf16>
    %cst = arith.constant dense<0.000000e+00> : vector<64x256xf32>
    %6 = tpu.matmul %4, %5, %cst {dimension_numbers = #tpu.dot_dimension_numbers<[1], [0], [0], [1], [0, 0, 1, 1], [], []>} : vector<64x256xbf16>, vector<256x256xbf16>, vector<64x256xf32> -> vector<64x256xf32>
    %7 = arith.addf %3, %6 : vector<64x256xf32>
    %c0_6 = arith.constant 0 : index
    %c0_7 = arith.constant 0 : index
    %8 = vector.load %arg8[%c0_6, %c0_7] : memref<64x256xf32, #tpu.memory_space<vmem>>, vector<64x256xf32>
    tpu.vector_store %arg8[%c0_6, %c0_7], %7 {strides = array<i32>} : memref<64x256xf32, #tpu.memory_space<vmem>>, vector<64x256xf32>,
    %c8_i32 = arith.constant 8 : i32
    %9 = arith.cmpi eq, %arg2, %c8_i32 : i32
    %10 = arith.extui %9 : i1 to i32
    %c0_i32_8 = arith.constant 0 : i32
    %11 = arith.cmpi ne, %10, %c0_i32_8 : i32
    scf.if %11 {
      %c0_9 = arith.constant 0 : index
      %c0_10 = arith.constant 0 : index
      %12 = vector.load %arg8[%c0_9, %c0_10] : memref<64x256xf32, #tpu.memory_space<vmem>>, vector<64x256xf32>
      %c0_11 = arith.constant 0 : index
      %c0_12 = arith.constant 0 : index
      %13 = vector.load %arg5[%c0_11, %c0_12] : memref<1x256xf32, #tpu.memory_space<vmem>>, vector<1x256xf32>
      %14 = vector.broadcast %13 : vector<1x256xf32> to vector<64x256xf32>
      %15 = arith.mulf %12, %14 : vector<64x256xf32>
      %c0_13 = arith.constant 0 : index
      %c0_14 = arith.constant 0 : index
      %16 = vector.load %arg6[%c0_13, %c0_14] : memref<1x256xf32, #tpu.memory_space<vmem>>, vector<1x256xf32>
      %17 = vector.broadcast %16 : vector<1x256xf32> to vector<64x256xf32>
      %18 = arith.addf %15, %17 : vector<64x256xf32>
      %cst_15 = arith.constant 0.000000e+00 : f32
      %19 = vector.broadcast %cst_15 : f32 to vector<64x256xf32>
      %20 = arith.cmpf oge, %18, %19 : vector<64x256xf32>
      %cst_16 = arith.constant 2.000000e-01 : f32
      %21 = vector.broadcast %cst_16 : f32 to vector<64x256xf32>
      %22 = arith.mulf %21, %18 : vector<64x256xf32>
      %23 = arith.select %20, %18, %22 : vector<64x256xi1>, vector<64x256xf32>
      %24 = arith.truncf %23 : vector<64x256xf32> to vector<64x256xbf16>
      %c0_17 = arith.constant 0 : index
      %c0_18 = arith.constant 0 : index
      %25 = vector.load %arg7[%c0_17, %c0_18] : memref<64x256xbf16, #tpu.memory_space<vmem>>, vector<64x256xbf16>
      tpu.vector_store %arg7[%c0_17, %c0_18], %24 {strides = array<i32>} : memref<64x256xbf16, #tpu.memory_space<vmem>>, vector<64x256xbf16>,
    } else {
    }
    return
  }
  func.func @transform_0(%arg0: i32, %arg1: i32, %arg2: i32) -> (i32, i32) {
    %c0_i32 = arith.constant 0 : i32
    return %arg0, %arg2 : i32, i32
  }
  func.func @transform_1(%arg0: i32, %arg1: i32, %arg2: i32) -> (i32, i32) {
    %c0_i32 = arith.constant 0 : i32
    return %arg2, %arg1 : i32, i32
  }
  func.func @transform_2(%arg0: i32, %arg1: i32, %arg2: i32) -> (i32, i32) {
    %c0_i32 = arith.constant 0 : i32
    %c0_i32_0 = arith.constant 0 : i32
    return %c0_i32, %arg1 : i32, i32
  }
  func.func @transform_3(%arg0: i32, %arg1: i32, %arg2: i32) -> (i32, i32) {
    %c0_i32 = arith.constant 0 : i32
    %c0_i32_0 = arith.constant 0 : i32
    return %c0_i32, %arg1 : i32, i32
  }
  func.func @transform_4(%arg0: i32, %arg1: i32, %arg2: i32) -> (i32, i32) {
    %c0_i32 = arith.constant 0 : i32
    return %arg0, %arg1 : i32, i32
  }
}

module attributes {stable_mosaic.version = 11 : i64} {
  func.func @_matmul_kernel(%arg0: i32, %arg1: i32, %arg2: i32, %arg3: memref<48x256xbf16, #tpu.memory_space<vmem>>, %arg4: memref<256x256xbf16, #tpu.memory_space<vmem>>, %arg5: memref<1x256xf32, #tpu.memory_space<vmem>>, %arg6: memref<1x256xf32, #tpu.memory_space<vmem>>, %arg7: memref<48x256xbf16, #tpu.memory_space<vmem>>, %arg8: memref<48x256xf32, #tpu.memory_space<vmem>>) attributes {dimension_semantics = [#tpu.dimension_semantics<parallel>, #tpu.dimension_semantics<parallel>, #tpu.dimension_semantics<arbitrary>], iteration_bounds = array<i64: 1, 2, 9>, scalar_prefetch = 0 : i64, scratch_operands = 1 : i64, tpu.core_type = #tpu.core_type<tc>, window_params = [{transform_indices = @transform_0, window_bounds = array<i64: 48, 256>}, {transform_indices = @transform_1, window_bounds = array<i64: 256, 256>}, {transform_indices = @transform_2, window_bounds = array<i64: 1, 256>}, {transform_indices = @transform_3, window_bounds = array<i64: 1, 256>}, {transform_indices = @transform_4, window_bounds = array<i64: 48, 256>}]} {
    %c0_i32 = arith.constant 0 : i32
    %0 = arith.cmpi eq, %arg2, %c0_i32 : i32
    %1 = arith.extui %0 : i1 to i32
    %c0_i32_0 = arith.constant 0 : i32
    %2 = arith.cmpi ne, %1, %c0_i32_0 : i32
    scf.if %2 {
      %cst_9 = arith.constant 0.000000e+00 : f32
      %12 = vector.broadcast %cst_9 : f32 to vector<48x256xf32>
      %c0_10 = arith.constant 0 : index
      %c0_11 = arith.constant 0 : index
      %13 = vector.load %arg8[%c0_10, %c0_11] : memref<48x256xf32, #tpu.memory_space<vmem>>, vector<48x256xf32>
      tpu.vector_store %arg8[%c0_10, %c0_11], %12 {strides = array<i32>} : memref<48x256xf32, #tpu.memory_space<vmem>>, vector<48x256xf32>,
    } else {
    }
    %c0 = arith.constant 0 : index
    %c0_1 = arith.constant 0 : index
    %3 = vector.load %arg8[%c0, %c0_1] : memref<48x256xf32, #tpu.memory_space<vmem>>, vector<48x256xf32>
    %c0_2 = arith.constant 0 : index
    %c0_3 = arith.constant 0 : index
    %4 = vector.load %arg3[%c0_2, %c0_3] : memref<48x256xbf16, #tpu.memory_space<vmem>>, vector<48x256xbf16>
    %c0_4 = arith.constant 0 : index
    %c0_5 = arith.constant 0 : index
    %5 = vector.load %arg4[%c0_4, %c0_5] : memref<256x256xbf16, #tpu.memory_space<vmem>>, vector<256x256xbf16>
    %cst = arith.constant dense<0.000000e+00> : vector<48x256xf32>
    %6 = tpu.matmul %4, %5, %cst {dimension_numbers = #tpu.dot_dimension_numbers<[1], [0], [0], [1], [0, 0, 1, 1], [], []>} : vector<48x256xbf16>, vector<256x256xbf16>, vector<48x256xf32> -> vector<48x256xf32>
    %7 = arith.addf %3, %6 : vector<48x256xf32>
    %c0_6 = arith.constant 0 : index
    %c0_7 = arith.constant 0 : index
    %8 = vector.load %arg8[%c0_6, %c0_7] : memref<48x256xf32, #tpu.memory_space<vmem>>, vector<48x256xf32>
    tpu.vector_store %arg8[%c0_6, %c0_7], %7 {strides = array<i32>} : memref<48x256xf32, #tpu.memory_space<vmem>>, vector<48x256xf32>,
    %c8_i32 = arith.constant 8 : i32
    %9 = arith.cmpi eq, %arg2, %c8_i32 : i32
    %10 = arith.extui %9 : i1 to i32
    %c0_i32_8 = arith.constant 0 : i32
    %11 = arith.cmpi ne, %10, %c0_i32_8 : i32
    scf.if %11 {
      %c0_9 = arith.constant 0 : index
      %c0_10 = arith.constant 0 : index
      %12 = vector.load %arg8[%c0_9, %c0_10] : memref<48x256xf32, #tpu.memory_space<vmem>>, vector<48x256xf32>
      %c0_11 = arith.constant 0 : index
      %c0_12 = arith.constant 0 : index
      %13 = vector.load %arg5[%c0_11, %c0_12] : memref<1x256xf32, #tpu.memory_space<vmem>>, vector<1x256xf32>
      %14 = vector.broadcast %13 : vector<1x256xf32> to vector<48x256xf32>
      %15 = arith.mulf %12, %14 : vector<48x256xf32>
      %c0_13 = arith.constant 0 : index
      %c0_14 = arith.constant 0 : index
      %16 = vector.load %arg6[%c0_13, %c0_14] : memref<1x256xf32, #tpu.memory_space<vmem>>, vector<1x256xf32>
      %17 = vector.broadcast %16 : vector<1x256xf32> to vector<48x256xf32>
      %18 = arith.addf %15, %17 : vector<48x256xf32>
      %cst_15 = arith.constant 0.000000e+00 : f32
      %19 = vector.broadcast %cst_15 : f32 to vector<48x256xf32>
      %20 = arith.cmpf oge, %18, %19 : vector<48x256xf32>
      %cst_16 = arith.constant 2.000000e-01 : f32
      %21 = vector.broadcast %cst_16 : f32 to vector<48x256xf32>
      %22 = arith.mulf %21, %18 : vector<48x256xf32>
      %23 = arith.select %20, %18, %22 : vector<48x256xi1>, vector<48x256xf32>
      %24 = arith.truncf %23 : vector<48x256xf32> to vector<48x256xbf16>
      %c0_17 = arith.constant 0 : index
      %c0_18 = arith.constant 0 : index
      %25 = vector.load %arg7[%c0_17, %c0_18] : memref<48x256xbf16, #tpu.memory_space<vmem>>, vector<48x256xbf16>
      tpu.vector_store %arg7[%c0_17, %c0_18], %24 {strides = array<i32>} : memref<48x256xbf16, #tpu.memory_space<vmem>>, vector<48x256xbf16>,
    } else {
    }
    return
  }
  func.func @transform_0(%arg0: i32, %arg1: i32, %arg2: i32) -> (i32, i32) {
    %c0_i32 = arith.constant 0 : i32
    return %arg0, %arg2 : i32, i32
  }
  func.func @transform_1(%arg0: i32, %arg1: i32, %arg2: i32) -> (i32, i32) {
    %c0_i32 = arith.constant 0 : i32
    return %arg2, %arg1 : i32, i32
  }
  func.func @transform_2(%arg0: i32, %arg1: i32, %arg2: i32) -> (i32, i32) {
    %c0_i32 = arith.constant 0 : i32
    %c0_i32_0 = arith.constant 0 : i32
    return %c0_i32, %arg1 : i32, i32
  }
  func.func @transform_3(%arg0: i32, %arg1: i32, %arg2: i32) -> (i32, i32) {
    %c0_i32 = arith.constant 0 : i32
    %c0_i32_0 = arith.constant 0 : i32
    return %c0_i32, %arg1 : i32, i32
  }
  func.func @transform_4(%arg0: i32, %arg1: i32, %arg2: i32) -> (i32, i32) {
    %c0_i32 = arith.constant 0 : i32
    return %arg0, %arg1 : i32, i32
  }
}

module attributes {stable_mosaic.version = 11 : i64} {
  func.func @_matmul_kernel(%arg0: i32, %arg1: i32, %arg2: i32, %arg3: memref<48x256xbf16, #tpu.memory_space<vmem>>, %arg4: memref<256x256xbf16, #tpu.memory_space<vmem>>, %arg5: memref<1x256xf32, #tpu.memory_space<vmem>>, %arg6: memref<1x256xf32, #tpu.memory_space<vmem>>, %arg7: memref<48x256xbf16, #tpu.memory_space<vmem>>, %arg8: memref<48x256xf32, #tpu.memory_space<vmem>>) attributes {dimension_semantics = [#tpu.dimension_semantics<parallel>, #tpu.dimension_semantics<parallel>, #tpu.dimension_semantics<arbitrary>], iteration_bounds = array<i64: 1, 2, 18>, scalar_prefetch = 0 : i64, scratch_operands = 1 : i64, tpu.core_type = #tpu.core_type<tc>, window_params = [{transform_indices = @transform_0, window_bounds = array<i64: 48, 256>}, {transform_indices = @transform_1, window_bounds = array<i64: 256, 256>}, {transform_indices = @transform_2, window_bounds = array<i64: 1, 256>}, {transform_indices = @transform_3, window_bounds = array<i64: 1, 256>}, {transform_indices = @transform_4, window_bounds = array<i64: 48, 256>}]} {
    %c0_i32 = arith.constant 0 : i32
    %0 = arith.cmpi eq, %arg2, %c0_i32 : i32
    %1 = arith.extui %0 : i1 to i32
    %c0_i32_0 = arith.constant 0 : i32
    %2 = arith.cmpi ne, %1, %c0_i32_0 : i32
    scf.if %2 {
      %cst_9 = arith.constant 0.000000e+00 : f32
      %12 = vector.broadcast %cst_9 : f32 to vector<48x256xf32>
      %c0_10 = arith.constant 0 : index
      %c0_11 = arith.constant 0 : index
      %13 = vector.load %arg8[%c0_10, %c0_11] : memref<48x256xf32, #tpu.memory_space<vmem>>, vector<48x256xf32>
      tpu.vector_store %arg8[%c0_10, %c0_11], %12 {strides = array<i32>} : memref<48x256xf32, #tpu.memory_space<vmem>>, vector<48x256xf32>,
    } else {
    }
    %c0 = arith.constant 0 : index
    %c0_1 = arith.constant 0 : index
    %3 = vector.load %arg8[%c0, %c0_1] : memref<48x256xf32, #tpu.memory_space<vmem>>, vector<48x256xf32>
    %c0_2 = arith.constant 0 : index
    %c0_3 = arith.constant 0 : index
    %4 = vector.load %arg3[%c0_2, %c0_3] : memref<48x256xbf16, #tpu.memory_space<vmem>>, vector<48x256xbf16>
    %c0_4 = arith.constant 0 : index
    %c0_5 = arith.constant 0 : index
    %5 = vector.load %arg4[%c0_4, %c0_5] : memref<256x256xbf16, #tpu.memory_space<vmem>>, vector<256x256xbf16>
    %cst = arith.constant dense<0.000000e+00> : vector<48x256xf32>
    %6 = tpu.matmul %4, %5, %cst {dimension_numbers = #tpu.dot_dimension_numbers<[1], [0], [0], [1], [0, 0, 1, 1], [], []>} : vector<48x256xbf16>, vector<256x256xbf16>, vector<48x256xf32> -> vector<48x256xf32>
    %7 = arith.addf %3, %6 : vector<48x256xf32>
    %c0_6 = arith.constant 0 : index
    %c0_7 = arith.constant 0 : index
    %8 = vector.load %arg8[%c0_6, %c0_7] : memref<48x256xf32, #tpu.memory_space<vmem>>, vector<48x256xf32>
    tpu.vector_store %arg8[%c0_6, %c0_7], %7 {strides = array<i32>} : memref<48x256xf32, #tpu.memory_space<vmem>>, vector<48x256xf32>,
    %c17_i32 = arith.constant 17 : i32
    %9 = arith.cmpi eq, %arg2, %c17_i32 : i32
    %10 = arith.extui %9 : i1 to i32
    %c0_i32_8 = arith.constant 0 : i32
    %11 = arith.cmpi ne, %10, %c0_i32_8 : i32
    scf.if %11 {
      %c0_9 = arith.constant 0 : index
      %c0_10 = arith.constant 0 : index
      %12 = vector.load %arg8[%c0_9, %c0_10] : memref<48x256xf32, #tpu.memory_space<vmem>>, vector<48x256xf32>
      %c0_11 = arith.constant 0 : index
      %c0_12 = arith.constant 0 : index
      %13 = vector.load %arg5[%c0_11, %c0_12] : memref<1x256xf32, #tpu.memory_space<vmem>>, vector<1x256xf32>
      %14 = vector.broadcast %13 : vector<1x256xf32> to vector<48x256xf32>
      %15 = arith.mulf %12, %14 : vector<48x256xf32>
      %c0_13 = arith.constant 0 : index
      %c0_14 = arith.constant 0 : index
      %16 = vector.load %arg6[%c0_13, %c0_14] : memref<1x256xf32, #tpu.memory_space<vmem>>, vector<1x256xf32>
      %17 = vector.broadcast %16 : vector<1x256xf32> to vector<48x256xf32>
      %18 = arith.addf %15, %17 : vector<48x256xf32>
      %cst_15 = arith.constant 0.000000e+00 : f32
      %19 = vector.broadcast %cst_15 : f32 to vector<48x256xf32>
      %20 = arith.cmpf oge, %18, %19 : vector<48x256xf32>
      %cst_16 = arith.constant 2.000000e-01 : f32
      %21 = vector.broadcast %cst_16 : f32 to vector<48x256xf32>
      %22 = arith.mulf %21, %18 : vector<48x256xf32>
      %23 = arith.select %20, %18, %22 : vector<48x256xi1>, vector<48x256xf32>
      %24 = arith.truncf %23 : vector<48x256xf32> to vector<48x256xbf16>
      %c0_17 = arith.constant 0 : index
      %c0_18 = arith.constant 0 : index
      %25 = vector.load %arg7[%c0_17, %c0_18] : memref<48x256xbf16, #tpu.memory_space<vmem>>, vector<48x256xbf16>
      tpu.vector_store %arg7[%c0_17, %c0_18], %24 {strides = array<i32>} : memref<48x256xbf16, #tpu.memory_space<vmem>>, vector<48x256xbf16>,
    } else {
    }
    return
  }
  func.func @transform_0(%arg0: i32, %arg1: i32, %arg2: i32) -> (i32, i32) {
    %c0_i32 = arith.constant 0 : i32
    return %arg0, %arg2 : i32, i32
  }
  func.func @transform_1(%arg0: i32, %arg1: i32, %arg2: i32) -> (i32, i32) {
    %c0_i32 = arith.constant 0 : i32
    return %arg2, %arg1 : i32, i32
  }
  func.func @transform_2(%arg0: i32, %arg1: i32, %arg2: i32) -> (i32, i32) {
    %c0_i32 = arith.constant 0 : i32
    %c0_i32_0 = arith.constant 0 : i32
    return %c0_i32, %arg1 : i32, i32
  }
  func.func @transform_3(%arg0: i32, %arg1: i32, %arg2: i32) -> (i32, i32) {
    %c0_i32 = arith.constant 0 : i32
    %c0_i32_0 = arith.constant 0 : i32
    return %c0_i32, %arg1 : i32, i32
  }
  func.func @transform_4(%arg0: i32, %arg1: i32, %arg2: i32) -> (i32, i32) {
    %c0_i32 = arith.constant 0 : i32
    return %arg0, %arg1 : i32, i32
  }
}

module attributes {stable_mosaic.version = 11 : i64} {
  func.func @_matmul_kernel(%arg0: i32, %arg1: i32, %arg2: i32, %arg3: memref<16x256xbf16, #tpu.memory_space<vmem>>, %arg4: memref<256x256xbf16, #tpu.memory_space<vmem>>, %arg5: memref<1x256xf32, #tpu.memory_space<vmem>>, %arg6: memref<1x256xf32, #tpu.memory_space<vmem>>, %arg7: memref<16x256xbf16, #tpu.memory_space<vmem>>, %arg8: memref<16x256xf32, #tpu.memory_space<vmem>>) attributes {dimension_semantics = [#tpu.dimension_semantics<parallel>, #tpu.dimension_semantics<parallel>, #tpu.dimension_semantics<arbitrary>], iteration_bounds = array<i64: 1, 2, 8>, scalar_prefetch = 0 : i64, scratch_operands = 1 : i64, tpu.core_type = #tpu.core_type<tc>, window_params = [{transform_indices = @transform_0, window_bounds = array<i64: 16, 256>}, {transform_indices = @transform_1, window_bounds = array<i64: 256, 256>}, {transform_indices = @transform_2, window_bounds = array<i64: 1, 256>}, {transform_indices = @transform_3, window_bounds = array<i64: 1, 256>}, {transform_indices = @transform_4, window_bounds = array<i64: 16, 256>}]} {
    %c0_i32 = arith.constant 0 : i32
    %0 = arith.cmpi eq, %arg2, %c0_i32 : i32
    %1 = arith.extui %0 : i1 to i32
    %c0_i32_0 = arith.constant 0 : i32
    %2 = arith.cmpi ne, %1, %c0_i32_0 : i32
    scf.if %2 {
      %cst_9 = arith.constant 0.000000e+00 : f32
      %12 = vector.broadcast %cst_9 : f32 to vector<16x256xf32>
      %c0_10 = arith.constant 0 : index
      %c0_11 = arith.constant 0 : index
      %13 = vector.load %arg8[%c0_10, %c0_11] : memref<16x256xf32, #tpu.memory_space<vmem>>, vector<16x256xf32>
      tpu.vector_store %arg8[%c0_10, %c0_11], %12 {strides = array<i32>} : memref<16x256xf32, #tpu.memory_space<vmem>>, vector<16x256xf32>,
    } else {
    }
    %c0 = arith.constant 0 : index
    %c0_1 = arith.constant 0 : index
    %3 = vector.load %arg8[%c0, %c0_1] : memref<16x256xf32, #tpu.memory_space<vmem>>, vector<16x256xf32>
    %c0_2 = arith.constant 0 : index
    %c0_3 = arith.constant 0 : index
    %4 = vector.load %arg3[%c0_2, %c0_3] : memref<16x256xbf16, #tpu.memory_space<vmem>>, vector<16x256xbf16>
    %c0_4 = arith.constant 0 : index
    %c0_5 = arith.constant 0 : index
    %5 = vector.load %arg4[%c0_4, %c0_5] : memref<256x256xbf16, #tpu.memory_space<vmem>>, vector<256x256xbf16>
    %cst = arith.constant dense<0.000000e+00> : vector<16x256xf32>
    %6 = tpu.matmul %4, %5, %cst {dimension_numbers = #tpu.dot_dimension_numbers<[1], [0], [0], [1], [0, 0, 1, 1], [], []>} : vector<16x256xbf16>, vector<256x256xbf16>, vector<16x256xf32> -> vector<16x256xf32>
    %7 = arith.addf %3, %6 : vector<16x256xf32>
    %c0_6 = arith.constant 0 : index
    %c0_7 = arith.constant 0 : index
    %8 = vector.load %arg8[%c0_6, %c0_7] : memref<16x256xf32, #tpu.memory_space<vmem>>, vector<16x256xf32>
    tpu.vector_store %arg8[%c0_6, %c0_7], %7 {strides = array<i32>} : memref<16x256xf32, #tpu.memory_space<vmem>>, vector<16x256xf32>,
    %c7_i32 = arith.constant 7 : i32
    %9 = arith.cmpi eq, %arg2, %c7_i32 : i32
    %10 = arith.extui %9 : i1 to i32
    %c0_i32_8 = arith.constant 0 : i32
    %11 = arith.cmpi ne, %10, %c0_i32_8 : i32
    scf.if %11 {
      %c0_9 = arith.constant 0 : index
      %c0_10 = arith.constant 0 : index
      %12 = vector.load %arg8[%c0_9, %c0_10] : memref<16x256xf32, #tpu.memory_space<vmem>>, vector<16x256xf32>
      %c0_11 = arith.constant 0 : index
      %c0_12 = arith.constant 0 : index
      %13 = vector.load %arg5[%c0_11, %c0_12] : memref<1x256xf32, #tpu.memory_space<vmem>>, vector<1x256xf32>
      %14 = vector.broadcast %13 : vector<1x256xf32> to vector<16x256xf32>
      %15 = arith.mulf %12, %14 : vector<16x256xf32>
      %c0_13 = arith.constant 0 : index
      %c0_14 = arith.constant 0 : index
      %16 = vector.load %arg6[%c0_13, %c0_14] : memref<1x256xf32, #tpu.memory_space<vmem>>, vector<1x256xf32>
      %17 = vector.broadcast %16 : vector<1x256xf32> to vector<16x256xf32>
      %18 = arith.addf %15, %17 : vector<16x256xf32>
      %cst_15 = arith.constant 0.000000e+00 : f32
      %19 = vector.broadcast %cst_15 : f32 to vector<16x256xf32>
      %20 = arith.cmpf oge, %18, %19 : vector<16x256xf32>
      %cst_16 = arith.constant 2.000000e-01 : f32
      %21 = vector.broadcast %cst_16 : f32 to vector<16x256xf32>
      %22 = arith.mulf %21, %18 : vector<16x256xf32>
      %23 = arith.select %20, %18, %22 : vector<16x256xi1>, vector<16x256xf32>
      %24 = arith.truncf %23 : vector<16x256xf32> to vector<16x256xbf16>
      %c0_17 = arith.constant 0 : index
      %c0_18 = arith.constant 0 : index
      %25 = vector.load %arg7[%c0_17, %c0_18] : memref<16x256xbf16, #tpu.memory_space<vmem>>, vector<16x256xbf16>
      tpu.vector_store %arg7[%c0_17, %c0_18], %24 {strides = array<i32>} : memref<16x256xbf16, #tpu.memory_space<vmem>>, vector<16x256xbf16>,
    } else {
    }
    return
  }
  func.func @transform_0(%arg0: i32, %arg1: i32, %arg2: i32) -> (i32, i32) {
    %c0_i32 = arith.constant 0 : i32
    return %arg0, %arg2 : i32, i32
  }
  func.func @transform_1(%arg0: i32, %arg1: i32, %arg2: i32) -> (i32, i32) {
    %c0_i32 = arith.constant 0 : i32
    return %arg2, %arg1 : i32, i32
  }
  func.func @transform_2(%arg0: i32, %arg1: i32, %arg2: i32) -> (i32, i32) {
    %c0_i32 = arith.constant 0 : i32
    %c0_i32_0 = arith.constant 0 : i32
    return %c0_i32, %arg1 : i32, i32
  }
  func.func @transform_3(%arg0: i32, %arg1: i32, %arg2: i32) -> (i32, i32) {
    %c0_i32 = arith.constant 0 : i32
    %c0_i32_0 = arith.constant 0 : i32
    return %c0_i32, %arg1 : i32, i32
  }
  func.func @transform_4(%arg0: i32, %arg1: i32, %arg2: i32) -> (i32, i32) {
    %c0_i32 = arith.constant 0 : i32
    return %arg0, %arg1 : i32, i32
  }
}

module attributes {stable_mosaic.version = 11 : i64} {
  func.func @_matmul_kernel(%arg0: i32, %arg1: i32, %arg2: i32, %arg3: memref<16x256xbf16, #tpu.memory_space<vmem>>, %arg4: memref<256x256xbf16, #tpu.memory_space<vmem>>, %arg5: memref<1x256xf32, #tpu.memory_space<vmem>>, %arg6: memref<1x256xf32, #tpu.memory_space<vmem>>, %arg7: memref<16x256xf32, #tpu.memory_space<vmem>>, %arg8: memref<16x256xf32, #tpu.memory_space<vmem>>) attributes {dimension_semantics = [#tpu.dimension_semantics<parallel>, #tpu.dimension_semantics<parallel>, #tpu.dimension_semantics<arbitrary>], iteration_bounds = array<i64: 1, 4, 2>, scalar_prefetch = 0 : i64, scratch_operands = 1 : i64, tpu.core_type = #tpu.core_type<tc>, window_params = [{transform_indices = @transform_0, window_bounds = array<i64: 16, 256>}, {transform_indices = @transform_1, window_bounds = array<i64: 256, 256>}, {transform_indices = @transform_2, window_bounds = array<i64: 1, 256>}, {transform_indices = @transform_3, window_bounds = array<i64: 1, 256>}, {transform_indices = @transform_4, window_bounds = array<i64: 16, 256>}]} {
    %c0_i32 = arith.constant 0 : i32
    %0 = arith.cmpi eq, %arg2, %c0_i32 : i32
    %1 = arith.extui %0 : i1 to i32
    %c0_i32_0 = arith.constant 0 : i32
    %2 = arith.cmpi ne, %1, %c0_i32_0 : i32
    scf.if %2 {
      %cst_9 = arith.constant 0.000000e+00 : f32
      %12 = vector.broadcast %cst_9 : f32 to vector<16x256xf32>
      %c0_10 = arith.constant 0 : index
      %c0_11 = arith.constant 0 : index
      %13 = vector.load %arg8[%c0_10, %c0_11] : memref<16x256xf32, #tpu.memory_space<vmem>>, vector<16x256xf32>
      tpu.vector_store %arg8[%c0_10, %c0_11], %12 {strides = array<i32>} : memref<16x256xf32, #tpu.memory_space<vmem>>, vector<16x256xf32>,
    } else {
    }
    %c0 = arith.constant 0 : index
    %c0_1 = arith.constant 0 : index
    %3 = vector.load %arg8[%c0, %c0_1] : memref<16x256xf32, #tpu.memory_space<vmem>>, vector<16x256xf32>
    %c0_2 = arith.constant 0 : index
    %c0_3 = arith.constant 0 : index
    %4 = vector.load %arg3[%c0_2, %c0_3] : memref<16x256xbf16, #tpu.memory_space<vmem>>, vector<16x256xbf16>
    %c0_4 = arith.constant 0 : index
    %c0_5 = arith.constant 0 : index
    %5 = vector.load %arg4[%c0_4, %c0_5] : memref<256x256xbf16, #tpu.memory_space<vmem>>, vector<256x256xbf16>
    %cst = arith.constant dense<0.000000e+00> : vector<16x256xf32>
    %6 = tpu.matmul %4, %5, %cst {dimension_numbers = #tpu.dot_dimension_numbers<[1], [0], [0], [1], [0, 0, 1, 1], [], []>} : vector<16x256xbf16>, vector<256x256xbf16>, vector<16x256xf32> -> vector<16x256xf32>
    %7 = arith.addf %3, %6 : vector<16x256xf32>
    %c0_6 = arith.constant 0 : index
    %c0_7 = arith.constant 0 : index
    %8 = vector.load %arg8[%c0_6, %c0_7] : memref<16x256xf32, #tpu.memory_space<vmem>>, vector<16x256xf32>
    tpu.vector_store %arg8[%c0_6, %c0_7], %7 {strides = array<i32>} : memref<16x256xf32, #tpu.memory_space<vmem>>, vector<16x256xf32>,
    %c1_i32 = arith.constant 1 : i32
    %9 = arith.cmpi eq, %arg2, %c1_i32 : i32
    %10 = arith.extui %9 : i1 to i32
    %c0_i32_8 = arith.constant 0 : i32
    %11 = arith.cmpi ne, %10, %c0_i32_8 : i32
    scf.if %11 {
      %c0_9 = arith.constant 0 : index
      %c0_10 = arith.constant 0 : index
      %12 = vector.load %arg8[%c0_9, %c0_10] : memref<16x256xf32, #tpu.memory_space<vmem>>, vector<16x256xf32>
      %c0_11 = arith.constant 0 : index
      %c0_12 = arith.constant 0 : index
      %13 = vector.load %arg5[%c0_11, %c0_12] : memref<1x256xf32, #tpu.memory_space<vmem>>, vector<1x256xf32>
      %14 = vector.broadcast %13 : vector<1x256xf32> to vector<16x256xf32>
      %15 = arith.mulf %12, %14 : vector<16x256xf32>
      %c0_13 = arith.constant 0 : index
      %c0_14 = arith.constant 0 : index
      %16 = vector.load %arg6[%c0_13, %c0_14] : memref<1x256xf32, #tpu.memory_space<vmem>>, vector<1x256xf32>
      %17 = vector.broadcast %16 : vector<1x256xf32> to vector<16x256xf32>
      %18 = arith.addf %15, %17 : vector<16x256xf32>
      %c0_15 = arith.constant 0 : index
      %c0_16 = arith.constant 0 : index
      %19 = vector.load %arg7[%c0_15, %c0_16] : memref<16x256xf32, #tpu.memory_space<vmem>>, vector<16x256xf32>
      tpu.vector_store %arg7[%c0_15, %c0_16], %18 {strides = array<i32>} : memref<16x256xf32, #tpu.memory_space<vmem>>, vector<16x256xf32>,
    } else {
    }
    return
  }
  func.func @transform_0(%arg0: i32, %arg1: i32, %arg2: i32) -> (i32, i32) {
    %c0_i32 = arith.constant 0 : i32
    return %arg0, %arg2 : i32, i32
  }
  func.func @transform_1(%arg0: i32, %arg1: i32, %arg2: i32) -> (i32, i32) {
    %c0_i32 = arith.constant 0 : i32
    return %arg2, %arg1 : i32, i32
  }
  func.func @transform_2(%arg0: i32, %arg1: i32, %arg2: i32) -> (i32, i32) {
    %c0_i32 = arith.constant 0 : i32
    %c0_i32_0 = arith.constant 0 : i32
    return %c0_i32, %arg1 : i32, i32
  }
  func.func @transform_3(%arg0: i32, %arg1: i32, %arg2: i32) -> (i32, i32) {
    %c0_i32 = arith.constant 0 : i32
    %c0_i32_0 = arith.constant 0 : i32
    return %c0_i32, %arg1 : i32, i32
  }
  func.func @transform_4(%arg0: i32, %arg1: i32, %arg2: i32) -> (i32, i32) {
    %c0_i32 = arith.constant 0 : i32
    return %arg0, %arg1 : i32, i32
  }
}

module attributes {stable_mosaic.version = 11 : i64} {
  func.func @_bilstm_kernel(%arg0: i32, %arg1: memref<5x2x1024xf32, #tpu.memory_space<vmem>>, %arg2: memref<128x1024xf32, #tpu.memory_space<vmem>>, %arg3: memref<5x2x128xf32, #tpu.memory_space<vmem>>, %arg4: memref<5x2x128xf32, #tpu.memory_space<vmem>>) attributes {dimension_semantics = [#tpu.dimension_semantics<arbitrary>], iteration_bounds = array<i64: 1>, scalar_prefetch = 0 : i64, scratch_operands = 0 : i64, tpu.core_type = #tpu.core_type<tc>, window_params = [{pipeline_mode = #tpu.pipeline_mode<synchronous>, transform_indices = @transform_0, window_bounds = array<i64: 5, 2, 1024>}, {pipeline_mode = #tpu.pipeline_mode<synchronous>, transform_indices = @transform_1, window_bounds = array<i64: 128, 1024>}, {pipeline_mode = #tpu.pipeline_mode<synchronous>, transform_indices = @transform_2, window_bounds = array<i64: 5, 2, 128>}, {pipeline_mode = #tpu.pipeline_mode<synchronous>, transform_indices = @transform_3, window_bounds = array<i64: 5, 2, 128>}]} {
    %cst = arith.constant 0.000000e+00 : f32
    %0 = vector.broadcast %cst : f32 to vector<2x128xf32>
    %c0_i32 = arith.constant 0 : i32
    %c5_i32 = arith.constant 5 : i32
    %1 = arith.addi %c0_i32, %c5_i32 : i32
    %c1_i32 = arith.constant 1 : i32
    %2:4 = scf.for %arg5 = %c0_i32 to %1 step %c1_i32 iter_args(%arg6 = %0, %arg7 = %0, %arg8 = %0, %arg9 = %0) -> (vector<2x128xf32>, vector<2x128xf32>, vector<2x128xf32>, vector<2x128xf32>)  : i32 {
      %c4_i32 = arith.constant 4 : i32
      %3 = arith.subi %c4_i32, %arg5 : i32
      %4 = arith.index_cast %arg5 : i32 to index
      %c0 = arith.constant 0 : index
      %c0_1 = arith.constant 0 : index
      %5 = vector.load %arg1[%4, %c0, %c0_1] : memref<5x2x1024xf32, #tpu.memory_space<vmem>>, vector<1x2x1024xf32>
      %6 = vector.shape_cast %5 : vector<1x2x1024xf32> to vector<2x1024xf32>
      %7 = vector.extract_strided_slice %6 {offsets = [0, 0], sizes = [2, 512], strides = [1, 1]} : vector<2x1024xf32> to vector<2x512xf32>
      %c0_2 = arith.constant 0 : index
      %c0_3 = arith.constant 0 : index
      %8 = vector.load %arg2[%c0_2, %c0_3] : memref<128x1024xf32, #tpu.memory_space<vmem>>, vector<128x512xf32>
      %cst_4 = arith.constant dense<0.000000e+00> : vector<2x512xf32>
      %9 = tpu.matmul %arg6, %8, %cst_4 {dimension_numbers = #tpu.dot_dimension_numbers<[1], [0], [0], [1], [0, 0, 1, 1], [], []>} : vector<2x128xf32>, vector<128x512xf32>, vector<2x512xf32> -> vector<2x512xf32>
      %10 = arith.addf %7, %9 : vector<2x512xf32>
      %11 = arith.index_cast %3 : i32 to index
      %c0_5 = arith.constant 0 : index
      %c0_6 = arith.constant 0 : index
      %12 = vector.load %arg1[%11, %c0_5, %c0_6] : memref<5x2x1024xf32, #tpu.memory_space<vmem>>, vector<1x2x1024xf32>
      %13 = vector.shape_cast %12 : vector<1x2x1024xf32> to vector<2x1024xf32>
      %14 = vector.extract_strided_slice %13 {offsets = [0, 512], sizes = [2, 512], strides = [1, 1]} : vector<2x1024xf32> to vector<2x512xf32>
      %c0_7 = arith.constant 0 : index
      %c512 = arith.constant 512 : index
      %15 = vector.load %arg2[%c0_7, %c512] : memref<128x1024xf32, #tpu.memory_space<vmem>>, vector<128x512xf32>
      %cst_8 = arith.constant dense<0.000000e+00> : vector<2x512xf32>
      %16 = tpu.matmul %arg8, %15, %cst_8 {dimension_numbers = #tpu.dot_dimension_numbers<[1], [0], [0], [1], [0, 0, 1, 1], [], []>} : vector<2x128xf32>, vector<128x512xf32>, vector<2x512xf32> -> vector<2x512xf32>
      %17 = arith.addf %14, %16 : vector<2x512xf32>
      %18 = vector.extract_strided_slice %10 {offsets = [0, 0], sizes = [2, 128], strides = [1, 1]} : vector<2x512xf32> to vector<2x128xf32>
      %19 = arith.negf %18 : vector<2x128xf32>
      %20 = math.exp %19 : vector<2x128xf32>
      %cst_9 = arith.constant 1.000000e+00 : f32
      %21 = vector.broadcast %cst_9 : f32 to vector<2x128xf32>
      %22 = arith.addf %21, %20 : vector<2x128xf32>
      %23 = arith.divf %21, %22 : vector<2x128xf32>
      %24 = vector.extract_strided_slice %10 {offsets = [0, 128], sizes = [2, 128], strides = [1, 1]} : vector<2x512xf32> to vector<2x128xf32>
      %25 = arith.negf %24 : vector<2x128xf32>
      %26 = math.exp %25 : vector<2x128xf32>
      %cst_10 = arith.constant 1.000000e+00 : f32
      %27 = vector.broadcast %cst_10 : f32 to vector<2x128xf32>
      %28 = arith.addf %27, %26 : vector<2x128xf32>
      %29 = arith.divf %27, %28 : vector<2x128xf32>
      %30 = vector.extract_strided_slice %10 {offsets = [0, 256], sizes = [2, 128], strides = [1, 1]} : vector<2x512xf32> to vector<2x128xf32>
      %31 = math.tanh %30 : vector<2x128xf32>
      %32 = vector.extract_strided_slice %10 {offsets = [0, 384], sizes = [2, 128], strides = [1, 1]} : vector<2x512xf32> to vector<2x128xf32>
      %33 = arith.negf %32 : vector<2x128xf32>
      %34 = math.exp %33 : vector<2x128xf32>
      %cst_11 = arith.constant 1.000000e+00 : f32
      %35 = vector.broadcast %cst_11 : f32 to vector<2x128xf32>
      %36 = arith.addf %35, %34 : vector<2x128xf32>
      %37 = arith.divf %35, %36 : vector<2x128xf32>
      %38 = arith.mulf %29, %arg7 : vector<2x128xf32>
      %39 = arith.mulf %23, %31 : vector<2x128xf32>
      %40 = arith.addf %38, %39 : vector<2x128xf32>
      %41 = math.tanh %40 : vector<2x128xf32>
      %42 = arith.mulf %37, %41 : vector<2x128xf32>
      %43 = vector.extract_strided_slice %17 {offsets = [0, 0], sizes = [2, 128], strides = [1, 1]} : vector<2x512xf32> to vector<2x128xf32>
      %44 = arith.negf %43 : vector<2x128xf32>
      %45 = math.exp %44 : vector<2x128xf32>
      %cst_12 = arith.constant 1.000000e+00 : f32
      %46 = vector.broadcast %cst_12 : f32 to vector<2x128xf32>
      %47 = arith.addf %46, %45 : vector<2x128xf32>
      %48 = arith.divf %46, %47 : vector<2x128xf32>
      %49 = vector.extract_strided_slice %17 {offsets = [0, 128], sizes = [2, 128], strides = [1, 1]} : vector<2x512xf32> to vector<2x128xf32>
      %50 = arith.negf %49 : vector<2x128xf32>
      %51 = math.exp %50 : vector<2x128xf32>
      %cst_13 = arith.constant 1.000000e+00 : f32
      %52 = vector.broadcast %cst_13 : f32 to vector<2x128xf32>
      %53 = arith.addf %52, %51 : vector<2x128xf32>
      %54 = arith.divf %52, %53 : vector<2x128xf32>
      %55 = vector.extract_strided_slice %17 {offsets = [0, 256], sizes = [2, 128], strides = [1, 1]} : vector<2x512xf32> to vector<2x128xf32>
      %56 = math.tanh %55 : vector<2x128xf32>
      %57 = vector.extract_strided_slice %17 {offsets = [0, 384], sizes = [2, 128], strides = [1, 1]} : vector<2x512xf32> to vector<2x128xf32>
      %58 = arith.negf %57 : vector<2x128xf32>
      %59 = math.exp %58 : vector<2x128xf32>
      %cst_14 = arith.constant 1.000000e+00 : f32
      %60 = vector.broadcast %cst_14 : f32 to vector<2x128xf32>
      %61 = arith.addf %60, %59 : vector<2x128xf32>
      %62 = arith.divf %60, %61 : vector<2x128xf32>
      %63 = arith.mulf %54, %arg9 : vector<2x128xf32>
      %64 = arith.mulf %48, %56 : vector<2x128xf32>
      %65 = arith.addf %63, %64 : vector<2x128xf32>
      %66 = math.tanh %65 : vector<2x128xf32>
      %67 = arith.mulf %62, %66 : vector<2x128xf32>
      %68 = arith.index_cast %arg5 : i32 to index
      %c0_15 = arith.constant 0 : index
      %c0_16 = arith.constant 0 : index
      %69 = vector.load %arg3[%68, %c0_15, %c0_16] : memref<5x2x128xf32, #tpu.memory_space<vmem>>, vector<1x2x128xf32>
      %70 = vector.shape_cast %69 : vector<1x2x128xf32> to vector<2x128xf32>
      %71 = vector.shape_cast %42 : vector<2x128xf32> to vector<1x2x128xf32>
      tpu.vector_store %arg3[%68, %c0_15, %c0_16], %71 {strides = array<i32>} : memref<5x2x128xf32, #tpu.memory_space<vmem>>, vector<1x2x128xf32>,
      %72 = arith.index_cast %3 : i32 to index
      %c0_17 = arith.constant 0 : index
      %c0_18 = arith.constant 0 : index
      %73 = vector.load %arg4[%72, %c0_17, %c0_18] : memref<5x2x128xf32, #tpu.memory_space<vmem>>, vector<1x2x128xf32>
      %74 = vector.shape_cast %73 : vector<1x2x128xf32> to vector<2x128xf32>
      %75 = vector.shape_cast %67 : vector<2x128xf32> to vector<1x2x128xf32>
      tpu.vector_store %arg4[%72, %c0_17, %c0_18], %75 {strides = array<i32>} : memref<5x2x128xf32, #tpu.memory_space<vmem>>, vector<1x2x128xf32>,
      scf.yield %42, %40, %67, %65 : vector<2x128xf32>, vector<2x128xf32>, vector<2x128xf32>, vector<2x128xf32>
    }
    %c5_i32_0 = arith.constant 5 : i32
    return
  }
  func.func @transform_0(%arg0: i32) -> (i32, i32, i32) {
    %c0_i32 = arith.constant 0 : i32
    %c0_i32_0 = arith.constant 0 : i32
    %c0_i32_1 = arith.constant 0 : i32
    %c0_i32_2 = arith.constant 0 : i32
    return %c0_i32, %c0_i32_0, %c0_i32_1 : i32, i32, i32
  }
  func.func @transform_1(%arg0: i32) -> (i32, i32) {
    %c0_i32 = arith.constant 0 : i32
    %c0_i32_0 = arith.constant 0 : i32
    %c0_i32_1 = arith.constant 0 : i32
    return %c0_i32, %c0_i32_0 : i32, i32
  }
  func.func @transform_2(%arg0: i32) -> (i32, i32, i32) {
    %c0_i32 = arith.constant 0 : i32
    %c0_i32_0 = arith.constant 0 : i32
    %c0_i32_1 = arith.constant 0 : i32
    %c0_i32_2 = arith.constant 0 : i32
    return %c0_i32, %c0_i32_0, %c0_i32_1 : i32, i32, i32
  }
  func.func @transform_3(%arg0: i32) -> (i32, i32, i32) {
    %c0_i32 = arith.constant 0 : i32
    %c0_i32_0 = arith.constant 0 : i32
    %c0_i32_1 = arith.constant 0 : i32
    %c0_i32_2 = arith.constant 0 : i32
    return %c0_i32, %c0_i32_0, %c0_i32_1 : i32, i32, i32
  }
}

module attributes {stable_mosaic.version = 11 : i64} {
  func.func @_matmul_kernel(%arg0: i32, %arg1: i32, %arg2: i32, %arg3: memref<16x256xbf16, #tpu.memory_space<vmem>>, %arg4: memref<256x128xbf16, #tpu.memory_space<vmem>>, %arg5: memref<1x128xf32, #tpu.memory_space<vmem>>, %arg6: memref<1x128xf32, #tpu.memory_space<vmem>>, %arg7: memref<16x128xf32, #tpu.memory_space<vmem>>, %arg8: memref<16x128xf32, #tpu.memory_space<vmem>>) attributes {dimension_semantics = [#tpu.dimension_semantics<parallel>, #tpu.dimension_semantics<parallel>, #tpu.dimension_semantics<arbitrary>], iteration_bounds = array<i64: 1, 1, 1>, scalar_prefetch = 0 : i64, scratch_operands = 1 : i64, tpu.core_type = #tpu.core_type<tc>, window_params = [{transform_indices = @transform_0, window_bounds = array<i64: 16, 256>}, {transform_indices = @transform_1, window_bounds = array<i64: 256, 128>}, {transform_indices = @transform_2, window_bounds = array<i64: 1, 128>}, {transform_indices = @transform_3, window_bounds = array<i64: 1, 128>}, {transform_indices = @transform_4, window_bounds = array<i64: 16, 128>}]} {
    %c0_i32 = arith.constant 0 : i32
    %0 = arith.cmpi eq, %arg2, %c0_i32 : i32
    %1 = arith.extui %0 : i1 to i32
    %c0_i32_0 = arith.constant 0 : i32
    %2 = arith.cmpi ne, %1, %c0_i32_0 : i32
    scf.if %2 {
      %cst_10 = arith.constant 0.000000e+00 : f32
      %12 = vector.broadcast %cst_10 : f32 to vector<16x128xf32>
      %c0_11 = arith.constant 0 : index
      %c0_12 = arith.constant 0 : index
      %13 = vector.load %arg8[%c0_11, %c0_12] : memref<16x128xf32, #tpu.memory_space<vmem>>, vector<16x128xf32>
      tpu.vector_store %arg8[%c0_11, %c0_12], %12 {strides = array<i32>} : memref<16x128xf32, #tpu.memory_space<vmem>>, vector<16x128xf32>,
    } else {
    }
    %c0 = arith.constant 0 : index
    %c0_1 = arith.constant 0 : index
    %3 = vector.load %arg8[%c0, %c0_1] : memref<16x128xf32, #tpu.memory_space<vmem>>, vector<16x128xf32>
    %c0_2 = arith.constant 0 : index
    %c0_3 = arith.constant 0 : index
    %4 = vector.load %arg3[%c0_2, %c0_3] : memref<16x256xbf16, #tpu.memory_space<vmem>>, vector<16x256xbf16>
    %c0_4 = arith.constant 0 : index
    %c0_5 = arith.constant 0 : index
    %5 = vector.load %arg4[%c0_4, %c0_5] : memref<256x128xbf16, #tpu.memory_space<vmem>>, vector<256x128xbf16>
    %cst = arith.constant dense<0.000000e+00> : vector<16x128xf32>
    %6 = tpu.matmul %4, %5, %cst {dimension_numbers = #tpu.dot_dimension_numbers<[1], [0], [0], [1], [0, 0, 1, 1], [], []>} : vector<16x256xbf16>, vector<256x128xbf16>, vector<16x128xf32> -> vector<16x128xf32>
    %7 = arith.addf %3, %6 : vector<16x128xf32>
    %c0_6 = arith.constant 0 : index
    %c0_7 = arith.constant 0 : index
    %8 = vector.load %arg8[%c0_6, %c0_7] : memref<16x128xf32, #tpu.memory_space<vmem>>, vector<16x128xf32>
    tpu.vector_store %arg8[%c0_6, %c0_7], %7 {strides = array<i32>} : memref<16x128xf32, #tpu.memory_space<vmem>>, vector<16x128xf32>,
    %c0_i32_8 = arith.constant 0 : i32
    %9 = arith.cmpi eq, %arg2, %c0_i32_8 : i32
    %10 = arith.extui %9 : i1 to i32
    %c0_i32_9 = arith.constant 0 : i32
    %11 = arith.cmpi ne, %10, %c0_i32_9 : i32
    scf.if %11 {
      %c0_10 = arith.constant 0 : index
      %c0_11 = arith.constant 0 : index
      %12 = vector.load %arg8[%c0_10, %c0_11] : memref<16x128xf32, #tpu.memory_space<vmem>>, vector<16x128xf32>
      %c0_12 = arith.constant 0 : index
      %c0_13 = arith.constant 0 : index
      %13 = vector.load %arg5[%c0_12, %c0_13] : memref<1x128xf32, #tpu.memory_space<vmem>>, vector<1x128xf32>
      %14 = vector.broadcast %13 : vector<1x128xf32> to vector<16x128xf32>
      %15 = arith.mulf %12, %14 : vector<16x128xf32>
      %c0_14 = arith.constant 0 : index
      %c0_15 = arith.constant 0 : index
      %16 = vector.load %arg6[%c0_14, %c0_15] : memref<1x128xf32, #tpu.memory_space<vmem>>, vector<1x128xf32>
      %17 = vector.broadcast %16 : vector<1x128xf32> to vector<16x128xf32>
      %18 = arith.addf %15, %17 : vector<16x128xf32>
      %c0_16 = arith.constant 0 : index
      %c0_17 = arith.constant 0 : index
      %19 = vector.load %arg7[%c0_16, %c0_17] : memref<16x128xf32, #tpu.memory_space<vmem>>, vector<16x128xf32>
      tpu.vector_store %arg7[%c0_16, %c0_17], %18 {strides = array<i32>} : memref<16x128xf32, #tpu.memory_space<vmem>>, vector<16x128xf32>,
    } else {
    }
    return
  }
  func.func @transform_0(%arg0: i32, %arg1: i32, %arg2: i32) -> (i32, i32) {
    %c0_i32 = arith.constant 0 : i32
    return %arg0, %arg2 : i32, i32
  }
  func.func @transform_1(%arg0: i32, %arg1: i32, %arg2: i32) -> (i32, i32) {
    %c0_i32 = arith.constant 0 : i32
    return %arg2, %arg1 : i32, i32
  }
  func.func @transform_2(%arg0: i32, %arg1: i32, %arg2: i32) -> (i32, i32) {
    %c0_i32 = arith.constant 0 : i32
    %c0_i32_0 = arith.constant 0 : i32
    return %c0_i32, %arg1 : i32, i32
  }
  func.func @transform_3(%arg0: i32, %arg1: i32, %arg2: i32) -> (i32, i32) {
    %c0_i32 = arith.constant 0 : i32
    %c0_i32_0 = arith.constant 0 : i32
    return %c0_i32, %arg1 : i32, i32
  }
  func.func @transform_4(%arg0: i32, %arg1: i32, %arg2: i32) -> (i32, i32) {
    %c0_i32 = arith.constant 0 : i32
    return %arg0, %arg1 : i32, i32
  }
}

module attributes {stable_mosaic.version = 11 : i64} {
  func.func @_matmul_kernel(%arg0: i32, %arg1: i32, %arg2: i32, %arg3: memref<16x128xbf16, #tpu.memory_space<vmem>>, %arg4: memref<128x128xbf16, #tpu.memory_space<vmem>>, %arg5: memref<1x128xf32, #tpu.memory_space<vmem>>, %arg6: memref<1x128xf32, #tpu.memory_space<vmem>>, %arg7: memref<16x128xf32, #tpu.memory_space<vmem>>, %arg8: memref<16x128xf32, #tpu.memory_space<vmem>>) attributes {dimension_semantics = [#tpu.dimension_semantics<parallel>, #tpu.dimension_semantics<parallel>, #tpu.dimension_semantics<arbitrary>], iteration_bounds = array<i64: 1, 3, 1>, scalar_prefetch = 0 : i64, scratch_operands = 1 : i64, tpu.core_type = #tpu.core_type<tc>, window_params = [{transform_indices = @transform_0, window_bounds = array<i64: 16, 128>}, {transform_indices = @transform_1, window_bounds = array<i64: 128, 128>}, {transform_indices = @transform_2, window_bounds = array<i64: 1, 128>}, {transform_indices = @transform_3, window_bounds = array<i64: 1, 128>}, {transform_indices = @transform_4, window_bounds = array<i64: 16, 128>}]} {
    %c0_i32 = arith.constant 0 : i32
    %0 = arith.cmpi eq, %arg2, %c0_i32 : i32
    %1 = arith.extui %0 : i1 to i32
    %c0_i32_0 = arith.constant 0 : i32
    %2 = arith.cmpi ne, %1, %c0_i32_0 : i32
    scf.if %2 {
      %cst_10 = arith.constant 0.000000e+00 : f32
      %12 = vector.broadcast %cst_10 : f32 to vector<16x128xf32>
      %c0_11 = arith.constant 0 : index
      %c0_12 = arith.constant 0 : index
      %13 = vector.load %arg8[%c0_11, %c0_12] : memref<16x128xf32, #tpu.memory_space<vmem>>, vector<16x128xf32>
      tpu.vector_store %arg8[%c0_11, %c0_12], %12 {strides = array<i32>} : memref<16x128xf32, #tpu.memory_space<vmem>>, vector<16x128xf32>,
    } else {
    }
    %c0 = arith.constant 0 : index
    %c0_1 = arith.constant 0 : index
    %3 = vector.load %arg8[%c0, %c0_1] : memref<16x128xf32, #tpu.memory_space<vmem>>, vector<16x128xf32>
    %c0_2 = arith.constant 0 : index
    %c0_3 = arith.constant 0 : index
    %4 = vector.load %arg3[%c0_2, %c0_3] : memref<16x128xbf16, #tpu.memory_space<vmem>>, vector<16x128xbf16>
    %c0_4 = arith.constant 0 : index
    %c0_5 = arith.constant 0 : index
    %5 = vector.load %arg4[%c0_4, %c0_5] : memref<128x128xbf16, #tpu.memory_space<vmem>>, vector<128x128xbf16>
    %cst = arith.constant dense<0.000000e+00> : vector<16x128xf32>
    %6 = tpu.matmul %4, %5, %cst {dimension_numbers = #tpu.dot_dimension_numbers<[1], [0], [0], [1], [0, 0, 1, 1], [], []>} : vector<16x128xbf16>, vector<128x128xbf16>, vector<16x128xf32> -> vector<16x128xf32>
    %7 = arith.addf %3, %6 : vector<16x128xf32>
    %c0_6 = arith.constant 0 : index
    %c0_7 = arith.constant 0 : index
    %8 = vector.load %arg8[%c0_6, %c0_7] : memref<16x128xf32, #tpu.memory_space<vmem>>, vector<16x128xf32>
    tpu.vector_store %arg8[%c0_6, %c0_7], %7 {strides = array<i32>} : memref<16x128xf32, #tpu.memory_space<vmem>>, vector<16x128xf32>,
    %c0_i32_8 = arith.constant 0 : i32
    %9 = arith.cmpi eq, %arg2, %c0_i32_8 : i32
    %10 = arith.extui %9 : i1 to i32
    %c0_i32_9 = arith.constant 0 : i32
    %11 = arith.cmpi ne, %10, %c0_i32_9 : i32
    scf.if %11 {
      %c0_10 = arith.constant 0 : index
      %c0_11 = arith.constant 0 : index
      %12 = vector.load %arg8[%c0_10, %c0_11] : memref<16x128xf32, #tpu.memory_space<vmem>>, vector<16x128xf32>
      %c0_12 = arith.constant 0 : index
      %c0_13 = arith.constant 0 : index
      %13 = vector.load %arg5[%c0_12, %c0_13] : memref<1x128xf32, #tpu.memory_space<vmem>>, vector<1x128xf32>
      %14 = vector.broadcast %13 : vector<1x128xf32> to vector<16x128xf32>
      %15 = arith.mulf %12, %14 : vector<16x128xf32>
      %c0_14 = arith.constant 0 : index
      %c0_15 = arith.constant 0 : index
      %16 = vector.load %arg6[%c0_14, %c0_15] : memref<1x128xf32, #tpu.memory_space<vmem>>, vector<1x128xf32>
      %17 = vector.broadcast %16 : vector<1x128xf32> to vector<16x128xf32>
      %18 = arith.addf %15, %17 : vector<16x128xf32>
      %c0_16 = arith.constant 0 : index
      %c0_17 = arith.constant 0 : index
      %19 = vector.load %arg7[%c0_16, %c0_17] : memref<16x128xf32, #tpu.memory_space<vmem>>, vector<16x128xf32>
      tpu.vector_store %arg7[%c0_16, %c0_17], %18 {strides = array<i32>} : memref<16x128xf32, #tpu.memory_space<vmem>>, vector<16x128xf32>,
    } else {
    }
    return
  }
  func.func @transform_0(%arg0: i32, %arg1: i32, %arg2: i32) -> (i32, i32) {
    %c0_i32 = arith.constant 0 : i32
    return %arg0, %arg2 : i32, i32
  }
  func.func @transform_1(%arg0: i32, %arg1: i32, %arg2: i32) -> (i32, i32) {
    %c0_i32 = arith.constant 0 : i32
    return %arg2, %arg1 : i32, i32
  }
  func.func @transform_2(%arg0: i32, %arg1: i32, %arg2: i32) -> (i32, i32) {
    %c0_i32 = arith.constant 0 : i32
    %c0_i32_0 = arith.constant 0 : i32
    return %c0_i32, %arg1 : i32, i32
  }
  func.func @transform_3(%arg0: i32, %arg1: i32, %arg2: i32) -> (i32, i32) {
    %c0_i32 = arith.constant 0 : i32
    %c0_i32_0 = arith.constant 0 : i32
    return %c0_i32, %arg1 : i32, i32
  }
  func.func @transform_4(%arg0: i32, %arg1: i32, %arg2: i32) -> (i32, i32) {
    %c0_i32 = arith.constant 0 : i32
    return %arg0, %arg1 : i32, i32
  }
}

module attributes {stable_mosaic.version = 11 : i64} {
  func.func @_attention_kernel(%arg0: i32, %arg1: memref<2x5x384xf32, #tpu.memory_space<vmem>>, %arg2: memref<2x5x32xf32, #tpu.memory_space<vmem>>, %arg3: memref<2x5x5xf32, #tpu.memory_space<vmem>>) attributes {dimension_semantics = [#tpu.dimension_semantics<arbitrary>], iteration_bounds = array<i64: 1>, scalar_prefetch = 0 : i64, scratch_operands = 0 : i64, tpu.core_type = #tpu.core_type<tc>, window_params = [{pipeline_mode = #tpu.pipeline_mode<synchronous>, transform_indices = @transform_0, window_bounds = array<i64: 2, 5, 384>}, {pipeline_mode = #tpu.pipeline_mode<synchronous>, transform_indices = @transform_1, window_bounds = array<i64: 2, 5, 32>}, {pipeline_mode = #tpu.pipeline_mode<synchronous>, transform_indices = @transform_2, window_bounds = array<i64: 2, 5, 5>}]} {
    %c0 = arith.constant 0 : index
    %c0_0 = arith.constant 0 : index
    %c0_1 = arith.constant 0 : index
    %0 = vector.load %arg1[%c0, %c0_0, %c0_1] : memref<2x5x384xf32, #tpu.memory_space<vmem>>, vector<2x5x128xf32>
    %c0_2 = arith.constant 0 : index
    %c0_3 = arith.constant 0 : index
    %c128 = arith.constant 128 : index
    %1 = vector.load %arg1[%c0_2, %c0_3, %c128] : memref<2x5x384xf32, #tpu.memory_space<vmem>>, vector<2x5x128xf32>
    %c0_4 = arith.constant 0 : index
    %c0_5 = arith.constant 0 : index
    %c256 = arith.constant 256 : index
    %2 = vector.load %arg1[%c0_4, %c0_5, %c256] : memref<2x5x384xf32, #tpu.memory_space<vmem>>, vector<2x5x128xf32>
    "tpu.trace_start"() <{level = 10 : i32, message = "btd,bsd->bts"}> : () -> ()
    %cst = arith.constant dense<0.000000e+00> : vector<2x5x5xf32>
    %3 = tpu.matmul %0, %1, %cst {dimension_numbers = #tpu.dot_dimension_numbers<[2], [2], [1], [1], [0, 0, 0, 1, 1, 1], [0], [0]>} : vector<2x5x128xf32>, vector<2x5x128xf32>, vector<2x5x5xf32> -> vector<2x5x5xf32>
    "tpu.trace_stop"() : () -> ()
    %cst_6 = arith.constant 0.176776692 : f32
    %4 = vector.broadcast %cst_6 : f32 to vector<2x5x5xf32>
    %5 = arith.mulf %3, %4 : vector<2x5x5xf32>
    %cst_7 = arith.constant dense<0xFF800000> : vector<2x5xf32>
    %6 = vector.multi_reduction <maximumf>, %5, %cst_7 [2] : vector<2x5x5xf32> to vector<2x5xf32>
    %7 = vector.shape_cast %6 : vector<2x5xf32> to vector<2x5x1xf32>
    %8 = vector.broadcast %7 : vector<2x5x1xf32> to vector<2x5x5xf32>
    %9 = arith.subf %5, %8 : vector<2x5x5xf32>
    %10 = math.exp %9 : vector<2x5x5xf32>
    %cst_8 = arith.constant dense<0.000000e+00> : vector<2x5xf32>
    %11 = vector.multi_reduction <add>, %10, %cst_8 [2] : vector<2x5x5xf32> to vector<2x5xf32>
    %12 = vector.shape_cast %11 : vector<2x5xf32> to vector<2x5x1xf32>
    %13 = tpu.reciprocal %12 {approx = true} : vector<2x5x1xf32> -> vector<2x5x1xf32>
    %14 = vector.broadcast %13 : vector<2x5x1xf32> to vector<2x5x5xf32>
    %15 = arith.mulf %10, %14 : vector<2x5x5xf32>
    "tpu.trace_start"() <{level = 10 : i32, message = "bts,bsd->btd"}> : () -> ()
    %cst_9 = arith.constant dense<0.000000e+00> : vector<2x5x128xf32>
    %16 = tpu.matmul %15, %2, %cst_9 {dimension_numbers = #tpu.dot_dimension_numbers<[2], [1], [1], [2], [0, 0, 0, 1, 1, 2], [0], [0]>} : vector<2x5x5xf32>, vector<2x5x128xf32>, vector<2x5x128xf32> -> vector<2x5x128xf32>
    "tpu.trace_stop"() : () -> ()
    %17 = vector.extract_strided_slice %16 {offsets = [0, 0, 0], sizes = [2, 5, 32], strides = [1, 1, 1]} : vector<2x5x128xf32> to vector<2x5x32xf32>
    %c0_10 = arith.constant 0 : index
    %c0_11 = arith.constant 0 : index
    %c0_12 = arith.constant 0 : index
    %18 = vector.load %arg2[%c0_10, %c0_11, %c0_12] : memref<2x5x32xf32, #tpu.memory_space<vmem>>, vector<2x5x32xf32>
    tpu.vector_store %arg2[%c0_10, %c0_11, %c0_12], %17 {strides = array<i32>} : memref<2x5x32xf32, #tpu.memory_space<vmem>>, vector<2x5x32xf32>,
    %c0_13 = arith.constant 0 : index
    %c0_14 = arith.constant 0 : index
    %c0_15 = arith.constant 0 : index
    %19 = vector.load %arg3[%c0_13, %c0_14, %c0_15] : memref<2x5x5xf32, #tpu.memory_space<vmem>>, vector<2x5x5xf32>
    tpu.vector_store %arg3[%c0_13, %c0_14, %c0_15], %15 {strides = array<i32>} : memref<2x5x5xf32, #tpu.memory_space<vmem>>, vector<2x5x5xf32>,
    return
  }
  func.func @transform_0(%arg0: i32) -> (i32, i32, i32) {
    %c0_i32 = arith.constant 0 : i32
    %c0_i32_0 = arith.constant 0 : i32
    %c0_i32_1 = arith.constant 0 : i32
    %c0_i32_2 = arith.constant 0 : i32
    return %c0_i32, %c0_i32_0, %c0_i32_1 : i32, i32, i32
  }
  func.func @transform_1(%arg0: i32) -> (i32, i32, i32) {
    %c0_i32 = arith.constant 0 : i32
    %c0_i32_0 = arith.constant 0 : i32
    %c0_i32_1 = arith.constant 0 : i32
    %c0_i32_2 = arith.constant 0 : i32
    return %c0_i32, %c0_i32_0, %c0_i32_1 : i32, i32, i32
  }
  func.func @transform_2(%arg0: i32) -> (i32, i32, i32) {
    %c0_i32 = arith.constant 0 : i32
    %c0_i32_0 = arith.constant 0 : i32
    %c0_i32_1 = arith.constant 0 : i32
    %c0_i32_2 = arith.constant 0 : i32
    return %c0_i32, %c0_i32_0, %c0_i32_1 : i32, i32, i32
  }
}

module attributes {stable_mosaic.version = 11 : i64} {
  func.func @_matmul_kernel(%arg0: i32, %arg1: i32, %arg2: i32, %arg3: memref<16x128xbf16, #tpu.memory_space<vmem>>, %arg4: memref<128x256xbf16, #tpu.memory_space<vmem>>, %arg5: memref<1x256xf32, #tpu.memory_space<vmem>>, %arg6: memref<1x256xf32, #tpu.memory_space<vmem>>, %arg7: memref<16x256xf32, #tpu.memory_space<vmem>>, %arg8: memref<16x256xf32, #tpu.memory_space<vmem>>) attributes {dimension_semantics = [#tpu.dimension_semantics<parallel>, #tpu.dimension_semantics<parallel>, #tpu.dimension_semantics<arbitrary>], iteration_bounds = array<i64: 1, 4, 1>, scalar_prefetch = 0 : i64, scratch_operands = 1 : i64, tpu.core_type = #tpu.core_type<tc>, window_params = [{transform_indices = @transform_0, window_bounds = array<i64: 16, 128>}, {transform_indices = @transform_1, window_bounds = array<i64: 128, 256>}, {transform_indices = @transform_2, window_bounds = array<i64: 1, 256>}, {transform_indices = @transform_3, window_bounds = array<i64: 1, 256>}, {transform_indices = @transform_4, window_bounds = array<i64: 16, 256>}]} {
    %c0_i32 = arith.constant 0 : i32
    %0 = arith.cmpi eq, %arg2, %c0_i32 : i32
    %1 = arith.extui %0 : i1 to i32
    %c0_i32_0 = arith.constant 0 : i32
    %2 = arith.cmpi ne, %1, %c0_i32_0 : i32
    scf.if %2 {
      %cst_10 = arith.constant 0.000000e+00 : f32
      %12 = vector.broadcast %cst_10 : f32 to vector<16x256xf32>
      %c0_11 = arith.constant 0 : index
      %c0_12 = arith.constant 0 : index
      %13 = vector.load %arg8[%c0_11, %c0_12] : memref<16x256xf32, #tpu.memory_space<vmem>>, vector<16x256xf32>
      tpu.vector_store %arg8[%c0_11, %c0_12], %12 {strides = array<i32>} : memref<16x256xf32, #tpu.memory_space<vmem>>, vector<16x256xf32>,
    } else {
    }
    %c0 = arith.constant 0 : index
    %c0_1 = arith.constant 0 : index
    %3 = vector.load %arg8[%c0, %c0_1] : memref<16x256xf32, #tpu.memory_space<vmem>>, vector<16x256xf32>
    %c0_2 = arith.constant 0 : index
    %c0_3 = arith.constant 0 : index
    %4 = vector.load %arg3[%c0_2, %c0_3] : memref<16x128xbf16, #tpu.memory_space<vmem>>, vector<16x128xbf16>
    %c0_4 = arith.constant 0 : index
    %c0_5 = arith.constant 0 : index
    %5 = vector.load %arg4[%c0_4, %c0_5] : memref<128x256xbf16, #tpu.memory_space<vmem>>, vector<128x256xbf16>
    %cst = arith.constant dense<0.000000e+00> : vector<16x256xf32>
    %6 = tpu.matmul %4, %5, %cst {dimension_numbers = #tpu.dot_dimension_numbers<[1], [0], [0], [1], [0, 0, 1, 1], [], []>} : vector<16x128xbf16>, vector<128x256xbf16>, vector<16x256xf32> -> vector<16x256xf32>
    %7 = arith.addf %3, %6 : vector<16x256xf32>
    %c0_6 = arith.constant 0 : index
    %c0_7 = arith.constant 0 : index
    %8 = vector.load %arg8[%c0_6, %c0_7] : memref<16x256xf32, #tpu.memory_space<vmem>>, vector<16x256xf32>
    tpu.vector_store %arg8[%c0_6, %c0_7], %7 {strides = array<i32>} : memref<16x256xf32, #tpu.memory_space<vmem>>, vector<16x256xf32>,
    %c0_i32_8 = arith.constant 0 : i32
    %9 = arith.cmpi eq, %arg2, %c0_i32_8 : i32
    %10 = arith.extui %9 : i1 to i32
    %c0_i32_9 = arith.constant 0 : i32
    %11 = arith.cmpi ne, %10, %c0_i32_9 : i32
    scf.if %11 {
      %c0_10 = arith.constant 0 : index
      %c0_11 = arith.constant 0 : index
      %12 = vector.load %arg8[%c0_10, %c0_11] : memref<16x256xf32, #tpu.memory_space<vmem>>, vector<16x256xf32>
      %c0_12 = arith.constant 0 : index
      %c0_13 = arith.constant 0 : index
      %13 = vector.load %arg5[%c0_12, %c0_13] : memref<1x256xf32, #tpu.memory_space<vmem>>, vector<1x256xf32>
      %14 = vector.broadcast %13 : vector<1x256xf32> to vector<16x256xf32>
      %15 = arith.mulf %12, %14 : vector<16x256xf32>
      %c0_14 = arith.constant 0 : index
      %c0_15 = arith.constant 0 : index
      %16 = vector.load %arg6[%c0_14, %c0_15] : memref<1x256xf32, #tpu.memory_space<vmem>>, vector<1x256xf32>
      %17 = vector.broadcast %16 : vector<1x256xf32> to vector<16x256xf32>
      %18 = arith.addf %15, %17 : vector<16x256xf32>
      %c0_16 = arith.constant 0 : index
      %c0_17 = arith.constant 0 : index
      %19 = vector.load %arg7[%c0_16, %c0_17] : memref<16x256xf32, #tpu.memory_space<vmem>>, vector<16x256xf32>
      tpu.vector_store %arg7[%c0_16, %c0_17], %18 {strides = array<i32>} : memref<16x256xf32, #tpu.memory_space<vmem>>, vector<16x256xf32>,
    } else {
    }
    return
  }
  func.func @transform_0(%arg0: i32, %arg1: i32, %arg2: i32) -> (i32, i32) {
    %c0_i32 = arith.constant 0 : i32
    return %arg0, %arg2 : i32, i32
  }
  func.func @transform_1(%arg0: i32, %arg1: i32, %arg2: i32) -> (i32, i32) {
    %c0_i32 = arith.constant 0 : i32
    return %arg2, %arg1 : i32, i32
  }
  func.func @transform_2(%arg0: i32, %arg1: i32, %arg2: i32) -> (i32, i32) {
    %c0_i32 = arith.constant 0 : i32
    %c0_i32_0 = arith.constant 0 : i32
    return %c0_i32, %arg1 : i32, i32
  }
  func.func @transform_3(%arg0: i32, %arg1: i32, %arg2: i32) -> (i32, i32) {
    %c0_i32 = arith.constant 0 : i32
    %c0_i32_0 = arith.constant 0 : i32
    return %c0_i32, %arg1 : i32, i32
  }
  func.func @transform_4(%arg0: i32, %arg1: i32, %arg2: i32) -> (i32, i32) {
    %c0_i32 = arith.constant 0 : i32
    return %arg0, %arg1 : i32, i32
  }
}

module attributes {stable_mosaic.version = 11 : i64} {
  func.func @_bilstm_kernel(%arg0: i32, %arg1: memref<5x2x1024xf32, #tpu.memory_space<vmem>>, %arg2: memref<128x1024xf32, #tpu.memory_space<vmem>>, %arg3: memref<5x2x128xf32, #tpu.memory_space<vmem>>, %arg4: memref<5x2x128xf32, #tpu.memory_space<vmem>>) attributes {dimension_semantics = [#tpu.dimension_semantics<arbitrary>], iteration_bounds = array<i64: 1>, scalar_prefetch = 0 : i64, scratch_operands = 0 : i64, tpu.core_type = #tpu.core_type<tc>, window_params = [{pipeline_mode = #tpu.pipeline_mode<synchronous>, transform_indices = @transform_0, window_bounds = array<i64: 5, 2, 1024>}, {pipeline_mode = #tpu.pipeline_mode<synchronous>, transform_indices = @transform_1, window_bounds = array<i64: 128, 1024>}, {pipeline_mode = #tpu.pipeline_mode<synchronous>, transform_indices = @transform_2, window_bounds = array<i64: 5, 2, 128>}, {pipeline_mode = #tpu.pipeline_mode<synchronous>, transform_indices = @transform_3, window_bounds = array<i64: 5, 2, 128>}]} {
    %cst = arith.constant 0.000000e+00 : f32
    %0 = vector.broadcast %cst : f32 to vector<2x128xf32>
    %c0_i32 = arith.constant 0 : i32
    %c5_i32 = arith.constant 5 : i32
    %1 = arith.addi %c0_i32, %c5_i32 : i32
    %c1_i32 = arith.constant 1 : i32
    %2:4 = scf.for %arg5 = %c0_i32 to %1 step %c1_i32 iter_args(%arg6 = %0, %arg7 = %0, %arg8 = %0, %arg9 = %0) -> (vector<2x128xf32>, vector<2x128xf32>, vector<2x128xf32>, vector<2x128xf32>)  : i32 {
      %c4_i32 = arith.constant 4 : i32
      %3 = arith.subi %c4_i32, %arg5 : i32
      %4 = arith.index_cast %arg5 : i32 to index
      %c0 = arith.constant 0 : index
      %c0_1 = arith.constant 0 : index
      %5 = vector.load %arg1[%4, %c0, %c0_1] : memref<5x2x1024xf32, #tpu.memory_space<vmem>>, vector<1x2x1024xf32>
      %6 = vector.shape_cast %5 : vector<1x2x1024xf32> to vector<2x1024xf32>
      %7 = vector.extract_strided_slice %6 {offsets = [0, 0], sizes = [2, 512], strides = [1, 1]} : vector<2x1024xf32> to vector<2x512xf32>
      %c0_2 = arith.constant 0 : index
      %c0_3 = arith.constant 0 : index
      %8 = vector.load %arg2[%c0_2, %c0_3] : memref<128x1024xf32, #tpu.memory_space<vmem>>, vector<128x512xf32>
      %cst_4 = arith.constant dense<0.000000e+00> : vector<2x512xf32>
      %9 = tpu.matmul %arg6, %8, %cst_4 {dimension_numbers = #tpu.dot_dimension_numbers<[1], [0], [0], [1], [0, 0, 1, 1], [], []>} : vector<2x128xf32>, vector<128x512xf32>, vector<2x512xf32> -> vector<2x512xf32>
      %10 = arith.addf %7, %9 : vector<2x512xf32>
      %11 = arith.index_cast %3 : i32 to index
      %c0_5 = arith.constant 0 : index
      %c0_6 = arith.constant 0 : index
      %12 = vector.load %arg1[%11, %c0_5, %c0_6] : memref<5x2x1024xf32, #tpu.memory_space<vmem>>, vector<1x2x1024xf32>
      %13 = vector.shape_cast %12 : vector<1x2x1024xf32> to vector<2x1024xf32>
      %14 = vector.extract_strided_slice %13 {offsets = [0, 512], sizes = [2, 512], strides = [1, 1]} : vector<2x1024xf32> to vector<2x512xf32>
      %c0_7 = arith.constant 0 : index
      %c512 = arith.constant 512 : index
      %15 = vector.load %arg2[%c0_7, %c512] : memref<128x1024xf32, #tpu.memory_space<vmem>>, vector<128x512xf32>
      %cst_8 = arith.constant dense<0.000000e+00> : vector<2x512xf32>
      %16 = tpu.matmul %arg8, %15, %cst_8 {dimension_numbers = #tpu.dot_dimension_numbers<[1], [0], [0], [1], [0, 0, 1, 1], [], []>} : vector<2x128xf32>, vector<128x512xf32>, vector<2x512xf32> -> vector<2x512xf32>
      %17 = arith.addf %14, %16 : vector<2x512xf32>
      %18 = vector.extract_strided_slice %10 {offsets = [0, 0], sizes = [2, 128], strides = [1, 1]} : vector<2x512xf32> to vector<2x128xf32>
      %19 = arith.negf %18 : vector<2x128xf32>
      %20 = math.exp %19 : vector<2x128xf32>
      %cst_9 = arith.constant 1.000000e+00 : f32
      %21 = vector.broadcast %cst_9 : f32 to vector<2x128xf32>
      %22 = arith.addf %21, %20 : vector<2x128xf32>
      %23 = arith.divf %21, %22 : vector<2x128xf32>
      %24 = vector.extract_strided_slice %10 {offsets = [0, 128], sizes = [2, 128], strides = [1, 1]} : vector<2x512xf32> to vector<2x128xf32>
      %25 = arith.negf %24 : vector<2x128xf32>
      %26 = math.exp %25 : vector<2x128xf32>
      %cst_10 = arith.constant 1.000000e+00 : f32
      %27 = vector.broadcast %cst_10 : f32 to vector<2x128xf32>
      %28 = arith.addf %27, %26 : vector<2x128xf32>
      %29 = arith.divf %27, %28 : vector<2x128xf32>
      %30 = vector.extract_strided_slice %10 {offsets = [0, 256], sizes = [2, 128], strides = [1, 1]} : vector<2x512xf32> to vector<2x128xf32>
      %31 = math.tanh %30 : vector<2x128xf32>
      %32 = vector.extract_strided_slice %10 {offsets = [0, 384], sizes = [2, 128], strides = [1, 1]} : vector<2x512xf32> to vector<2x128xf32>
      %33 = arith.negf %32 : vector<2x128xf32>
      %34 = math.exp %33 : vector<2x128xf32>
      %cst_11 = arith.constant 1.000000e+00 : f32
      %35 = vector.broadcast %cst_11 : f32 to vector<2x128xf32>
      %36 = arith.addf %35, %34 : vector<2x128xf32>
      %37 = arith.divf %35, %36 : vector<2x128xf32>
      %38 = arith.mulf %29, %arg7 : vector<2x128xf32>
      %39 = arith.mulf %23, %31 : vector<2x128xf32>
      %40 = arith.addf %38, %39 : vector<2x128xf32>
      %41 = math.tanh %40 : vector<2x128xf32>
      %42 = arith.mulf %37, %41 : vector<2x128xf32>
      %43 = vector.extract_strided_slice %17 {offsets = [0, 0], sizes = [2, 128], strides = [1, 1]} : vector<2x512xf32> to vector<2x128xf32>
      %44 = arith.negf %43 : vector<2x128xf32>
      %45 = math.exp %44 : vector<2x128xf32>
      %cst_12 = arith.constant 1.000000e+00 : f32
      %46 = vector.broadcast %cst_12 : f32 to vector<2x128xf32>
      %47 = arith.addf %46, %45 : vector<2x128xf32>
      %48 = arith.divf %46, %47 : vector<2x128xf32>
      %49 = vector.extract_strided_slice %17 {offsets = [0, 128], sizes = [2, 128], strides = [1, 1]} : vector<2x512xf32> to vector<2x128xf32>
      %50 = arith.negf %49 : vector<2x128xf32>
      %51 = math.exp %50 : vector<2x128xf32>
      %cst_13 = arith.constant 1.000000e+00 : f32
      %52 = vector.broadcast %cst_13 : f32 to vector<2x128xf32>
      %53 = arith.addf %52, %51 : vector<2x128xf32>
      %54 = arith.divf %52, %53 : vector<2x128xf32>
      %55 = vector.extract_strided_slice %17 {offsets = [0, 256], sizes = [2, 128], strides = [1, 1]} : vector<2x512xf32> to vector<2x128xf32>
      %56 = math.tanh %55 : vector<2x128xf32>
      %57 = vector.extract_strided_slice %17 {offsets = [0, 384], sizes = [2, 128], strides = [1, 1]} : vector<2x512xf32> to vector<2x128xf32>
      %58 = arith.negf %57 : vector<2x128xf32>
      %59 = math.exp %58 : vector<2x128xf32>
      %cst_14 = arith.constant 1.000000e+00 : f32
      %60 = vector.broadcast %cst_14 : f32 to vector<2x128xf32>
      %61 = arith.addf %60, %59 : vector<2x128xf32>
      %62 = arith.divf %60, %61 : vector<2x128xf32>
      %63 = arith.mulf %54, %arg9 : vector<2x128xf32>
      %64 = arith.mulf %48, %56 : vector<2x128xf32>
      %65 = arith.addf %63, %64 : vector<2x128xf32>
      %66 = math.tanh %65 : vector<2x128xf32>
      %67 = arith.mulf %62, %66 : vector<2x128xf32>
      %68 = arith.index_cast %arg5 : i32 to index
      %c0_15 = arith.constant 0 : index
      %c0_16 = arith.constant 0 : index
      %69 = vector.load %arg3[%68, %c0_15, %c0_16] : memref<5x2x128xf32, #tpu.memory_space<vmem>>, vector<1x2x128xf32>
      %70 = vector.shape_cast %69 : vector<1x2x128xf32> to vector<2x128xf32>
      %71 = vector.shape_cast %42 : vector<2x128xf32> to vector<1x2x128xf32>
      tpu.vector_store %arg3[%68, %c0_15, %c0_16], %71 {strides = array<i32>} : memref<5x2x128xf32, #tpu.memory_space<vmem>>, vector<1x2x128xf32>,
      %72 = arith.index_cast %3 : i32 to index
      %c0_17 = arith.constant 0 : index
      %c0_18 = arith.constant 0 : index
      %73 = vector.load %arg4[%72, %c0_17, %c0_18] : memref<5x2x128xf32, #tpu.memory_space<vmem>>, vector<1x2x128xf32>
      %74 = vector.shape_cast %73 : vector<1x2x128xf32> to vector<2x128xf32>
      %75 = vector.shape_cast %67 : vector<2x128xf32> to vector<1x2x128xf32>
      tpu.vector_store %arg4[%72, %c0_17, %c0_18], %75 {strides = array<i32>} : memref<5x2x128xf32, #tpu.memory_space<vmem>>, vector<1x2x128xf32>,
      scf.yield %42, %40, %67, %65 : vector<2x128xf32>, vector<2x128xf32>, vector<2x128xf32>, vector<2x128xf32>
    }
    %c5_i32_0 = arith.constant 5 : i32
    return
  }
  func.func @transform_0(%arg0: i32) -> (i32, i32, i32) {
    %c0_i32 = arith.constant 0 : i32
    %c0_i32_0 = arith.constant 0 : i32
    %c0_i32_1 = arith.constant 0 : i32
    %c0_i32_2 = arith.constant 0 : i32
    return %c0_i32, %c0_i32_0, %c0_i32_1 : i32, i32, i32
  }
  func.func @transform_1(%arg0: i32) -> (i32, i32) {
    %c0_i32 = arith.constant 0 : i32
    %c0_i32_0 = arith.constant 0 : i32
    %c0_i32_1 = arith.constant 0 : i32
    return %c0_i32, %c0_i32_0 : i32, i32
  }
  func.func @transform_2(%arg0: i32) -> (i32, i32, i32) {
    %c0_i32 = arith.constant 0 : i32
    %c0_i32_0 = arith.constant 0 : i32
    %c0_i32_1 = arith.constant 0 : i32
    %c0_i32_2 = arith.constant 0 : i32
    return %c0_i32, %c0_i32_0, %c0_i32_1 : i32, i32, i32
  }
  func.func @transform_3(%arg0: i32) -> (i32, i32, i32) {
    %c0_i32 = arith.constant 0 : i32
    %c0_i32_0 = arith.constant 0 : i32
    %c0_i32_1 = arith.constant 0 : i32
    %c0_i32_2 = arith.constant 0 : i32
    return %c0_i32, %c0_i32_0, %c0_i32_1 : i32, i32, i32
  }
}

</mosaic_0001>

<bundles_post_ra>
// kernel: attend_crnn_forward.15
= control target key start
LH: loop header
LB: loop body
LE: loop exit
PB: predicated region body
PF: predicated region fallthrough
CT: control target
= control target key end

     0   :  { %9 = vsyncpa [#allocation4], 0  ;;  %s1763_s0 = inlined_call_operand.vmem [shape: bf16[1024,128], index: 0, kind: input, shape index: {}]   ;;  %s1764_s1 = inlined_call_operand.hbm [shape: bf16[128,128], index: 1, kind: input, shape index: {}]   ;;  %s1765_s2 = inlined_call_operand.hbm [shape: f32[1,128], index: 2, kind: input, shape index: {}]   ;;  %s1766_s3 = inlined_call_operand.hbm [shape: f32[1,128], index: 3, kind: input, shape index: {}]   ;;  %s1767_s4 = inlined_call_operand.vmem [shape: bf16[1024,128], index: 4, kind: output, shape index: {}]  }
   0x1   :  { %10 = vsyncpa [#allocation6], 0  ;;  %s1574_s15 = smov 0   ;;  %s1576_s16 = smov 0  }
   0x2   :  { %s1578_s17 = smov 0  }
   0x3 LB: > { %s207_s20 = sshll.u32 %s1765_s2, 4  ;;  %s1107_s21 = sadd.s32 4294967295, %s1542_s17   ;;  %s1542_s17 = sphi %s1578_s17, %s16_s17   ;;  %s1538_s16 = sphi %s1576_s16, %s1772_s16   ;;  %s1534_s15 = sphi %s1574_s15, %s1771_s15   ;;  %s208_s20 = int_to_ptr.hbm [resolvable:$true] %s207_s20 }
   0x4   : > { %p1109_p0 = scmp.ge.s32.totalorder %s1542_s17, 1  ;;  %p176_p1 = scmp.lt.s32.totalorder %s1542_s17, 5 }
   0x5   : > { %p1595_p2 = scmp.eq.s32.totalorder %s1107_s21, 0  ;;  %s1544_s24 = smov [#allocation5]  }
   0x6   : > { %p1599_p3 = pnand %p1109_p0, %p176_p1  ;;  %s209_s25 = sshll.u32 %s1544_s24, 4  ;;  %s210_s25 = int_to_ptr.vmem [resolvable:$true] %s209_s25 }
   0x7   : > { %s35_s27 = sadd.s32 1, %s1538_s16  ;;  %s191_s30 = sshll.u32 %s1764_s1, 4  ;;  %s192_s30 = int_to_ptr.hbm [resolvable:$true] %s191_s30 }
   0x8   : > { %p1375_p4 = pneg %p1599_p3  ;;  %p37_p6 = scmp.ge.s32.totalorder %s35_s27, 4 }
   0x9   : > { %s1545_s5 = smov [#allocation3]   ;;  %s220_s9 = sshll.u32 %s1766_s3, 4  ;;  %s221_s9 = int_to_ptr.hbm [resolvable:$true] %s220_s9 }
   0xa   : > { %p1607_p5 = pnand %p1595_p2, %p1375_p4  ;;  %s1774_s27 = smov (%p37_p6, %s35_s27), 0 }
   0xb   : > { %s193_s6 = sshll.u32 %s1545_s5, 4  ;;  %s1546_s10 = smov 64   ;;  %s194_s6 = int_to_ptr.vmem [resolvable:$true] %s193_s6 }
   0xc   : > { %1381 = dma.hbm_to_vmem [thread:$0]  (!%p1607_p5), %s208_s20, 16, %s210_s25, [#allocation6]  }
   0xd   : > { %s1547_s11 = smov 4   ;;  %s1548_s12 = smov [#allocation7]  }
   0xe   : > { %1378 = dma.hbm_to_vmem [thread:$0]  (!%p1607_p5), %s192_s30, 1024, %s194_s6, [#allocation4], %s1546_s10, %s1546_s10, %s1547_s11  }
   0xf   : > { %s222_s13 = sshll.u32 %s1548_s12, 4  ;;  %247 = sbr.rel (%p1599_p3) target bundleno = 255 (0xff), region = 36  ;;  %s223_s13 = int_to_ptr.vmem [resolvable:$true] %s222_s13 }
  0x10   : > { %1384 = dma.hbm_to_vmem [thread:$0]  (!%p1607_p5), %s221_s9, 16, %s223_s13, [#allocation6]  }
  0x14   : > { %1525 = dma.done.wait (%p1595_p2), [#allocation4], 1024  }
  0x15   : > { %1527 = vsyncadd (%p1595_p2), [#allocation4], 4294966272 }
  0x16   : > { %1529 = dma.done.wait (%p1595_p2), [#allocation6], 32  }
  0x17   : > { %1531 = vsyncadd (%p1595_p2), [#allocation6], 4294967264  ;;  %v1243_v0 = vld [vmem:[#allocation3 + $0x38] sm:$0xff]  ;;  %v1242_v1 = vld [vmem:[#allocation3 + $0x30] sm:$0xff]  ;;  %s1118_s14 = sshll.u32 %s1534_s15, 5 }
  0x18   : > { %569 = vmatpush.bf16.msra.mxu0 %v1243_v0  ;;  %1339 = vmatpush.bf16.msra.mxu1 %v1243_v0  ;;  %v1241_v2 = vld [vmem:[#allocation3 + $0x28] sm:$0xff]  ;;  %v1240_v3 = vld [vmem:[#allocation3 + $0x20] sm:$0xff]  ;;  %v1239_v4 = vld [vmem:[#allocation3 + $0x18] sm:$0xff]  ;;  %p291_p7 = scmp.lt.s32.totalorder %s1118_s14, 127 }
  0x19   : > { %1340 = vmatpush.bf16.msra.mxu2 %v1243_v0  ;;  %1341 = vmatpush.bf16.msra.mxu3 %v1243_v0  ;;  %v1238_v5 = vld [vmem:[#allocation3 + $0x10] sm:$0xff]  ;;  %v1237_v6 = vld [vmem:[#allocation3 + $0x8] sm:$0xff]  ;;  %v1236_v7 = vld [vmem:[#allocation3] sm:$0xff] }
  0x1a   : > { %s1776_s14 = smov (!%p291_p7, %s1118_s14), 127  ;;  %v1663_v24 = vld [vmem:[#allocation5] ss:$0 sm:$0xff]  ;;  %v1666_v28 = vld [vmem:[#allocation7] ss:$0 sm:$0xff] }
  0x1b   : > { %s1119_s15 = sshll.u32 %s1776_s14, 2 }
  0x1c   : > { %570 = vmatpush.bf16.msra.mxu0 %v1242_v1  ;;  %1342 = vmatpush.bf16.msra.mxu1 %v1242_v1  ;;  %s1645_s20 = scalar_lea.vmem %s1763_s0, %s1119_s15  ;;  %s1684_s23 = scalar_lea.vmem %s1767_s4, %s1119_s15 }
  0x1d   : > { %1343 = vmatpush.bf16.msra.mxu2 %v1242_v1  ;;  %1344 = vmatpush.bf16.msra.mxu3 %v1242_v1  ;;  %v1220_v8 = vld [vmem:[%s1645_s20] sm:$0xff]  ;;  %v1221_v12 = vld [vmem:[%s1645_s20 + $0x8] sm:$0xff]  ;;  %v1222_v16 = vld [vmem:[%s1645_s20 + $0x10] sm:$0xff] }
  0x1e   : > { %v1224_v9 = vld [vmem:[%s1645_s20 + $0x20] sm:$0xff]  ;;  %v1225_v13 = vld [vmem:[%s1645_s20 + $0x28] sm:$0xff]  ;;  %v1226_v17 = vld [vmem:[%s1645_s20 + $0x30] sm:$0xff] }
  0x1f   : > { %v1228_v10 = vld [vmem:[%s1645_s20 + $0x40] sm:$0xff]  ;;  %v1229_v14 = vld [vmem:[%s1645_s20 + $0x48] sm:$0xff]  ;;  %v1230_v18 = vld [vmem:[%s1645_s20 + $0x50] sm:$0xff] }
  0x20   : > { %571 = vmatpush.bf16.msra.mxu0 %v1241_v2  ;;  %1345 = vmatpush.bf16.msra.mxu1 %v1241_v2  ;;  %v1232_v11 = vld [vmem:[%s1645_s20 + $0x60] sm:$0xff]  ;;  %v1233_v15 = vld [vmem:[%s1645_s20 + $0x68] sm:$0xff]  ;;  %v1234_v19 = vld [vmem:[%s1645_s20 + $0x70] sm:$0xff] }
  0x21   : > { %1346 = vmatpush.bf16.msra.mxu2 %v1241_v2  ;;  %1347 = vmatpush.bf16.msra.mxu3 %v1241_v2  ;;  %v1223_v20 = vld [vmem:[%s1645_s20 + $0x18] sm:$0xff] }
  0x22   : > { %v1227_v21 = vld [vmem:[%s1645_s20 + $0x38] sm:$0xff] }
  0x23   : > { %v1231_v22 = vld [vmem:[%s1645_s20 + $0x58] sm:$0xff] }
  0x24   : > { %572 = vmatpush.bf16.msra.mxu0 %v1240_v3  ;;  %1348 = vmatpush.bf16.msra.mxu1 %v1240_v3  ;;  %v1235_v23 = vld [vmem:[%s1645_s20 + $0x78] sm:$0xff] }
  0x25   : > { %1349 = vmatpush.bf16.msra.mxu2 %v1240_v3  ;;  %1350 = vmatpush.bf16.msra.mxu3 %v1240_v3 }
  0x28   : > { %573 = vmatpush.bf16.msra.mxu0 %v1239_v4  ;;  %1351 = vmatpush.bf16.msra.mxu1 %v1239_v4 }
  0x29   : > { %1352 = vmatpush.bf16.msra.mxu2 %v1239_v4  ;;  %1353 = vmatpush.bf16.msra.mxu3 %v1239_v4 }
  0x2c   : > { %574 = vmatpush.bf16.msra.mxu0 %v1238_v5  ;;  %1354 = vmatpush.bf16.msra.mxu1 %v1238_v5 }
  0x2d   : > { %1355 = vmatpush.bf16.msra.mxu2 %v1238_v5  ;;  %1356 = vmatpush.bf16.msra.mxu3 %v1238_v5 }
  0x30   : > { %575 = vmatpush.bf16.msra.mxu0 %v1237_v6  ;;  %1357 = vmatpush.bf16.msra.mxu1 %v1237_v6 }
  0x31   : > { %1358 = vmatpush.bf16.msra.mxu2 %v1237_v6  ;;  %1359 = vmatpush.bf16.msra.mxu3 %v1237_v6 }
  0x34   : > { %576 = vmatpush.bf16.msra.mxu0 %v1236_v7  ;;  %1360 = vmatpush.bf16.msra.mxu1 %v1236_v7 }
  0x35   : > { %1361 = vmatpush.bf16.msra.mxu2 %v1236_v7  ;;  %1362 = vmatpush.bf16.msra.mxu3 %v1236_v7 }
  0x37   : > { %577 = vmatmul.bf16.vlgmr.msra.gmra.mxu0 %v1220_v8  ;;  %597 = vmatmul.bf16.vlgmr.msra.gmra.mxu1 %v1224_v9 }
  0x38   : > { %617 = vmatmul.bf16.vlgmr.msra.gmra.mxu2 %v1228_v10  ;;  %637 = vmatmul.bf16.vlgmr.msra.gmra.mxu3 %v1232_v11 }
  0x47   : > { %582 = vmatmul.bf16.gmra.mxu0 %v1221_v12  ;;  %602 = vmatmul.bf16.gmra.mxu1 %v1225_v13 }
  0x48   : > { %622 = vmatmul.bf16.gmra.mxu2 %v1229_v14  ;;  %642 = vmatmul.bf16.gmra.mxu3 %v1233_v15 }
  0x57   : > { %587 = vmatmul.bf16.gmra.mxu0 %v1222_v16  ;;  %607 = vmatmul.bf16.gmra.mxu1 %v1226_v17 }
  0x58   : > { %627 = vmatmul.bf16.gmra.mxu2 %v1230_v18  ;;  %647 = vmatmul.bf16.gmra.mxu3 %v1234_v19 }
  0x67   : > { %592 = vmatmul.bf16.gmra.mxu0 %v1223_v20  ;;  %612 = vmatmul.bf16.gmra.mxu1 %v1227_v21 }
  0x68   : > { %632 = vmatmul.bf16.gmra.mxu2 %v1231_v22  ;;  %652 = vmatmul.bf16.gmra.mxu3 %v1235_v23 }
  0xb4   : > { %v578_v25 = vpop.f32.mrf.mxu0  ;;  %v598_v26 = vpop.f32.mrf.mxu1 }
  0xb5   : > { %v761_v27 = vmul.f32 %v1663_v24, %v578_v25  ;;  %v769_v29 = vmul.f32 %v1663_v24, %v598_v26 }
  0xb7   : > { %v797_v30 = vadd.f32 %v1666_v28, %v761_v27  ;;  %v805_v31 = vadd.f32 %v1666_v28, %v769_v29 }
  0xb9   : > { %v861_v40 = vmul.f32 0.2, %v797_v30  ;;  %v869_v41 = vmul.f32 0.2, %v805_v31  ;;  %vm829_vm0 = vcmp.ge.f32.partialorder %v797_v30, 0.0  ;;  %vm837_vm1 = vcmp.ge.f32.partialorder %v805_v31, 0.0 }
  0xbb   : > { %v618_v32 = vpop.f32.mrf.mxu2  ;;  %v638_v33 = vpop.f32.mrf.mxu3  ;;  %v893_v48 = vsel %vm829_vm0, %v797_v30, %v861_v40  ;;  %v901_v49 = vsel %vm837_vm1, %v805_v31, %v869_v41 }
  0xbc   : > { %v580_v34 = vpop.f32.mrf.mxu0  ;;  %v600_v35 = vpop.f32.mrf.mxu1  ;;  %v777_v38 = vmul.f32 %v1663_v24, %v618_v32  ;;  %v785_v39 = vmul.f32 %v1663_v24, %v638_v33 }
  0xbd   : > { %v762_v36 = vmul.f32 %v1663_v24, %v580_v34  ;;  %v770_v37 = vmul.f32 %v1663_v24, %v600_v35 }
  0xbe   : > { %v813_v46 = vadd.f32 %v1666_v28, %v777_v38  ;;  %v821_v47 = vadd.f32 %v1666_v28, %v785_v39 }
  0xbf   : > { %v798_v42 = vadd.f32 %v1666_v28, %v762_v36  ;;  %v806_v43 = vadd.f32 %v1666_v28, %v770_v37 }
  0xc0   : > { %v877_v60 = vmul.f32 0.2, %v813_v46  ;;  %v885_v61 = vmul.f32 0.2, %v821_v47  ;;  %vm845_vm4 = vcmp.ge.f32.partialorder %v813_v46, 0.0  ;;  %vm853_vm5 = vcmp.ge.f32.partialorder %v821_v47, 0.0 }
  0xc1   : > { %vm830_vm2 = vcmp.ge.f32.partialorder %v798_v42, 0.0  ;;  %v862_v44 = vmul.f32 0.2, %v798_v42  ;;  %vm838_vm3 = vcmp.ge.f32.partialorder %v806_v43, 0.0  ;;  %v870_v45 = vmul.f32 0.2, %v806_v43 }
  0xc2   : > { %v909_v4 = vsel %vm845_vm4, %v813_v46, %v877_v60  ;;  %v917_v5 = vsel %vm853_vm5, %v821_v47, %v885_v61 }
  0xc3   : > { %v894_v50 = vsel %vm830_vm2, %v798_v42, %v862_v44  ;;  %v902_v51 = vsel %vm838_vm3, %v806_v43, %v870_v45  ;;  %v620_v52 = vpop.f32.mrf.mxu2  ;;  %v640_v53 = vpop.f32.mrf.mxu3 }
  0xc4   : > { %v1247_v54 = vpack.c.bf16 %v894_v50, %v893_v48  ;;  %v1267_v55 = vpack.c.bf16 %v902_v51, %v901_v49  ;;  %v778_v56 = vmul.f32 %v1663_v24, %v620_v52  ;;  %v786_v57 = vmul.f32 %v1663_v24, %v640_v53  ;;  %v583_v58 = vpop.f32.mrf.mxu0  ;;  %v603_v59 = vpop.f32.mrf.mxu1 }
  0xc5   : > { %v763_v0 = vmul.f32 %v1663_v24, %v583_v58  ;;  %v771_v1 = vmul.f32 %v1663_v24, %v603_v59 }
  0xc6   : > { %1248 = vst [vmem:[%s1684_s23] sm:$0xff] %v1247_v54   ;;  %v814_v62 = vadd.f32 %v1666_v28, %v778_v56  ;;  %v822_v63 = vadd.f32 %v1666_v28, %v786_v57 }
  0xc7   : > { %1327 = vst [vmem:[%s1684_s23 + $0x20] sm:$0xff] %v1267_v55   ;;  %v799_v10 = vadd.f32 %v1666_v28, %v763_v0  ;;  %v807_v11 = vadd.f32 %v1666_v28, %v771_v1 }
  0xc8   : > { %vm846_vm6 = vcmp.ge.f32.partialorder %v814_v62, 0.0  ;;  %v878_v2 = vmul.f32 0.2, %v814_v62  ;;  %vm854_vm7 = vcmp.ge.f32.partialorder %v822_v63, 0.0  ;;  %v886_v3 = vmul.f32 0.2, %v822_v63 }
  0xc9   : > { %v863_v20 = vmul.f32 0.2, %v799_v10  ;;  %v871_v21 = vmul.f32 0.2, %v807_v11  ;;  %vm831_vm8 = vcmp.ge.f32.partialorder %v799_v10, 0.0  ;;  %vm839_vm9 = vcmp.ge.f32.partialorder %v807_v11, 0.0 }
  0xca   : > { %v910_v6 = vsel %vm846_vm6, %v814_v62, %v878_v2  ;;  %v918_v7 = vsel %vm854_vm7, %v822_v63, %v886_v3 }
  0xcb   : > { %v1287_v8 = vpack.c.bf16 %v910_v6, %v909_v4  ;;  %v1307_v9 = vpack.c.bf16 %v918_v7, %v917_v5  ;;  %v623_v12 = vpop.f32.mrf.mxu2  ;;  %v643_v13 = vpop.f32.mrf.mxu3  ;;  %v895_v30 = vsel %vm831_vm8, %v799_v10, %v863_v20  ;;  %v903_v31 = vsel %vm839_vm9, %v807_v11, %v871_v21 }
  0xcc   : > { %v585_v14 = vpop.f32.mrf.mxu0  ;;  %v605_v15 = vpop.f32.mrf.mxu1  ;;  %v779_v18 = vmul.f32 %v1663_v24, %v623_v12  ;;  %v787_v19 = vmul.f32 %v1663_v24, %v643_v13 }
  0xcd   : > { %1331 = vst [vmem:[%s1684_s23 + $0x40] sm:$0xff] %v1287_v8   ;;  %v764_v16 = vmul.f32 %v1663_v24, %v585_v14  ;;  %v772_v17 = vmul.f32 %v1663_v24, %v605_v15 }
  0xce   : > { %1335 = vst [vmem:[%s1684_s23 + $0x60] sm:$0xff] %v1307_v9   ;;  %v815_v27 = vadd.f32 %v1666_v28, %v779_v18  ;;  %v823_v29 = vadd.f32 %v1666_v28, %v787_v19 }
  0xcf   : > { %v800_v22 = vadd.f32 %v1666_v28, %v764_v16  ;;  %v808_v23 = vadd.f32 %v1666_v28, %v772_v17 }
  0xd0   : > { %v879_v42 = vmul.f32 0.2, %v815_v27  ;;  %v887_v43 = vmul.f32 0.2, %v823_v29  ;;  %vm847_vm12 = vcmp.ge.f32.partialorder %v815_v27, 0.0  ;;  %vm855_vm13 = vcmp.ge.f32.partialorder %v823_v29, 0.0 }
  0xd1   : > { %vm832_vm10 = vcmp.ge.f32.partialorder %v800_v22, 0.0  ;;  %v864_v25 = vmul.f32 0.2, %v800_v22  ;;  %vm840_vm11 = vcmp.ge.f32.partialorder %v808_v23, 0.0  ;;  %v872_v26 = vmul.f32 0.2, %v808_v23 }
  0xd2   : > { %v911_v50 = vsel %vm847_vm12, %v815_v27, %v879_v42  ;;  %v919_v51 = vsel %vm855_vm13, %v823_v29, %v887_v43 }
  0xd3   : > { %v896_v32 = vsel %vm832_vm10, %v800_v22, %v864_v25  ;;  %v904_v33 = vsel %vm840_vm11, %v808_v23, %v872_v26  ;;  %v625_v34 = vpop.f32.mrf.mxu2  ;;  %v645_v35 = vpop.f32.mrf.mxu3 }
  0xd4   : > { %v1252_v36 = vpack.c.bf16 %v896_v32, %v895_v30  ;;  %v1272_v37 = vpack.c.bf16 %v904_v33, %v903_v31  ;;  %v780_v38 = vmul.f32 %v1663_v24, %v625_v34  ;;  %v788_v39 = vmul.f32 %v1663_v24, %v645_v35  ;;  %v588_v40 = vpop.f32.mrf.mxu0  ;;  %v608_v41 = vpop.f32.mrf.mxu1 }
  0xd5   : > { %v765_v46 = vmul.f32 %v1663_v24, %v588_v40  ;;  %v773_v47 = vmul.f32 %v1663_v24, %v608_v41 }
  0xd6   : > { %1324 = vst [vmem:[%s1684_s23 + $0x8] sm:$0xff] %v1252_v36   ;;  %v816_v44 = vadd.f32 %v1666_v28, %v780_v38  ;;  %v824_v45 = vadd.f32 %v1666_v28, %v788_v39 }
  0xd7   : > { %1328 = vst [vmem:[%s1684_s23 + $0x28] sm:$0xff] %v1272_v37   ;;  %v801_v56 = vadd.f32 %v1666_v28, %v765_v46  ;;  %v809_v57 = vadd.f32 %v1666_v28, %v773_v47 }
  0xd8   : > { %vm848_vm14 = vcmp.ge.f32.partialorder %v816_v44, 0.0  ;;  %v880_v48 = vmul.f32 0.2, %v816_v44  ;;  %vm856_vm15 = vcmp.ge.f32.partialorder %v824_v45, 0.0  ;;  %v888_v49 = vmul.f32 0.2, %v824_v45 }
  0xd9   : > { %v865_v2 = vmul.f32 0.2, %v801_v56  ;;  %v873_v3 = vmul.f32 0.2, %v809_v57  ;;  %vm833_vm0 = vcmp.ge.f32.partialorder %v801_v56, 0.0  ;;  %vm841_vm1 = vcmp.ge.f32.partialorder %v809_v57, 0.0 }
  0xda   : > { %v912_v52 = vsel %vm848_vm14, %v816_v44, %v880_v48  ;;  %v920_v53 = vsel %vm856_vm15, %v824_v45, %v888_v49 }
  0xdb   : > { %v1292_v54 = vpack.c.bf16 %v912_v52, %v911_v50  ;;  %v1312_v55 = vpack.c.bf16 %v920_v53, %v919_v51  ;;  %v628_v58 = vpop.f32.mrf.mxu2  ;;  %v648_v59 = vpop.f32.mrf.mxu3  ;;  %v897_v10 = vsel %vm833_vm0, %v801_v56, %v865_v2  ;;  %v905_v11 = vsel %vm841_vm1, %v809_v57, %v873_v3 }
  0xdc   : > { %v590_v60 = vpop.f32.mrf.mxu0  ;;  %v610_v61 = vpop.f32.mrf.mxu1  ;;  %v781_v0 = vmul.f32 %v1663_v24, %v628_v58  ;;  %v789_v1 = vmul.f32 %v1663_v24, %v648_v59 }
  0xdd   : > { %1332 = vst [vmem:[%s1684_s23 + $0x48] sm:$0xff] %v1292_v54   ;;  %v766_v62 = vmul.f32 %v1663_v24, %v590_v60  ;;  %v774_v63 = vmul.f32 %v1663_v24, %v610_v61 }
  0xde   : > { %1336 = vst [vmem:[%s1684_s23 + $0x68] sm:$0xff] %v1312_v55   ;;  %v817_v8 = vadd.f32 %v1666_v28, %v781_v0  ;;  %v825_v9 = vadd.f32 %v1666_v28, %v789_v1 }
  0xdf   : > { %v802_v4 = vadd.f32 %v1666_v28, %v766_v62  ;;  %v810_v5 = vadd.f32 %v1666_v28, %v774_v63 }
  0xe0   : > { %v881_v22 = vmul.f32 0.2, %v817_v8  ;;  %v889_v23 = vmul.f32 0.2, %v825_v9  ;;  %vm849_vm4 = vcmp.ge.f32.partialorder %v817_v8, 0.0  ;;  %vm857_vm5 = vcmp.ge.f32.partialorder %v825_v9, 0.0 }
  0xe1   : > { %vm834_vm2 = vcmp.ge.f32.partialorder %v802_v4, 0.0  ;;  %v866_v6 = vmul.f32 0.2, %v802_v4  ;;  %vm842_vm3 = vcmp.ge.f32.partialorder %v810_v5, 0.0  ;;  %v874_v7 = vmul.f32 0.2, %v810_v5 }
  0xe2   : > { %v913_v32 = vsel %vm849_vm4, %v817_v8, %v881_v22  ;;  %v921_v33 = vsel %vm857_vm5, %v825_v9, %v889_v23 }
  0xe3   : > { %v898_v12 = vsel %vm834_vm2, %v802_v4, %v866_v6  ;;  %v906_v13 = vsel %vm842_vm3, %v810_v5, %v874_v7  ;;  %v630_v14 = vpop.f32.mrf.mxu2  ;;  %v650_v15 = vpop.f32.mrf.mxu3 }
  0xe4   : > { %v1257_v16 = vpack.c.bf16 %v898_v12, %v897_v10  ;;  %v1277_v17 = vpack.c.bf16 %v906_v13, %v905_v11  ;;  %v782_v18 = vmul.f32 %v1663_v24, %v630_v14  ;;  %v790_v19 = vmul.f32 %v1663_v24, %v650_v15  ;;  %v593_v20 = vpop.f32.mrf.mxu0  ;;  %v613_v21 = vpop.f32.mrf.mxu1 }
  0xe5   : > { %v767_v27 = vmul.f32 %v1663_v24, %v593_v20  ;;  %v775_v29 = vmul.f32 %v1663_v24, %v613_v21 }
  0xe6   : > { %1325 = vst [vmem:[%s1684_s23 + $0x10] sm:$0xff] %v1257_v16   ;;  %v818_v25 = vadd.f32 %v1666_v28, %v782_v18  ;;  %v826_v26 = vadd.f32 %v1666_v28, %v790_v19 }
  0xe7   : > { %1329 = vst [vmem:[%s1684_s23 + $0x30] sm:$0xff] %v1277_v17   ;;  %v803_v38 = vadd.f32 %v1666_v28, %v767_v27  ;;  %v811_v39 = vadd.f32 %v1666_v28, %v775_v29 }
  0xe8   : > { %vm850_vm6 = vcmp.ge.f32.partialorder %v818_v25, 0.0  ;;  %v882_v30 = vmul.f32 0.2, %v818_v25  ;;  %vm858_vm7 = vcmp.ge.f32.partialorder %v826_v26, 0.0  ;;  %v890_v31 = vmul.f32 0.2, %v826_v26 }
  0xe9   : > { %v867_v48 = vmul.f32 0.2, %v803_v38  ;;  %v875_v49 = vmul.f32 0.2, %v811_v39  ;;  %vm835_vm8 = vcmp.ge.f32.partialorder %v803_v38, 0.0  ;;  %vm843_vm9 = vcmp.ge.f32.partialorder %v811_v39, 0.0 }
  0xea   : > { %v914_v34 = vsel %vm850_vm6, %v818_v25, %v882_v30  ;;  %v922_v35 = vsel %vm858_vm7, %v826_v26, %v890_v31 }
  0xeb   : > { %v1297_v36 = vpack.c.bf16 %v914_v34, %v913_v32  ;;  %v1317_v37 = vpack.c.bf16 %v922_v35, %v921_v33  ;;  %v633_v40 = vpop.f32.mrf.mxu2  ;;  %v653_v41 = vpop.f32.mrf.mxu3  ;;  %v899_v56 = vsel %vm835_vm8, %v803_v38, %v867_v48  ;;  %v907_v57 = vsel %vm843_vm9, %v811_v39, %v875_v49 }
  0xec   : > { %v595_v42 = vpop.f32.mrf.mxu0  ;;  %v615_v43 = vpop.f32.mrf.mxu1  ;;  %v783_v46 = vmul.f32 %v1663_v24, %v633_v40  ;;  %v791_v47 = vmul.f32 %v1663_v24, %v653_v41 }
  0xed   : > { %1333 = vst [vmem:[%s1684_s23 + $0x50] sm:$0xff] %v1297_v36   ;;  %v768_v44 = vmul.f32 %v1663_v24, %v595_v42  ;;  %v776_v45 = vmul.f32 %v1663_v24, %v615_v43 }
  0xee   : > { %1337 = vst [vmem:[%s1684_s23 + $0x70] sm:$0xff] %v1317_v37   ;;  %v819_v54 = vadd.f32 %v1666_v28, %v783_v46  ;;  %v827_v55 = vadd.f32 %v1666_v28, %v791_v47 }
  0xef   : > { %v804_v50 = vadd.f32 %v1666_v28, %v768_v44  ;;  %v812_v51 = vadd.f32 %v1666_v28, %v776_v45 }
  0xf0   : > { %v883_v2 = vmul.f32 0.2, %v819_v54  ;;  %v891_v3 = vmul.f32 0.2, %v827_v55  ;;  %vm851_vm12 = vcmp.ge.f32.partialorder %v819_v54, 0.0  ;;  %vm859_vm13 = vcmp.ge.f32.partialorder %v827_v55, 0.0 }
  0xf1   : > { %vm836_vm10 = vcmp.ge.f32.partialorder %v804_v50, 0.0  ;;  %v868_v52 = vmul.f32 0.2, %v804_v50  ;;  %vm844_vm11 = vcmp.ge.f32.partialorder %v812_v51, 0.0  ;;  %v876_v53 = vmul.f32 0.2, %v812_v51 }
  0xf2   : > { %v915_v8 = vsel %vm851_vm12, %v819_v54, %v883_v2  ;;  %v923_v9 = vsel %vm859_vm13, %v827_v55, %v891_v3 }
  0xf3   : > { %v900_v58 = vsel %vm836_vm10, %v804_v50, %v868_v52  ;;  %v908_v59 = vsel %vm844_vm11, %v812_v51, %v876_v53  ;;  %v635_v60 = vpop.f32.mrf.mxu2  ;;  %v655_v61 = vpop.f32.mrf.mxu3 }
  0xf4   : > { %v1262_v62 = vpack.c.bf16 %v900_v58, %v899_v56  ;;  %v1282_v63 = vpack.c.bf16 %v908_v59, %v907_v57  ;;  %v784_v0 = vmul.f32 %v1663_v24, %v635_v60  ;;  %v792_v1 = vmul.f32 %v1663_v24, %v655_v61 }
  0xf6   : > { %1326 = vst [vmem:[%s1684_s23 + $0x18] sm:$0xff] %v1262_v62   ;;  %v820_v4 = vadd.f32 %v1666_v28, %v784_v0  ;;  %v828_v5 = vadd.f32 %v1666_v28, %v792_v1 }
  0xf7   : > { %1330 = vst [vmem:[%s1684_s23 + $0x38] sm:$0xff] %v1282_v63  }
  0xf8   : > { %vm852_vm14 = vcmp.ge.f32.partialorder %v820_v4, 0.0  ;;  %v884_v6 = vmul.f32 0.2, %v820_v4  ;;  %vm860_vm15 = vcmp.ge.f32.partialorder %v828_v5, 0.0  ;;  %v892_v7 = vmul.f32 0.2, %v828_v5 }
  0xfa   : > { %v916_v10 = vsel %vm852_vm14, %v820_v4, %v884_v6  ;;  %v924_v24 = vsel %vm860_vm15, %v828_v5, %v892_v7 }
  0xfb   : > { %v1302_v11 = vpack.c.bf16 %v916_v10, %v915_v8  ;;  %v1322_v12 = vpack.c.bf16 %v924_v24, %v923_v9 }
  0xfd   : > { %1334 = vst [vmem:[%s1684_s23 + $0x58] sm:$0xff] %v1302_v11  }
  0xfe   : > { %1338 = vst [vmem:[%s1684_s23 + $0x78] sm:$0xff] %v1322_v12  }
  0xff PF: > { %s16_s17 = sadd.s32 1, %s1542_s17   ;;  %s1771_s15 = smov %s1538_s16 }
 0x100   : > { %p13_p8 = scmp.ge.s32.totalorder %s16_s17, 6   ;;  %s1772_s16 = smov %s1774_s27 }
 0x102   :  { %15 = sbr.rel (!%p13_p8) target bundleno = 3 (0x3), region = 90 }
 0x107   :  { %1017 = vsyncpa [#allocation4], 1 }
 0x108   :  { %1019 = vsyncpa [#allocation4 + $0x1], 1 }
 0x109   :  { %1020 = vsyncpa [#allocation6], 1 }

// kernel: attend_crnn_forward.16
= control target key start
LH: loop header
LB: loop body
LE: loop exit
PB: predicated region body
PF: predicated region fallthrough
CT: control target
= control target key end

     0   :  { %s1628_s15 = smov 0   ;;  %s1630_s16 = smov 0   ;;  %s1914_s0 = inlined_call_operand.vmem [shape: bf16[256,640], index: 0, kind: input, shape index: {}]   ;;  %s1915_s1 = inlined_call_operand.vmem [shape: bf16[640,128], index: 1, kind: input, shape index: {}]   ;;  %s1916_s2 = inlined_call_operand.vmem [shape: f32[1,128], index: 2, kind: input, shape index: {}]   ;;  %s1917_s3 = inlined_call_operand.vmem [shape: f32[1,128], index: 3, kind: input, shape index: {}]   ;;  %s1918_s4 = inlined_call_operand.vmem [shape: bf16[256,128], index: 4, kind: output, shape index: {}]  }
   0x1   :  { %s1632_s17 = smov 0   ;;  %s1634_s18 = smov 0  }
   0x2   :  { %s1636_s19 = smov 0  }
   0x3 LB: > { %s26_s20 = sadd.s32 1, %s1596_s18  ;;  %p49_p1 = scmp.ne.s32.totalorder %s1588_s16, %s1584_s15  ;;  %s1600_s19 = sphi %s1636_s19, %s14_s19   ;;  %s1596_s18 = sphi %s1634_s18, %s1922_s18   ;;  %s1592_s17 = sphi %s1632_s17, %s1921_s17   ;;  %s1588_s16 = sphi %s1630_s16, %s1920_s16   ;;  %s1584_s15 = sphi %s1628_s15, %s1919_s15  }
   0x4   : > { %p27_p0 = scmp.ge.s32.totalorder %s26_s20, 5  ;;  %p50_p2 = scmp.eq.s32.totalorder %s1600_s19, 0 }
   0x5   : > { %s42_s22 = sadd.s32 1, %s1588_s16  ;;  %p1267_p5 = scmp.ge.s32.totalorder %s1600_s19, 5 }
   0x6   : > { %s1924_s20 = smov (%p27_p0, %s26_s20), 0  ;;  %p51_p3 = por %p50_p2, %p49_p1 }
   0x7   : > { %s38_s21 = ssub.s32 %s1596_s18, %s1924_s20  ;;  %195 = sbr.rel (%p1267_p5) target bundleno = 48 (0x30), region = 24 }
   0x8   : > { %p40_p4 = scmp.eq.s32.totalorder %s38_s21, 0 }
   0xa   : > { %s1663_s23 = scalar_select %p40_p4, %s1588_s16, %s42_s22  }
   0xc   : > { %198 = sbr.rel (!%p51_p3) target bundleno = 48 (0x30), region = 28  ;;  %s200_s24 = sand.u32 (%p51_p3), 1, %s1588_s16  }
   0xd   : > { %s1269_s25 = sshll.u32 (%p51_p3), %s1596_s18, 2  ;;  %s1268_s26 = sshll.u32 (%p51_p3), %s200_s24, 7 }
   0xe   : > { %s1671_s29 = scalar_lea.vmem (%p51_p3), %s1914_s0, %s1269_s25  ;;  %s1675_s30 = scalar_lea.vmem (%p51_p3), [#allocation3], %s1268_s26 }
   0xf   : > { %v224_v0 = vld [vmem:[%s1671_s29] sm:$0xf] (%p51_p3)  ;;  %v226_v1 = vld [vmem:[%s1671_s29 + $0x14] sm:$0xf] (%p51_p3)  ;;  %v228_v2 = vld [vmem:[%s1671_s29 + $0x28] sm:$0xf] (%p51_p3) }
  0x10   : > { %225 = vst [vmem:[%s1675_s30] sm:$0xf] (%p51_p3), %v224_v0  ;;  %v230_v3 = vld [vmem:[%s1671_s29 + $0x3c] sm:$0xf] (%p51_p3)  ;;  %v232_v4 = vld [vmem:[%s1671_s29 + $0x50] sm:$0xf] (%p51_p3) }
  0x11   : > { %227 = vst [vmem:[%s1675_s30 + $0x4] sm:$0xf] %v226_v1  ;;  %v234_v5 = vld [vmem:[%s1671_s29 + $0x64] sm:$0xf]  ;;  %v236_v6 = vld [vmem:[%s1671_s29 + $0x78] sm:$0xf] }
  0x12   : > { %229 = vst [vmem:[%s1675_s30 + $0x8] sm:$0xf] %v228_v2  ;;  %v238_v7 = vld [vmem:[%s1671_s29 + $0x8c] sm:$0xf]  ;;  %v240_v8 = vld [vmem:[%s1671_s29 + $0xa0] sm:$0xf] }
  0x13   : > { %231 = vst [vmem:[%s1675_s30 + $0xc] sm:$0xf] %v230_v3  ;;  %v242_v9 = vld [vmem:[%s1671_s29 + $0xb4] sm:$0xf]  ;;  %v244_v10 = vld [vmem:[%s1671_s29 + $0xc8] sm:$0xf] }
  0x14   : > { %233 = vst [vmem:[%s1675_s30 + $0x10] sm:$0xf] %v232_v4  ;;  %v246_v11 = vld [vmem:[%s1671_s29 + $0xdc] sm:$0xf]  ;;  %v248_v12 = vld [vmem:[%s1671_s29 + $0xf0] sm:$0xf] }
  0x15   : > { %235 = vst [vmem:[%s1675_s30 + $0x14] sm:$0xf] %v234_v5  ;;  %v250_v13 = vld [vmem:[%s1671_s29 + $0x104] sm:$0xf]  ;;  %v252_v14 = vld [vmem:[%s1671_s29 + $0x118] sm:$0xf] }
  0x16   : > { %237 = vst [vmem:[%s1675_s30 + $0x18] sm:$0xf] %v236_v6  ;;  %v254_v15 = vld [vmem:[%s1671_s29 + $0x12c] sm:$0xf]  ;;  %v256_v16 = vld [vmem:[%s1671_s29 + $0x140] sm:$0xf] }
  0x17   : > { %239 = vst [vmem:[%s1675_s30 + $0x1c] sm:$0xf] %v238_v7  ;;  %v258_v17 = vld [vmem:[%s1671_s29 + $0x154] sm:$0xf]  ;;  %v260_v18 = vld [vmem:[%s1671_s29 + $0x168] sm:$0xf] }
  0x18   : > { %241 = vst [vmem:[%s1675_s30 + $0x20] sm:$0xf] %v240_v8  ;;  %v262_v19 = vld [vmem:[%s1671_s29 + $0x17c] sm:$0xf]  ;;  %v264_v20 = vld [vmem:[%s1671_s29 + $0x190] sm:$0xf] }
  0x19   : > { %243 = vst [vmem:[%s1675_s30 + $0x24] sm:$0xf] %v242_v9  ;;  %v266_v21 = vld [vmem:[%s1671_s29 + $0x1a4] sm:$0xf]  ;;  %v268_v22 = vld [vmem:[%s1671_s29 + $0x1b8] sm:$0xf] }
  0x1a   : > { %245 = vst [vmem:[%s1675_s30 + $0x28] sm:$0xf] %v244_v10  ;;  %v270_v23 = vld [vmem:[%s1671_s29 + $0x1cc] sm:$0xf]  ;;  %v272_v24 = vld [vmem:[%s1671_s29 + $0x1e0] sm:$0xf] }
  0x1b   : > { %247 = vst [vmem:[%s1675_s30 + $0x2c] sm:$0xf] %v246_v11  ;;  %v274_v25 = vld [vmem:[%s1671_s29 + $0x1f4] sm:$0xf]  ;;  %v276_v26 = vld [vmem:[%s1671_s29 + $0x208] sm:$0xf] }
  0x1c   : > { %249 = vst [vmem:[%s1675_s30 + $0x30] sm:$0xf] %v248_v12  ;;  %v278_v27 = vld [vmem:[%s1671_s29 + $0x21c] sm:$0xf]  ;;  %v280_v28 = vld [vmem:[%s1671_s29 + $0x230] sm:$0xf] }
  0x1d   : > { %251 = vst [vmem:[%s1675_s30 + $0x34] sm:$0xf] %v250_v13  ;;  %v282_v29 = vld [vmem:[%s1671_s29 + $0x244] sm:$0xf]  ;;  %v284_v30 = vld [vmem:[%s1671_s29 + $0x258] sm:$0xf] }
  0x1e   : > { %253 = vst [vmem:[%s1675_s30 + $0x38] sm:$0xf] %v252_v14  ;;  %v286_v31 = vld [vmem:[%s1671_s29 + $0x26c] sm:$0xf] }
  0x1f   : > { %255 = vst [vmem:[%s1675_s30 + $0x3c] sm:$0xf] %v254_v15 }
  0x20   : > { %257 = vst [vmem:[%s1675_s30 + $0x40] sm:$0xf] %v256_v16 }
  0x21   : > { %259 = vst [vmem:[%s1675_s30 + $0x44] sm:$0xf] %v258_v17 }
  0x22   : > { %261 = vst [vmem:[%s1675_s30 + $0x48] sm:$0xf] %v260_v18 }
  0x23   : > { %263 = vst [vmem:[%s1675_s30 + $0x4c] sm:$0xf] %v262_v19 }
  0x24   : > { %265 = vst [vmem:[%s1675_s30 + $0x50] sm:$0xf] %v264_v20 }
  0x25   : > { %267 = vst [vmem:[%s1675_s30 + $0x54] sm:$0xf] %v266_v21 }
  0x26   : > { %269 = vst [vmem:[%s1675_s30 + $0x58] sm:$0xf] %v268_v22 }
  0x27   : > { %271 = vst [vmem:[%s1675_s30 + $0x5c] sm:$0xf] %v270_v23 }
  0x28   : > { %273 = vst [vmem:[%s1675_s30 + $0x60] sm:$0xf] %v272_v24 }
  0x29   : > { %275 = vst [vmem:[%s1675_s30 + $0x64] sm:$0xf] %v274_v25 }
  0x2a   : > { %277 = vst [vmem:[%s1675_s30 + $0x68] sm:$0xf] %v276_v26 }
  0x2b   : > { %279 = vst [vmem:[%s1675_s30 + $0x6c] sm:$0xf] %v278_v27 }
  0x2c   : > { %281 = vst [vmem:[%s1675_s30 + $0x70] sm:$0xf] %v280_v28 }
  0x2d   : > { %283 = vst [vmem:[%s1675_s30 + $0x74] sm:$0xf] %v282_v29 }
  0x2e   : > { %285 = vst [vmem:[%s1675_s30 + $0x78] sm:$0xf] %v284_v30 }
  0x2f   : > { %287 = vst [vmem:[%s1675_s30 + $0x7c] sm:$0xf] %v286_v31 }
  0x30 PF: > { %p1270_p6 = scmp.ge.s32.totalorder %s1600_s19, 1  ;;  %p386_p7 = scmp.lt.s32.totalorder %s1600_s19, 6 }
  0x32   : > { %p387_p8 = pnand %p1270_p6, %p386_p7 }
  0x33   : > { %s393_s5 = sand.u32 (!%p387_p8), 1, %s1584_s15   ;;  %s1272_s6 = sshll.u32 (!%p387_p8), %s1592_s17, 4 }
  0x34   : > { %390 = sbr.rel (%p387_p8) target bundleno = 372 (0x174), region = 73  ;;  %s1271_s7 = sshll.u32 (!%p387_p8), %s393_s5, 7 }
  0x35   : > { %p437_p9 = scmp.lt.s32.totalorder (!%p387_p8), %s1272_s6, 79  ;;  %s1748_s12 = scalar_lea.vmem (!%p387_p8), [#allocation3], %s1271_s7 }
  0x36   : > { %p1274_p10 = scmp.ne.s32.totalorder (!%p387_p8), %s1592_s17, 0 }
  0x39   : > { %s1926_s6 = smov (!%p437_p9, %s1272_s6), 79  ;;  %463 = sbr.rel (%p1274_p10) target bundleno = 95 (0x5f), region = 81 }
  0x3a   : > { %s1273_s8 = sshll.u32 %s1926_s6, 2 }
  0x3b   : > { %s1746_s11 = scalar_lea.vmem %s1915_s1, %s1273_s8 }
  0x3e   : > { %v1602_v32 = vmov 0.0  }
  0x3f   : > { %464 = vst [vmem:[#allocation2 + $0xb0] sm:$0xff] %v1602_v32 }
  0x40   : > { %465 = vst [vmem:[#allocation2] sm:$0xff] %v1602_v32 }
  0x41   : > { %466 = vst [vmem:[#allocation2 + $0xd8] sm:$0xff] %v1602_v32 }
  0x42   : > { %467 = vst [vmem:[#allocation2 + $0x18] sm:$0xff] %v1602_v32 }
  0x43   : > { %468 = vst [vmem:[#allocation2 + $0x50] sm:$0xff] %v1602_v32 }
  0x44   : > { %469 = vst [vmem:[#allocation2 + $0x68] sm:$0xff] %v1602_v32 }
  0x45   : > { %470 = vst [vmem:[#allocation2 + $0x30] sm:$0xff] %v1602_v32 }
  0x46   : > { %471 = vst [vmem:[#allocation2 + $0x48] sm:$0xff] %v1602_v32 }
  0x47   : > { %472 = vst [vmem:[#allocation2 + $0x80] sm:$0xff] %v1602_v32 }
  0x48   : > { %473 = vst [vmem:[#allocation2 + $0x88] sm:$0xff] %v1602_v32 }
  0x49   : > { %474 = vst [vmem:[#allocation2 + $0xe8] sm:$0xff] %v1602_v32 }
  0x4a   : > { %475 = vst [vmem:[#allocation2 + $0xb8] sm:$0xff] %v1602_v32 }
  0x4b   : > { %476 = vst [vmem:[#allocation2 + $0x60] sm:$0xff] %v1602_v32 }
  0x4c   : > { %477 = vst [vmem:[#allocation2 + $0xf0] sm:$0xff] %v1602_v32 }
  0x4d   : > { %478 = vst [vmem:[#allocation2 + $0x8] sm:$0xff] %v1602_v32 }
  0x4e   : > { %479 = vst [vmem:[#allocation2 + $0x78] sm:$0xff] %v1602_v32 }
  0x4f   : > { %480 = vst [vmem:[#allocation2 + $0x38] sm:$0xff] %v1602_v32 }
  0x50   : > { %481 = vst [vmem:[#allocation2 + $0x58] sm:$0xff] %v1602_v32 }
  0x51   : > { %482 = vst [vmem:[#allocation2 + $0x40] sm:$0xff] %v1602_v32 }
  0x52   : > { %483 = vst [vmem:[#allocation2 + $0xc8] sm:$0xff] %v1602_v32 }
  0x53   : > { %484 = vst [vmem:[#allocation2 + $0xe0] sm:$0xff] %v1602_v32 }
  0x54   : > { %485 = vst [vmem:[#allocation2 + $0x90] sm:$0xff] %v1602_v32 }
  0x55   : > { %486 = vst [vmem:[#allocation2 + $0x70] sm:$0xff] %v1602_v32 }
  0x56   : > { %487 = vst [vmem:[#allocation2 + $0xc0] sm:$0xff] %v1602_v32 }
  0x57   : > { %488 = vst [vmem:[#allocation2 + $0xa8] sm:$0xff] %v1602_v32 }
  0x58   : > { %489 = vst [vmem:[#allocation2 + $0xd0] sm:$0xff] %v1602_v32 }
  0x59   : > { %490 = vst [vmem:[#allocation2 + $0x10] sm:$0xff] %v1602_v32 }
  0x5a   : > { %491 = vst [vmem:[#allocation2 + $0x28] sm:$0xff] %v1602_v32 }
  0x5b   : > { %492 = vst [vmem:[#allocation2 + $0xa0] sm:$0xff] %v1602_v32 }
  0x5c   : > { %493 = vst [vmem:[#allocation2 + $0xf8] sm:$0xff] %v1602_v32 }
  0x5d   : > { %494 = vst [vmem:[#allocation2 + $0x20] sm:$0xff] %v1602_v32 }
  0x5e   : > { %495 = vst [vmem:[#allocation2 + $0x98] sm:$0xff] %v1602_v32 }
  0x5f PF: > { %v1399_v33 = vld [vmem:[%s1746_s11 + $0x38] sm:$0xff]  ;;  %v1398_v34 = vld [vmem:[%s1746_s11 + $0x30] sm:$0xff]  ;;  %v1397_v35 = vld [vmem:[%s1746_s11 + $0x28] sm:$0xff]  ;;  %p1371_p11 = scmp.ne.s32.totalorder %s1592_s17, 4 }
  0x60   : > { %720 = vmatpush.bf16.msra.mxu0 %v1399_v33  ;;  %1495 = vmatpush.bf16.msra.mxu1 %v1399_v33  ;;  %v1396_v36 = vld [vmem:[%s1746_s11 + $0x20] sm:$0xff]  ;;  %v1395_v37 = vld [vmem:[%s1746_s11 + $0x18] sm:$0xff]  ;;  %v1394_v38 = vld [vmem:[%s1746_s11 + $0x10] sm:$0xff] }
  0x61   : > { %1496 = vmatpush.bf16.msra.mxu2 %v1399_v33  ;;  %1497 = vmatpush.bf16.msra.mxu3 %v1399_v33  ;;  %v1393_v39 = vld [vmem:[%s1746_s11 + $0x8] sm:$0xff]  ;;  %v1392_v40 = vld [vmem:[%s1746_s11] sm:$0xff]  ;;  %v1378_v49 = vld [vmem:[%s1748_s12 + $0x10] sm:$0xff] }
  0x62   : > { %v1376_v41 = vld [vmem:[%s1748_s12] sm:$0xff]  ;;  %v1377_v45 = vld [vmem:[%s1748_s12 + $0x8] sm:$0xff]  ;;  %v1382_v50 = vld [vmem:[%s1748_s12 + $0x30] sm:$0xff] }
  0x63   : > { %v1380_v42 = vld [vmem:[%s1748_s12 + $0x20] sm:$0xff]  ;;  %v1381_v46 = vld [vmem:[%s1748_s12 + $0x28] sm:$0xff]  ;;  %v1386_v51 = vld [vmem:[%s1748_s12 + $0x50] sm:$0xff] }
  0x64   : > { %721 = vmatpush.bf16.msra.mxu0 %v1398_v34  ;;  %1498 = vmatpush.bf16.msra.mxu1 %v1398_v34  ;;  %v1384_v43 = vld [vmem:[%s1748_s12 + $0x40] sm:$0xff]  ;;  %v1385_v47 = vld [vmem:[%s1748_s12 + $0x48] sm:$0xff]  ;;  %v1390_v52 = vld [vmem:[%s1748_s12 + $0x70] sm:$0xff] }
  0x65   : > { %1499 = vmatpush.bf16.msra.mxu2 %v1398_v34  ;;  %1500 = vmatpush.bf16.msra.mxu3 %v1398_v34  ;;  %v1388_v44 = vld [vmem:[%s1748_s12 + $0x60] sm:$0xff]  ;;  %v1389_v48 = vld [vmem:[%s1748_s12 + $0x68] sm:$0xff]  ;;  %v1379_v53 = vld [vmem:[%s1748_s12 + $0x18] sm:$0xff] }
  0x66   : > { %v1383_v54 = vld [vmem:[%s1748_s12 + $0x38] sm:$0xff]  ;;  %v496_v57 = vld [vmem:[#allocation2 + $0xb0] sm:$0xff]  ;;  %v504_v58 = vld [vmem:[#allocation2 + $0x80] sm:$0xff] }
  0x67   : > { %v1387_v55 = vld [vmem:[%s1748_s12 + $0x58] sm:$0xff]  ;;  %v520_v0 = vld [vmem:[#allocation2 + $0xa8] sm:$0xff]  ;;  %v497_v1 = vld [vmem:[#allocation2] sm:$0xff] }
  0x68   : > { %722 = vmatpush.bf16.msra.mxu0 %v1397_v35  ;;  %1501 = vmatpush.bf16.msra.mxu1 %v1397_v35  ;;  %v1391_v56 = vld [vmem:[%s1748_s12 + $0x78] sm:$0xff]  ;;  %v505_v2 = vld [vmem:[#allocation2 + $0x88] sm:$0xff]  ;;  %v521_v12 = vld [vmem:[#allocation2 + $0xd0] sm:$0xff] }
  0x69   : > { %1502 = vmatpush.bf16.msra.mxu2 %v1397_v35  ;;  %1503 = vmatpush.bf16.msra.mxu3 %v1397_v35  ;;  %v512_v63 = vld [vmem:[#allocation2 + $0x38] sm:$0xff]  ;;  %v506_v14 = vld [vmem:[#allocation2 + $0xe8] sm:$0xff]  ;;  %v514_v23 = vld [vmem:[#allocation2 + $0x40] sm:$0xff] }
  0x6a   : > { %v513_v11 = vld [vmem:[#allocation2 + $0x58] sm:$0xff]  ;;  %v522_v24 = vld [vmem:[#allocation2 + $0x10] sm:$0xff]  ;;  %v515_v35 = vld [vmem:[#allocation2 + $0xc8] sm:$0xff] }
  0x6b   : > { %v498_v13 = vld [vmem:[#allocation2 + $0xd8] sm:$0xff] }
  0x6c   : > { %723 = vmatpush.bf16.msra.mxu0 %v1396_v36  ;;  %1504 = vmatpush.bf16.msra.mxu1 %v1396_v36  ;;  %v499_v25 = vld [vmem:[#allocation2 + $0x18] sm:$0xff] }
  0x6d   : > { %1505 = vmatpush.bf16.msra.mxu2 %v1396_v36  ;;  %1506 = vmatpush.bf16.msra.mxu3 %v1396_v36  ;;  %v507_v26 = vld [vmem:[#allocation2 + $0xb8] sm:$0xff]  ;;  %v523_v36 = vld [vmem:[#allocation2 + $0x28] sm:$0xff] }
  0x70   : > { %724 = vmatpush.bf16.msra.mxu0 %v1395_v37  ;;  %1507 = vmatpush.bf16.msra.mxu1 %v1395_v37 }
  0x71   : > { %1508 = vmatpush.bf16.msra.mxu2 %v1395_v37  ;;  %1509 = vmatpush.bf16.msra.mxu3 %v1395_v37  ;;  %v500_v37 = vld [vmem:[#allocation2 + $0x50] sm:$0xff] }
  0x74   : > { %725 = vmatpush.bf16.msra.mxu0 %v1394_v38  ;;  %1510 = vmatpush.bf16.msra.mxu1 %v1394_v38 }
  0x75   : > { %1511 = vmatpush.bf16.msra.mxu2 %v1394_v38  ;;  %1512 = vmatpush.bf16.msra.mxu3 %v1394_v38  ;;  %v508_v38 = vld [vmem:[#allocation2 + $0x60] sm:$0xff] }
  0x78   : > { %726 = vmatpush.bf16.msra.mxu0 %v1393_v39  ;;  %1513 = vmatpush.bf16.msra.mxu1 %v1393_v39 }
  0x79   : > { %1514 = vmatpush.bf16.msra.mxu2 %v1393_v39  ;;  %1515 = vmatpush.bf16.msra.mxu3 %v1393_v39 }
  0x7c   : > { %727 = vmatpush.bf16.msra.mxu0 %v1392_v40  ;;  %1516 = vmatpush.bf16.msra.mxu1 %v1392_v40 }
  0x7d   : > { %1517 = vmatpush.bf16.msra.mxu2 %v1392_v40  ;;  %1518 = vmatpush.bf16.msra.mxu3 %v1392_v40 }
  0x7f   : > { %728 = vmatmul.bf16.vlgmr.msra.gmra.mxu0 %v1376_v41  ;;  %748 = vmatmul.bf16.vlgmr.msra.gmra.mxu1 %v1380_v42 }
  0x80   : > { %768 = vmatmul.bf16.vlgmr.msra.gmra.mxu2 %v1384_v43  ;;  %788 = vmatmul.bf16.vlgmr.msra.gmra.mxu3 %v1388_v44 }
  0x8f   : > { %733 = vmatmul.bf16.gmra.mxu0 %v1377_v45  ;;  %753 = vmatmul.bf16.gmra.mxu1 %v1381_v46 }
  0x90   : > { %773 = vmatmul.bf16.gmra.mxu2 %v1385_v47  ;;  %793 = vmatmul.bf16.gmra.mxu3 %v1389_v48  ;;  %v516_v47 = vld [vmem:[#allocation2 + $0xe0] sm:$0xff] }
  0x91   : > { %v524_v48 = vld [vmem:[#allocation2 + $0xa0] sm:$0xff] }
  0x9f   : > { %738 = vmatmul.bf16.gmra.mxu0 %v1378_v49  ;;  %758 = vmatmul.bf16.gmra.mxu1 %v1382_v50  ;;  %v501_v49 = vld [vmem:[#allocation2 + $0x68] sm:$0xff]  ;;  %v509_v50 = vld [vmem:[#allocation2 + $0xf0] sm:$0xff] }
  0xa0   : > { %778 = vmatmul.bf16.gmra.mxu2 %v1386_v51  ;;  %798 = vmatmul.bf16.gmra.mxu3 %v1390_v52 }
  0xaf   : > { %743 = vmatmul.bf16.gmra.mxu0 %v1379_v53  ;;  %763 = vmatmul.bf16.gmra.mxu1 %v1383_v54 }
  0xb0   : > { %783 = vmatmul.bf16.gmra.mxu2 %v1387_v55  ;;  %803 = vmatmul.bf16.gmra.mxu3 %v1391_v56 }
  0xfc   : > { %v729_v59 = vpop.f32.mrf.mxu0  ;;  %v749_v60 = vpop.f32.mrf.mxu1 }
  0xfd   : > { %v809_v61 = vadd.f32 %v729_v59, %v496_v57  ;;  %v817_v62 = vadd.f32 %v749_v60, %v504_v58  ;;  %v517_v59 = vld [vmem:[#allocation2 + $0x90] sm:$0xff]  ;;  %v525_v60 = vld [vmem:[#allocation2 + $0xf8] sm:$0xff] }
  0xff   : > { %841 = vst [vmem:[#allocation2 + $0xb0] sm:$0xff] %v809_v61  ;;  %v502_v61 = vld [vmem:[#allocation2 + $0x30] sm:$0xff] }
 0x100   : > { %849 = vst [vmem:[#allocation2 + $0x80] sm:$0xff] %v817_v62  ;;  %v510_v62 = vld [vmem:[#allocation2 + $0x8] sm:$0xff] }
 0x103   : > { %v769_v3 = vpop.f32.mrf.mxu2  ;;  %v789_v4 = vpop.f32.mrf.mxu3 }
 0x104   : > { %v825_v5 = vadd.f32 %v769_v3, %v512_v63  ;;  %v833_v6 = vadd.f32 %v789_v4, %v520_v0  ;;  %v731_v7 = vpop.f32.mrf.mxu0  ;;  %v751_v8 = vpop.f32.mrf.mxu1 }
 0x105   : > { %v810_v9 = vadd.f32 %v731_v7, %v497_v1  ;;  %v818_v10 = vadd.f32 %v751_v8, %v505_v2  ;;  %v518_v7 = vld [vmem:[#allocation2 + $0x70] sm:$0xff]  ;;  %v526_v8 = vld [vmem:[#allocation2 + $0x20] sm:$0xff] }
 0x106   : > { %857 = vst [vmem:[#allocation2 + $0x38] sm:$0xff] %v825_v5 }
 0x107   : > { %865 = vst [vmem:[#allocation2 + $0xa8] sm:$0xff] %v833_v6 }
 0x108   : > { %842 = vst [vmem:[#allocation2] sm:$0xff] %v810_v9  ;;  %v503_v9 = vld [vmem:[#allocation2 + $0x48] sm:$0xff] }
 0x109   : > { %850 = vst [vmem:[#allocation2 + $0x88] sm:$0xff] %v818_v10  ;;  %v511_v10 = vld [vmem:[#allocation2 + $0x78] sm:$0xff] }
 0x10b   : > { %v771_v15 = vpop.f32.mrf.mxu2  ;;  %v791_v16 = vpop.f32.mrf.mxu3 }
 0x10c   : > { %v826_v17 = vadd.f32 %v771_v15, %v513_v11  ;;  %v834_v18 = vadd.f32 %v791_v16, %v521_v12  ;;  %v734_v19 = vpop.f32.mrf.mxu0  ;;  %v754_v20 = vpop.f32.mrf.mxu1 }
 0x10d   : > { %v811_v21 = vadd.f32 %v734_v19, %v498_v13  ;;  %v819_v22 = vadd.f32 %v754_v20, %v506_v14  ;;  %v519_v19 = vld [vmem:[#allocation2 + $0xc0] sm:$0xff]  ;;  %v527_v20 = vld [vmem:[#allocation2 + $0x98] sm:$0xff] }
 0x10e   : > { %858 = vst [vmem:[#allocation2 + $0x58] sm:$0xff] %v826_v17 }
 0x10f   : > { %866 = vst [vmem:[#allocation2 + $0xd0] sm:$0xff] %v834_v18 }
 0x110   : > { %843 = vst [vmem:[#allocation2 + $0xd8] sm:$0xff] %v811_v21 }
 0x111   : > { %851 = vst [vmem:[#allocation2 + $0xe8] sm:$0xff] %v819_v22 }
 0x113   : > { %v774_v27 = vpop.f32.mrf.mxu2  ;;  %v794_v28 = vpop.f32.mrf.mxu3 }
 0x114   : > { %v827_v29 = vadd.f32 %v774_v27, %v514_v23  ;;  %v835_v30 = vadd.f32 %v794_v28, %v522_v24  ;;  %v736_v31 = vpop.f32.mrf.mxu0  ;;  %v756_v32 = vpop.f32.mrf.mxu1 }
 0x115   : > { %v812_v33 = vadd.f32 %v736_v31, %v499_v25  ;;  %v820_v34 = vadd.f32 %v756_v32, %v507_v26 }
 0x116   : > { %859 = vst [vmem:[#allocation2 + $0x40] sm:$0xff] %v827_v29 }
 0x117   : > { %867 = vst [vmem:[#allocation2 + $0x10] sm:$0xff] %v835_v30 }
 0x118   : > { %844 = vst [vmem:[#allocation2 + $0x18] sm:$0xff] %v812_v33 }
 0x119   : > { %852 = vst [vmem:[#allocation2 + $0xb8] sm:$0xff] %v820_v34 }
 0x11b   : > { %v776_v39 = vpop.f32.mrf.mxu2  ;;  %v796_v40 = vpop.f32.mrf.mxu3 }
 0x11c   : > { %v828_v41 = vadd.f32 %v776_v39, %v515_v35  ;;  %v836_v42 = vadd.f32 %v796_v40, %v523_v36  ;;  %v739_v43 = vpop.f32.mrf.mxu0  ;;  %v759_v44 = vpop.f32.mrf.mxu1 }
 0x11d   : > { %v813_v45 = vadd.f32 %v739_v43, %v500_v37  ;;  %v821_v46 = vadd.f32 %v759_v44, %v508_v38 }
 0x11e   : > { %860 = vst [vmem:[#allocation2 + $0xc8] sm:$0xff] %v828_v41 }
 0x11f   : > { %868 = vst [vmem:[#allocation2 + $0x28] sm:$0xff] %v836_v42 }
 0x120   : > { %845 = vst [vmem:[#allocation2 + $0x50] sm:$0xff] %v813_v45 }
 0x121   : > { %853 = vst [vmem:[#allocation2 + $0x60] sm:$0xff] %v821_v46 }
 0x123   : > { %v779_v51 = vpop.f32.mrf.mxu2  ;;  %v799_v52 = vpop.f32.mrf.mxu3 }
 0x124   : > { %v829_v53 = vadd.f32 %v779_v51, %v516_v47  ;;  %v837_v54 = vadd.f32 %v799_v52, %v524_v48  ;;  %v741_v55 = vpop.f32.mrf.mxu0  ;;  %v761_v56 = vpop.f32.mrf.mxu1 }
 0x125   : > { %v814_v57 = vadd.f32 %v741_v55, %v501_v49  ;;  %v822_v58 = vadd.f32 %v761_v56, %v509_v50 }
 0x126   : > { %861 = vst [vmem:[#allocation2 + $0xe0] sm:$0xff] %v829_v53 }
 0x127   : > { %869 = vst [vmem:[#allocation2 + $0xa0] sm:$0xff] %v837_v54 }
 0x128   : > { %846 = vst [vmem:[#allocation2 + $0x68] sm:$0xff] %v814_v57 }
 0x129   : > { %854 = vst [vmem:[#allocation2 + $0xf0] sm:$0xff] %v822_v58 }
 0x12b   : > { %v781_v63 = vpop.f32.mrf.mxu2  ;;  %v801_v0 = vpop.f32.mrf.mxu3 }
 0x12c   : > { %v830_v1 = vadd.f32 %v781_v63, %v517_v59  ;;  %v838_v2 = vadd.f32 %v801_v0, %v525_v60  ;;  %v744_v3 = vpop.f32.mrf.mxu0  ;;  %v764_v4 = vpop.f32.mrf.mxu1 }
 0x12d   : > { %v815_v5 = vadd.f32 %v744_v3, %v502_v61  ;;  %v823_v6 = vadd.f32 %v764_v4, %v510_v62 }
 0x12e   : > { %862 = vst [vmem:[#allocation2 + $0x90] sm:$0xff] %v830_v1 }
 0x12f   : > { %870 = vst [vmem:[#allocation2 + $0xf8] sm:$0xff] %v838_v2 }
 0x130   : > { %847 = vst [vmem:[#allocation2 + $0x30] sm:$0xff] %v815_v5 }
 0x131   : > { %855 = vst [vmem:[#allocation2 + $0x8] sm:$0xff] %v823_v6 }
 0x133   : > { %v784_v11 = vpop.f32.mrf.mxu2  ;;  %v804_v12 = vpop.f32.mrf.mxu3 }
 0x134   : > { %v831_v13 = vadd.f32 %v784_v11, %v518_v7  ;;  %v839_v14 = vadd.f32 %v804_v12, %v526_v8  ;;  %v746_v15 = vpop.f32.mrf.mxu0  ;;  %v766_v16 = vpop.f32.mrf.mxu1 }
 0x135   : > { %v816_v17 = vadd.f32 %v746_v15, %v503_v9  ;;  %v824_v18 = vadd.f32 %v766_v16, %v511_v10 }
 0x136   : > { %863 = vst [vmem:[#allocation2 + $0x70] sm:$0xff] %v831_v13 }
 0x137   : > { %871 = vst [vmem:[#allocation2 + $0x20] sm:$0xff] %v839_v14 }
 0x138   : > { %848 = vst [vmem:[#allocation2 + $0x48] sm:$0xff] %v816_v17 }
 0x139   : > { %856 = vst [vmem:[#allocation2 + $0x78] sm:$0xff] %v824_v18 }
 0x13b   : > { %v786_v21 = vpop.f32.mrf.mxu2  ;;  %v806_v22 = vpop.f32.mrf.mxu3  ;;  %876 = sbr.rel (%p1371_p11) target bundleno = 372 (0x174), region = 85 }
 0x13c   : > { %v832_v23 = vadd.f32 %v786_v21, %v519_v19  ;;  %v840_v24 = vadd.f32 %v806_v22, %v527_v20 }
 0x13e   : > { %864 = vst [vmem:[#allocation2 + $0xc0] sm:$0xff] %v832_v23 }
 0x13f   : > { %872 = vst [vmem:[#allocation2 + $0x98] sm:$0xff] %v840_v24 }
 0x140   : > { %v877_v25 = vld [vmem:[#allocation2 + $0xb0] sm:$0xff]  ;;  %v878_v26 = vld [vmem:[#allocation2] sm:$0xff]  ;;  %v879_v29 = vld [vmem:[#allocation2 + $0xd8] sm:$0xff] }
 0x141   : > { %v1779_v27 = vld [vmem:[%s1916_s2] ss:$0 sm:$0xff]  ;;  %v880_v30 = vld [vmem:[#allocation2 + $0x18] sm:$0xff]  ;;  %v881_v31 = vld [vmem:[#allocation2 + $0x50] sm:$0xff] }
 0x142   : > { %v1784_v28 = vld [vmem:[%s1917_s3] ss:$0 sm:$0xff]  ;;  %v913_v32 = vmul.f32 %v1779_v27, %v877_v25  ;;  %v914_v33 = vmul.f32 %v1779_v27, %v878_v26  ;;  %v915_v34 = vmul.f32 %v1779_v27, %v879_v29  ;;  %v916_v35 = vmul.f32 %v1779_v27, %v880_v30  ;;  %v882_v36 = vld [vmem:[#allocation2 + $0x68] sm:$0xff]  ;;  %v883_v37 = vld [vmem:[#allocation2 + $0x30] sm:$0xff] }
 0x143   : > { %v884_v38 = vld [vmem:[#allocation2 + $0x48] sm:$0xff]  ;;  %v917_v39 = vmul.f32 %v1779_v27, %v881_v31  ;;  %v918_v40 = vmul.f32 %v1779_v27, %v882_v36  ;;  %v919_v41 = vmul.f32 %v1779_v27, %v883_v37  ;;  %v885_v57 = vld [vmem:[#allocation2 + $0x80] sm:$0xff]  ;;  %v888_v0 = vld [vmem:[#allocation2 + $0xb8] sm:$0xff] }
 0x144   : > { %v920_v42 = vmul.f32 %v1779_v27, %v884_v38  ;;  %v949_v43 = vadd.f32 %v1784_v28, %v913_v32  ;;  %v950_v44 = vadd.f32 %v1784_v28, %v914_v33  ;;  %v951_v45 = vadd.f32 %v1784_v28, %v915_v34  ;;  %v886_v62 = vld [vmem:[#allocation2 + $0x88] sm:$0xff]  ;;  %v889_v11 = vld [vmem:[#allocation2 + $0x60] sm:$0xff]  ;;  %v890_v12 = vld [vmem:[#allocation2 + $0xf0] sm:$0xff] }
 0x145   : > { %v952_v46 = vadd.f32 %v1784_v28, %v916_v35  ;;  %v953_v47 = vadd.f32 %v1784_v28, %v917_v39  ;;  %v954_v48 = vadd.f32 %v1784_v28, %v918_v40  ;;  %v955_v49 = vadd.f32 %v1784_v28, %v919_v41  ;;  %v887_v63 = vld [vmem:[#allocation2 + $0xe8] sm:$0xff]  ;;  %v892_v25 = vld [vmem:[#allocation2 + $0x78] sm:$0xff] }
 0x146   : > { %v956_v50 = vadd.f32 %v1784_v28, %v920_v42  ;;  %vm981_vm0 = vcmp.ge.f32.partialorder %v949_v43, 0.0  ;;  %vm982_vm1 = vcmp.ge.f32.partialorder %v950_v44, 0.0  ;;  %v1013_v51 = vmul.f32 0.2, %v949_v43  ;;  %v891_v24 = vld [vmem:[#allocation2 + $0x8] sm:$0xff]  ;;  %v893_v37 = vld [vmem:[#allocation2 + $0x38] sm:$0xff] }
 0x147   : > { %v1014_v52 = vmul.f32 0.2, %v950_v44  ;;  %vm983_vm2 = vcmp.ge.f32.partialorder %v951_v45, 0.0  ;;  %vm984_vm3 = vcmp.ge.f32.partialorder %v952_v46, 0.0  ;;  %v1015_v53 = vmul.f32 0.2, %v951_v45 }
 0x148   : > { %v1016_v54 = vmul.f32 0.2, %v952_v46  ;;  %v1045_v55 = vsel %vm981_vm0, %v949_v43, %v1013_v51  ;;  %vm985_vm4 = vcmp.ge.f32.partialorder %v953_v47, 0.0  ;;  %vm986_vm5 = vcmp.ge.f32.partialorder %v954_v48, 0.0  ;;  %v894_v38 = vld [vmem:[#allocation2 + $0x58] sm:$0xff]  ;;  %v895_v42 = vld [vmem:[#allocation2 + $0x40] sm:$0xff] }
 0x149   : > { %v1046_v56 = vsel %vm982_vm1, %v950_v44, %v1014_v52  ;;  %v1047_v59 = vsel %vm983_vm2, %v951_v45, %v1015_v53  ;;  %v1017_v61 = vmul.f32 0.2, %v953_v47  ;;  %v1018_v2 = vmul.f32 0.2, %v954_v48  ;;  %v896_v43 = vld [vmem:[#allocation2 + $0xc8] sm:$0xff] }
 0x14a   : > { %v1403_v58 = vpack.c.bf16 %v1046_v56, %v1045_v55  ;;  %v1048_v60 = vsel %vm984_vm3, %v952_v46, %v1016_v54  ;;  %vm987_vm6 = vcmp.ge.f32.partialorder %v955_v49, 0.0  ;;  %vm988_vm7 = vcmp.ge.f32.partialorder %v956_v50, 0.0  ;;  %v897_v55 = vld [vmem:[#allocation2 + $0xe0] sm:$0xff]  ;;  %v898_v56 = vld [vmem:[#allocation2 + $0x90] sm:$0xff] }
 0x14b   : > { %v1408_v1 = vpack.c.bf16 %v1048_v60, %v1047_v59  ;;  %v1049_v3 = vsel %vm985_vm4, %v953_v47, %v1017_v61  ;;  %v1019_v4 = vmul.f32 0.2, %v955_v49  ;;  %v1020_v5 = vmul.f32 0.2, %v956_v50 }
 0x14c   : > { %1404 = vst [vmem:[%s1918_s4] sm:$0xff] %v1403_v58   ;;  %v921_v6 = vmul.f32 %v1779_v27, %v885_v57  ;;  %v1050_v7 = vsel %vm986_vm5, %v954_v48, %v1018_v2  ;;  %v922_v8 = vmul.f32 %v1779_v27, %v886_v62  ;;  %v923_v9 = vmul.f32 %v1779_v27, %v887_v63 }
 0x14d   : > { %1480 = vst [vmem:[%s1918_s4 + $0x8] sm:$0xff] %v1408_v1   ;;  %v924_v10 = vmul.f32 %v1779_v27, %v888_v0  ;;  %v1413_v13 = vpack.c.bf16 %v1050_v7, %v1049_v3  ;;  %v1051_v14 = vsel %vm987_vm6, %v955_v49, %v1019_v4  ;;  %v1052_v15 = vsel %vm988_vm7, %v956_v50, %v1020_v5  ;;  %v899_v5 = vld [vmem:[#allocation2 + $0x70] sm:$0xff] }
 0x14e   : > { %v957_v16 = vadd.f32 %v1784_v28, %v921_v6  ;;  %v1418_v17 = vpack.c.bf16 %v1052_v15, %v1051_v14  ;;  %v958_v18 = vadd.f32 %v1784_v28, %v922_v8  ;;  %v959_v19 = vadd.f32 %v1784_v28, %v923_v9  ;;  %v900_v6 = vld [vmem:[#allocation2 + $0xc0] sm:$0xff] }
 0x14f   : > { %v960_v20 = vadd.f32 %v1784_v28, %v924_v10  ;;  %1481 = vst [vmem:[%s1918_s4 + $0x10] sm:$0xff] %v1413_v13   ;;  %v925_v22 = vmul.f32 %v1779_v27, %v889_v11  ;;  %v926_v23 = vmul.f32 %v1779_v27, %v890_v12  ;;  %v927_v35 = vmul.f32 %v1779_v27, %v891_v24 }
 0x150   : > { %vm989_vm8 = vcmp.ge.f32.partialorder %v957_v16, 0.0  ;;  %v1021_v21 = vmul.f32 0.2, %v957_v16  ;;  %1482 = vst [vmem:[%s1918_s4 + $0x18] sm:$0xff] %v1418_v17   ;;  %vm990_vm9 = vcmp.ge.f32.partialorder %v958_v18, 0.0  ;;  %vm991_vm10 = vcmp.ge.f32.partialorder %v959_v19, 0.0 }
 0x151   : > { %v1022_v26 = vmul.f32 0.2, %v958_v18  ;;  %vm992_vm11 = vcmp.ge.f32.partialorder %v960_v20, 0.0  ;;  %v1023_v30 = vmul.f32 0.2, %v959_v19  ;;  %v961_v32 = vadd.f32 %v1784_v28, %v925_v22  ;;  %v901_v17 = vld [vmem:[#allocation2 + $0xa8] sm:$0xff] }
 0x152   : > { %v1053_v29 = vsel %vm989_vm8, %v957_v16, %v1021_v21  ;;  %v1024_v31 = vmul.f32 0.2, %v960_v20  ;;  %v962_v34 = vadd.f32 %v1784_v28, %v926_v23  ;;  %v928_v36 = vmul.f32 %v1779_v27, %v892_v25  ;;  %v903_v22 = vld [vmem:[#allocation2 + $0x10] sm:$0xff]  ;;  %v904_v23 = vld [vmem:[#allocation2 + $0x28] sm:$0xff] }
 0x153   : > { %v1054_v33 = vsel %vm990_vm9, %v958_v18, %v1022_v26  ;;  %v1055_v40 = vsel %vm991_vm10, %v959_v19, %v1023_v30  ;;  %vm993_vm12 = vcmp.ge.f32.partialorder %v961_v32, 0.0  ;;  %v1025_v45 = vmul.f32 0.2, %v961_v32  ;;  %v902_v18 = vld [vmem:[#allocation2 + $0xd0] sm:$0xff] }
 0x154   : > { %v1423_v39 = vpack.c.bf16 %v1054_v33, %v1053_v29  ;;  %v1056_v41 = vsel %vm992_vm11, %v960_v20, %v1024_v31  ;;  %vm994_vm13 = vcmp.ge.f32.partialorder %v962_v34, 0.0  ;;  %v1026_v46 = vmul.f32 0.2, %v962_v34 }
 0x155   : > { %v1428_v44 = vpack.c.bf16 %v1056_v41, %v1055_v40  ;;  %v963_v47 = vadd.f32 %v1784_v28, %v927_v35  ;;  %v964_v48 = vadd.f32 %v1784_v28, %v928_v36  ;;  %v929_v49 = vmul.f32 %v1779_v27, %v893_v37  ;;  %v905_v37 = vld [vmem:[#allocation2 + $0xa0] sm:$0xff] }
 0x156   : > { %1483 = vst [vmem:[%s1918_s4 + $0x20] sm:$0xff] %v1423_v39   ;;  %v930_v50 = vmul.f32 %v1779_v27, %v894_v38  ;;  %v1057_v51 = vsel %vm993_vm12, %v961_v32, %v1025_v45  ;;  %v1058_v52 = vsel %vm994_vm13, %v962_v34, %v1026_v46  ;;  %v931_v53 = vmul.f32 %v1779_v27, %v895_v42  ;;  %v906_v38 = vld [vmem:[#allocation2 + $0xf8] sm:$0xff] }
 0x157   : > { %1484 = vst [vmem:[%s1918_s4 + $0x28] sm:$0xff] %v1428_v44   ;;  %v932_v54 = vmul.f32 %v1779_v27, %v896_v43  ;;  %v1433_v57 = vpack.c.bf16 %v1058_v52, %v1057_v51  ;;  %vm995_vm14 = vcmp.ge.f32.partialorder %v963_v47, 0.0  ;;  %vm996_vm15 = vcmp.ge.f32.partialorder %v964_v48, 0.0  ;;  %v907_v51 = vld [vmem:[#allocation2 + $0x20] sm:$0xff]  ;;  %v908_v52 = vld [vmem:[#allocation2 + $0x98] sm:$0xff] }
 0x158   : > { %v1027_v58 = vmul.f32 0.2, %v963_v47  ;;  %v1028_v59 = vmul.f32 0.2, %v964_v48  ;;  %v965_v60 = vadd.f32 %v1784_v28, %v929_v49  ;;  %v966_v61 = vadd.f32 %v1784_v28, %v930_v50 }
 0x159   : > { %v967_v62 = vadd.f32 %v1784_v28, %v931_v53  ;;  %1485 = vst [vmem:[%s1918_s4 + $0x30] sm:$0xff] %v1433_v57   ;;  %v968_v0 = vadd.f32 %v1784_v28, %v932_v54  ;;  %v933_v1 = vmul.f32 %v1779_v27, %v897_v55  ;;  %v934_v2 = vmul.f32 %v1779_v27, %v898_v56 }
 0x15a   : > { %v1059_v63 = vsel %vm995_vm14, %v963_v47, %v1027_v58  ;;  %v1060_v3 = vsel %vm996_vm15, %v964_v48, %v1028_v59  ;;  %vm997_vm0 = vcmp.ge.f32.partialorder %v965_v60, 0.0  ;;  %vm998_vm1 = vcmp.ge.f32.partialorder %v966_v61, 0.0 }
 0x15b   : > { %v1029_v4 = vmul.f32 0.2, %v965_v60  ;;  %v1438_v7 = vpack.c.bf16 %v1060_v3, %v1059_v63  ;;  %v1030_v8 = vmul.f32 0.2, %v966_v61  ;;  %vm999_vm2 = vcmp.ge.f32.partialorder %v967_v62, 0.0 }
 0x15c   : > { %vm1000_vm3 = vcmp.ge.f32.partialorder %v968_v0, 0.0  ;;  %v1031_v10 = vmul.f32 0.2, %v967_v62  ;;  %v1032_v11 = vmul.f32 0.2, %v968_v0  ;;  %v969_v12 = vadd.f32 %v1784_v28, %v933_v1 }
 0x15d   : > { %v1061_v9 = vsel %vm997_vm0, %v965_v60, %v1029_v4  ;;  %1486 = vst [vmem:[%s1918_s4 + $0x38] sm:$0xff] %v1438_v7   ;;  %v1062_v13 = vsel %vm998_vm1, %v966_v61, %v1030_v8  ;;  %v970_v14 = vadd.f32 %v1784_v28, %v934_v2  ;;  %v935_v15 = vmul.f32 %v1779_v27, %v899_v5 }
 0x15e   : > { %v936_v16 = vmul.f32 %v1779_v27, %v900_v6  ;;  %v1443_v19 = vpack.c.bf16 %v1062_v13, %v1061_v9  ;;  %v1063_v20 = vsel %vm999_vm2, %v967_v62, %v1031_v10  ;;  %v1064_v21 = vsel %vm1000_vm3, %v968_v0, %v1032_v11 }
 0x15f   : > { %vm1001_vm4 = vcmp.ge.f32.partialorder %v969_v12, 0.0  ;;  %v1448_v24 = vpack.c.bf16 %v1064_v21, %v1063_v20  ;;  %vm1002_vm5 = vcmp.ge.f32.partialorder %v970_v14, 0.0  ;;  %v1033_v25 = vmul.f32 0.2, %v969_v12 }
 0x160   : > { %v1034_v26 = vmul.f32 0.2, %v970_v14  ;;  %1487 = vst [vmem:[%s1918_s4 + $0x40] sm:$0xff] %v1443_v19   ;;  %v971_v29 = vadd.f32 %v1784_v28, %v935_v15  ;;  %v972_v30 = vadd.f32 %v1784_v28, %v936_v16  ;;  %v937_v31 = vmul.f32 %v1779_v27, %v901_v17 }
 0x161   : > { %v938_v32 = vmul.f32 %v1779_v27, %v902_v18  ;;  %1488 = vst [vmem:[%s1918_s4 + $0x48] sm:$0xff] %v1448_v24   ;;  %v1065_v33 = vsel %vm1001_vm4, %v969_v12, %v1033_v25  ;;  %v939_v35 = vmul.f32 %v1779_v27, %v903_v22  ;;  %v940_v36 = vmul.f32 %v1779_v27, %v904_v23 }
 0x162   : > { %v1066_v34 = vsel %vm1002_vm5, %v970_v14, %v1034_v26  ;;  %vm1003_vm6 = vcmp.ge.f32.partialorder %v971_v29, 0.0  ;;  %vm1004_vm7 = vcmp.ge.f32.partialorder %v972_v30, 0.0  ;;  %v1035_v40 = vmul.f32 0.2, %v971_v29 }
 0x163   : > { %v1453_v39 = vpack.c.bf16 %v1066_v34, %v1065_v33  ;;  %v1036_v41 = vmul.f32 0.2, %v972_v30  ;;  %v973_v42 = vadd.f32 %v1784_v28, %v937_v31  ;;  %v974_v43 = vadd.f32 %v1784_v28, %v938_v32 }
 0x164   : > { %v975_v44 = vadd.f32 %v1784_v28, %v939_v35  ;;  %v1067_v45 = vsel %vm1003_vm6, %v971_v29, %v1035_v40  ;;  %v976_v46 = vadd.f32 %v1784_v28, %v940_v36  ;;  %v941_v47 = vmul.f32 %v1779_v27, %v905_v37 }
 0x165   : > { %1489 = vst [vmem:[%s1918_s4 + $0x50] sm:$0xff] %v1453_v39   ;;  %v942_v48 = vmul.f32 %v1779_v27, %v906_v38  ;;  %v1068_v49 = vsel %vm1004_vm7, %v972_v30, %v1036_v41  ;;  %vm1005_vm8 = vcmp.ge.f32.partialorder %v973_v42, 0.0  ;;  %vm1006_vm9 = vcmp.ge.f32.partialorder %v974_v43, 0.0 }
 0x166   : > { %v1037_v50 = vmul.f32 0.2, %v973_v42  ;;  %v1458_v53 = vpack.c.bf16 %v1068_v49, %v1067_v45  ;;  %v1038_v54 = vmul.f32 0.2, %v974_v43  ;;  %vm1007_vm10 = vcmp.ge.f32.partialorder %v975_v44, 0.0 }
 0x167   : > { %vm1008_vm11 = vcmp.ge.f32.partialorder %v976_v46, 0.0  ;;  %v1039_v56 = vmul.f32 0.2, %v975_v44  ;;  %v1040_v57 = vmul.f32 0.2, %v976_v46  ;;  %v977_v58 = vadd.f32 %v1784_v28, %v941_v47 }
 0x168   : > { %v1069_v55 = vsel %vm1005_vm8, %v973_v42, %v1037_v50  ;;  %1490 = vst [vmem:[%s1918_s4 + $0x58] sm:$0xff] %v1458_v53   ;;  %v1070_v59 = vsel %vm1006_vm9, %v974_v43, %v1038_v54  ;;  %v978_v60 = vadd.f32 %v1784_v28, %v942_v48  ;;  %v943_v61 = vmul.f32 %v1779_v27, %v907_v51 }
 0x169   : > { %v944_v62 = vmul.f32 %v1779_v27, %v908_v52  ;;  %v1463_v63 = vpack.c.bf16 %v1070_v59, %v1069_v55  ;;  %v1071_v0 = vsel %vm1007_vm10, %v975_v44, %v1039_v56  ;;  %v1072_v1 = vsel %vm1008_vm11, %v976_v46, %v1040_v57 }
 0x16a   : > { %vm1009_vm12 = vcmp.ge.f32.partialorder %v977_v58, 0.0  ;;  %v1468_v2 = vpack.c.bf16 %v1072_v1, %v1071_v0  ;;  %vm1010_vm13 = vcmp.ge.f32.partialorder %v978_v60, 0.0  ;;  %v1041_v3 = vmul.f32 0.2, %v977_v58 }
 0x16b   : > { %v1042_v4 = vmul.f32 0.2, %v978_v60  ;;  %1491 = vst [vmem:[%s1918_s4 + $0x60] sm:$0xff] %v1463_v63   ;;  %v979_v5 = vadd.f32 %v1784_v28, %v943_v61  ;;  %v980_v6 = vadd.f32 %v1784_v28, %v944_v62 }
 0x16c   : > { %1492 = vst [vmem:[%s1918_s4 + $0x68] sm:$0xff] %v1468_v2   ;;  %v1073_v27 = vsel %vm1009_vm12, %v977_v58, %v1041_v3 }
 0x16d   : > { %v1074_v7 = vsel %vm1010_vm13, %v978_v60, %v1042_v4  ;;  %vm1011_vm14 = vcmp.ge.f32.partialorder %v979_v5, 0.0  ;;  %vm1012_vm15 = vcmp.ge.f32.partialorder %v980_v6, 0.0  ;;  %v1043_v9 = vmul.f32 0.2, %v979_v5 }
 0x16e   : > { %v1473_v8 = vpack.c.bf16 %v1074_v7, %v1073_v27  ;;  %v1044_v10 = vmul.f32 0.2, %v980_v6 }
 0x16f   : > { %v1075_v11 = vsel %vm1011_vm14, %v979_v5, %v1043_v9 }
 0x170   : > { %1493 = vst [vmem:[%s1918_s4 + $0x70] sm:$0xff] %v1473_v8   ;;  %v1076_v12 = vsel %vm1012_vm15, %v980_v6, %v1044_v10 }
 0x171   : > { %v1478_v13 = vpack.c.bf16 %v1076_v12, %v1075_v11 }
 0x173   : > { %1494 = vst [vmem:[%s1918_s4 + $0x78] sm:$0xff] %v1478_v13  }
 0x174 PF: > { %s14_s19 = sadd.s32 1, %s1600_s19   ;;  %s1919_s15 = smov %s1588_s16 }
 0x175   : > { %p11_p12 = scmp.ge.s32.totalorder %s14_s19, 7   ;;  %s1920_s16 = smov %s1663_s23 }
 0x176   : > { %s1921_s17 = smov %s1596_s18  ;;  %s1922_s18 = smov %s1924_s20 }
 0x177   :  { %13 = sbr.rel (!%p11_p12) target bundleno = 3 (0x3), region = 129 }

// kernel: attend_crnn_forward.17
= control target key start
LH: loop header
LB: loop body
LE: loop exit
PB: predicated region body
PF: predicated region fallthrough
CT: control target
= control target key end

     0   :  { %9 = vsyncpa [#allocation5], 0  ;;  %s1421_s0 = inlined_call_operand.vmem [shape: bf16[64,1152], index: 0, kind: input, shape index: {}]   ;;  %s1422_s1 = inlined_call_operand.hbm [shape: bf16[1152,256], index: 1, kind: input, shape index: {}]   ;;  %s1423_s2 = inlined_call_operand.vmem [shape: f32[1,256], index: 2, kind: input, shape index: {}]   ;;  %s1424_s3 = inlined_call_operand.vmem [shape: f32[1,256], index: 3, kind: input, shape index: {}]   ;;  %s1425_s4 = inlined_call_operand.vmem [shape: bf16[64,256], index: 4, kind: output, shape index: {}]  }
   0x1   :  { %11 = vsyncpa [#allocation5 + $0x1], 0  ;;  %s1218_s15 = smov 0   ;;  %s1220_s16 = smov 0  }
   0x2   :  { %s1222_s17 = smov 0   ;;  %s1224_s18 = smov 0  }
   0x3   :  { %s1226_s19 = smov 0   ;;  %s1228_s20 = smov 0  }
   0x4 LB: > { %s919_s21 = sadd.s32 4294967295, %s1188_s20   ;;  %s29_s22 = sadd.s32 1, %s1184_s19  ;;  %s1188_s20 = sphi %s1228_s20, %s17_s20   ;;  %s1184_s19 = sphi %s1226_s19, %s1432_s19   ;;  %s1180_s18 = sphi %s1224_s18, %s1431_s18   ;;  %s1176_s17 = sphi %s1222_s17, %s1430_s17   ;;  %s1172_s16 = sphi %s1220_s16, %s1429_s16   ;;  %s1168_s15 = sphi %s1218_s15, %s1428_s15  }
   0x5   : > { %p30_p0 = scmp.ge.s32.totalorder %s29_s22, 9  ;;  %s45_s23 = sadd.s32 1, %s1176_s17 }
   0x6   : > { %p52_p1 = scmp.ne.s32.totalorder %s1176_s17, %s1172_s16  ;;  %p53_p2 = scmp.eq.s32.totalorder %s1188_s20, 0 }
   0x7   : > { %s1434_s22 = smov (%p30_p0, %s29_s22), 0  ;;  %p86_p4 = scmp.ne.s32.totalorder %s1172_s16, %s1168_s15 }
   0x8   : > { %p1254_p3 = por %p53_p2, %p52_p1  ;;  %s41_s25 = ssub.s32 %s1184_s19, %s1434_s22 }
   0x9   : > { %p87_p5 = scmp.eq.s32.totalorder %s919_s21, 0  ;;  %p43_p6 = scmp.eq.s32.totalorder %s41_s25, 0 }
   0xa   : > { %p923_p8 = scmp.ge.s32.totalorder %s1188_s20, 9 }
   0xb   : > { %p1261_p7 = por %p87_p5, %p86_p4 }
   0xc   : > { %s1266_s27 = scalar_select %p43_p6, %s1176_s17, %s45_s23  }
   0xd   : > { %202 = sbr.rel (%p923_p8) target bundleno = 36 (0x24), region = 24 }
  0x12   : > { %205 = sbr.rel (!%p1254_p3) target bundleno = 30 (0x1e), region = 28  ;;  %s207_s28 = sand.u32 (%p1254_p3), 1, %s1176_s17  }
  0x13   : > { %s925_s29 = sshll.u32 (%p1254_p3), %s1184_s19, 2  ;;  %s924_s30 = sshll.u32 (%p1254_p3), %s207_s28, 5 }
  0x14   : > { %s214_s7 = scalar_lea.vmem (%p1254_p3), %s1421_s0, %s925_s29  ;;  %s209_s8 = scalar_lea.vmem (%p1254_p3), [#allocation3], %s924_s30 }
  0x15   : > { %v231_v0 = vld [vmem:[%s214_s7] sm:$0xf] (%p1254_p3)  ;;  %v233_v1 = vld [vmem:[%s214_s7 + $0x24] sm:$0xf] (%p1254_p3)  ;;  %v235_v2 = vld [vmem:[%s214_s7 + $0x48] sm:$0xf] (%p1254_p3) }
  0x16   : > { %232 = vst [vmem:[%s209_s8] sm:$0xf] (%p1254_p3), %v231_v0  ;;  %v237_v3 = vld [vmem:[%s214_s7 + $0x6c] sm:$0xf] (%p1254_p3)  ;;  %v239_v4 = vld [vmem:[%s214_s7 + $0x90] sm:$0xf] (%p1254_p3) }
  0x17   : > { %234 = vst [vmem:[%s209_s8 + $0x4] sm:$0xf] %v233_v1  ;;  %v241_v5 = vld [vmem:[%s214_s7 + $0xb4] sm:$0xf]  ;;  %v243_v6 = vld [vmem:[%s214_s7 + $0xd8] sm:$0xf] }
  0x18   : > { %236 = vst [vmem:[%s209_s8 + $0x8] sm:$0xf] %v235_v2  ;;  %v245_v7 = vld [vmem:[%s214_s7 + $0xfc] sm:$0xf] }
  0x19   : > { %238 = vst [vmem:[%s209_s8 + $0xc] sm:$0xf] %v237_v3 }
  0x1a   : > { %240 = vst [vmem:[%s209_s8 + $0x10] sm:$0xf] %v239_v4 }
  0x1b   : > { %242 = vst [vmem:[%s209_s8 + $0x14] sm:$0xf] %v241_v5 }
  0x1c   : > { %244 = vst [vmem:[%s209_s8 + $0x18] sm:$0xf] %v243_v6 }
  0x1d   : > { %246 = vst [vmem:[%s209_s8 + $0x1c] sm:$0xf] %v245_v7 }
  0x1e PF: > { %s287_s9 = sand.u32 1, %s1176_s17   ;;  %s1020_s10 = sshll.u32 %s1184_s19, 7 }
  0x1f   : > { %s926_s11 = sshll.u32 %s287_s9, 7  ;;  %s299_s14 = scalar_lea.hbm %s1422_s1, %s1020_s10 }
  0x20   : > { %s300_s15 = sshll.u32 %s299_s14, 4  ;;  %s291_s21 = scalar_lea.vmem [#allocation4], %s926_s11  ;;  %s301_s15 = int_to_ptr.hbm [resolvable:$true] %s300_s15 }
  0x21   : > { %s302_s23 = sshll.u32 %s291_s21, 4  ;;  %s288_s25 = scalar_lea.sflag [#allocation5], %s287_s9  ;;  %s303_s23 = int_to_ptr.vmem [resolvable:$true] %s302_s23 }
  0x22   : > { %s1190_s28 = smov 128   ;;  %s1191_s29 = smov 8  }
  0x23   : > { %1057 = dma.hbm_to_vmem [thread:$0]  (%p1254_p3), %s301_s15, 2048, %s303_s23, %s288_s25, %s1190_s28, %s1190_s28, %s1191_s29  }
  0x24 PF: > { %p930_p9 = scmp.ge.s32.totalorder %s1188_s20, 1  ;;  %p310_p10 = scmp.lt.s32.totalorder %s1188_s20, 10 }
  0x26   : > { %p311_p11 = pnand %p930_p9, %p310_p10 }
  0x27   : > { %s317_s30 = sand.u32 (!%p311_p11), 1, %s1172_s16  }
  0x28   : > { %314 = sbr.rel (%p311_p11) target bundleno = 296 (0x128), region = 73  ;;  %s931_s5 = sshll.u32 (!%p311_p11), %s317_s30, 5 }
  0x29   : > { %s932_s6 = sshll.u32 (!%p311_p11), %s317_s30, 7  ;;  %s1286_s7 = scalar_lea.vmem (!%p311_p11), [#allocation3], %s931_s5 }
  0x2a   : > { %s324_s8 = scalar_lea.sflag (!%p311_p11), [#allocation5], %s317_s30  ;;  %s1288_s9 = scalar_lea.vmem (!%p311_p11), [#allocation4], %s932_s6 }
  0x2d   : > { %1163 = dma.done.wait (%p1261_p7), %s324_s8, 2048  }
  0x2e   : > { %1165 = vsyncadd (%p1261_p7), %s324_s8, 4294965248  ;;  %p933_p12 = scmp.ne.s32.totalorder %s1180_s18, 0 }
  0x30   : > { %398 = sbr.rel (%p933_p12) target bundleno = 70 (0x46), region = 85 }
  0x35   : > { %v1192_v8 = vmov 0.0  }
  0x36   : > { %399 = vst [vmem:[#allocation2 + $0x30] sm:$0xff] %v1192_v8 }
  0x37   : > { %400 = vst [vmem:[#allocation2] sm:$0xff] %v1192_v8 }
  0x38   : > { %401 = vst [vmem:[#allocation2 + $0x58] sm:$0xff] %v1192_v8 }
  0x39   : > { %402 = vst [vmem:[#allocation2 + $0x18] sm:$0xff] %v1192_v8 }
  0x3a   : > { %403 = vst [vmem:[#allocation2 + $0x50] sm:$0xff] %v1192_v8 }
  0x3b   : > { %404 = vst [vmem:[#allocation2 + $0x68] sm:$0xff] %v1192_v8 }
  0x3c   : > { %405 = vst [vmem:[#allocation2 + $0x8] sm:$0xff] %v1192_v8 }
  0x3d   : > { %406 = vst [vmem:[#allocation2 + $0x48] sm:$0xff] %v1192_v8 }
  0x3e   : > { %407 = vst [vmem:[#allocation2 + $0x40] sm:$0xff] %v1192_v8 }
  0x3f   : > { %408 = vst [vmem:[#allocation2 + $0x20] sm:$0xff] %v1192_v8 }
  0x40   : > { %409 = vst [vmem:[#allocation2 + $0x10] sm:$0xff] %v1192_v8 }
  0x41   : > { %410 = vst [vmem:[#allocation2 + $0x38] sm:$0xff] %v1192_v8 }
  0x42   : > { %411 = vst [vmem:[#allocation2 + $0x60] sm:$0xff] %v1192_v8 }
  0x43   : > { %412 = vst [vmem:[#allocation2 + $0x70] sm:$0xff] %v1192_v8 }
  0x44   : > { %413 = vst [vmem:[#allocation2 + $0x78] sm:$0xff] %v1192_v8 }
  0x45   : > { %414 = vst [vmem:[#allocation2 + $0x28] sm:$0xff] %v1192_v8 }
  0x46 PF: > { %v1008_v9 = vld [vmem:[%s1288_s9 + $0x70] sm:$0xf]  ;;  %v1040_v10 = vld [vmem:[%s1288_s9 + $0x74] sm:$0xf0]  ;;  %v1039_v11 = vld [vmem:[%s1288_s9 + $0x74] sm:$0xf] }
  0x47   : > { %v1009_v12 = vor.u32 %v1040_v10, %v1008_v9  ;;  %v1010_v13 = vld [vmem:[%s1288_s9 + $0x78] sm:$0xf0]  ;;  %v1000_v14 = vld [vmem:[%s1288_s9 + $0x60] sm:$0xf]  ;;  %v1038_v15 = vld [vmem:[%s1288_s9 + $0x64] sm:$0xf0] }
  0x48   : > { %v1013_v16 = vor.u32 %v1039_v11, %v1010_v13  ;;  %v1037_v17 = vld [vmem:[%s1288_s9 + $0x64] sm:$0xf]  ;;  %v1002_v18 = vld [vmem:[%s1288_s9 + $0x68] sm:$0xf0]  ;;  %v1001_v19 = vor.u32 %v1038_v15, %v1000_v14  ;;  %v992_v21 = vld [vmem:[%s1288_s9 + $0x50] sm:$0xf] }
  0x49   : > { %559 = vmatpush.bf16.msra.mxu0 %v1009_v12  ;;  %1041 = vmatpush.bf16.msra.mxu2 %v1009_v12  ;;  %v1005_v20 = vor.u32 %v1037_v17, %v1002_v18  ;;  %v1036_v22 = vld [vmem:[%s1288_s9 + $0x54] sm:$0xf0]  ;;  %v1035_v23 = vld [vmem:[%s1288_s9 + $0x54] sm:$0xf]  ;;  %v994_v24 = vld [vmem:[%s1288_s9 + $0x58] sm:$0xf0] }
  0x4a   : > { %588 = vmatpush.bf16.msra.mxu1 %v1013_v16  ;;  %1049 = vmatpush.bf16.msra.mxu3 %v1013_v16  ;;  %v993_v25 = vor.u32 %v1036_v22, %v992_v21  ;;  %v997_v26 = vor.u32 %v1035_v23, %v994_v24  ;;  %v984_v27 = vld [vmem:[%s1288_s9 + $0x40] sm:$0xf]  ;;  %v1034_v28 = vld [vmem:[%s1288_s9 + $0x44] sm:$0xf0]  ;;  %v1033_v29 = vld [vmem:[%s1288_s9 + $0x44] sm:$0xf] }
  0x4b   : > { %v986_v30 = vld [vmem:[%s1288_s9 + $0x48] sm:$0xf0]  ;;  %v985_v31 = vor.u32 %v1034_v28, %v984_v27  ;;  %v976_v33 = vld [vmem:[%s1288_s9 + $0x30] sm:$0xf]  ;;  %v1032_v34 = vld [vmem:[%s1288_s9 + $0x34] sm:$0xf0] }
  0x4c   : > { %v989_v32 = vor.u32 %v1033_v29, %v986_v30  ;;  %v1031_v35 = vld [vmem:[%s1288_s9 + $0x34] sm:$0xf]  ;;  %v978_v36 = vld [vmem:[%s1288_s9 + $0x38] sm:$0xf0]  ;;  %v977_v37 = vor.u32 %v1032_v34, %v976_v33  ;;  %v968_v39 = vld [vmem:[%s1288_s9 + $0x20] sm:$0xf] }
  0x4d   : > { %560 = vmatpush.bf16.msra.mxu0 %v1001_v19  ;;  %1042 = vmatpush.bf16.msra.mxu2 %v1001_v19  ;;  %v981_v38 = vor.u32 %v1031_v35, %v978_v36  ;;  %v1030_v40 = vld [vmem:[%s1288_s9 + $0x24] sm:$0xf0]  ;;  %v1029_v41 = vld [vmem:[%s1288_s9 + $0x24] sm:$0xf]  ;;  %v970_v42 = vld [vmem:[%s1288_s9 + $0x28] sm:$0xf0] }
  0x4e   : > { %589 = vmatpush.bf16.msra.mxu1 %v1005_v20  ;;  %1050 = vmatpush.bf16.msra.mxu3 %v1005_v20  ;;  %v969_v43 = vor.u32 %v1030_v40, %v968_v39  ;;  %v973_v44 = vor.u32 %v1029_v41, %v970_v42  ;;  %v960_v45 = vld [vmem:[%s1288_s9 + $0x10] sm:$0xf]  ;;  %v1028_v46 = vld [vmem:[%s1288_s9 + $0x14] sm:$0xf0]  ;;  %v1027_v47 = vld [vmem:[%s1288_s9 + $0x14] sm:$0xf] }
  0x4f   : > { %v962_v48 = vld [vmem:[%s1288_s9 + $0x18] sm:$0xf0]  ;;  %v961_v49 = vor.u32 %v1028_v46, %v960_v45  ;;  %v952_v51 = vld [vmem:[%s1288_s9] sm:$0xf]  ;;  %v1026_v52 = vld [vmem:[%s1288_s9 + $0x4] sm:$0xf0] }
  0x50   : > { %v965_v50 = vor.u32 %v1027_v47, %v962_v48  ;;  %v1025_v53 = vld [vmem:[%s1288_s9 + $0x4] sm:$0xf]  ;;  %v954_v54 = vld [vmem:[%s1288_s9 + $0x8] sm:$0xf0]  ;;  %v953_v55 = vor.u32 %v1026_v52, %v952_v51  ;;  %v1023_v58 = vld [vmem:[%s1286_s7 + $0x10] sm:$0xff]  ;;  %p1014_p13 = scmp.ne.s32.totalorder %s1180_s18, 8 }
  0x51   : > { %561 = vmatpush.bf16.msra.mxu0 %v993_v25  ;;  %1043 = vmatpush.bf16.msra.mxu2 %v993_v25  ;;  %v957_v56 = vor.u32 %v1025_v53, %v954_v54  ;;  %v1021_v57 = vld [vmem:[%s1286_s7] sm:$0xff]  ;;  %v1022_v59 = vld [vmem:[%s1286_s7 + $0x8] sm:$0xff]  ;;  %v1024_v60 = vld [vmem:[%s1286_s7 + $0x18] sm:$0xff] }
  0x52   : > { %590 = vmatpush.bf16.msra.mxu1 %v997_v26  ;;  %1051 = vmatpush.bf16.msra.mxu3 %v997_v26  ;;  %v415_v61 = vld [vmem:[#allocation2 + $0x30] sm:$0xff]  ;;  %v416_v62 = vld [vmem:[#allocation2] sm:$0xff]  ;;  %v417_v6 = vld [vmem:[#allocation2 + $0x58] sm:$0xff] }
  0x53   : > { %v423_v3 = vld [vmem:[#allocation2 + $0x40] sm:$0xff]  ;;  %v418_v9 = vld [vmem:[#allocation2 + $0x18] sm:$0xff]  ;;  %v425_v15 = vld [vmem:[#allocation2 + $0x10] sm:$0xff] }
  0x54   : > { %v424_v4 = vld [vmem:[#allocation2 + $0x20] sm:$0xff]  ;;  %v426_v16 = vld [vmem:[#allocation2 + $0x38] sm:$0xff]  ;;  %v419_v18 = vld [vmem:[#allocation2 + $0x50] sm:$0xff] }
  0x55   : > { %562 = vmatpush.bf16.msra.mxu0 %v985_v31  ;;  %1044 = vmatpush.bf16.msra.mxu2 %v985_v31  ;;  %v420_v21 = vld [vmem:[#allocation2 + $0x68] sm:$0xff]  ;;  %v427_v27 = vld [vmem:[#allocation2 + $0x60] sm:$0xff]  ;;  %v428_v28 = vld [vmem:[#allocation2 + $0x70] sm:$0xff] }
  0x56   : > { %591 = vmatpush.bf16.msra.mxu1 %v989_v32  ;;  %1052 = vmatpush.bf16.msra.mxu3 %v989_v32  ;;  %v421_v30 = vld [vmem:[#allocation2 + $0x8] sm:$0xff]  ;;  %v429_v39 = vld [vmem:[#allocation2 + $0x78] sm:$0xff] }
  0x57   : > { %v422_v33 = vld [vmem:[#allocation2 + $0x48] sm:$0xff] }
  0x58   : > { %v430_v40 = vld [vmem:[#allocation2 + $0x28] sm:$0xff] }
  0x59   : > { %563 = vmatpush.bf16.msra.mxu0 %v977_v37  ;;  %1045 = vmatpush.bf16.msra.mxu2 %v977_v37 }
  0x5a   : > { %592 = vmatpush.bf16.msra.mxu1 %v981_v38  ;;  %1053 = vmatpush.bf16.msra.mxu3 %v981_v38 }
  0x5d   : > { %564 = vmatpush.bf16.msra.mxu0 %v969_v43  ;;  %1046 = vmatpush.bf16.msra.mxu2 %v969_v43 }
  0x5e   : > { %593 = vmatpush.bf16.msra.mxu1 %v973_v44  ;;  %1054 = vmatpush.bf16.msra.mxu3 %v973_v44 }
  0x61   : > { %565 = vmatpush.bf16.msra.mxu0 %v961_v49  ;;  %1047 = vmatpush.bf16.msra.mxu2 %v961_v49 }
  0x62   : > { %594 = vmatpush.bf16.msra.mxu1 %v965_v50  ;;  %1055 = vmatpush.bf16.msra.mxu3 %v965_v50 }
  0x65   : > { %566 = vmatpush.bf16.msra.mxu0 %v953_v55  ;;  %1048 = vmatpush.bf16.msra.mxu2 %v953_v55 }
  0x66   : > { %595 = vmatpush.bf16.msra.mxu1 %v957_v56  ;;  %1056 = vmatpush.bf16.msra.mxu3 %v957_v56 }
  0x68   : > { %567 = vmatmul.bf16.vlgmr.msra.gmra.mxu0 %v1021_v57  ;;  %577 = vmatmul.bf16.vlgmr.msra.gmra.mxu2 %v1023_v58 }
  0x69   : > { %596 = vmatmul.bf16.vlgmr.msra.gmra.mxu1 %v1021_v57  ;;  %606 = vmatmul.bf16.vlgmr.msra.gmra.mxu3 %v1023_v58 }
  0x78   : > { %572 = vmatmul.bf16.gmra.mxu0 %v1022_v59  ;;  %582 = vmatmul.bf16.gmra.mxu2 %v1024_v60 }
  0x79   : > { %601 = vmatmul.bf16.gmra.mxu1 %v1022_v59  ;;  %611 = vmatmul.bf16.gmra.mxu3 %v1024_v60 }
  0xe5   : > { %v568_v63 = vpop.f32.mrf.mxu0 }
  0xe6   : > { %v617_v0 = vadd.f32 %v568_v63, %v415_v61  ;;  %v597_v1 = vpop.f32.mrf.mxu1 }
  0xe7   : > { %v618_v2 = vadd.f32 %v597_v1, %v416_v62 }
  0xe8   : > { %633 = vst [vmem:[#allocation2 + $0x30] sm:$0xff] %v617_v0 }
  0xe9   : > { %634 = vst [vmem:[#allocation2] sm:$0xff] %v618_v2 }
  0xeb   : > { %v578_v5 = vpop.f32.mrf.mxu2 }
  0xec   : > { %v625_v7 = vadd.f32 %v578_v5, %v423_v3  ;;  %v607_v8 = vpop.f32.mrf.mxu3 }
  0xed   : > { %v626_v10 = vadd.f32 %v607_v8, %v424_v4  ;;  %v570_v11 = vpop.f32.mrf.mxu0 }
  0xee   : > { %641 = vst [vmem:[#allocation2 + $0x40] sm:$0xff] %v625_v7  ;;  %v619_v12 = vadd.f32 %v570_v11, %v417_v6  ;;  %v599_v13 = vpop.f32.mrf.mxu1 }
  0xef   : > { %642 = vst [vmem:[#allocation2 + $0x20] sm:$0xff] %v626_v10  ;;  %v620_v14 = vadd.f32 %v599_v13, %v418_v9 }
  0xf0   : > { %635 = vst [vmem:[#allocation2 + $0x58] sm:$0xff] %v619_v12 }
  0xf1   : > { %636 = vst [vmem:[#allocation2 + $0x18] sm:$0xff] %v620_v14 }
  0xf3   : > { %v580_v17 = vpop.f32.mrf.mxu2 }
  0xf4   : > { %v627_v19 = vadd.f32 %v580_v17, %v425_v15  ;;  %v609_v20 = vpop.f32.mrf.mxu3 }
  0xf5   : > { %v628_v22 = vadd.f32 %v609_v20, %v426_v16  ;;  %v573_v23 = vpop.f32.mrf.mxu0 }
  0xf6   : > { %643 = vst [vmem:[#allocation2 + $0x10] sm:$0xff] %v627_v19  ;;  %v621_v24 = vadd.f32 %v573_v23, %v419_v18  ;;  %v602_v25 = vpop.f32.mrf.mxu1 }
  0xf7   : > { %644 = vst [vmem:[#allocation2 + $0x38] sm:$0xff] %v628_v22  ;;  %v622_v26 = vadd.f32 %v602_v25, %v420_v21 }
  0xf8   : > { %637 = vst [vmem:[#allocation2 + $0x50] sm:$0xff] %v621_v24 }
  0xf9   : > { %638 = vst [vmem:[#allocation2 + $0x68] sm:$0xff] %v622_v26 }
  0xfb   : > { %v583_v29 = vpop.f32.mrf.mxu2 }
  0xfc   : > { %v629_v31 = vadd.f32 %v583_v29, %v427_v27  ;;  %v612_v32 = vpop.f32.mrf.mxu3 }
  0xfd   : > { %v630_v34 = vadd.f32 %v612_v32, %v428_v28  ;;  %v575_v35 = vpop.f32.mrf.mxu0 }
  0xfe   : > { %645 = vst [vmem:[#allocation2 + $0x60] sm:$0xff] %v629_v31  ;;  %v623_v36 = vadd.f32 %v575_v35, %v421_v30  ;;  %v604_v37 = vpop.f32.mrf.mxu1 }
  0xff   : > { %646 = vst [vmem:[#allocation2 + $0x70] sm:$0xff] %v630_v34  ;;  %v624_v38 = vadd.f32 %v604_v37, %v422_v33 }
 0x100   : > { %639 = vst [vmem:[#allocation2 + $0x8] sm:$0xff] %v623_v36 }
 0x101   : > { %640 = vst [vmem:[#allocation2 + $0x48] sm:$0xff] %v624_v38 }
 0x103   : > { %v585_v41 = vpop.f32.mrf.mxu2  ;;  %652 = sbr.rel (%p1014_p13) target bundleno = 296 (0x128), region = 89 }
 0x104   : > { %v631_v42 = vadd.f32 %v585_v41, %v429_v39  ;;  %v614_v43 = vpop.f32.mrf.mxu3 }
 0x105   : > { %v632_v44 = vadd.f32 %v614_v43, %v430_v40 }
 0x106   : > { %647 = vst [vmem:[#allocation2 + $0x78] sm:$0xff] %v631_v42 }
 0x107   : > { %648 = vst [vmem:[#allocation2 + $0x28] sm:$0xff] %v632_v44 }
 0x108   : > { %v653_v45 = vld [vmem:[#allocation2 + $0x30] sm:$0xff]  ;;  %v654_v46 = vld [vmem:[#allocation2] sm:$0xff]  ;;  %v655_v51 = vld [vmem:[#allocation2 + $0x58] sm:$0xff] }
 0x109   : > { %v669_v47 = vld [vmem:[%s1423_s2] sm:$0x3]  ;;  %v656_v52 = vld [vmem:[#allocation2 + $0x18] sm:$0xff]  ;;  %v657_v55 = vld [vmem:[#allocation2 + $0x50] sm:$0xff] }
 0x10a   : > { %v1335_v48 = vperm.slane %v669_v47, 0  ;;  %v1337_v49 = vperm.slane %v669_v47, 1  ;;  %v691_v50 = vld [vmem:[%s1424_s3] sm:$0x3]  ;;  %v658_v56 = vld [vmem:[#allocation2 + $0x68] sm:$0xff]  ;;  %v663_v23 = vld [vmem:[#allocation2 + $0x10] sm:$0xff] }
 0x10b   : > { %v1342_v53 = vperm.slane %v691_v50, 0  ;;  %v1344_v54 = vperm.slane %v691_v50, 1  ;;  %v659_v57 = vld [vmem:[#allocation2 + $0x8] sm:$0xff]  ;;  %v661_v17 = vld [vmem:[#allocation2 + $0x40] sm:$0xff]  ;;  %v664_v24 = vld [vmem:[#allocation2 + $0x38] sm:$0xff] }
 0x10c   : > { %v675_v58 = vmul.f32 %v1335_v48, %v653_v45  ;;  %v676_v59 = vmul.f32 %v1337_v49, %v654_v46  ;;  %v677_v60 = vmul.f32 %v1335_v48, %v655_v51  ;;  %v678_v61 = vmul.f32 %v1337_v49, %v656_v52  ;;  %v660_v62 = vld [vmem:[#allocation2 + $0x48] sm:$0xff]  ;;  %v662_v22 = vld [vmem:[#allocation2 + $0x20] sm:$0xff]  ;;  %v666_v36 = vld [vmem:[#allocation2 + $0x70] sm:$0xff] }
 0x10d   : > { %v679_v63 = vmul.f32 %v1335_v48, %v657_v55  ;;  %v680_v0 = vmul.f32 %v1337_v49, %v658_v56  ;;  %v681_v1 = vmul.f32 %v1335_v48, %v659_v57  ;;  %v682_v2 = vmul.f32 %v1337_v49, %v660_v62  ;;  %v665_v35 = vld [vmem:[#allocation2 + $0x60] sm:$0xff]  ;;  %v667_v50 = vld [vmem:[#allocation2 + $0x78] sm:$0xff] }
 0x10e   : > { %v697_v3 = vadd.f32 %v1342_v53, %v675_v58  ;;  %v698_v4 = vadd.f32 %v1344_v54, %v676_v59  ;;  %v699_v5 = vadd.f32 %v1342_v53, %v677_v60  ;;  %v700_v6 = vadd.f32 %v1344_v54, %v678_v61  ;;  %v668_v51 = vld [vmem:[#allocation2 + $0x28] sm:$0xff] }
 0x10f   : > { %v701_v7 = vadd.f32 %v1342_v53, %v679_v63  ;;  %v702_v8 = vadd.f32 %v1344_v54, %v680_v0  ;;  %v703_v9 = vadd.f32 %v1342_v53, %v681_v1  ;;  %v704_v10 = vadd.f32 %v1344_v54, %v682_v2 }
 0x110   : > { %vm713_vm0 = vcmp.ge.f32.partialorder %v697_v3, 0.0  ;;  %vm714_vm1 = vcmp.ge.f32.partialorder %v698_v4, 0.0  ;;  %v729_v11 = vmul.f32 0.2, %v697_v3  ;;  %v730_v12 = vmul.f32 0.2, %v698_v4 }
 0x111   : > { %vm715_vm2 = vcmp.ge.f32.partialorder %v699_v5, 0.0  ;;  %vm716_vm3 = vcmp.ge.f32.partialorder %v700_v6, 0.0  ;;  %v731_v13 = vmul.f32 0.2, %v699_v5  ;;  %v732_v14 = vmul.f32 0.2, %v700_v6 }
 0x112   : > { %v745_v15 = vsel %vm713_vm0, %v697_v3, %v729_v11  ;;  %v746_v16 = vsel %vm714_vm1, %v698_v4, %v730_v12  ;;  %vm717_vm4 = vcmp.ge.f32.partialorder %v701_v7, 0.0  ;;  %vm718_vm5 = vcmp.ge.f32.partialorder %v702_v8, 0.0 }
 0x113   : > { %v761_v18 = vpack.c.bf16 %v746_v16, %v745_v15  ;;  %v747_v19 = vsel %vm715_vm2, %v699_v5, %v731_v13  ;;  %v748_v20 = vsel %vm716_vm3, %v700_v6, %v732_v14  ;;  %v733_v21 = vmul.f32 0.2, %v701_v7 }
 0x114   : > { %v762_v25 = vpack.c.bf16 %v748_v20, %v747_v19  ;;  %v734_v26 = vmul.f32 0.2, %v702_v8  ;;  %vm719_vm6 = vcmp.ge.f32.partialorder %v703_v9, 0.0  ;;  %vm720_vm7 = vcmp.ge.f32.partialorder %v704_v10, 0.0 }
 0x115   : > { %769 = vst [vmem:[%s1425_s4] sm:$0xff] %v761_v18  ;;  %v749_v27 = vsel %vm717_vm4, %v701_v7, %v733_v21  ;;  %v735_v28 = vmul.f32 0.2, %v703_v9  ;;  %v736_v29 = vmul.f32 0.2, %v704_v10  ;;  %v683_v30 = vmul.f32 %v1335_v48, %v661_v17 }
 0x116   : > { %770 = vst [vmem:[%s1425_s4 + $0x8] sm:$0xff] %v762_v25  ;;  %v750_v31 = vsel %vm718_vm5, %v702_v8, %v734_v26  ;;  %v684_v32 = vmul.f32 %v1337_v49, %v662_v22  ;;  %v685_v33 = vmul.f32 %v1335_v48, %v663_v23  ;;  %v686_v34 = vmul.f32 %v1337_v49, %v664_v24 }
 0x117   : > { %v763_v37 = vpack.c.bf16 %v750_v31, %v749_v27  ;;  %v751_v38 = vsel %vm719_vm6, %v703_v9, %v735_v28  ;;  %v752_v39 = vsel %vm720_vm7, %v704_v10, %v736_v29  ;;  %v705_v40 = vadd.f32 %v1342_v53, %v683_v30 }
 0x118   : > { %v764_v41 = vpack.c.bf16 %v752_v39, %v751_v38  ;;  %v706_v42 = vadd.f32 %v1344_v54, %v684_v32  ;;  %v707_v43 = vadd.f32 %v1342_v53, %v685_v33  ;;  %v708_v44 = vadd.f32 %v1344_v54, %v686_v34 }
 0x119   : > { %771 = vst [vmem:[%s1425_s4 + $0x10] sm:$0xff] %v763_v37  ;;  %vm721_vm8 = vcmp.ge.f32.partialorder %v705_v40, 0.0  ;;  %v737_v45 = vmul.f32 0.2, %v705_v40  ;;  %v687_v46 = vmul.f32 %v1335_v48, %v665_v35  ;;  %v688_v47 = vmul.f32 %v1337_v49, %v666_v36 }
 0x11a   : > { %772 = vst [vmem:[%s1425_s4 + $0x18] sm:$0xff] %v764_v41  ;;  %vm722_vm9 = vcmp.ge.f32.partialorder %v706_v42, 0.0  ;;  %v738_v52 = vmul.f32 0.2, %v706_v42  ;;  %vm723_vm10 = vcmp.ge.f32.partialorder %v707_v43, 0.0  ;;  %vm724_vm11 = vcmp.ge.f32.partialorder %v708_v44, 0.0 }
 0x11b   : > { %v753_v55 = vsel %vm721_vm8, %v705_v40, %v737_v45  ;;  %v739_v56 = vmul.f32 0.2, %v707_v43  ;;  %v740_v57 = vmul.f32 0.2, %v708_v44  ;;  %v709_v58 = vadd.f32 %v1342_v53, %v687_v46 }
 0x11c   : > { %v754_v59 = vsel %vm722_vm9, %v706_v42, %v738_v52  ;;  %v710_v60 = vadd.f32 %v1344_v54, %v688_v47  ;;  %v689_v61 = vmul.f32 %v1335_v48, %v667_v50  ;;  %v690_v62 = vmul.f32 %v1337_v49, %v668_v51 }
 0x11d   : > { %v765_v63 = vpack.c.bf16 %v754_v59, %v753_v55  ;;  %v755_v0 = vsel %vm723_vm10, %v707_v43, %v739_v56  ;;  %v756_v1 = vsel %vm724_vm11, %v708_v44, %v740_v57  ;;  %vm725_vm12 = vcmp.ge.f32.partialorder %v709_v58, 0.0 }
 0x11e   : > { %v766_v2 = vpack.c.bf16 %v756_v1, %v755_v0  ;;  %vm726_vm13 = vcmp.ge.f32.partialorder %v710_v60, 0.0  ;;  %v741_v3 = vmul.f32 0.2, %v709_v58  ;;  %v742_v4 = vmul.f32 0.2, %v710_v60 }
 0x11f   : > { %773 = vst [vmem:[%s1425_s4 + $0x20] sm:$0xff] %v765_v63  ;;  %v711_v5 = vadd.f32 %v1342_v53, %v689_v61  ;;  %v712_v6 = vadd.f32 %v1344_v54, %v690_v62 }
 0x120   : > { %774 = vst [vmem:[%s1425_s4 + $0x28] sm:$0xff] %v766_v2  ;;  %v757_v48 = vsel %vm725_vm12, %v709_v58, %v741_v3  ;;  %v758_v49 = vsel %vm726_vm13, %v710_v60, %v742_v4 }
 0x121   : > { %v767_v7 = vpack.c.bf16 %v758_v49, %v757_v48  ;;  %vm727_vm14 = vcmp.ge.f32.partialorder %v711_v5, 0.0  ;;  %vm728_vm15 = vcmp.ge.f32.partialorder %v712_v6, 0.0  ;;  %v743_v8 = vmul.f32 0.2, %v711_v5 }
 0x122   : > { %v744_v9 = vmul.f32 0.2, %v712_v6 }
 0x123   : > { %775 = vst [vmem:[%s1425_s4 + $0x30] sm:$0xff] %v767_v7  ;;  %v759_v10 = vsel %vm727_vm14, %v711_v5, %v743_v8 }
 0x124   : > { %v760_v11 = vsel %vm728_vm15, %v712_v6, %v744_v9 }
 0x125   : > { %v768_v53 = vpack.c.bf16 %v760_v11, %v759_v10 }
 0x127   : > { %776 = vst [vmem:[%s1425_s4 + $0x38] sm:$0xff] %v768_v53 }
 0x128 PF: > { %s17_s20 = sadd.s32 1, %s1188_s20   ;;  %s1428_s15 = smov %s1172_s16 }
 0x129   : > { %p14_p0 = scmp.ge.s32.totalorder %s17_s20, 11   ;;  %s1429_s16 = smov %s1176_s17 }
 0x12a   : > { %s1430_s17 = smov %s1266_s27  ;;  %s1431_s18 = smov %s1184_s19 }
 0x12b   : > { %s1432_s19 = smov %s1434_s22  ;;  %16 = sbr.rel (!%p14_p0) target bundleno = 4 (0x4), region = 139 }
 0x130   :  { %810 = vsyncpa [#allocation5], 1 }
 0x131   :  { %812 = vsyncpa [#allocation5 + $0x1], 1 }

// kernel: attend_crnn_forward.18
= control target key start
LH: loop header
LB: loop body
LE: loop exit
PB: predicated region body
PF: predicated region fallthrough
CT: control target
= control target key end

     0   :  { %s1396_s15 = smov 0   ;;  %s1398_s16 = smov 0   ;;  %s1618_s0 = inlined_call_operand.vmem [shape: bf16[64,2304], index: 0, kind: input, shape index: {}]   ;;  %s1619_s1 = inlined_call_operand.vmem [shape: bf16[2304,256], index: 1, kind: input, shape index: {}]   ;;  %s1620_s2 = inlined_call_operand.vmem [shape: f32[1,256], index: 2, kind: input, shape index: {}]   ;;  %s1621_s3 = inlined_call_operand.vmem [shape: f32[1,256], index: 3, kind: input, shape index: {}]   ;;  %s1622_s4 = inlined_call_operand.vmem [shape: bf16[64,256], index: 4, kind: output, shape index: {}]  }
   0x1   :  { %s1400_s17 = smov 0   ;;  %s1402_s18 = smov 0  }
   0x2   :  { %s1404_s19 = smov 0  }
   0x3 LB: > { %s26_s20 = sadd.s32 1, %s1364_s18  ;;  %p49_p1 = scmp.ne.s32.totalorder %s1356_s16, %s1352_s15  ;;  %s1368_s19 = sphi %s1404_s19, %s14_s19   ;;  %s1364_s18 = sphi %s1402_s18, %s1626_s18   ;;  %s1360_s17 = sphi %s1400_s17, %s1625_s17   ;;  %s1356_s16 = sphi %s1398_s16, %s1624_s16   ;;  %s1352_s15 = sphi %s1396_s15, %s1623_s15  }
   0x4   : > { %p27_p0 = scmp.ge.s32.totalorder %s26_s20, 9  ;;  %p50_p2 = scmp.eq.s32.totalorder %s1368_s19, 0 }
   0x5   : > { %s42_s22 = sadd.s32 1, %s1356_s16  ;;  %p1072_p5 = scmp.ge.s32.totalorder %s1368_s19, 9 }
   0x6   : > { %s1628_s20 = smov (%p27_p0, %s26_s20), 0  ;;  %p51_p3 = por %p50_p2, %p49_p1 }
   0x7   : > { %s38_s21 = ssub.s32 %s1364_s18, %s1628_s20  ;;  %199 = sbr.rel (%p1072_p5) target bundleno = 24 (0x18), region = 24 }
   0x8   : > { %p40_p4 = scmp.eq.s32.totalorder %s38_s21, 0 }
   0xa   : > { %s1431_s23 = scalar_select %p40_p4, %s1356_s16, %s42_s22  }
   0xc   : > { %202 = sbr.rel (!%p51_p3) target bundleno = 24 (0x18), region = 28  ;;  %s204_s24 = sand.u32 (%p51_p3), 1, %s1356_s16  }
   0xd   : > { %s1247_s25 = sshll.u32 (%p51_p3), %s1364_s18, 3  ;;  %s1073_s26 = sshll.u32 (%p51_p3), %s204_s24, 6 }
   0xe   : > { %s212_s29 = scalar_lea.vmem (%p51_p3), %s1618_s0, %s1247_s25  ;;  %s206_s30 = scalar_lea.vmem (%p51_p3), [#allocation3], %s1073_s26 }
   0xf   : > { %v255_v0 = vld [vmem:[%s212_s29] sm:$0xff] (%p51_p3)  ;;  %v257_v1 = vld [vmem:[%s212_s29 + $0x48] sm:$0xff] (%p51_p3)  ;;  %v259_v2 = vld [vmem:[%s212_s29 + $0x90] sm:$0xff] (%p51_p3) }
  0x10   : > { %256 = vst [vmem:[%s206_s30] sm:$0xff] (%p51_p3), %v255_v0  ;;  %v261_v3 = vld [vmem:[%s212_s29 + $0xd8] sm:$0xff] (%p51_p3)  ;;  %v263_v4 = vld [vmem:[%s212_s29 + $0x120] sm:$0xff] (%p51_p3)  ;;  %v265_v5 = vld [vmem:[%s212_s29 + $0x168] sm:$0xff] (%p51_p3) }
  0x11   : > { %258 = vst [vmem:[%s206_s30 + $0x8] sm:$0xff] %v257_v1  ;;  %v267_v6 = vld [vmem:[%s212_s29 + $0x1b0] sm:$0xff]  ;;  %v269_v7 = vld [vmem:[%s212_s29 + $0x1f8] sm:$0xff] }
  0x12   : > { %260 = vst [vmem:[%s206_s30 + $0x10] sm:$0xff] %v259_v2 }
  0x13   : > { %262 = vst [vmem:[%s206_s30 + $0x18] sm:$0xff] %v261_v3 }
  0x14   : > { %264 = vst [vmem:[%s206_s30 + $0x20] sm:$0xff] %v263_v4 }
  0x15   : > { %266 = vst [vmem:[%s206_s30 + $0x28] sm:$0xff] %v265_v5 }
  0x16   : > { %268 = vst [vmem:[%s206_s30 + $0x30] sm:$0xff] %v267_v6 }
  0x17   : > { %270 = vst [vmem:[%s206_s30 + $0x38] sm:$0xff] %v269_v7 }
  0x18 PF: > { %p1076_p6 = scmp.ge.s32.totalorder %s1368_s19, 1  ;;  %p290_p7 = scmp.lt.s32.totalorder %s1368_s19, 10 }
  0x1a   : > { %p291_p8 = pnand %p1076_p6, %p290_p7 }
  0x1b   : > { %s297_s5 = sand.u32 (!%p291_p8), 1, %s1352_s15   ;;  %s1078_s6 = sshll.u32 (!%p291_p8), %s1360_s17, 5 }
  0x1c   : > { %294 = sbr.rel (%p291_p8) target bundleno = 316 (0x13c), region = 70  ;;  %s1077_s7 = sshll.u32 (!%p291_p8), %s297_s5, 6 }
  0x1d   : > { %p349_p9 = scmp.lt.s32.totalorder (!%p291_p8), %s1078_s6, 287  ;;  %s1448_s12 = scalar_lea.vmem (!%p291_p8), [#allocation3], %s1077_s7 }
  0x1e   : > { %p1081_p10 = scmp.ne.s32.totalorder (!%p291_p8), %s1360_s17, 0 }
  0x21   : > { %s1630_s6 = smov (!%p349_p9, %s1078_s6), 287  ;;  %384 = sbr.rel (%p1081_p10) target bundleno = 55 (0x37), region = 78 }
  0x22   : > { %s1248_s8 = sshll.u32 %s1630_s6, 3 }
  0x23   : > { %s1446_s11 = scalar_lea.vmem %s1619_s1, %s1248_s8 }
  0x26   : > { %v1370_v8 = vmov 0.0  }
  0x27   : > { %385 = vst [vmem:[#allocation2 + $0x30] sm:$0xff] %v1370_v8 }
  0x28   : > { %386 = vst [vmem:[#allocation2] sm:$0xff] %v1370_v8 }
  0x29   : > { %387 = vst [vmem:[#allocation2 + $0x58] sm:$0xff] %v1370_v8 }
  0x2a   : > { %388 = vst [vmem:[#allocation2 + $0x18] sm:$0xff] %v1370_v8 }
  0x2b   : > { %389 = vst [vmem:[#allocation2 + $0x50] sm:$0xff] %v1370_v8 }
  0x2c   : > { %390 = vst [vmem:[#allocation2 + $0x68] sm:$0xff] %v1370_v8 }
  0x2d   : > { %391 = vst [vmem:[#allocation2 + $0x8] sm:$0xff] %v1370_v8 }
  0x2e   : > { %392 = vst [vmem:[#allocation2 + $0x48] sm:$0xff] %v1370_v8 }
  0x2f   : > { %393 = vst [vmem:[#allocation2 + $0x40] sm:$0xff] %v1370_v8 }
  0x30   : > { %394 = vst [vmem:[#allocation2 + $0x20] sm:$0xff] %v1370_v8 }
  0x31   : > { %395 = vst [vmem:[#allocation2 + $0x10] sm:$0xff] %v1370_v8 }
  0x32   : > { %396 = vst [vmem:[#allocation2 + $0x38] sm:$0xff] %v1370_v8 }
  0x33   : > { %397 = vst [vmem:[#allocation2 + $0x60] sm:$0xff] %v1370_v8 }
  0x34   : > { %398 = vst [vmem:[#allocation2 + $0x70] sm:$0xff] %v1370_v8 }
  0x35   : > { %399 = vst [vmem:[#allocation2 + $0x78] sm:$0xff] %v1370_v8 }
  0x36   : > { %400 = vst [vmem:[#allocation2 + $0x28] sm:$0xff] %v1370_v8 }
  0x37 PF: > { %v1172_v9 = vld [vmem:[%s1446_s11 + $0x70] sm:$0xf]  ;;  %v1272_v10 = vld [vmem:[%s1446_s11 + $0x74] sm:$0xf0]  ;;  %v1271_v14 = vld [vmem:[%s1446_s11 + $0x74] sm:$0xf] }
  0x38   : > { %v1236_v11 = vld [vmem:[%s1446_s11 + $0xf0] sm:$0xf]  ;;  %v1173_v12 = vor.u32 %v1272_v10, %v1172_v9  ;;  %v1288_v13 = vld [vmem:[%s1446_s11 + $0xf4] sm:$0xf0]  ;;  %v1174_v15 = vld [vmem:[%s1446_s11 + $0x78] sm:$0xf0] }
  0x39   : > { %v1237_v16 = vor.u32 %v1288_v13, %v1236_v11  ;;  %v1177_v17 = vor.u32 %v1271_v14, %v1174_v15  ;;  %v1287_v18 = vld [vmem:[%s1446_s11 + $0xf4] sm:$0xf]  ;;  %v1238_v19 = vld [vmem:[%s1446_s11 + $0xf8] sm:$0xf0]  ;;  %v1164_v20 = vld [vmem:[%s1446_s11 + $0x60] sm:$0xf] }
  0x3a   : > { %657 = vmatpush.bf16.msra.mxu0 %v1173_v12  ;;  %v1241_v21 = vor.u32 %v1287_v18, %v1238_v19  ;;  %v1270_v22 = vld [vmem:[%s1446_s11 + $0x64] sm:$0xf0]  ;;  %v1228_v23 = vld [vmem:[%s1446_s11 + $0xe0] sm:$0xf]  ;;  %v1269_v27 = vld [vmem:[%s1446_s11 + $0x64] sm:$0xf] }
  0x3b   : > { %v1286_v24 = vld [vmem:[%s1446_s11 + $0xe4] sm:$0xf0]  ;;  %686 = vmatpush.bf16.msra.mxu1 %v1237_v16  ;;  %715 = vmatpush.bf16.msra.mxu2 %v1177_v17  ;;  %v1165_v25 = vor.u32 %v1270_v22, %v1164_v20  ;;  %v1166_v28 = vld [vmem:[%s1446_s11 + $0x68] sm:$0xf0]  ;;  %v1285_v29 = vld [vmem:[%s1446_s11 + $0xe4] sm:$0xf] }
  0x3c   : > { %v1229_v26 = vor.u32 %v1286_v24, %v1228_v23  ;;  %744 = vmatpush.bf16.msra.mxu3 %v1241_v21  ;;  %v1169_v30 = vor.u32 %v1269_v27, %v1166_v28  ;;  %v1230_v31 = vld [vmem:[%s1446_s11 + $0xe8] sm:$0xf0]  ;;  %v1156_v32 = vld [vmem:[%s1446_s11 + $0x50] sm:$0xf]  ;;  %v1268_v33 = vld [vmem:[%s1446_s11 + $0x54] sm:$0xf0] }
  0x3d   : > { %v1233_v34 = vor.u32 %v1285_v29, %v1230_v31  ;;  %v1220_v35 = vld [vmem:[%s1446_s11 + $0xd0] sm:$0xf]  ;;  %v1284_v36 = vld [vmem:[%s1446_s11 + $0xd4] sm:$0xf0]  ;;  %v1267_v37 = vld [vmem:[%s1446_s11 + $0x54] sm:$0xf]  ;;  %v1157_v38 = vor.u32 %v1268_v33, %v1156_v32 }
  0x3e   : > { %658 = vmatpush.bf16.msra.mxu0 %v1165_v25  ;;  %v1158_v39 = vld [vmem:[%s1446_s11 + $0x58] sm:$0xf0]  ;;  %v1283_v40 = vld [vmem:[%s1446_s11 + $0xd4] sm:$0xf]  ;;  %v1221_v42 = vor.u32 %v1284_v36, %v1220_v35  ;;  %v1148_v44 = vld [vmem:[%s1446_s11 + $0x40] sm:$0xf] }
  0x3f   : > { %v1222_v41 = vld [vmem:[%s1446_s11 + $0xd8] sm:$0xf0]  ;;  %687 = vmatpush.bf16.msra.mxu1 %v1229_v26  ;;  %716 = vmatpush.bf16.msra.mxu2 %v1169_v30  ;;  %v1161_v43 = vor.u32 %v1267_v37, %v1158_v39  ;;  %v1266_v45 = vld [vmem:[%s1446_s11 + $0x44] sm:$0xf0]  ;;  %v1212_v46 = vld [vmem:[%s1446_s11 + $0xc0] sm:$0xf] }
  0x40   : > { %745 = vmatpush.bf16.msra.mxu3 %v1233_v34  ;;  %v1225_v47 = vor.u32 %v1283_v40, %v1222_v41  ;;  %v1282_v48 = vld [vmem:[%s1446_s11 + $0xc4] sm:$0xf0]  ;;  %v1265_v49 = vld [vmem:[%s1446_s11 + $0x44] sm:$0xf]  ;;  %v1150_v50 = vld [vmem:[%s1446_s11 + $0x48] sm:$0xf0]  ;;  %v1149_v53 = vor.u32 %v1266_v45, %v1148_v44 }
  0x41   : > { %v1281_v51 = vld [vmem:[%s1446_s11 + $0xc4] sm:$0xf]  ;;  %v1214_v52 = vld [vmem:[%s1446_s11 + $0xc8] sm:$0xf0]  ;;  %v1213_v54 = vor.u32 %v1282_v48, %v1212_v46  ;;  %v1153_v55 = vor.u32 %v1265_v49, %v1150_v50  ;;  %v1140_v56 = vld [vmem:[%s1446_s11 + $0x30] sm:$0xf] }
  0x42   : > { %659 = vmatpush.bf16.msra.mxu0 %v1157_v38  ;;  %v1264_v57 = vld [vmem:[%s1446_s11 + $0x34] sm:$0xf0]  ;;  %v1204_v58 = vld [vmem:[%s1446_s11 + $0xb0] sm:$0xf]  ;;  %v1217_v59 = vor.u32 %v1281_v51, %v1214_v52  ;;  %v1263_v61 = vld [vmem:[%s1446_s11 + $0x34] sm:$0xf] }
  0x43   : > { %688 = vmatpush.bf16.msra.mxu1 %v1221_v42  ;;  %717 = vmatpush.bf16.msra.mxu2 %v1161_v43  ;;  %v1280_v60 = vld [vmem:[%s1446_s11 + $0xb4] sm:$0xf0]  ;;  %v1142_v62 = vld [vmem:[%s1446_s11 + $0x38] sm:$0xf0]  ;;  %v1279_v63 = vld [vmem:[%s1446_s11 + $0xb4] sm:$0xf]  ;;  %v1141_v1 = vor.u32 %v1264_v57, %v1140_v56 }
  0x44   : > { %746 = vmatpush.bf16.msra.mxu3 %v1225_v47  ;;  %v1206_v0 = vld [vmem:[%s1446_s11 + $0xb8] sm:$0xf0]  ;;  %v1205_v2 = vor.u32 %v1280_v60, %v1204_v58  ;;  %v1145_v3 = vor.u32 %v1263_v61, %v1142_v62  ;;  %v1132_v4 = vld [vmem:[%s1446_s11 + $0x20] sm:$0xf]  ;;  %v1262_v5 = vld [vmem:[%s1446_s11 + $0x24] sm:$0xf0] }
  0x45   : > { %v1196_v6 = vld [vmem:[%s1446_s11 + $0xa0] sm:$0xf]  ;;  %v1209_v7 = vor.u32 %v1279_v63, %v1206_v0  ;;  %v1278_v8 = vld [vmem:[%s1446_s11 + $0xa4] sm:$0xf0]  ;;  %v1261_v9 = vld [vmem:[%s1446_s11 + $0x24] sm:$0xf]  ;;  %v1133_v13 = vor.u32 %v1262_v5, %v1132_v4 }
  0x46   : > { %660 = vmatpush.bf16.msra.mxu0 %v1149_v53  ;;  %v1134_v10 = vld [vmem:[%s1446_s11 + $0x28] sm:$0xf0]  ;;  %v1277_v11 = vld [vmem:[%s1446_s11 + $0xa4] sm:$0xf]  ;;  %v1197_v14 = vor.u32 %v1278_v8, %v1196_v6  ;;  %v1124_v16 = vld [vmem:[%s1446_s11 + $0x10] sm:$0xf] }
  0x47   : > { %689 = vmatpush.bf16.msra.mxu1 %v1213_v54  ;;  %718 = vmatpush.bf16.msra.mxu2 %v1153_v55  ;;  %v1198_v12 = vld [vmem:[%s1446_s11 + $0xa8] sm:$0xf0]  ;;  %v1137_v15 = vor.u32 %v1261_v9, %v1134_v10  ;;  %v1260_v17 = vld [vmem:[%s1446_s11 + $0x14] sm:$0xf0]  ;;  %v1188_v18 = vld [vmem:[%s1446_s11 + $0x90] sm:$0xf] }
  0x48   : > { %747 = vmatpush.bf16.msra.mxu3 %v1217_v59  ;;  %v1201_v19 = vor.u32 %v1277_v11, %v1198_v12  ;;  %v1276_v20 = vld [vmem:[%s1446_s11 + $0x94] sm:$0xf0]  ;;  %v1259_v21 = vld [vmem:[%s1446_s11 + $0x14] sm:$0xf]  ;;  %v1126_v22 = vld [vmem:[%s1446_s11 + $0x18] sm:$0xf0]  ;;  %v1125_v25 = vor.u32 %v1260_v17, %v1124_v16 }
  0x49   : > { %v1275_v23 = vld [vmem:[%s1446_s11 + $0x94] sm:$0xf]  ;;  %v1190_v24 = vld [vmem:[%s1446_s11 + $0x98] sm:$0xf0]  ;;  %v1189_v26 = vor.u32 %v1276_v20, %v1188_v18  ;;  %v1129_v27 = vor.u32 %v1259_v21, %v1126_v22  ;;  %v1116_v28 = vld [vmem:[%s1446_s11] sm:$0xf] }
  0x4a   : > { %661 = vmatpush.bf16.msra.mxu0 %v1141_v1  ;;  %v1258_v29 = vld [vmem:[%s1446_s11 + $0x4] sm:$0xf0]  ;;  %v1180_v30 = vld [vmem:[%s1446_s11 + $0x80] sm:$0xf]  ;;  %v1193_v31 = vor.u32 %v1275_v23, %v1190_v24  ;;  %v1257_v33 = vld [vmem:[%s1446_s11 + $0x4] sm:$0xf] }
  0x4b   : > { %690 = vmatpush.bf16.msra.mxu1 %v1205_v2  ;;  %719 = vmatpush.bf16.msra.mxu2 %v1145_v3  ;;  %v1274_v32 = vld [vmem:[%s1446_s11 + $0x84] sm:$0xf0]  ;;  %v1118_v34 = vld [vmem:[%s1446_s11 + $0x8] sm:$0xf0]  ;;  %v1273_v35 = vld [vmem:[%s1446_s11 + $0x84] sm:$0xf]  ;;  %v1117_v37 = vor.u32 %v1258_v29, %v1116_v28 }
  0x4c   : > { %748 = vmatpush.bf16.msra.mxu3 %v1209_v7  ;;  %v1182_v36 = vld [vmem:[%s1446_s11 + $0x88] sm:$0xf0]  ;;  %v1084_v38 = vld [vmem:[%s1448_s12] sm:$0xf]  ;;  %v1250_v39 = vld [vmem:[%s1448_s12 + $0x4] sm:$0xf0]  ;;  %v1181_v40 = vor.u32 %v1274_v32, %v1180_v30  ;;  %v1121_v41 = vor.u32 %v1257_v33, %v1118_v34 }
  0x4d   : > { %v1249_v42 = vld [vmem:[%s1448_s12 + $0x4] sm:$0xf]  ;;  %v1086_v43 = vld [vmem:[%s1448_s12 + $0x8] sm:$0xf0]  ;;  %v1185_v44 = vor.u32 %v1273_v35, %v1182_v36  ;;  %v1085_v45 = vor.u32 %v1250_v39, %v1084_v38  ;;  %v1092_v47 = vld [vmem:[%s1448_s12 + $0x10] sm:$0xf] }
  0x4e   : > { %662 = vmatpush.bf16.msra.mxu0 %v1133_v13  ;;  %v1089_v46 = vor.u32 %v1249_v42, %v1086_v43  ;;  %v1252_v48 = vld [vmem:[%s1448_s12 + $0x14] sm:$0xf0]  ;;  %v1251_v49 = vld [vmem:[%s1448_s12 + $0x14] sm:$0xf]  ;;  %v1094_v50 = vld [vmem:[%s1448_s12 + $0x18] sm:$0xf0] }
  0x4f   : > { %691 = vmatpush.bf16.msra.mxu1 %v1197_v14  ;;  %720 = vmatpush.bf16.msra.mxu2 %v1137_v15  ;;  %v1093_v51 = vor.u32 %v1252_v48, %v1092_v47  ;;  %v1097_v52 = vor.u32 %v1251_v49, %v1094_v50  ;;  %v1100_v53 = vld [vmem:[%s1448_s12 + $0x20] sm:$0xf]  ;;  %v1254_v54 = vld [vmem:[%s1448_s12 + $0x24] sm:$0xf0]  ;;  %v1253_v55 = vld [vmem:[%s1448_s12 + $0x24] sm:$0xf] }
  0x50   : > { %749 = vmatpush.bf16.msra.mxu3 %v1201_v19  ;;  %v1102_v56 = vld [vmem:[%s1448_s12 + $0x28] sm:$0xf0]  ;;  %v1101_v57 = vor.u32 %v1254_v54, %v1100_v53  ;;  %v1108_v59 = vld [vmem:[%s1448_s12 + $0x30] sm:$0xf]  ;;  %v1256_v60 = vld [vmem:[%s1448_s12 + $0x34] sm:$0xf0] }
  0x51   : > { %v1105_v58 = vor.u32 %v1253_v55, %v1102_v56  ;;  %v1255_v61 = vld [vmem:[%s1448_s12 + $0x34] sm:$0xf]  ;;  %v1110_v62 = vld [vmem:[%s1448_s12 + $0x38] sm:$0xf0]  ;;  %v1109_v63 = vor.u32 %v1256_v60, %v1108_v59  ;;  %v402_v7 = vld [vmem:[#allocation2] sm:$0xff]  ;;  %p1242_p11 = scmp.ne.s32.totalorder %s1360_s17, 8 }
  0x52   : > { %663 = vmatpush.bf16.msra.mxu0 %v1125_v25  ;;  %v1113_v0 = vor.u32 %v1255_v61, %v1110_v62  ;;  %v401_v2 = vld [vmem:[#allocation2 + $0x30] sm:$0xff]  ;;  %v403_v11 = vld [vmem:[#allocation2 + $0x58] sm:$0xff]  ;;  %v410_v47 = vld [vmem:[#allocation2 + $0x20] sm:$0xff] }
  0x53   : > { %692 = vmatpush.bf16.msra.mxu1 %v1189_v26  ;;  %721 = vmatpush.bf16.msra.mxu2 %v1129_v27  ;;  %v404_v17 = vld [vmem:[#allocation2 + $0x18] sm:$0xff]  ;;  %v405_v21 = vld [vmem:[#allocation2 + $0x50] sm:$0xff]  ;;  %v406_v27 = vld [vmem:[#allocation2 + $0x68] sm:$0xff] }
  0x54   : > { %750 = vmatpush.bf16.msra.mxu3 %v1193_v31  ;;  %v407_v31 = vld [vmem:[#allocation2 + $0x8] sm:$0xff]  ;;  %v413_v61 = vld [vmem:[#allocation2 + $0x60] sm:$0xff] }
  0x56   : > { %664 = vmatpush.bf16.msra.mxu0 %v1117_v37  ;;  %v408_v37 = vld [vmem:[#allocation2 + $0x48] sm:$0xff] }
  0x57   : > { %693 = vmatpush.bf16.msra.mxu1 %v1181_v40  ;;  %722 = vmatpush.bf16.msra.mxu2 %v1121_v41  ;;  %v409_v41 = vld [vmem:[#allocation2 + $0x40] sm:$0xff] }
  0x58   : > { %751 = vmatpush.bf16.msra.mxu3 %v1185_v44 }
  0x59   : > { %665 = vmatmul.bf16.vlgmr.msra.gmra.mxu0 %v1085_v45 }
  0x5a   : > { %694 = vmatmul.bf16.vlgmr.msra.gmra.mxu1 %v1089_v46  ;;  %723 = vmatmul.bf16.vlgmr.msra.gmra.mxu2 %v1085_v45 }
  0x5b   : > { %752 = vmatmul.bf16.vlgmr.msra.gmra.mxu3 %v1089_v46 }
  0x69   : > { %670 = vmatmul.bf16.gmra.mxu0 %v1093_v51 }
  0x6a   : > { %699 = vmatmul.bf16.gmra.mxu1 %v1097_v52  ;;  %728 = vmatmul.bf16.gmra.mxu2 %v1093_v51  ;;  %v411_v51 = vld [vmem:[#allocation2 + $0x10] sm:$0xff] }
  0x6b   : > { %757 = vmatmul.bf16.gmra.mxu3 %v1097_v52 }
  0x79   : > { %675 = vmatmul.bf16.gmra.mxu0 %v1101_v57 }
  0x7a   : > { %704 = vmatmul.bf16.gmra.mxu1 %v1105_v58  ;;  %733 = vmatmul.bf16.gmra.mxu2 %v1101_v57  ;;  %v412_v57 = vld [vmem:[#allocation2 + $0x38] sm:$0xff] }
  0x7b   : > { %762 = vmatmul.bf16.gmra.mxu3 %v1105_v58 }
  0x89   : > { %680 = vmatmul.bf16.gmra.mxu0 %v1109_v63 }
  0x8a   : > { %709 = vmatmul.bf16.gmra.mxu1 %v1113_v0  ;;  %738 = vmatmul.bf16.gmra.mxu2 %v1109_v63 }
  0x8b   : > { %767 = vmatmul.bf16.gmra.mxu3 %v1113_v0 }
  0xd6   : > { %v666_v1 = vpop.f32.mrf.mxu0 }
  0xd7   : > { %v695_v3 = vpop.f32.mrf.mxu1 }
  0xd8   : > { %v696_v4 = vadd.f32 %v695_v3, %v666_v1  ;;  %v414_v3 = vld [vmem:[#allocation2 + $0x70] sm:$0xff] }
  0xda   : > { %v773_v5 = vadd.f32 %v696_v4, %v401_v2 }
  0xdc   : > { %789 = vst [vmem:[#allocation2 + $0x30] sm:$0xff] %v773_v5 }
  0xdd   : > { %v724_v6 = vpop.f32.mrf.mxu2 }
  0xde   : > { %v753_v8 = vpop.f32.mrf.mxu3  ;;  %v668_v9 = vpop.f32.mrf.mxu0 }
  0xdf   : > { %v754_v10 = vadd.f32 %v753_v8, %v724_v6  ;;  %v697_v12 = vpop.f32.mrf.mxu1 }
  0xe0   : > { %v698_v13 = vadd.f32 %v697_v12, %v668_v9 }
  0xe1   : > { %v774_v14 = vadd.f32 %v754_v10, %v402_v7  ;;  %v415_v7 = vld [vmem:[#allocation2 + $0x78] sm:$0xff] }
  0xe2   : > { %v775_v15 = vadd.f32 %v698_v13, %v403_v11  ;;  %v416_v13 = vld [vmem:[#allocation2 + $0x28] sm:$0xff] }
  0xe3   : > { %790 = vst [vmem:[#allocation2] sm:$0xff] %v774_v14 }
  0xe4   : > { %791 = vst [vmem:[#allocation2 + $0x58] sm:$0xff] %v775_v15 }
  0xe5   : > { %v726_v16 = vpop.f32.mrf.mxu2 }
  0xe6   : > { %v755_v18 = vpop.f32.mrf.mxu3  ;;  %v671_v19 = vpop.f32.mrf.mxu0 }
  0xe7   : > { %v756_v20 = vadd.f32 %v755_v18, %v726_v16  ;;  %v700_v22 = vpop.f32.mrf.mxu1 }
  0xe8   : > { %v701_v23 = vadd.f32 %v700_v22, %v671_v19 }
  0xe9   : > { %v776_v24 = vadd.f32 %v756_v20, %v404_v17 }
  0xea   : > { %v777_v25 = vadd.f32 %v701_v23, %v405_v21 }
  0xeb   : > { %792 = vst [vmem:[#allocation2 + $0x18] sm:$0xff] %v776_v24 }
  0xec   : > { %793 = vst [vmem:[#allocation2 + $0x50] sm:$0xff] %v777_v25 }
  0xed   : > { %v729_v26 = vpop.f32.mrf.mxu2 }
  0xee   : > { %v758_v28 = vpop.f32.mrf.mxu3  ;;  %v673_v29 = vpop.f32.mrf.mxu0 }
  0xef   : > { %v759_v30 = vadd.f32 %v758_v28, %v729_v26  ;;  %v702_v32 = vpop.f32.mrf.mxu1 }
  0xf0   : > { %v703_v33 = vadd.f32 %v702_v32, %v673_v29 }
  0xf1   : > { %v778_v34 = vadd.f32 %v759_v30, %v406_v27 }
  0xf2   : > { %v779_v35 = vadd.f32 %v703_v33, %v407_v31 }
  0xf3   : > { %794 = vst [vmem:[#allocation2 + $0x68] sm:$0xff] %v778_v34 }
  0xf4   : > { %795 = vst [vmem:[#allocation2 + $0x8] sm:$0xff] %v779_v35 }
  0xf5   : > { %v731_v36 = vpop.f32.mrf.mxu2 }
  0xf6   : > { %v760_v38 = vpop.f32.mrf.mxu3  ;;  %v676_v39 = vpop.f32.mrf.mxu0 }
  0xf7   : > { %v761_v40 = vadd.f32 %v760_v38, %v731_v36  ;;  %v705_v42 = vpop.f32.mrf.mxu1 }
  0xf8   : > { %v706_v43 = vadd.f32 %v705_v42, %v676_v39 }
  0xf9   : > { %v780_v44 = vadd.f32 %v761_v40, %v408_v37 }
  0xfa   : > { %v781_v45 = vadd.f32 %v706_v43, %v409_v41 }
  0xfb   : > { %796 = vst [vmem:[#allocation2 + $0x48] sm:$0xff] %v780_v44 }
  0xfc   : > { %797 = vst [vmem:[#allocation2 + $0x40] sm:$0xff] %v781_v45 }
  0xfd   : > { %v734_v46 = vpop.f32.mrf.mxu2 }
  0xfe   : > { %v763_v48 = vpop.f32.mrf.mxu3  ;;  %v678_v49 = vpop.f32.mrf.mxu0 }
  0xff   : > { %v764_v50 = vadd.f32 %v763_v48, %v734_v46  ;;  %v707_v52 = vpop.f32.mrf.mxu1 }
 0x100   : > { %v708_v53 = vadd.f32 %v707_v52, %v678_v49 }
 0x101   : > { %v782_v54 = vadd.f32 %v764_v50, %v410_v47 }
 0x102   : > { %v783_v55 = vadd.f32 %v708_v53, %v411_v51 }
 0x103   : > { %798 = vst [vmem:[#allocation2 + $0x20] sm:$0xff] %v782_v54 }
 0x104   : > { %799 = vst [vmem:[#allocation2 + $0x10] sm:$0xff] %v783_v55 }
 0x105   : > { %v736_v56 = vpop.f32.mrf.mxu2 }
 0x106   : > { %v765_v58 = vpop.f32.mrf.mxu3  ;;  %v681_v59 = vpop.f32.mrf.mxu0 }
 0x107   : > { %v766_v60 = vadd.f32 %v765_v58, %v736_v56  ;;  %v710_v62 = vpop.f32.mrf.mxu1 }
 0x108   : > { %v711_v63 = vadd.f32 %v710_v62, %v681_v59 }
 0x109   : > { %v784_v0 = vadd.f32 %v766_v60, %v412_v57 }
 0x10a   : > { %v785_v1 = vadd.f32 %v711_v63, %v413_v61 }
 0x10b   : > { %800 = vst [vmem:[#allocation2 + $0x38] sm:$0xff] %v784_v0 }
 0x10c   : > { %801 = vst [vmem:[#allocation2 + $0x60] sm:$0xff] %v785_v1 }
 0x10d   : > { %v739_v2 = vpop.f32.mrf.mxu2 }
 0x10e   : > { %v768_v4 = vpop.f32.mrf.mxu3  ;;  %v683_v5 = vpop.f32.mrf.mxu0 }
 0x10f   : > { %v769_v6 = vadd.f32 %v768_v4, %v739_v2  ;;  %v712_v8 = vpop.f32.mrf.mxu1 }
 0x110   : > { %v713_v9 = vadd.f32 %v712_v8, %v683_v5 }
 0x111   : > { %v786_v10 = vadd.f32 %v769_v6, %v414_v3 }
 0x112   : > { %v787_v11 = vadd.f32 %v713_v9, %v415_v7 }
 0x113   : > { %802 = vst [vmem:[#allocation2 + $0x70] sm:$0xff] %v786_v10 }
 0x114   : > { %803 = vst [vmem:[#allocation2 + $0x78] sm:$0xff] %v787_v11 }
 0x115   : > { %v741_v12 = vpop.f32.mrf.mxu2 }
 0x116   : > { %v770_v14 = vpop.f32.mrf.mxu3 }
 0x117   : > { %v771_v15 = vadd.f32 %v770_v14, %v741_v12  ;;  %808 = sbr.rel (%p1242_p11) target bundleno = 316 (0x13c), region = 82 }
 0x119   : > { %v788_v16 = vadd.f32 %v771_v15, %v416_v13 }
 0x11b   : > { %804 = vst [vmem:[#allocation2 + $0x28] sm:$0xff] %v788_v16 }
 0x11c   : > { %v809_v17 = vld [vmem:[#allocation2 + $0x30] sm:$0xff]  ;;  %v810_v18 = vld [vmem:[#allocation2] sm:$0xff]  ;;  %v811_v23 = vld [vmem:[#allocation2 + $0x58] sm:$0xff] }
 0x11d   : > { %v825_v19 = vld [vmem:[%s1620_s2] sm:$0x3]  ;;  %v812_v24 = vld [vmem:[#allocation2 + $0x18] sm:$0xff]  ;;  %v813_v27 = vld [vmem:[#allocation2 + $0x50] sm:$0xff] }
 0x11e   : > { %v1535_v20 = vperm.slane %v825_v19, 0  ;;  %v1537_v21 = vperm.slane %v825_v19, 1  ;;  %v847_v22 = vld [vmem:[%s1621_s3] sm:$0x3]  ;;  %v814_v28 = vld [vmem:[#allocation2 + $0x68] sm:$0xff]  ;;  %v819_v59 = vld [vmem:[#allocation2 + $0x10] sm:$0xff] }
 0x11f   : > { %v1542_v25 = vperm.slane %v847_v22, 0  ;;  %v1544_v26 = vperm.slane %v847_v22, 1  ;;  %v815_v29 = vld [vmem:[#allocation2 + $0x8] sm:$0xff]  ;;  %v817_v53 = vld [vmem:[#allocation2 + $0x40] sm:$0xff]  ;;  %v820_v60 = vld [vmem:[#allocation2 + $0x38] sm:$0xff] }
 0x120   : > { %v831_v30 = vmul.f32 %v1535_v20, %v809_v17  ;;  %v832_v31 = vmul.f32 %v1537_v21, %v810_v18  ;;  %v833_v32 = vmul.f32 %v1535_v20, %v811_v23  ;;  %v834_v33 = vmul.f32 %v1537_v21, %v812_v24  ;;  %v816_v34 = vld [vmem:[#allocation2 + $0x48] sm:$0xff]  ;;  %v818_v58 = vld [vmem:[#allocation2 + $0x20] sm:$0xff]  ;;  %v822_v8 = vld [vmem:[#allocation2 + $0x70] sm:$0xff] }
 0x121   : > { %v835_v35 = vmul.f32 %v1535_v20, %v813_v27  ;;  %v836_v36 = vmul.f32 %v1537_v21, %v814_v28  ;;  %v837_v37 = vmul.f32 %v1535_v20, %v815_v29  ;;  %v838_v38 = vmul.f32 %v1537_v21, %v816_v34  ;;  %v821_v7 = vld [vmem:[#allocation2 + $0x60] sm:$0xff]  ;;  %v823_v22 = vld [vmem:[#allocation2 + $0x78] sm:$0xff] }
 0x122   : > { %v853_v39 = vadd.f32 %v1542_v25, %v831_v30  ;;  %v854_v40 = vadd.f32 %v1544_v26, %v832_v31  ;;  %v855_v41 = vadd.f32 %v1542_v25, %v833_v32  ;;  %v856_v42 = vadd.f32 %v1544_v26, %v834_v33  ;;  %v824_v23 = vld [vmem:[#allocation2 + $0x28] sm:$0xff] }
 0x123   : > { %v857_v43 = vadd.f32 %v1542_v25, %v835_v35  ;;  %v858_v44 = vadd.f32 %v1544_v26, %v836_v36  ;;  %v859_v45 = vadd.f32 %v1542_v25, %v837_v37  ;;  %v860_v46 = vadd.f32 %v1544_v26, %v838_v38 }
 0x124   : > { %vm869_vm0 = vcmp.ge.f32.partialorder %v853_v39, 0.0  ;;  %vm870_vm1 = vcmp.ge.f32.partialorder %v854_v40, 0.0  ;;  %v885_v47 = vmul.f32 0.2, %v853_v39  ;;  %v886_v48 = vmul.f32 0.2, %v854_v40 }
 0x125   : > { %vm871_vm2 = vcmp.ge.f32.partialorder %v855_v41, 0.0  ;;  %vm872_vm3 = vcmp.ge.f32.partialorder %v856_v42, 0.0  ;;  %v887_v49 = vmul.f32 0.2, %v855_v41  ;;  %v888_v50 = vmul.f32 0.2, %v856_v42 }
 0x126   : > { %v901_v51 = vsel %vm869_vm0, %v853_v39, %v885_v47  ;;  %v902_v52 = vsel %vm870_vm1, %v854_v40, %v886_v48  ;;  %vm873_vm4 = vcmp.ge.f32.partialorder %v857_v43, 0.0  ;;  %vm874_vm5 = vcmp.ge.f32.partialorder %v858_v44, 0.0 }
 0x127   : > { %v917_v54 = vpack.c.bf16 %v902_v52, %v901_v51  ;;  %v903_v55 = vsel %vm871_vm2, %v855_v41, %v887_v49  ;;  %v904_v56 = vsel %vm872_vm3, %v856_v42, %v888_v50  ;;  %v889_v57 = vmul.f32 0.2, %v857_v43 }
 0x128   : > { %v918_v61 = vpack.c.bf16 %v904_v56, %v903_v55  ;;  %v890_v62 = vmul.f32 0.2, %v858_v44  ;;  %vm875_vm6 = vcmp.ge.f32.partialorder %v859_v45, 0.0  ;;  %vm876_vm7 = vcmp.ge.f32.partialorder %v860_v46, 0.0 }
 0x129   : > { %925 = vst [vmem:[%s1622_s4] sm:$0xff] %v917_v54  ;;  %v905_v63 = vsel %vm873_vm4, %v857_v43, %v889_v57  ;;  %v891_v0 = vmul.f32 0.2, %v859_v45  ;;  %v892_v1 = vmul.f32 0.2, %v860_v46  ;;  %v839_v2 = vmul.f32 %v1535_v20, %v817_v53 }
 0x12a   : > { %926 = vst [vmem:[%s1622_s4 + $0x8] sm:$0xff] %v918_v61  ;;  %v906_v3 = vsel %vm874_vm5, %v858_v44, %v890_v62  ;;  %v840_v4 = vmul.f32 %v1537_v21, %v818_v58  ;;  %v841_v5 = vmul.f32 %v1535_v20, %v819_v59  ;;  %v842_v6 = vmul.f32 %v1537_v21, %v820_v60 }
 0x12b   : > { %v919_v9 = vpack.c.bf16 %v906_v3, %v905_v63  ;;  %v907_v10 = vsel %vm875_vm6, %v859_v45, %v891_v0  ;;  %v908_v11 = vsel %vm876_vm7, %v860_v46, %v892_v1  ;;  %v861_v12 = vadd.f32 %v1542_v25, %v839_v2 }
 0x12c   : > { %v920_v13 = vpack.c.bf16 %v908_v11, %v907_v10  ;;  %v862_v14 = vadd.f32 %v1544_v26, %v840_v4  ;;  %v863_v15 = vadd.f32 %v1542_v25, %v841_v5  ;;  %v864_v16 = vadd.f32 %v1544_v26, %v842_v6 }
 0x12d   : > { %927 = vst [vmem:[%s1622_s4 + $0x10] sm:$0xff] %v919_v9  ;;  %vm877_vm8 = vcmp.ge.f32.partialorder %v861_v12, 0.0  ;;  %v893_v17 = vmul.f32 0.2, %v861_v12  ;;  %v843_v18 = vmul.f32 %v1535_v20, %v821_v7  ;;  %v844_v19 = vmul.f32 %v1537_v21, %v822_v8 }
 0x12e   : > { %928 = vst [vmem:[%s1622_s4 + $0x18] sm:$0xff] %v920_v13  ;;  %vm878_vm9 = vcmp.ge.f32.partialorder %v862_v14, 0.0  ;;  %v894_v24 = vmul.f32 0.2, %v862_v14  ;;  %vm879_vm10 = vcmp.ge.f32.partialorder %v863_v15, 0.0  ;;  %vm880_vm11 = vcmp.ge.f32.partialorder %v864_v16, 0.0 }
 0x12f   : > { %v909_v27 = vsel %vm877_vm8, %v861_v12, %v893_v17  ;;  %v895_v28 = vmul.f32 0.2, %v863_v15  ;;  %v896_v29 = vmul.f32 0.2, %v864_v16  ;;  %v865_v30 = vadd.f32 %v1542_v25, %v843_v18 }
 0x130   : > { %v910_v31 = vsel %vm878_vm9, %v862_v14, %v894_v24  ;;  %v866_v32 = vadd.f32 %v1544_v26, %v844_v19  ;;  %v845_v33 = vmul.f32 %v1535_v20, %v823_v22  ;;  %v846_v34 = vmul.f32 %v1537_v21, %v824_v23 }
 0x131   : > { %v921_v35 = vpack.c.bf16 %v910_v31, %v909_v27  ;;  %v911_v36 = vsel %vm879_vm10, %v863_v15, %v895_v28  ;;  %v912_v37 = vsel %vm880_vm11, %v864_v16, %v896_v29  ;;  %vm881_vm12 = vcmp.ge.f32.partialorder %v865_v30, 0.0 }
 0x132   : > { %v922_v38 = vpack.c.bf16 %v912_v37, %v911_v36  ;;  %vm882_vm13 = vcmp.ge.f32.partialorder %v866_v32, 0.0  ;;  %v897_v39 = vmul.f32 0.2, %v865_v30  ;;  %v898_v40 = vmul.f32 0.2, %v866_v32 }
 0x133   : > { %929 = vst [vmem:[%s1622_s4 + $0x20] sm:$0xff] %v921_v35  ;;  %v867_v41 = vadd.f32 %v1542_v25, %v845_v33  ;;  %v868_v42 = vadd.f32 %v1544_v26, %v846_v34 }
 0x134   : > { %930 = vst [vmem:[%s1622_s4 + $0x28] sm:$0xff] %v922_v38  ;;  %v913_v20 = vsel %vm881_vm12, %v865_v30, %v897_v39  ;;  %v914_v21 = vsel %vm882_vm13, %v866_v32, %v898_v40 }
 0x135   : > { %v923_v43 = vpack.c.bf16 %v914_v21, %v913_v20  ;;  %vm883_vm14 = vcmp.ge.f32.partialorder %v867_v41, 0.0  ;;  %vm884_vm15 = vcmp.ge.f32.partialorder %v868_v42, 0.0  ;;  %v899_v44 = vmul.f32 0.2, %v867_v41 }
 0x136   : > { %v900_v45 = vmul.f32 0.2, %v868_v42 }
 0x137   : > { %931 = vst [vmem:[%s1622_s4 + $0x30] sm:$0xff] %v923_v43  ;;  %v915_v46 = vsel %vm883_vm14, %v867_v41, %v899_v44 }
 0x138   : > { %v916_v47 = vsel %vm884_vm15, %v868_v42, %v900_v45 }
 0x139   : > { %v924_v25 = vpack.c.bf16 %v916_v47, %v915_v46 }
 0x13b   : > { %932 = vst [vmem:[%s1622_s4 + $0x38] sm:$0xff] %v924_v25 }
 0x13c PF: > { %s14_s19 = sadd.s32 1, %s1368_s19   ;;  %s1623_s15 = smov %s1356_s16 }
 0x13d   : > { %p11_p12 = scmp.ge.s32.totalorder %s14_s19, 11   ;;  %s1624_s16 = smov %s1431_s23 }
 0x13e   : > { %s1625_s17 = smov %s1364_s18  ;;  %s1626_s18 = smov %s1628_s20 }
 0x13f   :  { %13 = sbr.rel (!%p11_p12) target bundleno = 3 (0x3), region = 126 }

// kernel: attend_crnn_forward.19
= control target key start
LH: loop header
LB: loop body
LE: loop exit
PB: predicated region body
PF: predicated region fallthrough
CT: control target
= control target key end

     0   :  { %s1925_s0 = inlined_call_operand.vmem [shape: bf16[48,2304], index: 0, kind: input, shape index: {}]   ;;  %s1926_s1 = inlined_call_operand.vmem [shape: bf16[2304,512], index: 1, kind: input, shape index: {}]   ;;  %s1927_s2 = inlined_call_operand.vmem [shape: f32[1,512], index: 2, kind: input, shape index: {}]   ;;  %s1928_s3 = inlined_call_operand.vmem [shape: f32[1,512], index: 3, kind: input, shape index: {}]   ;;  %s1929_s4 = inlined_call_operand.vmem [shape: bf16[48,512], index: 4, kind: output, shape index: {}]  }
   0x1   :  { %1932 = sst [smem:[#allocation8_spill]] %s1925_s0 }
   0x2   :  { %1933 = sst [smem:[#allocation9_spill]] %s1926_s1 }
   0x3   :  { %s1581_s15 = smov 0   ;;  %s1583_s16 = smov 0  }
   0x4   :  { %s1585_s17 = smov 0   ;;  %s1587_s18 = smov 0  }
   0x5   :  { %s1589_s19 = smov 0   ;;  %s1591_s20 = smov 0  }
   0x6   :  { %s1593_s21 = smov 0   ;;  %s1595_s22 = smov 0  }
   0x7   :  { %s1597_s23 = smov 0   ;;  %s1599_s24 = smov 0  }
   0x8   :  { %s1601_s25 = smov 0  }
   0x9 LB: > { %s1161_s26 = sadd.s32 4294967295, %s1553_s25   ;;  %s26_s27 = sadd.s32 1, %s1545_s23  ;;  %s1553_s25 = sphi %s1601_s25, %s14_s25   ;;  %s1549_s24 = sphi %s1599_s24, %s1952_s24   ;;  %s1545_s23 = sphi %s1597_s23, %s1951_s23   ;;  %s1541_s22 = sphi %s1595_s22, %s1950_s22   ;;  %s1537_s21 = sphi %s1593_s21, %s1949_s21   ;;  %s1533_s20 = sphi %s1591_s20, %s1948_s20   ;;  %s1529_s19 = sphi %s1589_s19, %s1947_s19   ;;  %s1525_s18 = sphi %s1587_s18, %s1946_s18   ;;  %s1521_s17 = sphi %s1585_s17, %s1945_s17   ;;  %s1517_s16 = sphi %s1583_s16, %s1944_s16   ;;  %s1513_s15 = sphi %s1581_s15, %s1943_s15  }
   0xa   : > { %p27_p0 = scmp.ge.s32.totalorder %s26_s27, 9  ;;  %s29_s28 = sadd.s32 1, %s1549_s24 }
   0xb   : > { %s42_s29 = sadd.s32 1, %s1533_s20  ;;  %p49_p1 = scmp.ne.s32.totalorder %s1533_s20, %s1529_s19 }
   0xc   : > { %s1954_s27 = smov (%p27_p0, %s26_s27), 0  ;;  %s1956_s28 = smov (!%p27_p0, %s29_s28), %s1549_s24 }
   0xd   : > { %1934 = sst [smem:[#allocation6_spill]] %s1954_s27  ;;  %s38_s30 = ssub.s32 %s1545_s23, %s1954_s27 }
   0xe   : > { %p50_p2 = scmp.eq.s32.totalorder %s1553_s25, 0  ;;  %p31_p3 = scmp.ge.s32.totalorder %s1956_s28, 2 }
   0xf   : > { %p40_p4 = scmp.eq.s32.totalorder %s38_s30, 0  ;;  %s70_s6 = sadd.s32 1, %s1525_s18 }
  0x10   : > { %p1648_p5 = por %p50_p2, %p49_p1  ;;  %s1958_s28 = smov (%p31_p3, %s1956_s28), 0 }
  0x11   : > { %1936 = sst [smem:[#allocation7_spill]] %s1958_s28  ;;  %s66_s8 = ssub.s32 %s1549_s24, %s1958_s28 }
  0x12   : > { %s1656_s7 = scalar_select %p40_p4, %s1533_s20, %s42_s29  }
  0x13   : > { %p77_p6 = scmp.ne.s32.totalorder %s1525_s18, %s1521_s17  ;;  %s67_s9 = sor.u32 %s66_s8, %s38_s30 }
  0x14   : > { %p148_p7 = scmp.eq.s32.totalorder %s66_s8, 0  ;;  %p68_p8 = scmp.eq.s32.totalorder %s67_s9, 0 }
  0x15   : > { %p1662_p9 = por %p77_p6, %p50_p2  ;;  %s150_s11 = sadd.s32 1, %s1517_s16 }
  0x16   : > { %p160_p10 = scmp.ne.s32.totalorder %s1517_s16, %s1513_s15  ;;  %p161_p11 = scmp.eq.s32.totalorder %s1161_s26, 17 }
  0x17   : > { %s1670_s12 = scalar_select %p68_p8, %s1525_s18, %s70_s6  }
  0x18   : > { %s1673_s13 = scalar_select %p148_p7, %s1517_s16, %s150_s11  }
  0x19   : > { %p1675_p12 = por %p161_p11, %p160_p10  ;;  %p1164_p13 = scmp.ge.s32.totalorder %s1553_s25, 18 }
  0x1b   : > { %183 = sbr.rel (%p1164_p13) target bundleno = 90 (0x5a), region = 16 }
  0x20   : > { %186 = sbr.rel (!%p1648_p5) target bundleno = 48 (0x30), region = 20  ;;  %s188_s29 = sand.u32 (%p1648_p5), 1, %s1533_s20  }
  0x21   : > { %s1334_s30 = sshll.u32 (%p1648_p5), %s1545_s23, 3  ;;  %s1375_s8 = smul.u32 (%p1648_p5), 48, %s188_s29 }
  0x22   : > { %s1939_s0 = sld [smem:[#allocation8_spill]] (%p1648_p5) }
  0x23   : > { %s190_s26 = scalar_lea.vmem (%p1648_p5), [#allocation3], %s1375_s8 }
  0x28   : > { %s196_s11 = scalar_lea.vmem %s1939_s0, %s1334_s30 }
  0x29   : > { %v235_v0 = vld [vmem:[%s196_s11] sm:$0xff]  ;;  %v237_v1 = vld [vmem:[%s196_s11 + $0x48] sm:$0xff]  ;;  %v239_v2 = vld [vmem:[%s196_s11 + $0x90] sm:$0xff] }
  0x2a   : > { %236 = vst [vmem:[%s190_s26] sm:$0xff] %v235_v0  ;;  %v241_v3 = vld [vmem:[%s196_s11 + $0xd8] sm:$0xff]  ;;  %v243_v4 = vld [vmem:[%s196_s11 + $0x120] sm:$0xff]  ;;  %v245_v5 = vld [vmem:[%s196_s11 + $0x168] sm:$0xff] }
  0x2b   : > { %238 = vst [vmem:[%s190_s26 + $0x8] sm:$0xff] %v237_v1 }
  0x2c   : > { %240 = vst [vmem:[%s190_s26 + $0x10] sm:$0xff] %v239_v2 }
  0x2d   : > { %242 = vst [vmem:[%s190_s26 + $0x18] sm:$0xff] %v241_v3 }
  0x2e   : > { %244 = vst [vmem:[%s190_s26 + $0x20] sm:$0xff] %v243_v4 }
  0x2f   : > { %246 = vst [vmem:[%s190_s26 + $0x28] sm:$0xff] %v245_v5 }
  0x30 PF: > { %252 = sbr.rel (!%p1662_p9) target bundleno = 90 (0x5a), region = 58  ;;  %s254_s5 = sand.u32 (%p1662_p9), 1, %s1525_s18  }
  0x31   : > { %s1169_s29 = sshll.u32 (%p1662_p9), %s1549_s24, 1  ;;  %s1167_s30 = sshll.u32 (%p1662_p9), %s254_s5, 8 }
  0x32   : > { %s1335_s8 = sshll.u32 (%p1662_p9), %s1545_s23, 7  ;;  %s1940_s1 = sld [smem:[#allocation9_spill]] (%p1662_p9) }
  0x33   : > { %s260_s6 = sadd.s32 (%p1662_p9), %s1335_s8, %s1169_s29  ;;  %s1700_s10 = scalar_lea.vmem (%p1662_p9), [#allocation4], %s1167_s30 }
  0x34   : > { %s1171_s9 = sshll.u32 (%p1662_p9), %s260_s6, 2 }
  0x38   : > { %s1695_s11 = scalar_lea.vmem %s1940_s1, %s1171_s9 }
  0x39   : > { %v353_v6 = vld [vmem:[%s1695_s11] sm:$0xff]  ;;  %v355_v7 = vld [vmem:[%s1695_s11 + $0x10] sm:$0xff] }
  0x3a   : > { %v357_v8 = vld [vmem:[%s1695_s11 + $0x20] sm:$0xff]  ;;  %354 = vst [vmem:[%s1700_s10] sm:$0xff] %v353_v6  ;;  %v359_v9 = vld [vmem:[%s1695_s11 + $0x30] sm:$0xff] }
  0x3b   : > { %356 = vst [vmem:[%s1700_s10 + $0x8] sm:$0xff] %v355_v7  ;;  %v361_v10 = vld [vmem:[%s1695_s11 + $0x40] sm:$0xff]  ;;  %v363_v11 = vld [vmem:[%s1695_s11 + $0x50] sm:$0xff] }
  0x3c   : > { %358 = vst [vmem:[%s1700_s10 + $0x10] sm:$0xff] %v357_v8  ;;  %v365_v12 = vld [vmem:[%s1695_s11 + $0x60] sm:$0xff]  ;;  %v367_v13 = vld [vmem:[%s1695_s11 + $0x70] sm:$0xff] }
  0x3d   : > { %360 = vst [vmem:[%s1700_s10 + $0x18] sm:$0xff] %v359_v9  ;;  %v369_v14 = vld [vmem:[%s1695_s11 + $0x80] sm:$0xff]  ;;  %v371_v15 = vld [vmem:[%s1695_s11 + $0x90] sm:$0xff] }
  0x3e   : > { %362 = vst [vmem:[%s1700_s10 + $0x20] sm:$0xff] %v361_v10  ;;  %v373_v16 = vld [vmem:[%s1695_s11 + $0xa0] sm:$0xff]  ;;  %v375_v17 = vld [vmem:[%s1695_s11 + $0xb0] sm:$0xff] }
  0x3f   : > { %364 = vst [vmem:[%s1700_s10 + $0x28] sm:$0xff] %v363_v11  ;;  %v377_v18 = vld [vmem:[%s1695_s11 + $0xc0] sm:$0xff]  ;;  %v379_v19 = vld [vmem:[%s1695_s11 + $0xd0] sm:$0xff] }
  0x40   : > { %366 = vst [vmem:[%s1700_s10 + $0x30] sm:$0xff] %v365_v12  ;;  %v381_v20 = vld [vmem:[%s1695_s11 + $0xe0] sm:$0xff]  ;;  %v383_v21 = vld [vmem:[%s1695_s11 + $0xf0] sm:$0xff] }
  0x41   : > { %368 = vst [vmem:[%s1700_s10 + $0x38] sm:$0xff] %v367_v13  ;;  %v385_v22 = vld [vmem:[%s1695_s11 + $0x100] sm:$0xff]  ;;  %v387_v23 = vld [vmem:[%s1695_s11 + $0x110] sm:$0xff] }
  0x42   : > { %370 = vst [vmem:[%s1700_s10 + $0x40] sm:$0xff] %v369_v14  ;;  %v389_v24 = vld [vmem:[%s1695_s11 + $0x120] sm:$0xff]  ;;  %v391_v25 = vld [vmem:[%s1695_s11 + $0x130] sm:$0xff] }
  0x43   : > { %372 = vst [vmem:[%s1700_s10 + $0x48] sm:$0xff] %v371_v15  ;;  %v393_v26 = vld [vmem:[%s1695_s11 + $0x140] sm:$0xff]  ;;  %v395_v27 = vld [vmem:[%s1695_s11 + $0x150] sm:$0xff] }
  0x44   : > { %374 = vst [vmem:[%s1700_s10 + $0x50] sm:$0xff] %v373_v16  ;;  %v397_v28 = vld [vmem:[%s1695_s11 + $0x160] sm:$0xff]  ;;  %v399_v29 = vld [vmem:[%s1695_s11 + $0x170] sm:$0xff] }
  0x45   : > { %376 = vst [vmem:[%s1700_s10 + $0x58] sm:$0xff] %v375_v17  ;;  %v401_v30 = vld [vmem:[%s1695_s11 + $0x180] sm:$0xff]  ;;  %v403_v31 = vld [vmem:[%s1695_s11 + $0x190] sm:$0xff] }
  0x46   : > { %378 = vst [vmem:[%s1700_s10 + $0x60] sm:$0xff] %v377_v18  ;;  %v405_v32 = vld [vmem:[%s1695_s11 + $0x1a0] sm:$0xff]  ;;  %v407_v33 = vld [vmem:[%s1695_s11 + $0x1b0] sm:$0xff] }
  0x47   : > { %380 = vst [vmem:[%s1700_s10 + $0x68] sm:$0xff] %v379_v19  ;;  %v409_v34 = vld [vmem:[%s1695_s11 + $0x1c0] sm:$0xff]  ;;  %v411_v35 = vld [vmem:[%s1695_s11 + $0x1d0] sm:$0xff] }
  0x48   : > { %382 = vst [vmem:[%s1700_s10 + $0x70] sm:$0xff] %v381_v20  ;;  %v413_v36 = vld [vmem:[%s1695_s11 + $0x1e0] sm:$0xff]  ;;  %v415_v37 = vld [vmem:[%s1695_s11 + $0x1f0] sm:$0xff] }
  0x49   : > { %384 = vst [vmem:[%s1700_s10 + $0x78] sm:$0xff] %v383_v21 }
  0x4a   : > { %386 = vst [vmem:[%s1700_s10 + $0x80] sm:$0xff] %v385_v22 }
  0x4b   : > { %388 = vst [vmem:[%s1700_s10 + $0x88] sm:$0xff] %v387_v23 }
  0x4c   : > { %390 = vst [vmem:[%s1700_s10 + $0x90] sm:$0xff] %v389_v24 }
  0x4d   : > { %392 = vst [vmem:[%s1700_s10 + $0x98] sm:$0xff] %v391_v25 }
  0x4e   : > { %394 = vst [vmem:[%s1700_s10 + $0xa0] sm:$0xff] %v393_v26 }
  0x4f   : > { %396 = vst [vmem:[%s1700_s10 + $0xa8] sm:$0xff] %v395_v27 }
  0x50   : > { %398 = vst [vmem:[%s1700_s10 + $0xb0] sm:$0xff] %v397_v28 }
  0x51   : > { %400 = vst [vmem:[%s1700_s10 + $0xb8] sm:$0xff] %v399_v29 }
  0x52   : > { %402 = vst [vmem:[%s1700_s10 + $0xc0] sm:$0xff] %v401_v30 }
  0x53   : > { %404 = vst [vmem:[%s1700_s10 + $0xc8] sm:$0xff] %v403_v31 }
  0x54   : > { %406 = vst [vmem:[%s1700_s10 + $0xd0] sm:$0xff] %v405_v32 }
  0x55   : > { %408 = vst [vmem:[%s1700_s10 + $0xd8] sm:$0xff] %v407_v33 }
  0x56   : > { %410 = vst [vmem:[%s1700_s10 + $0xe0] sm:$0xff] %v409_v34 }
  0x57   : > { %412 = vst [vmem:[%s1700_s10 + $0xe8] sm:$0xff] %v411_v35 }
  0x58   : > { %414 = vst [vmem:[%s1700_s10 + $0xf0] sm:$0xff] %v413_v36 }
  0x59   : > { %416 = vst [vmem:[%s1700_s10 + $0xf8] sm:$0xff] %v415_v37 }
  0x5a PF: > { %p1172_p0 = scmp.ge.s32.totalorder %s1553_s25, 1  ;;  %p437_p1 = scmp.lt.s32.totalorder %s1553_s25, 19 }
  0x5c   : > { %p438_p2 = pnand %p1172_p0, %p437_p1 }
  0x5d   : > { %s444_s0 = sand.u32 (!%p438_p2), 1, %s1529_s19   ;;  %s451_s28 = sand.u32 (!%p438_p2), 1, %s1521_s17  }
  0x5e   : > { %441 = sbr.rel (%p438_p2) target bundleno = 365 (0x16d), region = 104  ;;  %s1173_s5 = sshll.u32 (!%p438_p2), %s451_s28, 8 }
  0x5f   : > { %s1376_s26 = smul.u32 (!%p438_p2), 48, %s444_s0  ;;  %s484_s29 = sand.u32 (!%p438_p2), 1, %s1513_s15  }
  0x60   : > { %s1377_s30 = smul.u32 (!%p438_p2), 48, %s484_s29  ;;  %s1174_s8 = sshll.u32 (!%p438_p2), %s1541_s22, 1 }
  0x61   : > { %p492_p3 = scmp.lt.s32.totalorder (!%p438_p2), %s1174_s8, 3  ;;  %s1779_s19 = scalar_lea.vmem (!%p438_p2), [#allocation3], %s1376_s26 }
  0x62   : > { %s1781_s17 = scalar_lea.vmem (!%p438_p2), [#allocation4], %s1173_s5  ;;  %s1783_s15 = scalar_lea.vmem (!%p438_p2), [#allocation5], %s1377_s30 }
  0x63   : > { %s1960_s8 = smov (!%p492_p3, %s1174_s8), 3  ;;  %p1176_p4 = scmp.ne.s32.totalorder %s1537_s21, 0 }
  0x64   : > { %s494_s11 = scalar_lea.vmem %s1927_s2, %s1960_s8  ;;  %s499_s27 = scalar_lea.vmem %s1928_s3, %s1960_s8 }
  0x65   : > { %506 = sbr.rel (%p1176_p4) target bundleno = 119 (0x77), region = 116 }
  0x6a   : > { %v1555_v38 = vmov 0.0  }
  0x6b   : > { %507 = vst [vmem:[#allocation2 + $0x30] sm:$0xff] %v1555_v38 }
  0x6c   : > { %508 = vst [vmem:[#allocation2] sm:$0xff] %v1555_v38 }
  0x6d   : > { %509 = vst [vmem:[#allocation2 + $0x58] sm:$0xff] %v1555_v38 }
  0x6e   : > { %510 = vst [vmem:[#allocation2 + $0x18] sm:$0xff] %v1555_v38 }
  0x6f   : > { %511 = vst [vmem:[#allocation2 + $0x50] sm:$0xff] %v1555_v38 }
  0x70   : > { %512 = vst [vmem:[#allocation2 + $0x20] sm:$0xff] %v1555_v38 }
  0x71   : > { %513 = vst [vmem:[#allocation2 + $0x8] sm:$0xff] %v1555_v38 }
  0x72   : > { %514 = vst [vmem:[#allocation2 + $0x38] sm:$0xff] %v1555_v38 }
  0x73   : > { %515 = vst [vmem:[#allocation2 + $0x28] sm:$0xff] %v1555_v38 }
  0x74   : > { %516 = vst [vmem:[#allocation2 + $0x48] sm:$0xff] %v1555_v38 }
  0x75   : > { %517 = vst [vmem:[#allocation2 + $0x10] sm:$0xff] %v1555_v38 }
  0x76   : > { %518 = vst [vmem:[#allocation2 + $0x40] sm:$0xff] %v1555_v38 }
  0x77 PF: > { %v1259_v39 = vld [vmem:[%s1781_s17 + $0x70] sm:$0xf]  ;;  %v1357_v40 = vld [vmem:[%s1781_s17 + $0x74] sm:$0xf0]  ;;  %v1356_v44 = vld [vmem:[%s1781_s17 + $0x74] sm:$0xf] }
  0x78   : > { %v1323_v41 = vld [vmem:[%s1781_s17 + $0xf0] sm:$0xf]  ;;  %v1260_v42 = vor.u32 %v1357_v40, %v1259_v39  ;;  %v1373_v43 = vld [vmem:[%s1781_s17 + $0xf4] sm:$0xf0]  ;;  %v1261_v45 = vld [vmem:[%s1781_s17 + $0x78] sm:$0xf0] }
  0x79   : > { %v1324_v46 = vor.u32 %v1373_v43, %v1323_v41  ;;  %v1264_v47 = vor.u32 %v1356_v44, %v1261_v45  ;;  %v1372_v48 = vld [vmem:[%s1781_s17 + $0xf4] sm:$0xf]  ;;  %v1325_v49 = vld [vmem:[%s1781_s17 + $0xf8] sm:$0xf0]  ;;  %v1251_v50 = vld [vmem:[%s1781_s17 + $0x60] sm:$0xf] }
  0x7a   : > { %759 = vmatpush.bf16.msra.mxu0 %v1260_v42  ;;  %v1328_v51 = vor.u32 %v1372_v48, %v1325_v49  ;;  %v1355_v52 = vld [vmem:[%s1781_s17 + $0x64] sm:$0xf0]  ;;  %v1315_v53 = vld [vmem:[%s1781_s17 + $0xe0] sm:$0xf]  ;;  %v1354_v57 = vld [vmem:[%s1781_s17 + $0x64] sm:$0xf] }
  0x7b   : > { %v1371_v54 = vld [vmem:[%s1781_s17 + $0xe4] sm:$0xf0]  ;;  %783 = vmatpush.bf16.msra.mxu1 %v1324_v46  ;;  %807 = vmatpush.bf16.msra.mxu2 %v1264_v47  ;;  %v1252_v55 = vor.u32 %v1355_v52, %v1251_v50  ;;  %v1253_v58 = vld [vmem:[%s1781_s17 + $0x68] sm:$0xf0]  ;;  %v1370_v59 = vld [vmem:[%s1781_s17 + $0xe4] sm:$0xf] }
  0x7c   : > { %v1316_v56 = vor.u32 %v1371_v54, %v1315_v53  ;;  %831 = vmatpush.bf16.msra.mxu3 %v1328_v51  ;;  %v1256_v60 = vor.u32 %v1354_v57, %v1253_v58  ;;  %v1317_v61 = vld [vmem:[%s1781_s17 + $0xe8] sm:$0xf0]  ;;  %v1243_v62 = vld [vmem:[%s1781_s17 + $0x50] sm:$0xf]  ;;  %v1353_v63 = vld [vmem:[%s1781_s17 + $0x54] sm:$0xf0] }
  0x7d   : > { %v1320_v0 = vor.u32 %v1370_v59, %v1317_v61  ;;  %v1307_v1 = vld [vmem:[%s1781_s17 + $0xd0] sm:$0xf]  ;;  %v1369_v2 = vld [vmem:[%s1781_s17 + $0xd4] sm:$0xf0]  ;;  %v1352_v3 = vld [vmem:[%s1781_s17 + $0x54] sm:$0xf]  ;;  %v1244_v4 = vor.u32 %v1353_v63, %v1243_v62 }
  0x7e   : > { %760 = vmatpush.bf16.msra.mxu0 %v1252_v55  ;;  %v1245_v5 = vld [vmem:[%s1781_s17 + $0x58] sm:$0xf0]  ;;  %v1368_v6 = vld [vmem:[%s1781_s17 + $0xd4] sm:$0xf]  ;;  %v1308_v8 = vor.u32 %v1369_v2, %v1307_v1  ;;  %v1235_v10 = vld [vmem:[%s1781_s17 + $0x40] sm:$0xf] }
  0x7f   : > { %v1309_v7 = vld [vmem:[%s1781_s17 + $0xd8] sm:$0xf0]  ;;  %784 = vmatpush.bf16.msra.mxu1 %v1316_v56  ;;  %808 = vmatpush.bf16.msra.mxu2 %v1256_v60  ;;  %v1248_v9 = vor.u32 %v1352_v3, %v1245_v5  ;;  %v1351_v11 = vld [vmem:[%s1781_s17 + $0x44] sm:$0xf0]  ;;  %v1299_v12 = vld [vmem:[%s1781_s17 + $0xc0] sm:$0xf] }
  0x80   : > { %832 = vmatpush.bf16.msra.mxu3 %v1320_v0  ;;  %v1312_v13 = vor.u32 %v1368_v6, %v1309_v7  ;;  %v1367_v14 = vld [vmem:[%s1781_s17 + $0xc4] sm:$0xf0]  ;;  %v1350_v15 = vld [vmem:[%s1781_s17 + $0x44] sm:$0xf]  ;;  %v1237_v16 = vld [vmem:[%s1781_s17 + $0x48] sm:$0xf0]  ;;  %v1236_v19 = vor.u32 %v1351_v11, %v1235_v10 }
  0x81   : > { %v1366_v17 = vld [vmem:[%s1781_s17 + $0xc4] sm:$0xf]  ;;  %v1301_v18 = vld [vmem:[%s1781_s17 + $0xc8] sm:$0xf0]  ;;  %v1300_v20 = vor.u32 %v1367_v14, %v1299_v12  ;;  %v1240_v21 = vor.u32 %v1350_v15, %v1237_v16  ;;  %v1227_v22 = vld [vmem:[%s1781_s17 + $0x30] sm:$0xf] }
  0x82   : > { %761 = vmatpush.bf16.msra.mxu0 %v1244_v4  ;;  %v1349_v23 = vld [vmem:[%s1781_s17 + $0x34] sm:$0xf0]  ;;  %v1291_v24 = vld [vmem:[%s1781_s17 + $0xb0] sm:$0xf]  ;;  %v1304_v25 = vor.u32 %v1366_v17, %v1301_v18  ;;  %v1348_v27 = vld [vmem:[%s1781_s17 + $0x34] sm:$0xf] }
  0x83   : > { %785 = vmatpush.bf16.msra.mxu1 %v1308_v8  ;;  %809 = vmatpush.bf16.msra.mxu2 %v1248_v9  ;;  %v1365_v26 = vld [vmem:[%s1781_s17 + $0xb4] sm:$0xf0]  ;;  %v1229_v28 = vld [vmem:[%s1781_s17 + $0x38] sm:$0xf0]  ;;  %v1364_v29 = vld [vmem:[%s1781_s17 + $0xb4] sm:$0xf]  ;;  %v1228_v31 = vor.u32 %v1349_v23, %v1227_v22 }
  0x84   : > { %833 = vmatpush.bf16.msra.mxu3 %v1312_v13  ;;  %v1293_v30 = vld [vmem:[%s1781_s17 + $0xb8] sm:$0xf0]  ;;  %v1292_v32 = vor.u32 %v1365_v26, %v1291_v24  ;;  %v1232_v33 = vor.u32 %v1348_v27, %v1229_v28  ;;  %v1219_v34 = vld [vmem:[%s1781_s17 + $0x20] sm:$0xf]  ;;  %v1347_v35 = vld [vmem:[%s1781_s17 + $0x24] sm:$0xf0] }
  0x85   : > { %v1283_v36 = vld [vmem:[%s1781_s17 + $0xa0] sm:$0xf]  ;;  %v1296_v37 = vor.u32 %v1364_v29, %v1293_v30  ;;  %v1363_v38 = vld [vmem:[%s1781_s17 + $0xa4] sm:$0xf0]  ;;  %v1346_v39 = vld [vmem:[%s1781_s17 + $0x24] sm:$0xf]  ;;  %v1220_v43 = vor.u32 %v1347_v35, %v1219_v34 }
  0x86   : > { %762 = vmatpush.bf16.msra.mxu0 %v1236_v19  ;;  %v1221_v40 = vld [vmem:[%s1781_s17 + $0x28] sm:$0xf0]  ;;  %v1362_v41 = vld [vmem:[%s1781_s17 + $0xa4] sm:$0xf]  ;;  %v1284_v44 = vor.u32 %v1363_v38, %v1283_v36  ;;  %v1211_v46 = vld [vmem:[%s1781_s17 + $0x10] sm:$0xf] }
  0x87   : > { %786 = vmatpush.bf16.msra.mxu1 %v1300_v20  ;;  %810 = vmatpush.bf16.msra.mxu2 %v1240_v21  ;;  %v1285_v42 = vld [vmem:[%s1781_s17 + $0xa8] sm:$0xf0]  ;;  %v1224_v45 = vor.u32 %v1346_v39, %v1221_v40  ;;  %v1345_v47 = vld [vmem:[%s1781_s17 + $0x14] sm:$0xf0]  ;;  %v1275_v48 = vld [vmem:[%s1781_s17 + $0x90] sm:$0xf] }
  0x88   : > { %834 = vmatpush.bf16.msra.mxu3 %v1304_v25  ;;  %v1288_v49 = vor.u32 %v1362_v41, %v1285_v42  ;;  %v1361_v50 = vld [vmem:[%s1781_s17 + $0x94] sm:$0xf0]  ;;  %v1344_v51 = vld [vmem:[%s1781_s17 + $0x14] sm:$0xf]  ;;  %v1213_v52 = vld [vmem:[%s1781_s17 + $0x18] sm:$0xf0]  ;;  %v1212_v55 = vor.u32 %v1345_v47, %v1211_v46 }
  0x89   : > { %v1360_v53 = vld [vmem:[%s1781_s17 + $0x94] sm:$0xf]  ;;  %v1277_v54 = vld [vmem:[%s1781_s17 + $0x98] sm:$0xf0]  ;;  %v1276_v56 = vor.u32 %v1361_v50, %v1275_v48  ;;  %v1216_v57 = vor.u32 %v1344_v51, %v1213_v52  ;;  %v1203_v58 = vld [vmem:[%s1781_s17] sm:$0xf] }
  0x8a   : > { %763 = vmatpush.bf16.msra.mxu0 %v1228_v31  ;;  %v1343_v59 = vld [vmem:[%s1781_s17 + $0x4] sm:$0xf0]  ;;  %v1267_v60 = vld [vmem:[%s1781_s17 + $0x80] sm:$0xf]  ;;  %v1280_v61 = vor.u32 %v1360_v53, %v1277_v54  ;;  %v1342_v63 = vld [vmem:[%s1781_s17 + $0x4] sm:$0xf] }
  0x8b   : > { %787 = vmatpush.bf16.msra.mxu1 %v1292_v32  ;;  %811 = vmatpush.bf16.msra.mxu2 %v1232_v33  ;;  %v1359_v62 = vld [vmem:[%s1781_s17 + $0x84] sm:$0xf0]  ;;  %v1205_v0 = vld [vmem:[%s1781_s17 + $0x8] sm:$0xf0]  ;;  %v1358_v1 = vld [vmem:[%s1781_s17 + $0x84] sm:$0xf]  ;;  %v1204_v3 = vor.u32 %v1343_v59, %v1203_v58 }
  0x8c   : > { %835 = vmatpush.bf16.msra.mxu3 %v1296_v37  ;;  %v1269_v2 = vld [vmem:[%s1781_s17 + $0x88] sm:$0xf0]  ;;  %v1179_v4 = vld [vmem:[%s1779_s19] sm:$0xf]  ;;  %v1337_v5 = vld [vmem:[%s1779_s19 + $0x4] sm:$0xf0]  ;;  %v1268_v6 = vor.u32 %v1359_v62, %v1267_v60  ;;  %v1208_v7 = vor.u32 %v1342_v63, %v1205_v0 }
  0x8d   : > { %v1336_v8 = vld [vmem:[%s1779_s19 + $0x4] sm:$0xf]  ;;  %v1181_v9 = vld [vmem:[%s1779_s19 + $0x8] sm:$0xf0]  ;;  %v1272_v10 = vor.u32 %v1358_v1, %v1269_v2  ;;  %v1180_v11 = vor.u32 %v1337_v5, %v1179_v4  ;;  %v1187_v13 = vld [vmem:[%s1779_s19 + $0x10] sm:$0xf] }
  0x8e   : > { %764 = vmatpush.bf16.msra.mxu0 %v1220_v43  ;;  %v1184_v12 = vor.u32 %v1336_v8, %v1181_v9  ;;  %v1339_v14 = vld [vmem:[%s1779_s19 + $0x14] sm:$0xf0]  ;;  %v1338_v15 = vld [vmem:[%s1779_s19 + $0x14] sm:$0xf]  ;;  %v1189_v16 = vld [vmem:[%s1779_s19 + $0x18] sm:$0xf0] }
  0x8f   : > { %788 = vmatpush.bf16.msra.mxu1 %v1284_v44  ;;  %812 = vmatpush.bf16.msra.mxu2 %v1224_v45  ;;  %v1188_v17 = vor.u32 %v1339_v14, %v1187_v13  ;;  %v1192_v18 = vor.u32 %v1338_v15, %v1189_v16  ;;  %v1195_v19 = vld [vmem:[%s1779_s19 + $0x20] sm:$0xf]  ;;  %v1341_v20 = vld [vmem:[%s1779_s19 + $0x24] sm:$0xf0]  ;;  %v1340_v21 = vld [vmem:[%s1779_s19 + $0x24] sm:$0xf] }
  0x90   : > { %836 = vmatpush.bf16.msra.mxu3 %v1288_v49  ;;  %v1197_v22 = vld [vmem:[%s1779_s19 + $0x28] sm:$0xf0]  ;;  %v1196_v23 = vor.u32 %v1341_v20, %v1195_v19  ;;  %v519_v26 = vld [vmem:[#allocation2 + $0x30] sm:$0xff]  ;;  %v520_v31 = vld [vmem:[#allocation2] sm:$0xff]  ;;  %p1329_p5 = scmp.ne.s32.totalorder %s1537_s21, 8 }
  0x91   : > { %v1200_v24 = vor.u32 %v1340_v21, %v1197_v22  ;;  %v521_v35 = vld [vmem:[#allocation2 + $0x58] sm:$0xff]  ;;  %v523_v45 = vld [vmem:[#allocation2 + $0x50] sm:$0xff]  ;;  %v524_v51 = vld [vmem:[#allocation2 + $0x20] sm:$0xff] }
  0x92   : > { %765 = vmatpush.bf16.msra.mxu0 %v1212_v55  ;;  %v522_v41 = vld [vmem:[#allocation2 + $0x18] sm:$0xff]  ;;  %v525_v55 = vld [vmem:[#allocation2 + $0x8] sm:$0xff] }
  0x93   : > { %789 = vmatpush.bf16.msra.mxu1 %v1276_v56  ;;  %813 = vmatpush.bf16.msra.mxu2 %v1216_v57  ;;  %v527_v1 = vld [vmem:[#allocation2 + $0x28] sm:$0xff] }
  0x94   : > { %837 = vmatpush.bf16.msra.mxu3 %v1280_v61  ;;  %v526_v61 = vld [vmem:[#allocation2 + $0x38] sm:$0xff] }
  0x96   : > { %766 = vmatpush.bf16.msra.mxu0 %v1204_v3 }
  0x97   : > { %790 = vmatpush.bf16.msra.mxu1 %v1268_v6  ;;  %814 = vmatpush.bf16.msra.mxu2 %v1208_v7  ;;  %v528_v7 = vld [vmem:[#allocation2 + $0x48] sm:$0xff] }
  0x98   : > { %838 = vmatpush.bf16.msra.mxu3 %v1272_v10 }
  0x99   : > { %767 = vmatmul.bf16.vlgmr.msra.gmra.mxu0 %v1180_v11 }
  0x9a   : > { %791 = vmatmul.bf16.vlgmr.msra.gmra.mxu1 %v1184_v12  ;;  %815 = vmatmul.bf16.vlgmr.msra.gmra.mxu2 %v1180_v11  ;;  %v529_v11 = vld [vmem:[#allocation2 + $0x10] sm:$0xff] }
  0x9b   : > { %839 = vmatmul.bf16.vlgmr.msra.gmra.mxu3 %v1184_v12 }
  0xa9   : > { %772 = vmatmul.bf16.gmra.mxu0 %v1188_v17 }
  0xaa   : > { %796 = vmatmul.bf16.gmra.mxu1 %v1192_v18  ;;  %820 = vmatmul.bf16.gmra.mxu2 %v1188_v17  ;;  %v530_v17 = vld [vmem:[#allocation2 + $0x40] sm:$0xff] }
  0xab   : > { %844 = vmatmul.bf16.gmra.mxu3 %v1192_v18 }
  0xb9   : > { %777 = vmatmul.bf16.gmra.mxu0 %v1196_v23 }
  0xba   : > { %801 = vmatmul.bf16.gmra.mxu1 %v1200_v24  ;;  %825 = vmatmul.bf16.gmra.mxu2 %v1196_v23 }
  0xbb   : > { %849 = vmatmul.bf16.gmra.mxu3 %v1200_v24 }
 0x116   : > { %v768_v25 = vpop.f32.mrf.mxu0 }
 0x117   : > { %v792_v27 = vpop.f32.mrf.mxu1 }
 0x118   : > { %v793_v28 = vadd.f32 %v792_v27, %v768_v25 }
 0x11a   : > { %v855_v29 = vadd.f32 %v793_v28, %v519_v26 }
 0x11c   : > { %867 = vst [vmem:[#allocation2 + $0x30] sm:$0xff] %v855_v29 }
 0x11d   : > { %v816_v30 = vpop.f32.mrf.mxu2 }
 0x11e   : > { %v840_v32 = vpop.f32.mrf.mxu3  ;;  %v770_v33 = vpop.f32.mrf.mxu0 }
 0x11f   : > { %v841_v34 = vadd.f32 %v840_v32, %v816_v30  ;;  %v794_v36 = vpop.f32.mrf.mxu1 }
 0x120   : > { %v795_v37 = vadd.f32 %v794_v36, %v770_v33 }
 0x121   : > { %v856_v38 = vadd.f32 %v841_v34, %v520_v31 }
 0x122   : > { %v857_v39 = vadd.f32 %v795_v37, %v521_v35 }
 0x123   : > { %868 = vst [vmem:[#allocation2] sm:$0xff] %v856_v38 }
 0x124   : > { %869 = vst [vmem:[#allocation2 + $0x58] sm:$0xff] %v857_v39 }
 0x125   : > { %v818_v40 = vpop.f32.mrf.mxu2 }
 0x126   : > { %v842_v42 = vpop.f32.mrf.mxu3  ;;  %v773_v43 = vpop.f32.mrf.mxu0 }
 0x127   : > { %v843_v44 = vadd.f32 %v842_v42, %v818_v40  ;;  %v797_v46 = vpop.f32.mrf.mxu1 }
 0x128   : > { %v798_v47 = vadd.f32 %v797_v46, %v773_v43 }
 0x129   : > { %v858_v48 = vadd.f32 %v843_v44, %v522_v41 }
 0x12a   : > { %v859_v49 = vadd.f32 %v798_v47, %v523_v45 }
 0x12b   : > { %870 = vst [vmem:[#allocation2 + $0x18] sm:$0xff] %v858_v48 }
 0x12c   : > { %871 = vst [vmem:[#allocation2 + $0x50] sm:$0xff] %v859_v49 }
 0x12d   : > { %v821_v50 = vpop.f32.mrf.mxu2 }
 0x12e   : > { %v845_v52 = vpop.f32.mrf.mxu3  ;;  %v775_v53 = vpop.f32.mrf.mxu0 }
 0x12f   : > { %v846_v54 = vadd.f32 %v845_v52, %v821_v50  ;;  %v799_v56 = vpop.f32.mrf.mxu1 }
 0x130   : > { %v800_v57 = vadd.f32 %v799_v56, %v775_v53 }
 0x131   : > { %v860_v58 = vadd.f32 %v846_v54, %v524_v51 }
 0x132   : > { %v861_v59 = vadd.f32 %v800_v57, %v525_v55 }
 0x133   : > { %872 = vst [vmem:[#allocation2 + $0x20] sm:$0xff] %v860_v58 }
 0x134   : > { %873 = vst [vmem:[#allocation2 + $0x8] sm:$0xff] %v861_v59 }
 0x135   : > { %v823_v60 = vpop.f32.mrf.mxu2 }
 0x136   : > { %v847_v62 = vpop.f32.mrf.mxu3  ;;  %v778_v63 = vpop.f32.mrf.mxu0 }
 0x137   : > { %v848_v0 = vadd.f32 %v847_v62, %v823_v60  ;;  %v802_v2 = vpop.f32.mrf.mxu1 }
 0x138   : > { %v803_v3 = vadd.f32 %v802_v2, %v778_v63 }
 0x139   : > { %v862_v4 = vadd.f32 %v848_v0, %v526_v61 }
 0x13a   : > { %v863_v5 = vadd.f32 %v803_v3, %v527_v1 }
 0x13b   : > { %874 = vst [vmem:[#allocation2 + $0x38] sm:$0xff] %v862_v4 }
 0x13c   : > { %875 = vst [vmem:[#allocation2 + $0x28] sm:$0xff] %v863_v5 }
 0x13d   : > { %v826_v6 = vpop.f32.mrf.mxu2 }
 0x13e   : > { %v850_v8 = vpop.f32.mrf.mxu3  ;;  %v780_v9 = vpop.f32.mrf.mxu0 }
 0x13f   : > { %v851_v10 = vadd.f32 %v850_v8, %v826_v6  ;;  %v804_v12 = vpop.f32.mrf.mxu1 }
 0x140   : > { %v805_v13 = vadd.f32 %v804_v12, %v780_v9 }
 0x141   : > { %v864_v14 = vadd.f32 %v851_v10, %v528_v7 }
 0x142   : > { %v865_v15 = vadd.f32 %v805_v13, %v529_v11 }
 0x143   : > { %876 = vst [vmem:[#allocation2 + $0x48] sm:$0xff] %v864_v14 }
 0x144   : > { %877 = vst [vmem:[#allocation2 + $0x10] sm:$0xff] %v865_v15 }
 0x145   : > { %v828_v16 = vpop.f32.mrf.mxu2 }
 0x146   : > { %v852_v18 = vpop.f32.mrf.mxu3 }
 0x147   : > { %v853_v19 = vadd.f32 %v852_v18, %v828_v16  ;;  %882 = sbr.rel (%p1329_p5) target bundleno = 357 (0x165), region = 120 }
 0x149   : > { %v866_v20 = vadd.f32 %v853_v19, %v530_v17 }
 0x14b   : > { %878 = vst [vmem:[#allocation2 + $0x40] sm:$0xff] %v866_v20 }
 0x14c   : > { %v883_v21 = vld [vmem:[#allocation2 + $0x30] sm:$0xff]  ;;  %v884_v22 = vld [vmem:[#allocation2] sm:$0xff]  ;;  %v885_v27 = vld [vmem:[#allocation2 + $0x58] sm:$0xff] }
 0x14d   : > { %v895_v23 = vld [vmem:[%s494_s11] sm:$0x3]  ;;  %v886_v28 = vld [vmem:[#allocation2 + $0x18] sm:$0xff]  ;;  %v887_v31 = vld [vmem:[#allocation2 + $0x50] sm:$0xff] }
 0x14e   : > { %v897_v24 = vperm.slane %v895_v23, 0  ;;  %v898_v25 = vperm.slane %v895_v23, 1  ;;  %v913_v26 = vld [vmem:[%s499_s27] sm:$0x3]  ;;  %v889_v33 = vld [vmem:[#allocation2 + $0x8] sm:$0xff]  ;;  %v890_v38 = vld [vmem:[#allocation2 + $0x38] sm:$0xff] }
 0x14f   : > { %v915_v29 = vperm.slane %v913_v26, 0  ;;  %v916_v30 = vperm.slane %v913_v26, 1  ;;  %v888_v32 = vld [vmem:[#allocation2 + $0x20] sm:$0xff]  ;;  %v891_v57 = vld [vmem:[#allocation2 + $0x28] sm:$0xff]  ;;  %v893_v63 = vld [vmem:[#allocation2 + $0x10] sm:$0xff] }
 0x150   : > { %v901_v34 = vmul.f32 %v897_v24, %v883_v21  ;;  %v902_v35 = vmul.f32 %v898_v25, %v884_v22  ;;  %v903_v36 = vmul.f32 %v897_v24, %v885_v27  ;;  %v904_v37 = vmul.f32 %v898_v25, %v886_v28  ;;  %v892_v62 = vld [vmem:[#allocation2 + $0x48] sm:$0xff] }
 0x151   : > { %v905_v39 = vmul.f32 %v897_v24, %v887_v31  ;;  %v906_v40 = vmul.f32 %v898_v25, %v888_v32  ;;  %v907_v41 = vmul.f32 %v897_v24, %v889_v33  ;;  %v908_v42 = vmul.f32 %v898_v25, %v890_v38 }
 0x152   : > { %v919_v43 = vadd.f32 %v915_v29, %v901_v34  ;;  %v920_v44 = vadd.f32 %v916_v30, %v902_v35  ;;  %v921_v45 = vadd.f32 %v915_v29, %v903_v36  ;;  %v922_v46 = vadd.f32 %v916_v30, %v904_v37  ;;  %v894_v0 = vld [vmem:[#allocation2 + $0x40] sm:$0xff] }
 0x153   : > { %v923_v47 = vadd.f32 %v915_v29, %v905_v39  ;;  %v924_v48 = vadd.f32 %v916_v30, %v906_v40  ;;  %v925_v49 = vadd.f32 %v915_v29, %v907_v41  ;;  %v926_v50 = vadd.f32 %v916_v30, %v908_v42 }
 0x154   : > { %vm931_vm0 = vcmp.ge.f32.partialorder %v919_v43, 0.0  ;;  %vm932_vm1 = vcmp.ge.f32.partialorder %v920_v44, 0.0  ;;  %v943_v51 = vmul.f32 0.2, %v919_v43  ;;  %v944_v52 = vmul.f32 0.2, %v920_v44 }
 0x155   : > { %vm933_vm2 = vcmp.ge.f32.partialorder %v921_v45, 0.0  ;;  %vm934_vm3 = vcmp.ge.f32.partialorder %v922_v46, 0.0  ;;  %v945_v53 = vmul.f32 0.2, %v921_v45  ;;  %v946_v54 = vmul.f32 0.2, %v922_v46 }
 0x156   : > { %v955_v55 = vsel %vm931_vm0, %v919_v43, %v943_v51  ;;  %v956_v56 = vsel %vm932_vm1, %v920_v44, %v944_v52  ;;  %vm935_vm4 = vcmp.ge.f32.partialorder %v923_v47, 0.0  ;;  %vm936_vm5 = vcmp.ge.f32.partialorder %v924_v48, 0.0 }
 0x157   : > { %v967_v58 = vpack.c.bf16 %v956_v56, %v955_v55  ;;  %v957_v59 = vsel %vm933_vm2, %v921_v45, %v945_v53  ;;  %v958_v60 = vsel %vm934_vm3, %v922_v46, %v946_v54  ;;  %v947_v61 = vmul.f32 0.2, %v923_v47 }
 0x158   : > { %v968_v1 = vpack.c.bf16 %v958_v60, %v957_v59  ;;  %v948_v2 = vmul.f32 0.2, %v924_v48  ;;  %vm937_vm6 = vcmp.ge.f32.partialorder %v925_v49, 0.0  ;;  %vm938_vm7 = vcmp.ge.f32.partialorder %v926_v50, 0.0 }
 0x159   : > { %973 = vst [vmem:[%s1783_s15] sm:$0xff] %v967_v58  ;;  %v959_v3 = vsel %vm935_vm4, %v923_v47, %v947_v61  ;;  %v949_v4 = vmul.f32 0.2, %v925_v49  ;;  %v950_v5 = vmul.f32 0.2, %v926_v50  ;;  %v909_v6 = vmul.f32 %v897_v24, %v891_v57 }
 0x15a   : > { %974 = vst [vmem:[%s1783_s15 + $0x8] sm:$0xff] %v968_v1  ;;  %v960_v7 = vsel %vm936_vm5, %v924_v48, %v948_v2  ;;  %v910_v8 = vmul.f32 %v898_v25, %v892_v62  ;;  %v911_v9 = vmul.f32 %v897_v24, %v893_v63  ;;  %v912_v10 = vmul.f32 %v898_v25, %v894_v0 }
 0x15b   : > { %v969_v11 = vpack.c.bf16 %v960_v7, %v959_v3  ;;  %v961_v12 = vsel %vm937_vm6, %v925_v49, %v949_v4  ;;  %v962_v13 = vsel %vm938_vm7, %v926_v50, %v950_v5  ;;  %v927_v14 = vadd.f32 %v915_v29, %v909_v6 }
 0x15c   : > { %v970_v15 = vpack.c.bf16 %v962_v13, %v961_v12  ;;  %v928_v16 = vadd.f32 %v916_v30, %v910_v8  ;;  %v929_v17 = vadd.f32 %v915_v29, %v911_v9  ;;  %v930_v18 = vadd.f32 %v916_v30, %v912_v10 }
 0x15d   : > { %975 = vst [vmem:[%s1783_s15 + $0x10] sm:$0xff] %v969_v11  ;;  %vm939_vm8 = vcmp.ge.f32.partialorder %v927_v14, 0.0  ;;  %v951_v19 = vmul.f32 0.2, %v927_v14 }
 0x15e   : > { %976 = vst [vmem:[%s1783_s15 + $0x18] sm:$0xff] %v970_v15  ;;  %vm940_vm9 = vcmp.ge.f32.partialorder %v928_v16, 0.0  ;;  %v952_v20 = vmul.f32 0.2, %v928_v16  ;;  %vm941_vm10 = vcmp.ge.f32.partialorder %v929_v17, 0.0  ;;  %vm942_vm11 = vcmp.ge.f32.partialorder %v930_v18, 0.0 }
 0x15f   : > { %v963_v21 = vsel %vm939_vm8, %v927_v14, %v951_v19  ;;  %v953_v22 = vmul.f32 0.2, %v929_v17  ;;  %v954_v23 = vmul.f32 0.2, %v930_v18 }
 0x160   : > { %v964_v24 = vsel %vm940_vm9, %v928_v16, %v952_v20 }
 0x161   : > { %v971_v25 = vpack.c.bf16 %v964_v24, %v963_v21  ;;  %v965_v26 = vsel %vm941_vm10, %v929_v17, %v953_v22  ;;  %v966_v27 = vsel %vm942_vm11, %v930_v18, %v954_v23 }
 0x162   : > { %v972_v28 = vpack.c.bf16 %v966_v27, %v965_v26 }
 0x163   : > { %977 = vst [vmem:[%s1783_s15 + $0x20] sm:$0xff] %v971_v25 }
 0x164   : > { %978 = vst [vmem:[%s1783_s15 + $0x28] sm:$0xff] %v972_v28 }
 0x165 PF: > { %985 = sbr.rel (!%p1675_p12) target bundleno = 365 (0x16d), region = 124  ;;  %s1374_s21 = sshll.u32 (%p1675_p12), %s1541_s22, 3  ;;  %v1030_v29 = vld [vmem:[%s1783_s15] sm:$0xff] (%p1675_p12)  ;;  %v1032_v30 = vld [vmem:[%s1783_s15 + $0x8] sm:$0xff] (%p1675_p12)  ;;  %v1034_v31 = vld [vmem:[%s1783_s15 + $0x10] sm:$0xff] (%p1675_p12) }
 0x166   : > { %s991_s29 = scalar_lea.vmem (%p1675_p12), %s1929_s4, %s1374_s21  ;;  %v1036_v32 = vld [vmem:[%s1783_s15 + $0x18] sm:$0xff] (%p1675_p12) }
 0x167   : > { %1031 = vst [vmem:[%s991_s29] sm:$0xff] (%p1675_p12), %v1030_v29 }
 0x168   : > { %1033 = vst [vmem:[%s991_s29 + $0x10] sm:$0xff] (%p1675_p12), %v1032_v30 }
 0x169   : > { %1035 = vst [vmem:[%s991_s29 + $0x20] sm:$0xff] (%p1675_p12), %v1034_v31 }
 0x16a   : > { %v1038_v33 = vld [vmem:[%s1783_s15 + $0x20] sm:$0xff]  ;;  %1037 = vst [vmem:[%s991_s29 + $0x30] sm:$0xff] %v1036_v32 }
 0x16b   : > { %v1040_v34 = vld [vmem:[%s1783_s15 + $0x28] sm:$0xff]  ;;  %1039 = vst [vmem:[%s991_s29 + $0x40] sm:$0xff] %v1038_v33 }
 0x16c   : > { %1041 = vst [vmem:[%s991_s29 + $0x50] sm:$0xff] %v1040_v34 }
 0x16d PF: > { %s14_s25 = sadd.s32 1, %s1553_s25   ;;  %s1941_s14 = sld [smem:[#allocation6_spill]] }
 0x16e   : > { %p11_p6 = scmp.ge.s32.totalorder %s14_s25, 20   ;;  %s1942_s30 = sld [smem:[#allocation7_spill]] }
 0x16f   : > { %s1943_s15 = smov %s1517_s16  ;;  %s1944_s16 = smov %s1673_s13 }
 0x170   : > { %s1945_s17 = smov %s1525_s18  ;;  %s1946_s18 = smov %s1670_s12 }
 0x171   : > { %s1947_s19 = smov %s1533_s20  ;;  %s1948_s20 = smov %s1656_s7 }
 0x172   : > { %s1949_s21 = smov %s1545_s23  ;;  %s1950_s22 = smov %s1549_s24 }
 0x173   : > { %s1951_s23 = smov %s1941_s14  ;;  %13 = sbr.rel (!%p11_p6) target bundleno = 9 (0x9), region = 207 }
 0x174   : > { %s1952_s24 = smov %s1942_s30 }

// kernel: attend_crnn_forward.20
= control target key start
LH: loop header
LB: loop body
LE: loop exit
PB: predicated region body
PF: predicated region fallthrough
CT: control target
= control target key end

     0   :  { %s1925_s0 = inlined_call_operand.vmem [shape: bf16[48,4608], index: 0, kind: input, shape index: {}]   ;;  %s1926_s1 = inlined_call_operand.vmem [shape: bf16[4608,512], index: 1, kind: input, shape index: {}]   ;;  %s1927_s2 = inlined_call_operand.vmem [shape: f32[1,512], index: 2, kind: input, shape index: {}]   ;;  %s1928_s3 = inlined_call_operand.vmem [shape: f32[1,512], index: 3, kind: input, shape index: {}]   ;;  %s1929_s4 = inlined_call_operand.vmem [shape: bf16[48,512], index: 4, kind: output, shape index: {}]  }
   0x1   :  { %1932 = sst [smem:[#allocation8_spill]] %s1925_s0 }
   0x2   :  { %1933 = sst [smem:[#allocation9_spill]] %s1926_s1 }
   0x3   :  { %s1581_s15 = smov 0   ;;  %s1583_s16 = smov 0  }
   0x4   :  { %s1585_s17 = smov 0   ;;  %s1587_s18 = smov 0  }
   0x5   :  { %s1589_s19 = smov 0   ;;  %s1591_s20 = smov 0  }
   0x6   :  { %s1593_s21 = smov 0   ;;  %s1595_s22 = smov 0  }
   0x7   :  { %s1597_s23 = smov 0   ;;  %s1599_s24 = smov 0  }
   0x8   :  { %s1601_s25 = smov 0  }
   0x9 LB: > { %s1161_s26 = sadd.s32 4294967295, %s1553_s25   ;;  %s26_s27 = sadd.s32 1, %s1545_s23  ;;  %s1553_s25 = sphi %s1601_s25, %s14_s25   ;;  %s1549_s24 = sphi %s1599_s24, %s1952_s24   ;;  %s1545_s23 = sphi %s1597_s23, %s1951_s23   ;;  %s1541_s22 = sphi %s1595_s22, %s1950_s22   ;;  %s1537_s21 = sphi %s1593_s21, %s1949_s21   ;;  %s1533_s20 = sphi %s1591_s20, %s1948_s20   ;;  %s1529_s19 = sphi %s1589_s19, %s1947_s19   ;;  %s1525_s18 = sphi %s1587_s18, %s1946_s18   ;;  %s1521_s17 = sphi %s1585_s17, %s1945_s17   ;;  %s1517_s16 = sphi %s1583_s16, %s1944_s16   ;;  %s1513_s15 = sphi %s1581_s15, %s1943_s15  }
   0xa   : > { %p27_p0 = scmp.ge.s32.totalorder %s26_s27, 18  ;;  %s29_s28 = sadd.s32 1, %s1549_s24 }
   0xb   : > { %s42_s29 = sadd.s32 1, %s1533_s20  ;;  %p49_p1 = scmp.ne.s32.totalorder %s1533_s20, %s1529_s19 }
   0xc   : > { %s1954_s27 = smov (%p27_p0, %s26_s27), 0  ;;  %s1956_s28 = smov (!%p27_p0, %s29_s28), %s1549_s24 }
   0xd   : > { %1934 = sst [smem:[#allocation6_spill]] %s1954_s27  ;;  %s38_s30 = ssub.s32 %s1545_s23, %s1954_s27 }
   0xe   : > { %p50_p2 = scmp.eq.s32.totalorder %s1553_s25, 0  ;;  %p31_p3 = scmp.ge.s32.totalorder %s1956_s28, 2 }
   0xf   : > { %p40_p4 = scmp.eq.s32.totalorder %s38_s30, 0  ;;  %s70_s6 = sadd.s32 1, %s1525_s18 }
  0x10   : > { %p1648_p5 = por %p50_p2, %p49_p1  ;;  %s1958_s28 = smov (%p31_p3, %s1956_s28), 0 }
  0x11   : > { %1936 = sst [smem:[#allocation7_spill]] %s1958_s28  ;;  %s66_s8 = ssub.s32 %s1549_s24, %s1958_s28 }
  0x12   : > { %s1656_s7 = scalar_select %p40_p4, %s1533_s20, %s42_s29  }
  0x13   : > { %p77_p6 = scmp.ne.s32.totalorder %s1525_s18, %s1521_s17  ;;  %s67_s9 = sor.u32 %s66_s8, %s38_s30 }
  0x14   : > { %p148_p7 = scmp.eq.s32.totalorder %s66_s8, 0  ;;  %p68_p8 = scmp.eq.s32.totalorder %s67_s9, 0 }
  0x15   : > { %p1662_p9 = por %p77_p6, %p50_p2  ;;  %s150_s11 = sadd.s32 1, %s1517_s16 }
  0x16   : > { %p160_p10 = scmp.ne.s32.totalorder %s1517_s16, %s1513_s15  ;;  %p161_p11 = scmp.eq.s32.totalorder %s1161_s26, 35 }
  0x17   : > { %s1670_s12 = scalar_select %p68_p8, %s1525_s18, %s70_s6  }
  0x18   : > { %s1673_s13 = scalar_select %p148_p7, %s1517_s16, %s150_s11  }
  0x19   : > { %p1675_p12 = por %p161_p11, %p160_p10  ;;  %p1164_p13 = scmp.ge.s32.totalorder %s1553_s25, 36 }
  0x1b   : > { %183 = sbr.rel (%p1164_p13) target bundleno = 90 (0x5a), region = 16 }
  0x20   : > { %186 = sbr.rel (!%p1648_p5) target bundleno = 48 (0x30), region = 20  ;;  %s188_s29 = sand.u32 (%p1648_p5), 1, %s1533_s20  }
  0x21   : > { %s1334_s30 = sshll.u32 (%p1648_p5), %s1545_s23, 3  ;;  %s1375_s8 = smul.u32 (%p1648_p5), 48, %s188_s29 }
  0x22   : > { %s1939_s0 = sld [smem:[#allocation8_spill]] (%p1648_p5) }
  0x23   : > { %s190_s26 = scalar_lea.vmem (%p1648_p5), [#allocation3], %s1375_s8 }
  0x28   : > { %s196_s11 = scalar_lea.vmem %s1939_s0, %s1334_s30 }
  0x29   : > { %v235_v0 = vld [vmem:[%s196_s11] sm:$0xff]  ;;  %v237_v1 = vld [vmem:[%s196_s11 + $0x90] sm:$0xff] }
  0x2a   : > { %v239_v2 = vld [vmem:[%s196_s11 + $0x120] sm:$0xff]  ;;  %236 = vst [vmem:[%s190_s26] sm:$0xff] %v235_v0  ;;  %v241_v3 = vld [vmem:[%s196_s11 + $0x1b0] sm:$0xff] }
  0x2b   : > { %238 = vst [vmem:[%s190_s26 + $0x8] sm:$0xff] %v237_v1  ;;  %v243_v4 = vld [vmem:[%s196_s11 + $0x240] sm:$0xff]  ;;  %v245_v5 = vld [vmem:[%s196_s11 + $0x2d0] sm:$0xff] }
  0x2c   : > { %240 = vst [vmem:[%s190_s26 + $0x10] sm:$0xff] %v239_v2 }
  0x2d   : > { %242 = vst [vmem:[%s190_s26 + $0x18] sm:$0xff] %v241_v3 }
  0x2e   : > { %244 = vst [vmem:[%s190_s26 + $0x20] sm:$0xff] %v243_v4 }
  0x2f   : > { %246 = vst [vmem:[%s190_s26 + $0x28] sm:$0xff] %v245_v5 }
  0x30 PF: > { %252 = sbr.rel (!%p1662_p9) target bundleno = 90 (0x5a), region = 58  ;;  %s254_s5 = sand.u32 (%p1662_p9), 1, %s1525_s18  }
  0x31   : > { %s1169_s29 = sshll.u32 (%p1662_p9), %s1549_s24, 1  ;;  %s1167_s30 = sshll.u32 (%p1662_p9), %s254_s5, 8 }
  0x32   : > { %s1335_s8 = sshll.u32 (%p1662_p9), %s1545_s23, 7  ;;  %s1940_s1 = sld [smem:[#allocation9_spill]] (%p1662_p9) }
  0x33   : > { %s260_s6 = sadd.s32 (%p1662_p9), %s1335_s8, %s1169_s29  ;;  %s1700_s10 = scalar_lea.vmem (%p1662_p9), [#allocation4], %s1167_s30 }
  0x34   : > { %s1171_s9 = sshll.u32 (%p1662_p9), %s260_s6, 2 }
  0x38   : > { %s1695_s11 = scalar_lea.vmem %s1940_s1, %s1171_s9 }
  0x39   : > { %v353_v6 = vld [vmem:[%s1695_s11] sm:$0xff]  ;;  %v355_v7 = vld [vmem:[%s1695_s11 + $0x10] sm:$0xff] }
  0x3a   : > { %v357_v8 = vld [vmem:[%s1695_s11 + $0x20] sm:$0xff]  ;;  %354 = vst [vmem:[%s1700_s10] sm:$0xff] %v353_v6  ;;  %v359_v9 = vld [vmem:[%s1695_s11 + $0x30] sm:$0xff] }
  0x3b   : > { %356 = vst [vmem:[%s1700_s10 + $0x8] sm:$0xff] %v355_v7  ;;  %v361_v10 = vld [vmem:[%s1695_s11 + $0x40] sm:$0xff]  ;;  %v363_v11 = vld [vmem:[%s1695_s11 + $0x50] sm:$0xff] }
  0x3c   : > { %358 = vst [vmem:[%s1700_s10 + $0x10] sm:$0xff] %v357_v8  ;;  %v365_v12 = vld [vmem:[%s1695_s11 + $0x60] sm:$0xff]  ;;  %v367_v13 = vld [vmem:[%s1695_s11 + $0x70] sm:$0xff] }
  0x3d   : > { %360 = vst [vmem:[%s1700_s10 + $0x18] sm:$0xff] %v359_v9  ;;  %v369_v14 = vld [vmem:[%s1695_s11 + $0x80] sm:$0xff]  ;;  %v371_v15 = vld [vmem:[%s1695_s11 + $0x90] sm:$0xff] }
  0x3e   : > { %362 = vst [vmem:[%s1700_s10 + $0x20] sm:$0xff] %v361_v10  ;;  %v373_v16 = vld [vmem:[%s1695_s11 + $0xa0] sm:$0xff]  ;;  %v375_v17 = vld [vmem:[%s1695_s11 + $0xb0] sm:$0xff] }
  0x3f   : > { %364 = vst [vmem:[%s1700_s10 + $0x28] sm:$0xff] %v363_v11  ;;  %v377_v18 = vld [vmem:[%s1695_s11 + $0xc0] sm:$0xff]  ;;  %v379_v19 = vld [vmem:[%s1695_s11 + $0xd0] sm:$0xff] }
  0x40   : > { %366 = vst [vmem:[%s1700_s10 + $0x30] sm:$0xff] %v365_v12  ;;  %v381_v20 = vld [vmem:[%s1695_s11 + $0xe0] sm:$0xff]  ;;  %v383_v21 = vld [vmem:[%s1695_s11 + $0xf0] sm:$0xff] }
  0x41   : > { %368 = vst [vmem:[%s1700_s10 + $0x38] sm:$0xff] %v367_v13  ;;  %v385_v22 = vld [vmem:[%s1695_s11 + $0x100] sm:$0xff]  ;;  %v387_v23 = vld [vmem:[%s1695_s11 + $0x110] sm:$0xff] }
  0x42   : > { %370 = vst [vmem:[%s1700_s10 + $0x40] sm:$0xff] %v369_v14  ;;  %v389_v24 = vld [vmem:[%s1695_s11 + $0x120] sm:$0xff]  ;;  %v391_v25 = vld [vmem:[%s1695_s11 + $0x130] sm:$0xff] }
  0x43   : > { %372 = vst [vmem:[%s1700_s10 + $0x48] sm:$0xff] %v371_v15  ;;  %v393_v26 = vld [vmem:[%s1695_s11 + $0x140] sm:$0xff]  ;;  %v395_v27 = vld [vmem:[%s1695_s11 + $0x150] sm:$0xff] }
  0x44   : > { %374 = vst [vmem:[%s1700_s10 + $0x50] sm:$0xff] %v373_v16  ;;  %v397_v28 = vld [vmem:[%s1695_s11 + $0x160] sm:$0xff]  ;;  %v399_v29 = vld [vmem:[%s1695_s11 + $0x170] sm:$0xff] }
  0x45   : > { %376 = vst [vmem:[%s1700_s10 + $0x58] sm:$0xff] %v375_v17  ;;  %v401_v30 = vld [vmem:[%s1695_s11 + $0x180] sm:$0xff]  ;;  %v403_v31 = vld [vmem:[%s1695_s11 + $0x190] sm:$0xff] }
  0x46   : > { %378 = vst [vmem:[%s1700_s10 + $0x60] sm:$0xff] %v377_v18  ;;  %v405_v32 = vld [vmem:[%s1695_s11 + $0x1a0] sm:$0xff]  ;;  %v407_v33 = vld [vmem:[%s1695_s11 + $0x1b0] sm:$0xff] }
  0x47   : > { %380 = vst [vmem:[%s1700_s10 + $0x68] sm:$0xff] %v379_v19  ;;  %v409_v34 = vld [vmem:[%s1695_s11 + $0x1c0] sm:$0xff]  ;;  %v411_v35 = vld [vmem:[%s1695_s11 + $0x1d0] sm:$0xff] }
  0x48   : > { %382 = vst [vmem:[%s1700_s10 + $0x70] sm:$0xff] %v381_v20  ;;  %v413_v36 = vld [vmem:[%s1695_s11 + $0x1e0] sm:$0xff]  ;;  %v415_v37 = vld [vmem:[%s1695_s11 + $0x1f0] sm:$0xff] }
  0x49   : > { %384 = vst [vmem:[%s1700_s10 + $0x78] sm:$0xff] %v383_v21 }
  0x4a   : > { %386 = vst [vmem:[%s1700_s10 + $0x80] sm:$0xff] %v385_v22 }
  0x4b   : > { %388 = vst [vmem:[%s1700_s10 + $0x88] sm:$0xff] %v387_v23 }
  0x4c   : > { %390 = vst [vmem:[%s1700_s10 + $0x90] sm:$0xff] %v389_v24 }
  0x4d   : > { %392 = vst [vmem:[%s1700_s10 + $0x98] sm:$0xff] %v391_v25 }
  0x4e   : > { %394 = vst [vmem:[%s1700_s10 + $0xa0] sm:$0xff] %v393_v26 }
  0x4f   : > { %396 = vst [vmem:[%s1700_s10 + $0xa8] sm:$0xff] %v395_v27 }
  0x50   : > { %398 = vst [vmem:[%s1700_s10 + $0xb0] sm:$0xff] %v397_v28 }
  0x51   : > { %400 = vst [vmem:[%s1700_s10 + $0xb8] sm:$0xff] %v399_v29 }
  0x52   : > { %402 = vst [vmem:[%s1700_s10 + $0xc0] sm:$0xff] %v401_v30 }
  0x53   : > { %404 = vst [vmem:[%s1700_s10 + $0xc8] sm:$0xff] %v403_v31 }
  0x54   : > { %406 = vst [vmem:[%s1700_s10 + $0xd0] sm:$0xff] %v405_v32 }
  0x55   : > { %408 = vst [vmem:[%s1700_s10 + $0xd8] sm:$0xff] %v407_v33 }
  0x56   : > { %410 = vst [vmem:[%s1700_s10 + $0xe0] sm:$0xff] %v409_v34 }
  0x57   : > { %412 = vst [vmem:[%s1700_s10 + $0xe8] sm:$0xff] %v411_v35 }
  0x58   : > { %414 = vst [vmem:[%s1700_s10 + $0xf0] sm:$0xff] %v413_v36 }
  0x59   : > { %416 = vst [vmem:[%s1700_s10 + $0xf8] sm:$0xff] %v415_v37 }
  0x5a PF: > { %p1172_p0 = scmp.ge.s32.totalorder %s1553_s25, 1  ;;  %p437_p1 = scmp.lt.s32.totalorder %s1553_s25, 37 }
  0x5c   : > { %p438_p2 = pnand %p1172_p0, %p437_p1 }
  0x5d   : > { %s444_s0 = sand.u32 (!%p438_p2), 1, %s1529_s19   ;;  %s451_s28 = sand.u32 (!%p438_p2), 1, %s1521_s17  }
  0x5e   : > { %441 = sbr.rel (%p438_p2) target bundleno = 365 (0x16d), region = 104  ;;  %s1173_s5 = sshll.u32 (!%p438_p2), %s451_s28, 8 }
  0x5f   : > { %s1376_s26 = smul.u32 (!%p438_p2), 48, %s444_s0  ;;  %s484_s29 = sand.u32 (!%p438_p2), 1, %s1513_s15  }
  0x60   : > { %s1377_s30 = smul.u32 (!%p438_p2), 48, %s484_s29  ;;  %s1174_s8 = sshll.u32 (!%p438_p2), %s1541_s22, 1 }
  0x61   : > { %p492_p3 = scmp.lt.s32.totalorder (!%p438_p2), %s1174_s8, 3  ;;  %s1779_s19 = scalar_lea.vmem (!%p438_p2), [#allocation3], %s1376_s26 }
  0x62   : > { %s1781_s17 = scalar_lea.vmem (!%p438_p2), [#allocation4], %s1173_s5  ;;  %s1783_s15 = scalar_lea.vmem (!%p438_p2), [#allocation5], %s1377_s30 }
  0x63   : > { %s1960_s8 = smov (!%p492_p3, %s1174_s8), 3  ;;  %p1176_p4 = scmp.ne.s32.totalorder %s1537_s21, 0 }
  0x64   : > { %s494_s11 = scalar_lea.vmem %s1927_s2, %s1960_s8  ;;  %s499_s27 = scalar_lea.vmem %s1928_s3, %s1960_s8 }
  0x65   : > { %506 = sbr.rel (%p1176_p4) target bundleno = 119 (0x77), region = 116 }
  0x6a   : > { %v1555_v38 = vmov 0.0  }
  0x6b   : > { %507 = vst [vmem:[#allocation2 + $0x30] sm:$0xff] %v1555_v38 }
  0x6c   : > { %508 = vst [vmem:[#allocation2] sm:$0xff] %v1555_v38 }
  0x6d   : > { %509 = vst [vmem:[#allocation2 + $0x58] sm:$0xff] %v1555_v38 }
  0x6e   : > { %510 = vst [vmem:[#allocation2 + $0x18] sm:$0xff] %v1555_v38 }
  0x6f   : > { %511 = vst [vmem:[#allocation2 + $0x50] sm:$0xff] %v1555_v38 }
  0x70   : > { %512 = vst [vmem:[#allocation2 + $0x20] sm:$0xff] %v1555_v38 }
  0x71   : > { %513 = vst [vmem:[#allocation2 + $0x8] sm:$0xff] %v1555_v38 }
  0x72   : > { %514 = vst [vmem:[#allocation2 + $0x38] sm:$0xff] %v1555_v38 }
  0x73   : > { %515 = vst [vmem:[#allocation2 + $0x28] sm:$0xff] %v1555_v38 }
  0x74   : > { %516 = vst [vmem:[#allocation2 + $0x48] sm:$0xff] %v1555_v38 }
  0x75   : > { %517 = vst [vmem:[#allocation2 + $0x10] sm:$0xff] %v1555_v38 }
  0x76   : > { %518 = vst [vmem:[#allocation2 + $0x40] sm:$0xff] %v1555_v38 }
  0x77 PF: > { %v1259_v39 = vld [vmem:[%s1781_s17 + $0x70] sm:$0xf]  ;;  %v1357_v40 = vld [vmem:[%s1781_s17 + $0x74] sm:$0xf0]  ;;  %v1356_v44 = vld [vmem:[%s1781_s17 + $0x74] sm:$0xf] }
  0x78   : > { %v1323_v41 = vld [vmem:[%s1781_s17 + $0xf0] sm:$0xf]  ;;  %v1260_v42 = vor.u32 %v1357_v40, %v1259_v39  ;;  %v1373_v43 = vld [vmem:[%s1781_s17 + $0xf4] sm:$0xf0]  ;;  %v1261_v45 = vld [vmem:[%s1781_s17 + $0x78] sm:$0xf0] }
  0x79   : > { %v1324_v46 = vor.u32 %v1373_v43, %v1323_v41  ;;  %v1264_v47 = vor.u32 %v1356_v44, %v1261_v45  ;;  %v1372_v48 = vld [vmem:[%s1781_s17 + $0xf4] sm:$0xf]  ;;  %v1325_v49 = vld [vmem:[%s1781_s17 + $0xf8] sm:$0xf0]  ;;  %v1251_v50 = vld [vmem:[%s1781_s17 + $0x60] sm:$0xf] }
  0x7a   : > { %759 = vmatpush.bf16.msra.mxu0 %v1260_v42  ;;  %v1328_v51 = vor.u32 %v1372_v48, %v1325_v49  ;;  %v1355_v52 = vld [vmem:[%s1781_s17 + $0x64] sm:$0xf0]  ;;  %v1315_v53 = vld [vmem:[%s1781_s17 + $0xe0] sm:$0xf]  ;;  %v1354_v57 = vld [vmem:[%s1781_s17 + $0x64] sm:$0xf] }
  0x7b   : > { %v1371_v54 = vld [vmem:[%s1781_s17 + $0xe4] sm:$0xf0]  ;;  %783 = vmatpush.bf16.msra.mxu1 %v1324_v46  ;;  %807 = vmatpush.bf16.msra.mxu2 %v1264_v47  ;;  %v1252_v55 = vor.u32 %v1355_v52, %v1251_v50  ;;  %v1253_v58 = vld [vmem:[%s1781_s17 + $0x68] sm:$0xf0]  ;;  %v1370_v59 = vld [vmem:[%s1781_s17 + $0xe4] sm:$0xf] }
  0x7c   : > { %v1316_v56 = vor.u32 %v1371_v54, %v1315_v53  ;;  %831 = vmatpush.bf16.msra.mxu3 %v1328_v51  ;;  %v1256_v60 = vor.u32 %v1354_v57, %v1253_v58  ;;  %v1317_v61 = vld [vmem:[%s1781_s17 + $0xe8] sm:$0xf0]  ;;  %v1243_v62 = vld [vmem:[%s1781_s17 + $0x50] sm:$0xf]  ;;  %v1353_v63 = vld [vmem:[%s1781_s17 + $0x54] sm:$0xf0] }
  0x7d   : > { %v1320_v0 = vor.u32 %v1370_v59, %v1317_v61  ;;  %v1307_v1 = vld [vmem:[%s1781_s17 + $0xd0] sm:$0xf]  ;;  %v1369_v2 = vld [vmem:[%s1781_s17 + $0xd4] sm:$0xf0]  ;;  %v1352_v3 = vld [vmem:[%s1781_s17 + $0x54] sm:$0xf]  ;;  %v1244_v4 = vor.u32 %v1353_v63, %v1243_v62 }
  0x7e   : > { %760 = vmatpush.bf16.msra.mxu0 %v1252_v55  ;;  %v1245_v5 = vld [vmem:[%s1781_s17 + $0x58] sm:$0xf0]  ;;  %v1368_v6 = vld [vmem:[%s1781_s17 + $0xd4] sm:$0xf]  ;;  %v1308_v8 = vor.u32 %v1369_v2, %v1307_v1  ;;  %v1235_v10 = vld [vmem:[%s1781_s17 + $0x40] sm:$0xf] }
  0x7f   : > { %v1309_v7 = vld [vmem:[%s1781_s17 + $0xd8] sm:$0xf0]  ;;  %784 = vmatpush.bf16.msra.mxu1 %v1316_v56  ;;  %808 = vmatpush.bf16.msra.mxu2 %v1256_v60  ;;  %v1248_v9 = vor.u32 %v1352_v3, %v1245_v5  ;;  %v1351_v11 = vld [vmem:[%s1781_s17 + $0x44] sm:$0xf0]  ;;  %v1299_v12 = vld [vmem:[%s1781_s17 + $0xc0] sm:$0xf] }
  0x80   : > { %832 = vmatpush.bf16.msra.mxu3 %v1320_v0  ;;  %v1312_v13 = vor.u32 %v1368_v6, %v1309_v7  ;;  %v1367_v14 = vld [vmem:[%s1781_s17 + $0xc4] sm:$0xf0]  ;;  %v1350_v15 = vld [vmem:[%s1781_s17 + $0x44] sm:$0xf]  ;;  %v1237_v16 = vld [vmem:[%s1781_s17 + $0x48] sm:$0xf0]  ;;  %v1236_v19 = vor.u32 %v1351_v11, %v1235_v10 }
  0x81   : > { %v1366_v17 = vld [vmem:[%s1781_s17 + $0xc4] sm:$0xf]  ;;  %v1301_v18 = vld [vmem:[%s1781_s17 + $0xc8] sm:$0xf0]  ;;  %v1300_v20 = vor.u32 %v1367_v14, %v1299_v12  ;;  %v1240_v21 = vor.u32 %v1350_v15, %v1237_v16  ;;  %v1227_v22 = vld [vmem:[%s1781_s17 + $0x30] sm:$0xf] }
  0x82   : > { %761 = vmatpush.bf16.msra.mxu0 %v1244_v4  ;;  %v1349_v23 = vld [vmem:[%s1781_s17 + $0x34] sm:$0xf0]  ;;  %v1291_v24 = vld [vmem:[%s1781_s17 + $0xb0] sm:$0xf]  ;;  %v1304_v25 = vor.u32 %v1366_v17, %v1301_v18  ;;  %v1348_v27 = vld [vmem:[%s1781_s17 + $0x34] sm:$0xf] }
  0x83   : > { %785 = vmatpush.bf16.msra.mxu1 %v1308_v8  ;;  %809 = vmatpush.bf16.msra.mxu2 %v1248_v9  ;;  %v1365_v26 = vld [vmem:[%s1781_s17 + $0xb4] sm:$0xf0]  ;;  %v1229_v28 = vld [vmem:[%s1781_s17 + $0x38] sm:$0xf0]  ;;  %v1364_v29 = vld [vmem:[%s1781_s17 + $0xb4] sm:$0xf]  ;;  %v1228_v31 = vor.u32 %v1349_v23, %v1227_v22 }
  0x84   : > { %833 = vmatpush.bf16.msra.mxu3 %v1312_v13  ;;  %v1293_v30 = vld [vmem:[%s1781_s17 + $0xb8] sm:$0xf0]  ;;  %v1292_v32 = vor.u32 %v1365_v26, %v1291_v24  ;;  %v1232_v33 = vor.u32 %v1348_v27, %v1229_v28  ;;  %v1219_v34 = vld [vmem:[%s1781_s17 + $0x20] sm:$0xf]  ;;  %v1347_v35 = vld [vmem:[%s1781_s17 + $0x24] sm:$0xf0] }
  0x85   : > { %v1283_v36 = vld [vmem:[%s1781_s17 + $0xa0] sm:$0xf]  ;;  %v1296_v37 = vor.u32 %v1364_v29, %v1293_v30  ;;  %v1363_v38 = vld [vmem:[%s1781_s17 + $0xa4] sm:$0xf0]  ;;  %v1346_v39 = vld [vmem:[%s1781_s17 + $0x24] sm:$0xf]  ;;  %v1220_v43 = vor.u32 %v1347_v35, %v1219_v34 }
  0x86   : > { %762 = vmatpush.bf16.msra.mxu0 %v1236_v19  ;;  %v1221_v40 = vld [vmem:[%s1781_s17 + $0x28] sm:$0xf0]  ;;  %v1362_v41 = vld [vmem:[%s1781_s17 + $0xa4] sm:$0xf]  ;;  %v1284_v44 = vor.u32 %v1363_v38, %v1283_v36  ;;  %v1211_v46 = vld [vmem:[%s1781_s17 + $0x10] sm:$0xf] }
  0x87   : > { %786 = vmatpush.bf16.msra.mxu1 %v1300_v20  ;;  %810 = vmatpush.bf16.msra.mxu2 %v1240_v21  ;;  %v1285_v42 = vld [vmem:[%s1781_s17 + $0xa8] sm:$0xf0]  ;;  %v1224_v45 = vor.u32 %v1346_v39, %v1221_v40  ;;  %v1345_v47 = vld [vmem:[%s1781_s17 + $0x14] sm:$0xf0]  ;;  %v1275_v48 = vld [vmem:[%s1781_s17 + $0x90] sm:$0xf] }
  0x88   : > { %834 = vmatpush.bf16.msra.mxu3 %v1304_v25  ;;  %v1288_v49 = vor.u32 %v1362_v41, %v1285_v42  ;;  %v1361_v50 = vld [vmem:[%s1781_s17 + $0x94] sm:$0xf0]  ;;  %v1344_v51 = vld [vmem:[%s1781_s17 + $0x14] sm:$0xf]  ;;  %v1213_v52 = vld [vmem:[%s1781_s17 + $0x18] sm:$0xf0]  ;;  %v1212_v55 = vor.u32 %v1345_v47, %v1211_v46 }
  0x89   : > { %v1360_v53 = vld [vmem:[%s1781_s17 + $0x94] sm:$0xf]  ;;  %v1277_v54 = vld [vmem:[%s1781_s17 + $0x98] sm:$0xf0]  ;;  %v1276_v56 = vor.u32 %v1361_v50, %v1275_v48  ;;  %v1216_v57 = vor.u32 %v1344_v51, %v1213_v52  ;;  %v1203_v58 = vld [vmem:[%s1781_s17] sm:$0xf] }
  0x8a   : > { %763 = vmatpush.bf16.msra.mxu0 %v1228_v31  ;;  %v1343_v59 = vld [vmem:[%s1781_s17 + $0x4] sm:$0xf0]  ;;  %v1267_v60 = vld [vmem:[%s1781_s17 + $0x80] sm:$0xf]  ;;  %v1280_v61 = vor.u32 %v1360_v53, %v1277_v54  ;;  %v1342_v63 = vld [vmem:[%s1781_s17 + $0x4] sm:$0xf] }
  0x8b   : > { %787 = vmatpush.bf16.msra.mxu1 %v1292_v32  ;;  %811 = vmatpush.bf16.msra.mxu2 %v1232_v33  ;;  %v1359_v62 = vld [vmem:[%s1781_s17 + $0x84] sm:$0xf0]  ;;  %v1205_v0 = vld [vmem:[%s1781_s17 + $0x8] sm:$0xf0]  ;;  %v1358_v1 = vld [vmem:[%s1781_s17 + $0x84] sm:$0xf]  ;;  %v1204_v3 = vor.u32 %v1343_v59, %v1203_v58 }
  0x8c   : > { %835 = vmatpush.bf16.msra.mxu3 %v1296_v37  ;;  %v1269_v2 = vld [vmem:[%s1781_s17 + $0x88] sm:$0xf0]  ;;  %v1179_v4 = vld [vmem:[%s1779_s19] sm:$0xf]  ;;  %v1337_v5 = vld [vmem:[%s1779_s19 + $0x4] sm:$0xf0]  ;;  %v1268_v6 = vor.u32 %v1359_v62, %v1267_v60  ;;  %v1208_v7 = vor.u32 %v1342_v63, %v1205_v0 }
  0x8d   : > { %v1336_v8 = vld [vmem:[%s1779_s19 + $0x4] sm:$0xf]  ;;  %v1181_v9 = vld [vmem:[%s1779_s19 + $0x8] sm:$0xf0]  ;;  %v1272_v10 = vor.u32 %v1358_v1, %v1269_v2  ;;  %v1180_v11 = vor.u32 %v1337_v5, %v1179_v4  ;;  %v1187_v13 = vld [vmem:[%s1779_s19 + $0x10] sm:$0xf] }
  0x8e   : > { %764 = vmatpush.bf16.msra.mxu0 %v1220_v43  ;;  %v1184_v12 = vor.u32 %v1336_v8, %v1181_v9  ;;  %v1339_v14 = vld [vmem:[%s1779_s19 + $0x14] sm:$0xf0]  ;;  %v1338_v15 = vld [vmem:[%s1779_s19 + $0x14] sm:$0xf]  ;;  %v1189_v16 = vld [vmem:[%s1779_s19 + $0x18] sm:$0xf0] }
  0x8f   : > { %788 = vmatpush.bf16.msra.mxu1 %v1284_v44  ;;  %812 = vmatpush.bf16.msra.mxu2 %v1224_v45  ;;  %v1188_v17 = vor.u32 %v1339_v14, %v1187_v13  ;;  %v1192_v18 = vor.u32 %v1338_v15, %v1189_v16  ;;  %v1195_v19 = vld [vmem:[%s1779_s19 + $0x20] sm:$0xf]  ;;  %v1341_v20 = vld [vmem:[%s1779_s19 + $0x24] sm:$0xf0]  ;;  %v1340_v21 = vld [vmem:[%s1779_s19 + $0x24] sm:$0xf] }
  0x90   : > { %836 = vmatpush.bf16.msra.mxu3 %v1288_v49  ;;  %v1197_v22 = vld [vmem:[%s1779_s19 + $0x28] sm:$0xf0]  ;;  %v1196_v23 = vor.u32 %v1341_v20, %v1195_v19  ;;  %v519_v26 = vld [vmem:[#allocation2 + $0x30] sm:$0xff]  ;;  %v520_v31 = vld [vmem:[#allocation2] sm:$0xff]  ;;  %p1329_p5 = scmp.ne.s32.totalorder %s1537_s21, 17 }
  0x91   : > { %v1200_v24 = vor.u32 %v1340_v21, %v1197_v22  ;;  %v521_v35 = vld [vmem:[#allocation2 + $0x58] sm:$0xff]  ;;  %v523_v45 = vld [vmem:[#allocation2 + $0x50] sm:$0xff]  ;;  %v524_v51 = vld [vmem:[#allocation2 + $0x20] sm:$0xff] }
  0x92   : > { %765 = vmatpush.bf16.msra.mxu0 %v1212_v55  ;;  %v522_v41 = vld [vmem:[#allocation2 + $0x18] sm:$0xff]  ;;  %v525_v55 = vld [vmem:[#allocation2 + $0x8] sm:$0xff] }
  0x93   : > { %789 = vmatpush.bf16.msra.mxu1 %v1276_v56  ;;  %813 = vmatpush.bf16.msra.mxu2 %v1216_v57  ;;  %v527_v1 = vld [vmem:[#allocation2 + $0x28] sm:$0xff] }
  0x94   : > { %837 = vmatpush.bf16.msra.mxu3 %v1280_v61  ;;  %v526_v61 = vld [vmem:[#allocation2 + $0x38] sm:$0xff] }
  0x96   : > { %766 = vmatpush.bf16.msra.mxu0 %v1204_v3 }
  0x97   : > { %790 = vmatpush.bf16.msra.mxu1 %v1268_v6  ;;  %814 = vmatpush.bf16.msra.mxu2 %v1208_v7  ;;  %v528_v7 = vld [vmem:[#allocation2 + $0x48] sm:$0xff] }
  0x98   : > { %838 = vmatpush.bf16.msra.mxu3 %v1272_v10 }
  0x99   : > { %767 = vmatmul.bf16.vlgmr.msra.gmra.mxu0 %v1180_v11 }
  0x9a   : > { %791 = vmatmul.bf16.vlgmr.msra.gmra.mxu1 %v1184_v12  ;;  %815 = vmatmul.bf16.vlgmr.msra.gmra.mxu2 %v1180_v11  ;;  %v529_v11 = vld [vmem:[#allocation2 + $0x10] sm:$0xff] }
  0x9b   : > { %839 = vmatmul.bf16.vlgmr.msra.gmra.mxu3 %v1184_v12 }
  0xa9   : > { %772 = vmatmul.bf16.gmra.mxu0 %v1188_v17 }
  0xaa   : > { %796 = vmatmul.bf16.gmra.mxu1 %v1192_v18  ;;  %820 = vmatmul.bf16.gmra.mxu2 %v1188_v17  ;;  %v530_v17 = vld [vmem:[#allocation2 + $0x40] sm:$0xff] }
  0xab   : > { %844 = vmatmul.bf16.gmra.mxu3 %v1192_v18 }
  0xb9   : > { %777 = vmatmul.bf16.gmra.mxu0 %v1196_v23 }
  0xba   : > { %801 = vmatmul.bf16.gmra.mxu1 %v1200_v24  ;;  %825 = vmatmul.bf16.gmra.mxu2 %v1196_v23 }
  0xbb   : > { %849 = vmatmul.bf16.gmra.mxu3 %v1200_v24 }
 0x116   : > { %v768_v25 = vpop.f32.mrf.mxu0 }
 0x117   : > { %v792_v27 = vpop.f32.mrf.mxu1 }
 0x118   : > { %v793_v28 = vadd.f32 %v792_v27, %v768_v25 }
 0x11a   : > { %v855_v29 = vadd.f32 %v793_v28, %v519_v26 }
 0x11c   : > { %867 = vst [vmem:[#allocation2 + $0x30] sm:$0xff] %v855_v29 }
 0x11d   : > { %v816_v30 = vpop.f32.mrf.mxu2 }
 0x11e   : > { %v840_v32 = vpop.f32.mrf.mxu3  ;;  %v770_v33 = vpop.f32.mrf.mxu0 }
 0x11f   : > { %v841_v34 = vadd.f32 %v840_v32, %v816_v30  ;;  %v794_v36 = vpop.f32.mrf.mxu1 }
 0x120   : > { %v795_v37 = vadd.f32 %v794_v36, %v770_v33 }
 0x121   : > { %v856_v38 = vadd.f32 %v841_v34, %v520_v31 }
 0x122   : > { %v857_v39 = vadd.f32 %v795_v37, %v521_v35 }
 0x123   : > { %868 = vst [vmem:[#allocation2] sm:$0xff] %v856_v38 }
 0x124   : > { %869 = vst [vmem:[#allocation2 + $0x58] sm:$0xff] %v857_v39 }
 0x125   : > { %v818_v40 = vpop.f32.mrf.mxu2 }
 0x126   : > { %v842_v42 = vpop.f32.mrf.mxu3  ;;  %v773_v43 = vpop.f32.mrf.mxu0 }
 0x127   : > { %v843_v44 = vadd.f32 %v842_v42, %v818_v40  ;;  %v797_v46 = vpop.f32.mrf.mxu1 }
 0x128   : > { %v798_v47 = vadd.f32 %v797_v46, %v773_v43 }
 0x129   : > { %v858_v48 = vadd.f32 %v843_v44, %v522_v41 }
 0x12a   : > { %v859_v49 = vadd.f32 %v798_v47, %v523_v45 }
 0x12b   : > { %870 = vst [vmem:[#allocation2 + $0x18] sm:$0xff] %v858_v48 }
 0x12c   : > { %871 = vst [vmem:[#allocation2 + $0x50] sm:$0xff] %v859_v49 }
 0x12d   : > { %v821_v50 = vpop.f32.mrf.mxu2 }
 0x12e   : > { %v845_v52 = vpop.f32.mrf.mxu3  ;;  %v775_v53 = vpop.f32.mrf.mxu0 }
 0x12f   : > { %v846_v54 = vadd.f32 %v845_v52, %v821_v50  ;;  %v799_v56 = vpop.f32.mrf.mxu1 }
 0x130   : > { %v800_v57 = vadd.f32 %v799_v56, %v775_v53 }
 0x131   : > { %v860_v58 = vadd.f32 %v846_v54, %v524_v51 }
 0x132   : > { %v861_v59 = vadd.f32 %v800_v57, %v525_v55 }
 0x133   : > { %872 = vst [vmem:[#allocation2 + $0x20] sm:$0xff] %v860_v58 }
 0x134   : > { %873 = vst [vmem:[#allocation2 + $0x8] sm:$0xff] %v861_v59 }
 0x135   : > { %v823_v60 = vpop.f32.mrf.mxu2 }
 0x136   : > { %v847_v62 = vpop.f32.mrf.mxu3  ;;  %v778_v63 = vpop.f32.mrf.mxu0 }
 0x137   : > { %v848_v0 = vadd.f32 %v847_v62, %v823_v60  ;;  %v802_v2 = vpop.f32.mrf.mxu1 }
 0x138   : > { %v803_v3 = vadd.f32 %v802_v2, %v778_v63 }
 0x139   : > { %v862_v4 = vadd.f32 %v848_v0, %v526_v61 }
 0x13a   : > { %v863_v5 = vadd.f32 %v803_v3, %v527_v1 }
 0x13b   : > { %874 = vst [vmem:[#allocation2 + $0x38] sm:$0xff] %v862_v4 }
 0x13c   : > { %875 = vst [vmem:[#allocation2 + $0x28] sm:$0xff] %v863_v5 }
 0x13d   : > { %v826_v6 = vpop.f32.mrf.mxu2 }
 0x13e   : > { %v850_v8 = vpop.f32.mrf.mxu3  ;;  %v780_v9 = vpop.f32.mrf.mxu0 }
 0x13f   : > { %v851_v10 = vadd.f32 %v850_v8, %v826_v6  ;;  %v804_v12 = vpop.f32.mrf.mxu1 }
 0x140   : > { %v805_v13 = vadd.f32 %v804_v12, %v780_v9 }
 0x141   : > { %v864_v14 = vadd.f32 %v851_v10, %v528_v7 }
 0x142   : > { %v865_v15 = vadd.f32 %v805_v13, %v529_v11 }
 0x143   : > { %876 = vst [vmem:[#allocation2 + $0x48] sm:$0xff] %v864_v14 }
 0x144   : > { %877 = vst [vmem:[#allocation2 + $0x10] sm:$0xff] %v865_v15 }
 0x145   : > { %v828_v16 = vpop.f32.mrf.mxu2 }
 0x146   : > { %v852_v18 = vpop.f32.mrf.mxu3 }
 0x147   : > { %v853_v19 = vadd.f32 %v852_v18, %v828_v16  ;;  %882 = sbr.rel (%p1329_p5) target bundleno = 357 (0x165), region = 120 }
 0x149   : > { %v866_v20 = vadd.f32 %v853_v19, %v530_v17 }
 0x14b   : > { %878 = vst [vmem:[#allocation2 + $0x40] sm:$0xff] %v866_v20 }
 0x14c   : > { %v883_v21 = vld [vmem:[#allocation2 + $0x30] sm:$0xff]  ;;  %v884_v22 = vld [vmem:[#allocation2] sm:$0xff]  ;;  %v885_v27 = vld [vmem:[#allocation2 + $0x58] sm:$0xff] }
 0x14d   : > { %v895_v23 = vld [vmem:[%s494_s11] sm:$0x3]  ;;  %v886_v28 = vld [vmem:[#allocation2 + $0x18] sm:$0xff]  ;;  %v887_v31 = vld [vmem:[#allocation2 + $0x50] sm:$0xff] }
 0x14e   : > { %v897_v24 = vperm.slane %v895_v23, 0  ;;  %v898_v25 = vperm.slane %v895_v23, 1  ;;  %v913_v26 = vld [vmem:[%s499_s27] sm:$0x3]  ;;  %v889_v33 = vld [vmem:[#allocation2 + $0x8] sm:$0xff]  ;;  %v890_v38 = vld [vmem:[#allocation2 + $0x38] sm:$0xff] }
 0x14f   : > { %v915_v29 = vperm.slane %v913_v26, 0  ;;  %v916_v30 = vperm.slane %v913_v26, 1  ;;  %v888_v32 = vld [vmem:[#allocation2 + $0x20] sm:$0xff]  ;;  %v891_v57 = vld [vmem:[#allocation2 + $0x28] sm:$0xff]  ;;  %v893_v63 = vld [vmem:[#allocation2 + $0x10] sm:$0xff] }
 0x150   : > { %v901_v34 = vmul.f32 %v897_v24, %v883_v21  ;;  %v902_v35 = vmul.f32 %v898_v25, %v884_v22  ;;  %v903_v36 = vmul.f32 %v897_v24, %v885_v27  ;;  %v904_v37 = vmul.f32 %v898_v25, %v886_v28  ;;  %v892_v62 = vld [vmem:[#allocation2 + $0x48] sm:$0xff] }
 0x151   : > { %v905_v39 = vmul.f32 %v897_v24, %v887_v31  ;;  %v906_v40 = vmul.f32 %v898_v25, %v888_v32  ;;  %v907_v41 = vmul.f32 %v897_v24, %v889_v33  ;;  %v908_v42 = vmul.f32 %v898_v25, %v890_v38 }
 0x152   : > { %v919_v43 = vadd.f32 %v915_v29, %v901_v34  ;;  %v920_v44 = vadd.f32 %v916_v30, %v902_v35  ;;  %v921_v45 = vadd.f32 %v915_v29, %v903_v36  ;;  %v922_v46 = vadd.f32 %v916_v30, %v904_v37  ;;  %v894_v0 = vld [vmem:[#allocation2 + $0x40] sm:$0xff] }
 0x153   : > { %v923_v47 = vadd.f32 %v915_v29, %v905_v39  ;;  %v924_v48 = vadd.f32 %v916_v30, %v906_v40  ;;  %v925_v49 = vadd.f32 %v915_v29, %v907_v41  ;;  %v926_v50 = vadd.f32 %v916_v30, %v908_v42 }
 0x154   : > { %vm931_vm0 = vcmp.ge.f32.partialorder %v919_v43, 0.0  ;;  %vm932_vm1 = vcmp.ge.f32.partialorder %v920_v44, 0.0  ;;  %v943_v51 = vmul.f32 0.2, %v919_v43  ;;  %v944_v52 = vmul.f32 0.2, %v920_v44 }
 0x155   : > { %vm933_vm2 = vcmp.ge.f32.partialorder %v921_v45, 0.0  ;;  %vm934_vm3 = vcmp.ge.f32.partialorder %v922_v46, 0.0  ;;  %v945_v53 = vmul.f32 0.2, %v921_v45  ;;  %v946_v54 = vmul.f32 0.2, %v922_v46 }
 0x156   : > { %v955_v55 = vsel %vm931_vm0, %v919_v43, %v943_v51  ;;  %v956_v56 = vsel %vm932_vm1, %v920_v44, %v944_v52  ;;  %vm935_vm4 = vcmp.ge.f32.partialorder %v923_v47, 0.0  ;;  %vm936_vm5 = vcmp.ge.f32.partialorder %v924_v48, 0.0 }
 0x157   : > { %v967_v58 = vpack.c.bf16 %v956_v56, %v955_v55  ;;  %v957_v59 = vsel %vm933_vm2, %v921_v45, %v945_v53  ;;  %v958_v60 = vsel %vm934_vm3, %v922_v46, %v946_v54  ;;  %v947_v61 = vmul.f32 0.2, %v923_v47 }
 0x158   : > { %v968_v1 = vpack.c.bf16 %v958_v60, %v957_v59  ;;  %v948_v2 = vmul.f32 0.2, %v924_v48  ;;  %vm937_vm6 = vcmp.ge.f32.partialorder %v925_v49, 0.0  ;;  %vm938_vm7 = vcmp.ge.f32.partialorder %v926_v50, 0.0 }
 0x159   : > { %973 = vst [vmem:[%s1783_s15] sm:$0xff] %v967_v58  ;;  %v959_v3 = vsel %vm935_vm4, %v923_v47, %v947_v61  ;;  %v949_v4 = vmul.f32 0.2, %v925_v49  ;;  %v950_v5 = vmul.f32 0.2, %v926_v50  ;;  %v909_v6 = vmul.f32 %v897_v24, %v891_v57 }
 0x15a   : > { %974 = vst [vmem:[%s1783_s15 + $0x8] sm:$0xff] %v968_v1  ;;  %v960_v7 = vsel %vm936_vm5, %v924_v48, %v948_v2  ;;  %v910_v8 = vmul.f32 %v898_v25, %v892_v62  ;;  %v911_v9 = vmul.f32 %v897_v24, %v893_v63  ;;  %v912_v10 = vmul.f32 %v898_v25, %v894_v0 }
 0x15b   : > { %v969_v11 = vpack.c.bf16 %v960_v7, %v959_v3  ;;  %v961_v12 = vsel %vm937_vm6, %v925_v49, %v949_v4  ;;  %v962_v13 = vsel %vm938_vm7, %v926_v50, %v950_v5  ;;  %v927_v14 = vadd.f32 %v915_v29, %v909_v6 }
 0x15c   : > { %v970_v15 = vpack.c.bf16 %v962_v13, %v961_v12  ;;  %v928_v16 = vadd.f32 %v916_v30, %v910_v8  ;;  %v929_v17 = vadd.f32 %v915_v29, %v911_v9  ;;  %v930_v18 = vadd.f32 %v916_v30, %v912_v10 }
 0x15d   : > { %975 = vst [vmem:[%s1783_s15 + $0x10] sm:$0xff] %v969_v11  ;;  %vm939_vm8 = vcmp.ge.f32.partialorder %v927_v14, 0.0  ;;  %v951_v19 = vmul.f32 0.2, %v927_v14 }
 0x15e   : > { %976 = vst [vmem:[%s1783_s15 + $0x18] sm:$0xff] %v970_v15  ;;  %vm940_vm9 = vcmp.ge.f32.partialorder %v928_v16, 0.0  ;;  %v952_v20 = vmul.f32 0.2, %v928_v16  ;;  %vm941_vm10 = vcmp.ge.f32.partialorder %v929_v17, 0.0  ;;  %vm942_vm11 = vcmp.ge.f32.partialorder %v930_v18, 0.0 }
 0x15f   : > { %v963_v21 = vsel %vm939_vm8, %v927_v14, %v951_v19  ;;  %v953_v22 = vmul.f32 0.2, %v929_v17  ;;  %v954_v23 = vmul.f32 0.2, %v930_v18 }
 0x160   : > { %v964_v24 = vsel %vm940_vm9, %v928_v16, %v952_v20 }
 0x161   : > { %v971_v25 = vpack.c.bf16 %v964_v24, %v963_v21  ;;  %v965_v26 = vsel %vm941_vm10, %v929_v17, %v953_v22  ;;  %v966_v27 = vsel %vm942_vm11, %v930_v18, %v954_v23 }
 0x162   : > { %v972_v28 = vpack.c.bf16 %v966_v27, %v965_v26 }
 0x163   : > { %977 = vst [vmem:[%s1783_s15 + $0x20] sm:$0xff] %v971_v25 }
 0x164   : > { %978 = vst [vmem:[%s1783_s15 + $0x28] sm:$0xff] %v972_v28 }
 0x165 PF: > { %985 = sbr.rel (!%p1675_p12) target bundleno = 365 (0x16d), region = 124  ;;  %s1374_s21 = sshll.u32 (%p1675_p12), %s1541_s22, 3  ;;  %v1030_v29 = vld [vmem:[%s1783_s15] sm:$0xff] (%p1675_p12)  ;;  %v1032_v30 = vld [vmem:[%s1783_s15 + $0x8] sm:$0xff] (%p1675_p12)  ;;  %v1034_v31 = vld [vmem:[%s1783_s15 + $0x10] sm:$0xff] (%p1675_p12) }
 0x166   : > { %s991_s29 = scalar_lea.vmem (%p1675_p12), %s1929_s4, %s1374_s21  ;;  %v1036_v32 = vld [vmem:[%s1783_s15 + $0x18] sm:$0xff] (%p1675_p12) }
 0x167   : > { %1031 = vst [vmem:[%s991_s29] sm:$0xff] (%p1675_p12), %v1030_v29 }
 0x168   : > { %1033 = vst [vmem:[%s991_s29 + $0x10] sm:$0xff] (%p1675_p12), %v1032_v30 }
 0x169   : > { %1035 = vst [vmem:[%s991_s29 + $0x20] sm:$0xff] (%p1675_p12), %v1034_v31 }
 0x16a   : > { %v1038_v33 = vld [vmem:[%s1783_s15 + $0x20] sm:$0xff]  ;;  %1037 = vst [vmem:[%s991_s29 + $0x30] sm:$0xff] %v1036_v32 }
 0x16b   : > { %v1040_v34 = vld [vmem:[%s1783_s15 + $0x28] sm:$0xff]  ;;  %1039 = vst [vmem:[%s991_s29 + $0x40] sm:$0xff] %v1038_v33 }
 0x16c   : > { %1041 = vst [vmem:[%s991_s29 + $0x50] sm:$0xff] %v1040_v34 }
 0x16d PF: > { %s14_s25 = sadd.s32 1, %s1553_s25   ;;  %s1941_s14 = sld [smem:[#allocation6_spill]] }
 0x16e   : > { %p11_p6 = scmp.ge.s32.totalorder %s14_s25, 38   ;;  %s1942_s30 = sld [smem:[#allocation7_spill]] }
 0x16f   : > { %s1943_s15 = smov %s1517_s16  ;;  %s1944_s16 = smov %s1673_s13 }
 0x170   : > { %s1945_s17 = smov %s1525_s18  ;;  %s1946_s18 = smov %s1670_s12 }
 0x171   : > { %s1947_s19 = smov %s1533_s20  ;;  %s1948_s20 = smov %s1656_s7 }
 0x172   : > { %s1949_s21 = smov %s1545_s23  ;;  %s1950_s22 = smov %s1549_s24 }
 0x173   : > { %s1951_s23 = smov %s1941_s14  ;;  %13 = sbr.rel (!%p11_p6) target bundleno = 9 (0x9), region = 207 }
 0x174   : > { %s1952_s24 = smov %s1942_s30 }

// kernel: attend_crnn_forward.21
= control target key start
LH: loop header
LB: loop body
LE: loop exit
PB: predicated region body
PF: predicated region fallthrough
CT: control target
= control target key end

     0   :  { %s1378_s15 = smov 0   ;;  %s1380_s16 = smov 0   ;;  %s1705_s0 = inlined_call_operand.vmem [shape: bf16[16,2048], index: 0, kind: input, shape index: {}]   ;;  %s1706_s1 = inlined_call_operand.vmem [shape: bf16[2048,512], index: 1, kind: input, shape index: {}]   ;;  %s1707_s2 = inlined_call_operand.vmem [shape: f32[1,512], index: 2, kind: input, shape index: {}]   ;;  %s1708_s3 = inlined_call_operand.vmem [shape: f32[1,512], index: 3, kind: input, shape index: {}]   ;;  %s1709_s4 = inlined_call_operand.vmem [shape: bf16[16,512], index: 4, kind: output, shape index: {}]  }
   0x1   :  { %s1382_s17 = smov 0   ;;  %s1384_s18 = smov 0  }
   0x2   :  { %s1386_s19 = smov 0   ;;  %s1388_s20 = smov 0  }
   0x3   :  { %s1390_s21 = smov 0   ;;  %s1392_s22 = smov 0  }
   0x4   :  { %s1394_s23 = smov 0   ;;  %s1396_s24 = smov 0  }
   0x5   :  { %s1398_s25 = smov 0  }
   0x6 LB: > { %1713 = sst [smem:[#allocation6_spill]] %s1330_s20  ;;  %s977_s26 = sadd.s32 4294967295, %s1350_s25   ;;  %s1350_s25 = sphi %s1398_s25, %s14_s25   ;;  %s1346_s24 = sphi %s1396_s24, %s1731_s24   ;;  %s1342_s23 = sphi %s1394_s23, %s1730_s23   ;;  %s1338_s22 = sphi %s1392_s22, %s1729_s22   ;;  %s1334_s21 = sphi %s1390_s21, %s1728_s21   ;;  %s1330_s20 = sphi %s1388_s20, %s1721_s20   ;;  %s1326_s19 = sphi %s1386_s19, %s1720_s19   ;;  %s1322_s18 = sphi %s1384_s18, %s1727_s18   ;;  %s1318_s17 = sphi %s1382_s17, %s1726_s17   ;;  %s1314_s16 = sphi %s1380_s16, %s1725_s16   ;;  %s1310_s15 = sphi %s1378_s15, %s1724_s15  }
   0x7   : > { %s26_s27 = sadd.s32 1, %s1342_s23  ;;  %s29_s28 = sadd.s32 1, %s1346_s24 }
   0x8   : > { %p27_p0 = scmp.ge.s32.totalorder %s26_s27, 8  ;;  %s42_s29 = sadd.s32 1, %s1330_s20 }
   0x9   : > { %p49_p1 = scmp.ne.s32.totalorder %s1330_s20, %s1326_s19  ;;  %p50_p2 = scmp.eq.s32.totalorder %s1350_s25, 0 }
   0xa   : > { %s1733_s27 = smov (%p27_p0, %s26_s27), 0  ;;  %s1735_s28 = smov (!%p27_p0, %s29_s28), %s1346_s24 }
   0xb   : > { %1714 = sst [smem:[#allocation7_spill]] %s1733_s27  ;;  %s38_s30 = ssub.s32 %s1342_s23, %s1733_s27 }
   0xc   : > { %p31_p3 = scmp.ge.s32.totalorder %s1735_s28, 2  ;;  %p40_p4 = scmp.eq.s32.totalorder %s38_s30, 0 }
   0xd   : > { %p1445_p5 = por %p50_p2, %p49_p1  ;;  %s70_s6 = sadd.s32 1, %s1322_s18 }
   0xe   : > { %s1737_s28 = smov (%p31_p3, %s1735_s28), 0  ;;  %p77_p6 = scmp.ne.s32.totalorder %s1322_s18, %s1318_s17 }
   0xf   : > { %1716 = sst [smem:[#allocation8_spill]] %s1737_s28  ;;  %s66_s8 = ssub.s32 %s1346_s24, %s1737_s28 }
  0x10   : > { %s1453_s7 = scalar_select %p40_p4, %s1330_s20, %s42_s29  }
  0x11   : > { %s67_s9 = sor.u32 %s66_s8, %s38_s30  ;;  %p148_p7 = scmp.eq.s32.totalorder %s66_s8, 0 }
  0x12   : > { %1717 = sst [smem:[#allocation9_spill]] %s1453_s7  ;;  %p68_p8 = scmp.eq.s32.totalorder %s67_s9, 0 }
  0x13   : > { %p1459_p9 = por %p77_p6, %p50_p2  ;;  %s150_s11 = sadd.s32 1, %s1314_s16 }
  0x14   : > { %p160_p10 = scmp.ne.s32.totalorder %s1314_s16, %s1310_s15  ;;  %p161_p11 = scmp.eq.s32.totalorder %s977_s26, 15 }
  0x15   : > { %s1467_s12 = scalar_select %p68_p8, %s1322_s18, %s70_s6  }
  0x16   : > { %s1470_s13 = scalar_select %p148_p7, %s1314_s16, %s150_s11  }
  0x17   : > { %p1472_p12 = por %p161_p11, %p160_p10  ;;  %p980_p13 = scmp.ge.s32.totalorder %s1350_s25, 16 }
  0x19   : > { %183 = sbr.rel (%p980_p13) target bundleno = 75 (0x4b), region = 16 }
  0x1e   : > { %186 = sbr.rel (!%p1445_p5) target bundleno = 36 (0x24), region = 20  ;;  %s188_s29 = sand.u32 (%p1445_p5), 1, %s1330_s20  }
  0x1f   : > { %s1138_s30 = sshll.u32 (%p1445_p5), %s1342_s23, 3  ;;  %s981_s8 = sshll.u32 (%p1445_p5), %s188_s29, 4 }
  0x20   : > { %s196_s11 = scalar_lea.vmem (%p1445_p5), %s1705_s0, %s1138_s30  ;;  %s190_s26 = scalar_lea.vmem (%p1445_p5), [#allocation3], %s981_s8 }
  0x21   : > { %v227_v0 = vld [vmem:[%s196_s11] sm:$0xff] (%p1445_p5) }
  0x22   : > { %v229_v1 = vld [vmem:[%s196_s11 + $0x40] sm:$0xff] (%p1445_p5)  ;;  %228 = vst [vmem:[%s190_s26] sm:$0xff] (%p1445_p5), %v227_v0 }
  0x23   : > { %230 = vst [vmem:[%s190_s26 + $0x8] sm:$0xff] %v229_v1 }
  0x24 PF: > { %236 = sbr.rel (!%p1459_p9) target bundleno = 75 (0x4b), region = 58  ;;  %s238_s5 = sand.u32 (%p1459_p9), 1, %s1322_s18  }
  0x25   : > { %s986_s28 = sshll.u32 (%p1459_p9), %s1346_s24, 1  ;;  %s984_s27 = sshll.u32 (%p1459_p9), %s238_s5, 8 }
  0x26   : > { %s1139_s29 = sshll.u32 (%p1459_p9), %s1342_s23, 7 }
  0x27   : > { %s244_s7 = sadd.s32 (%p1459_p9), %s1139_s29, %s986_s28  ;;  %s1497_s28 = scalar_lea.vmem (%p1459_p9), [#allocation4], %s984_s27 }
  0x28   : > { %s988_s20 = sshll.u32 (%p1459_p9), %s244_s7, 2 }
  0x29   : > { %s1492_s9 = scalar_lea.vmem %s1706_s1, %s988_s20 }
  0x2a   : > { %v337_v2 = vld [vmem:[%s1492_s9] sm:$0xff]  ;;  %v339_v3 = vld [vmem:[%s1492_s9 + $0x10] sm:$0xff] }
  0x2b   : > { %v341_v4 = vld [vmem:[%s1492_s9 + $0x20] sm:$0xff]  ;;  %338 = vst [vmem:[%s1497_s28] sm:$0xff] %v337_v2  ;;  %v343_v5 = vld [vmem:[%s1492_s9 + $0x30] sm:$0xff] }
  0x2c   : > { %340 = vst [vmem:[%s1497_s28 + $0x8] sm:$0xff] %v339_v3  ;;  %v345_v6 = vld [vmem:[%s1492_s9 + $0x40] sm:$0xff]  ;;  %v347_v7 = vld [vmem:[%s1492_s9 + $0x50] sm:$0xff] }
  0x2d   : > { %342 = vst [vmem:[%s1497_s28 + $0x10] sm:$0xff] %v341_v4  ;;  %v349_v8 = vld [vmem:[%s1492_s9 + $0x60] sm:$0xff]  ;;  %v351_v9 = vld [vmem:[%s1492_s9 + $0x70] sm:$0xff] }
  0x2e   : > { %344 = vst [vmem:[%s1497_s28 + $0x18] sm:$0xff] %v343_v5  ;;  %v353_v10 = vld [vmem:[%s1492_s9 + $0x80] sm:$0xff]  ;;  %v355_v11 = vld [vmem:[%s1492_s9 + $0x90] sm:$0xff] }
  0x2f   : > { %346 = vst [vmem:[%s1497_s28 + $0x20] sm:$0xff] %v345_v6  ;;  %v357_v12 = vld [vmem:[%s1492_s9 + $0xa0] sm:$0xff]  ;;  %v359_v13 = vld [vmem:[%s1492_s9 + $0xb0] sm:$0xff] }
  0x30   : > { %348 = vst [vmem:[%s1497_s28 + $0x28] sm:$0xff] %v347_v7  ;;  %v361_v14 = vld [vmem:[%s1492_s9 + $0xc0] sm:$0xff]  ;;  %v363_v15 = vld [vmem:[%s1492_s9 + $0xd0] sm:$0xff] }
  0x31   : > { %350 = vst [vmem:[%s1497_s28 + $0x30] sm:$0xff] %v349_v8  ;;  %v365_v16 = vld [vmem:[%s1492_s9 + $0xe0] sm:$0xff]  ;;  %v367_v17 = vld [vmem:[%s1492_s9 + $0xf0] sm:$0xff] }
  0x32   : > { %352 = vst [vmem:[%s1497_s28 + $0x38] sm:$0xff] %v351_v9  ;;  %v369_v18 = vld [vmem:[%s1492_s9 + $0x100] sm:$0xff]  ;;  %v371_v19 = vld [vmem:[%s1492_s9 + $0x110] sm:$0xff] }
  0x33   : > { %354 = vst [vmem:[%s1497_s28 + $0x40] sm:$0xff] %v353_v10  ;;  %v373_v20 = vld [vmem:[%s1492_s9 + $0x120] sm:$0xff]  ;;  %v375_v21 = vld [vmem:[%s1492_s9 + $0x130] sm:$0xff] }
  0x34   : > { %356 = vst [vmem:[%s1497_s28 + $0x48] sm:$0xff] %v355_v11  ;;  %v377_v22 = vld [vmem:[%s1492_s9 + $0x140] sm:$0xff]  ;;  %v379_v23 = vld [vmem:[%s1492_s9 + $0x150] sm:$0xff] }
  0x35   : > { %358 = vst [vmem:[%s1497_s28 + $0x50] sm:$0xff] %v357_v12  ;;  %v381_v24 = vld [vmem:[%s1492_s9 + $0x160] sm:$0xff]  ;;  %v383_v25 = vld [vmem:[%s1492_s9 + $0x170] sm:$0xff] }
  0x36   : > { %360 = vst [vmem:[%s1497_s28 + $0x58] sm:$0xff] %v359_v13  ;;  %v385_v26 = vld [vmem:[%s1492_s9 + $0x180] sm:$0xff]  ;;  %v387_v27 = vld [vmem:[%s1492_s9 + $0x190] sm:$0xff] }
  0x37   : > { %362 = vst [vmem:[%s1497_s28 + $0x60] sm:$0xff] %v361_v14  ;;  %v389_v28 = vld [vmem:[%s1492_s9 + $0x1a0] sm:$0xff]  ;;  %v391_v29 = vld [vmem:[%s1492_s9 + $0x1b0] sm:$0xff] }
  0x38   : > { %364 = vst [vmem:[%s1497_s28 + $0x68] sm:$0xff] %v363_v15  ;;  %v393_v30 = vld [vmem:[%s1492_s9 + $0x1c0] sm:$0xff]  ;;  %v395_v31 = vld [vmem:[%s1492_s9 + $0x1d0] sm:$0xff] }
  0x39   : > { %366 = vst [vmem:[%s1497_s28 + $0x70] sm:$0xff] %v365_v16  ;;  %v397_v32 = vld [vmem:[%s1492_s9 + $0x1e0] sm:$0xff]  ;;  %v399_v33 = vld [vmem:[%s1492_s9 + $0x1f0] sm:$0xff] }
  0x3a   : > { %368 = vst [vmem:[%s1497_s28 + $0x78] sm:$0xff] %v367_v17 }
  0x3b   : > { %370 = vst [vmem:[%s1497_s28 + $0x80] sm:$0xff] %v369_v18 }
  0x3c   : > { %372 = vst [vmem:[%s1497_s28 + $0x88] sm:$0xff] %v371_v19 }
  0x3d   : > { %374 = vst [vmem:[%s1497_s28 + $0x90] sm:$0xff] %v373_v20 }
  0x3e   : > { %376 = vst [vmem:[%s1497_s28 + $0x98] sm:$0xff] %v375_v21 }
  0x3f   : > { %378 = vst [vmem:[%s1497_s28 + $0xa0] sm:$0xff] %v377_v22 }
  0x40   : > { %380 = vst [vmem:[%s1497_s28 + $0xa8] sm:$0xff] %v379_v23 }
  0x41   : > { %382 = vst [vmem:[%s1497_s28 + $0xb0] sm:$0xff] %v381_v24 }
  0x42   : > { %384 = vst [vmem:[%s1497_s28 + $0xb8] sm:$0xff] %v383_v25 }
  0x43   : > { %386 = vst [vmem:[%s1497_s28 + $0xc0] sm:$0xff] %v385_v26 }
  0x44   : > { %388 = vst [vmem:[%s1497_s28 + $0xc8] sm:$0xff] %v387_v27 }
  0x45   : > { %390 = vst [vmem:[%s1497_s28 + $0xd0] sm:$0xff] %v389_v28 }
  0x46   : > { %392 = vst [vmem:[%s1497_s28 + $0xd8] sm:$0xff] %v391_v29 }
  0x47   : > { %394 = vst [vmem:[%s1497_s28 + $0xe0] sm:$0xff] %v393_v30 }
  0x48   : > { %396 = vst [vmem:[%s1497_s28 + $0xe8] sm:$0xff] %v395_v31 }
  0x49   : > { %398 = vst [vmem:[%s1497_s28 + $0xf0] sm:$0xff] %v397_v32 }
  0x4a   : > { %400 = vst [vmem:[%s1497_s28 + $0xf8] sm:$0xff] %v399_v33 }
  0x4b PF: > { %p989_p0 = scmp.ge.s32.totalorder %s1350_s25, 1  ;;  %p421_p1 = scmp.lt.s32.totalorder %s1350_s25, 17 }
  0x4d   : > { %p422_p2 = pnand %p989_p0, %p421_p1 }
  0x4e   : > { %s428_s20 = sand.u32 (!%p422_p2), 1, %s1326_s19   ;;  %s435_s27 = sand.u32 (!%p422_p2), 1, %s1318_s17  }
  0x4f   : > { %425 = sbr.rel (%p422_p2) target bundleno = 302 (0x12e), region = 104  ;;  %s990_s7 = sshll.u32 (!%p422_p2), %s428_s20, 4 }
  0x50   : > { %s991_s10 = sshll.u32 (!%p422_p2), %s435_s27, 8  ;;  %s468_s8 = sand.u32 (!%p422_p2), 1, %s1310_s15  }
  0x51   : > { %s993_s11 = sshll.u32 (!%p422_p2), %s1338_s22, 1  ;;  %s992_s26 = sshll.u32 (!%p422_p2), %s468_s8, 4 }
  0x52   : > { %p476_p3 = scmp.lt.s32.totalorder (!%p422_p2), %s993_s11, 3  ;;  %s1576_s19 = scalar_lea.vmem (!%p422_p2), [#allocation3], %s990_s7 }
  0x53   : > { %s1578_s17 = scalar_lea.vmem (!%p422_p2), [#allocation4], %s991_s10  ;;  %s1580_s15 = scalar_lea.vmem (!%p422_p2), [#allocation5], %s992_s26 }
  0x54   : > { %s1739_s11 = smov (!%p476_p3, %s993_s11), 3  ;;  %p995_p4 = scmp.ne.s32.totalorder %s1334_s21, 0 }
  0x55   : > { %s478_s6 = scalar_lea.vmem %s1707_s2, %s1739_s11  ;;  %s483_s28 = scalar_lea.vmem %s1708_s3, %s1739_s11 }
  0x56   : > { %490 = sbr.rel (%p995_p4) target bundleno = 96 (0x60), region = 116 }
  0x5b   : > { %v1352_v34 = vmov 0.0  }
  0x5c   : > { %491 = vst [vmem:[#allocation2 + $0x10] sm:$0xff] %v1352_v34 }
  0x5d   : > { %492 = vst [vmem:[#allocation2] sm:$0xff] %v1352_v34 }
  0x5e   : > { %493 = vst [vmem:[#allocation2 + $0x18] sm:$0xff] %v1352_v34 }
  0x5f   : > { %494 = vst [vmem:[#allocation2 + $0x8] sm:$0xff] %v1352_v34 }
  0x60 PF: > { %v1062_v35 = vld [vmem:[%s1578_s17 + $0x70] sm:$0xf]  ;;  %v1157_v36 = vld [vmem:[%s1578_s17 + $0x74] sm:$0xf0]  ;;  %v1156_v40 = vld [vmem:[%s1578_s17 + $0x74] sm:$0xf] }
  0x61   : > { %v1126_v37 = vld [vmem:[%s1578_s17 + $0xf0] sm:$0xf]  ;;  %v1063_v38 = vor.u32 %v1157_v36, %v1062_v35  ;;  %v1173_v39 = vld [vmem:[%s1578_s17 + $0xf4] sm:$0xf0]  ;;  %v1064_v41 = vld [vmem:[%s1578_s17 + $0x78] sm:$0xf0] }
  0x62   : > { %v1127_v42 = vor.u32 %v1173_v39, %v1126_v37  ;;  %v1067_v43 = vor.u32 %v1156_v40, %v1064_v41  ;;  %v1172_v44 = vld [vmem:[%s1578_s17 + $0xf4] sm:$0xf]  ;;  %v1128_v45 = vld [vmem:[%s1578_s17 + $0xf8] sm:$0xf0]  ;;  %v1054_v46 = vld [vmem:[%s1578_s17 + $0x60] sm:$0xf] }
  0x63   : > { %703 = vmatpush.bf16.msra.mxu0 %v1063_v38  ;;  %v1131_v47 = vor.u32 %v1172_v44, %v1128_v45  ;;  %v1155_v48 = vld [vmem:[%s1578_s17 + $0x64] sm:$0xf0]  ;;  %v1118_v49 = vld [vmem:[%s1578_s17 + $0xe0] sm:$0xf]  ;;  %v1154_v53 = vld [vmem:[%s1578_s17 + $0x64] sm:$0xf] }
  0x64   : > { %v1171_v50 = vld [vmem:[%s1578_s17 + $0xe4] sm:$0xf0]  ;;  %717 = vmatpush.bf16.msra.mxu1 %v1127_v42  ;;  %731 = vmatpush.bf16.msra.mxu2 %v1067_v43  ;;  %v1055_v51 = vor.u32 %v1155_v48, %v1054_v46  ;;  %v1056_v54 = vld [vmem:[%s1578_s17 + $0x68] sm:$0xf0]  ;;  %v1170_v55 = vld [vmem:[%s1578_s17 + $0xe4] sm:$0xf] }
  0x65   : > { %v1119_v52 = vor.u32 %v1171_v50, %v1118_v49  ;;  %745 = vmatpush.bf16.msra.mxu3 %v1131_v47  ;;  %v1059_v56 = vor.u32 %v1154_v53, %v1056_v54  ;;  %v1120_v57 = vld [vmem:[%s1578_s17 + $0xe8] sm:$0xf0]  ;;  %v1046_v58 = vld [vmem:[%s1578_s17 + $0x50] sm:$0xf]  ;;  %v1153_v59 = vld [vmem:[%s1578_s17 + $0x54] sm:$0xf0] }
  0x66   : > { %v1123_v60 = vor.u32 %v1170_v55, %v1120_v57  ;;  %v1110_v61 = vld [vmem:[%s1578_s17 + $0xd0] sm:$0xf]  ;;  %v1169_v62 = vld [vmem:[%s1578_s17 + $0xd4] sm:$0xf0]  ;;  %v1152_v63 = vld [vmem:[%s1578_s17 + $0x54] sm:$0xf]  ;;  %v1047_v0 = vor.u32 %v1153_v59, %v1046_v58 }
  0x67   : > { %704 = vmatpush.bf16.msra.mxu0 %v1055_v51  ;;  %v1048_v1 = vld [vmem:[%s1578_s17 + $0x58] sm:$0xf0]  ;;  %v1168_v2 = vld [vmem:[%s1578_s17 + $0xd4] sm:$0xf]  ;;  %v1111_v4 = vor.u32 %v1169_v62, %v1110_v61  ;;  %v1038_v6 = vld [vmem:[%s1578_s17 + $0x40] sm:$0xf] }
  0x68   : > { %v1112_v3 = vld [vmem:[%s1578_s17 + $0xd8] sm:$0xf0]  ;;  %718 = vmatpush.bf16.msra.mxu1 %v1119_v52  ;;  %732 = vmatpush.bf16.msra.mxu2 %v1059_v56  ;;  %v1051_v5 = vor.u32 %v1152_v63, %v1048_v1  ;;  %v1151_v7 = vld [vmem:[%s1578_s17 + $0x44] sm:$0xf0]  ;;  %v1102_v8 = vld [vmem:[%s1578_s17 + $0xc0] sm:$0xf] }
  0x69   : > { %746 = vmatpush.bf16.msra.mxu3 %v1123_v60  ;;  %v1115_v9 = vor.u32 %v1168_v2, %v1112_v3  ;;  %v1167_v10 = vld [vmem:[%s1578_s17 + $0xc4] sm:$0xf0]  ;;  %v1150_v11 = vld [vmem:[%s1578_s17 + $0x44] sm:$0xf]  ;;  %v1040_v12 = vld [vmem:[%s1578_s17 + $0x48] sm:$0xf0]  ;;  %v1039_v15 = vor.u32 %v1151_v7, %v1038_v6 }
  0x6a   : > { %v1166_v13 = vld [vmem:[%s1578_s17 + $0xc4] sm:$0xf]  ;;  %v1104_v14 = vld [vmem:[%s1578_s17 + $0xc8] sm:$0xf0]  ;;  %v1103_v16 = vor.u32 %v1167_v10, %v1102_v8  ;;  %v1043_v17 = vor.u32 %v1150_v11, %v1040_v12  ;;  %v1030_v18 = vld [vmem:[%s1578_s17 + $0x30] sm:$0xf] }
  0x6b   : > { %705 = vmatpush.bf16.msra.mxu0 %v1047_v0  ;;  %v1149_v19 = vld [vmem:[%s1578_s17 + $0x34] sm:$0xf0]  ;;  %v1094_v20 = vld [vmem:[%s1578_s17 + $0xb0] sm:$0xf]  ;;  %v1107_v21 = vor.u32 %v1166_v13, %v1104_v14  ;;  %v1148_v23 = vld [vmem:[%s1578_s17 + $0x34] sm:$0xf] }
  0x6c   : > { %719 = vmatpush.bf16.msra.mxu1 %v1111_v4  ;;  %733 = vmatpush.bf16.msra.mxu2 %v1051_v5  ;;  %v1165_v22 = vld [vmem:[%s1578_s17 + $0xb4] sm:$0xf0]  ;;  %v1032_v24 = vld [vmem:[%s1578_s17 + $0x38] sm:$0xf0]  ;;  %v1164_v25 = vld [vmem:[%s1578_s17 + $0xb4] sm:$0xf]  ;;  %v1031_v27 = vor.u32 %v1149_v19, %v1030_v18 }
  0x6d   : > { %747 = vmatpush.bf16.msra.mxu3 %v1115_v9  ;;  %v1096_v26 = vld [vmem:[%s1578_s17 + $0xb8] sm:$0xf0]  ;;  %v1095_v28 = vor.u32 %v1165_v22, %v1094_v20  ;;  %v1035_v29 = vor.u32 %v1148_v23, %v1032_v24  ;;  %v1022_v30 = vld [vmem:[%s1578_s17 + $0x20] sm:$0xf]  ;;  %v1147_v31 = vld [vmem:[%s1578_s17 + $0x24] sm:$0xf0] }
  0x6e   : > { %v1086_v32 = vld [vmem:[%s1578_s17 + $0xa0] sm:$0xf]  ;;  %v1099_v33 = vor.u32 %v1164_v25, %v1096_v26  ;;  %v1163_v34 = vld [vmem:[%s1578_s17 + $0xa4] sm:$0xf0]  ;;  %v1146_v35 = vld [vmem:[%s1578_s17 + $0x24] sm:$0xf]  ;;  %v1023_v39 = vor.u32 %v1147_v31, %v1022_v30 }
  0x6f   : > { %706 = vmatpush.bf16.msra.mxu0 %v1039_v15  ;;  %v1024_v36 = vld [vmem:[%s1578_s17 + $0x28] sm:$0xf0]  ;;  %v1162_v37 = vld [vmem:[%s1578_s17 + $0xa4] sm:$0xf]  ;;  %v1087_v40 = vor.u32 %v1163_v34, %v1086_v32  ;;  %v1014_v42 = vld [vmem:[%s1578_s17 + $0x10] sm:$0xf] }
  0x70   : > { %720 = vmatpush.bf16.msra.mxu1 %v1103_v16  ;;  %734 = vmatpush.bf16.msra.mxu2 %v1043_v17  ;;  %v1088_v38 = vld [vmem:[%s1578_s17 + $0xa8] sm:$0xf0]  ;;  %v1027_v41 = vor.u32 %v1146_v35, %v1024_v36  ;;  %v1145_v43 = vld [vmem:[%s1578_s17 + $0x14] sm:$0xf0]  ;;  %v1078_v44 = vld [vmem:[%s1578_s17 + $0x90] sm:$0xf] }
  0x71   : > { %748 = vmatpush.bf16.msra.mxu3 %v1107_v21  ;;  %v1091_v45 = vor.u32 %v1162_v37, %v1088_v38  ;;  %v1161_v46 = vld [vmem:[%s1578_s17 + $0x94] sm:$0xf0]  ;;  %v1144_v47 = vld [vmem:[%s1578_s17 + $0x14] sm:$0xf]  ;;  %v1016_v48 = vld [vmem:[%s1578_s17 + $0x18] sm:$0xf0]  ;;  %v1015_v51 = vor.u32 %v1145_v43, %v1014_v42 }
  0x72   : > { %v1160_v49 = vld [vmem:[%s1578_s17 + $0x94] sm:$0xf]  ;;  %v1080_v50 = vld [vmem:[%s1578_s17 + $0x98] sm:$0xf0]  ;;  %v1079_v52 = vor.u32 %v1161_v46, %v1078_v44  ;;  %v1019_v53 = vor.u32 %v1144_v47, %v1016_v48  ;;  %v1006_v54 = vld [vmem:[%s1578_s17] sm:$0xf] }
  0x73   : > { %707 = vmatpush.bf16.msra.mxu0 %v1031_v27  ;;  %v1143_v55 = vld [vmem:[%s1578_s17 + $0x4] sm:$0xf0]  ;;  %v1070_v56 = vld [vmem:[%s1578_s17 + $0x80] sm:$0xf]  ;;  %v1083_v57 = vor.u32 %v1160_v49, %v1080_v50  ;;  %v1142_v59 = vld [vmem:[%s1578_s17 + $0x4] sm:$0xf] }
  0x74   : > { %721 = vmatpush.bf16.msra.mxu1 %v1095_v28  ;;  %735 = vmatpush.bf16.msra.mxu2 %v1035_v29  ;;  %v1159_v58 = vld [vmem:[%s1578_s17 + $0x84] sm:$0xf0]  ;;  %v1008_v60 = vld [vmem:[%s1578_s17 + $0x8] sm:$0xf0]  ;;  %v1158_v61 = vld [vmem:[%s1578_s17 + $0x84] sm:$0xf]  ;;  %v1007_v63 = vor.u32 %v1143_v55, %v1006_v54 }
  0x75   : > { %749 = vmatpush.bf16.msra.mxu3 %v1099_v33  ;;  %v1072_v62 = vld [vmem:[%s1578_s17 + $0x88] sm:$0xf0]  ;;  %v998_v0 = vld [vmem:[%s1576_s19] sm:$0xf]  ;;  %v1141_v1 = vld [vmem:[%s1576_s19 + $0x4] sm:$0xf0]  ;;  %v1071_v2 = vor.u32 %v1159_v58, %v1070_v56  ;;  %v1011_v3 = vor.u32 %v1142_v59, %v1008_v60 }
  0x76   : > { %v1140_v4 = vld [vmem:[%s1576_s19 + $0x4] sm:$0xf]  ;;  %v1000_v5 = vld [vmem:[%s1576_s19 + $0x8] sm:$0xf0]  ;;  %v1075_v6 = vor.u32 %v1158_v61, %v1072_v62  ;;  %v999_v7 = vor.u32 %v1141_v1, %v998_v0  ;;  %p1132_p5 = scmp.ne.s32.totalorder %s1334_s21, 7 }
  0x77   : > { %708 = vmatpush.bf16.msra.mxu0 %v1023_v39  ;;  %v1003_v8 = vor.u32 %v1140_v4, %v1000_v5  ;;  %v495_v10 = vld [vmem:[#allocation2 + $0x10] sm:$0xff]  ;;  %v496_v15 = vld [vmem:[#allocation2] sm:$0xff]  ;;  %v497_v19 = vld [vmem:[#allocation2 + $0x18] sm:$0xff] }
  0x78   : > { %722 = vmatpush.bf16.msra.mxu1 %v1087_v40  ;;  %736 = vmatpush.bf16.msra.mxu2 %v1027_v41  ;;  %v498_v25 = vld [vmem:[#allocation2 + $0x8] sm:$0xff] }
  0x79   : > { %750 = vmatpush.bf16.msra.mxu3 %v1091_v45 }
  0x7b   : > { %709 = vmatpush.bf16.msra.mxu0 %v1015_v51 }
  0x7c   : > { %723 = vmatpush.bf16.msra.mxu1 %v1079_v52  ;;  %737 = vmatpush.bf16.msra.mxu2 %v1019_v53 }
  0x7d   : > { %751 = vmatpush.bf16.msra.mxu3 %v1083_v57 }
  0x7f   : > { %710 = vmatpush.bf16.msra.mxu0 %v1007_v63 }
  0x80   : > { %724 = vmatpush.bf16.msra.mxu1 %v1071_v2  ;;  %738 = vmatpush.bf16.msra.mxu2 %v1011_v3 }
  0x81   : > { %752 = vmatpush.bf16.msra.mxu3 %v1075_v6 }
  0x82   : > { %711 = vmatmul.bf16.vlgmr.msra.gmra.mxu0 %v999_v7 }
  0x83   : > { %725 = vmatmul.bf16.vlgmr.msra.gmra.mxu1 %v1003_v8  ;;  %739 = vmatmul.bf16.vlgmr.msra.gmra.mxu2 %v999_v7 }
  0x84   : > { %753 = vmatmul.bf16.vlgmr.msra.gmra.mxu3 %v1003_v8 }
  0xff   : > { %v712_v9 = vpop.f32.mrf.mxu0 }
 0x100   : > { %v726_v11 = vpop.f32.mrf.mxu1 }
 0x101   : > { %v727_v12 = vadd.f32 %v726_v11, %v712_v9 }
 0x103   : > { %v759_v13 = vadd.f32 %v727_v12, %v495_v10 }
 0x105   : > { %763 = vst [vmem:[#allocation2 + $0x10] sm:$0xff] %v759_v13 }
 0x106   : > { %v740_v14 = vpop.f32.mrf.mxu2 }
 0x107   : > { %v754_v16 = vpop.f32.mrf.mxu3  ;;  %v714_v17 = vpop.f32.mrf.mxu0 }
 0x108   : > { %v755_v18 = vadd.f32 %v754_v16, %v740_v14  ;;  %v728_v20 = vpop.f32.mrf.mxu1 }
 0x109   : > { %v729_v21 = vadd.f32 %v728_v20, %v714_v17 }
 0x10a   : > { %v760_v22 = vadd.f32 %v755_v18, %v496_v15 }
 0x10b   : > { %v761_v23 = vadd.f32 %v729_v21, %v497_v19 }
 0x10c   : > { %764 = vst [vmem:[#allocation2] sm:$0xff] %v760_v22 }
 0x10d   : > { %765 = vst [vmem:[#allocation2 + $0x18] sm:$0xff] %v761_v23 }
 0x10e   : > { %v742_v24 = vpop.f32.mrf.mxu2 }
 0x10f   : > { %v756_v26 = vpop.f32.mrf.mxu3 }
 0x110   : > { %v757_v27 = vadd.f32 %v756_v26, %v742_v24  ;;  %770 = sbr.rel (%p1132_p5) target bundleno = 294 (0x126), region = 120 }
 0x112   : > { %v762_v28 = vadd.f32 %v757_v27, %v498_v25 }
 0x114   : > { %766 = vst [vmem:[#allocation2 + $0x8] sm:$0xff] %v762_v28 }
 0x115   : > { %v771_v29 = vld [vmem:[#allocation2 + $0x10] sm:$0xff]  ;;  %v772_v30 = vld [vmem:[#allocation2] sm:$0xff]  ;;  %v773_v35 = vld [vmem:[#allocation2 + $0x18] sm:$0xff] }
 0x116   : > { %v775_v31 = vld [vmem:[%s478_s6] sm:$0x3] }
 0x117   : > { %v777_v32 = vperm.slane %v775_v31, 0  ;;  %v778_v33 = vperm.slane %v775_v31, 1  ;;  %v785_v34 = vld [vmem:[%s483_s28] sm:$0x3] }
 0x118   : > { %v787_v37 = vperm.slane %v785_v34, 0  ;;  %v788_v38 = vperm.slane %v785_v34, 1 }
 0x119   : > { %v781_v39 = vmul.f32 %v777_v32, %v771_v29  ;;  %v782_v40 = vmul.f32 %v778_v33, %v772_v30  ;;  %v783_v41 = vmul.f32 %v777_v32, %v773_v35 }
 0x11b   : > { %v774_v36 = vld [vmem:[#allocation2 + $0x8] sm:$0xff]  ;;  %v791_v43 = vadd.f32 %v787_v37, %v781_v39  ;;  %v792_v44 = vadd.f32 %v788_v38, %v782_v40  ;;  %v793_v45 = vadd.f32 %v787_v37, %v783_v41 }
 0x11c   : > { %v784_v42 = vmul.f32 %v778_v33, %v774_v36 }
 0x11d   : > { %vm795_vm0 = vcmp.ge.f32.partialorder %v791_v43, 0.0  ;;  %vm796_vm1 = vcmp.ge.f32.partialorder %v792_v44, 0.0  ;;  %v799_v47 = vmul.f32 0.2, %v791_v43  ;;  %v800_v48 = vmul.f32 0.2, %v792_v44 }
 0x11e   : > { %v794_v46 = vadd.f32 %v788_v38, %v784_v42  ;;  %vm797_vm2 = vcmp.ge.f32.partialorder %v793_v45, 0.0  ;;  %v801_v49 = vmul.f32 0.2, %v793_v45 }
 0x11f   : > { %v803_v51 = vsel %vm795_vm0, %v791_v43, %v799_v47  ;;  %v804_v52 = vsel %vm796_vm1, %v792_v44, %v800_v48 }
 0x120   : > { %vm798_vm3 = vcmp.ge.f32.partialorder %v794_v46, 0.0  ;;  %v802_v50 = vmul.f32 0.2, %v794_v46  ;;  %v807_v53 = vpack.c.bf16 %v804_v52, %v803_v51  ;;  %v805_v54 = vsel %vm797_vm2, %v793_v45, %v801_v49 }
 0x122   : > { %v806_v55 = vsel %vm798_vm3, %v794_v46, %v802_v50  ;;  %809 = vst [vmem:[%s1580_s15] sm:$0xff] %v807_v53 }
 0x123   : > { %v808_v56 = vpack.c.bf16 %v806_v55, %v805_v54 }
 0x125   : > { %810 = vst [vmem:[%s1580_s15 + $0x8] sm:$0xff] %v808_v56 }
 0x126 PF: > { %817 = sbr.rel (!%p1472_p12) target bundleno = 302 (0x12e), region = 124  ;;  %s1174_s21 = sshll.u32 (%p1472_p12), %s1338_s22, 3 }
 0x127   : > { %s823_s26 = scalar_lea.vmem (%p1472_p12), %s1709_s4, %s1174_s21 }
 0x129   : > { %v854_v57 = vld [vmem:[%s1580_s15] sm:$0xff] (%p1472_p12) }
 0x12a   : > { %855 = vst [vmem:[%s823_s26] sm:$0xff] (%p1472_p12), %v854_v57 }
 0x12c   : > { %v856_v58 = vld [vmem:[%s1580_s15 + $0x8] sm:$0xff] }
 0x12d   : > { %857 = vst [vmem:[%s823_s26 + $0x10] sm:$0xff] %v856_v58 }
 0x12e PF: > { %s14_s25 = sadd.s32 1, %s1350_s25   ;;  %s1720_s19 = sld [smem:[#allocation6_spill]] }
 0x12f   : > { %p11_p6 = scmp.ge.s32.totalorder %s14_s25, 18   ;;  %s1721_s20 = sld [smem:[#allocation9_spill]] }
 0x130   : > { %s1722_s14 = sld [smem:[#allocation7_spill]]  ;;  %s1724_s15 = smov %s1314_s16 }
 0x131   : > { %s1723_s5 = sld [smem:[#allocation8_spill]]  ;;  %s1725_s16 = smov %s1470_s13 }
 0x132   : > { %s1726_s17 = smov %s1322_s18  ;;  %s1727_s18 = smov %s1467_s12 }
 0x133   : > { %s1728_s21 = smov %s1342_s23  ;;  %s1729_s22 = smov %s1346_s24 }
 0x134   :  { %13 = sbr.rel (!%p11_p6) target bundleno = 6 (0x6), region = 207 }
 0x136   : > { %s1730_s23 = smov %s1722_s14 }
 0x137   : > { %s1731_s24 = smov %s1723_s5 }

// kernel: attend_crnn_forward.22
= control target key start
LH: loop header
LB: loop body
LE: loop exit
PB: predicated region body
PF: predicated region fallthrough
CT: control target
= control target key end

     0   :  { %s1560_s0 = inlined_call_operand.vmem [shape: bf16[16,512], index: 0, kind: input, shape index: {}]   ;;  %s1561_s1 = inlined_call_operand.hbm [shape: bf16[512,1024], index: 1, kind: input, shape index: {}]   ;;  %s1562_s2 = inlined_call_operand.vmem [shape: f32[1,1024], index: 2, kind: input, shape index: {}]   ;;  %s1563_s3 = inlined_call_operand.vmem [shape: f32[1,1024], index: 3, kind: input, shape index: {}]   ;;  %s1564_s4 = inlined_call_operand.vmem [shape: f32[16,1024], index: 4, kind: output, shape index: {}]  }
   0x1   :  { %1569 = sst [smem:[#allocation15_spill]] %s1560_s0 }
   0x2   :  { %1570 = sst [smem:[#allocation16_spill]] %s1564_s4 }
   0x3   :  { %9 = vsyncpa [#allocation5], 0 }
   0x4   :  { %11 = vsyncpa [#allocation5 + $0x1], 0  ;;  %s1275_s15 = smov 0   ;;  %s1277_s16 = smov 0  }
   0x5   :  { %s1279_s17 = smov 0   ;;  %s1281_s18 = smov 0  }
   0x6   :  { %s1283_s19 = smov 0   ;;  %s1285_s20 = smov 0  }
   0x7   :  { %s1287_s21 = smov 0   ;;  %s1289_s22 = smov 0  }
   0x8   :  { %s1291_s23 = smov 0   ;;  %s1293_s24 = smov 0  }
   0x9   :  { %s1295_s25 = smov 0   ;;  %s1297_s26 = smov 0  }
   0xa LB: > { %1571 = sst [smem:[#allocation8_spill]] %s1204_s16  ;;  %s818_s27 = sadd.s32 4294967295, %s1244_s26   ;;  %s1244_s26 = sphi %s1297_s26, %s17_s26   ;;  %s1240_s25 = sphi %s1295_s25, %s1597_s25   ;;  %s1236_s24 = sphi %s1293_s24, %s1596_s24   ;;  %s1232_s23 = sphi %s1291_s23, %s1595_s23   ;;  %s1228_s22 = sphi %s1289_s22, %s1594_s22   ;;  %s1224_s21 = sphi %s1287_s21, %s1588_s21   ;;  %s1220_s20 = sphi %s1285_s20, %s1587_s20   ;;  %s1216_s19 = sphi %s1283_s19, %s1593_s19   ;;  %s1212_s18 = sphi %s1281_s18, %s1592_s18   ;;  %s1208_s17 = sphi %s1279_s17, %s1591_s17   ;;  %s1204_s16 = sphi %s1277_s16, %s1585_s16   ;;  %s1200_s15 = sphi %s1275_s15, %s1584_s15  }
   0xb   : > { %1572 = sst [smem:[#allocation9_spill]] %s1224_s21  ;;  %s29_s28 = sadd.s32 1, %s1236_s24 }
   0xc   : > { %p30_p0 = scmp.ge.s32.totalorder %s29_s28, 2  ;;  %s32_s29 = sadd.s32 1, %s1240_s25 }
   0xd   : > { %s45_s30 = sadd.s32 1, %s1224_s21  ;;  %p52_p1 = scmp.ne.s32.totalorder %s1224_s21, %s1220_s20 }
   0xe   : > { %s1599_s28 = smov (%p30_p0, %s29_s28), 0  ;;  %s1601_s29 = smov (!%p30_p0, %s32_s29), %s1240_s25 }
   0xf   : > { %1573 = sst [smem:[#allocation10_spill]] %s1599_s28  ;;  %s41_s5 = ssub.s32 %s1236_s24, %s1599_s28 }
  0x10   : > { %p53_p2 = scmp.eq.s32.totalorder %s1244_s26, 0  ;;  %p34_p3 = scmp.ge.s32.totalorder %s1601_s29, 4 }
  0x11   : > { %p43_p4 = scmp.eq.s32.totalorder %s41_s5, 0  ;;  %s73_s7 = sadd.s32 1, %s1216_s19 }
  0x12   : > { %p1347_p5 = por %p53_p2, %p52_p1  ;;  %s1603_s29 = smov (%p34_p3, %s1601_s29), 0 }
  0x13   : > { %1575 = sst [smem:[#allocation11_spill]] %s1603_s29  ;;  %s69_s9 = ssub.s32 %s1240_s25, %s1603_s29 }
  0x14   : > { %s1355_s8 = scalar_select %p43_p4, %s1224_s21, %s45_s30  }
  0x15   : > { %p80_p6 = scmp.ne.s32.totalorder %s1216_s19, %s1212_s18  ;;  %s70_s10 = sor.u32 %s69_s9, %s41_s5 }
  0x16   : > { %1576 = sst [smem:[#allocation12_spill]] %s1355_s8  ;;  %p86_p7 = scmp.ne.s32.totalorder %s1212_s18, %s1208_s17 }
  0x17   : > { %p71_p8 = scmp.eq.s32.totalorder %s70_s10, 0  ;;  %p1363_p9 = por %p80_p6, %p53_p2 }
  0x18   : > { %p87_p10 = scmp.eq.s32.totalorder %s818_s27, 0  ;;  %p151_p11 = scmp.eq.s32.totalorder %s69_s9, 0 }
  0x19   : > { %s1370_s12 = scalar_select %p71_p8, %s1216_s19, %s73_s7  }
  0x1a   : > { %p1372_p12 = por %p87_p10, %p86_p7  ;;  %s153_s14 = sadd.s32 1, %s1204_s16 }
  0x1b   : > { %1578 = sst [smem:[#allocation13_spill]] %s1370_s12  ;;  %p163_p13 = scmp.ne.s32.totalorder %s1204_s16, %s1200_s15 }
  0x1c   : > { %s1378_s30 = scalar_select %p151_p11, %s1204_s16, %s153_s14  }
  0x1d   : > { %p164_p0 = scmp.eq.s32.totalorder %s818_s27, 7  ;;  %p821_p2 = scmp.ge.s32.totalorder %s1244_s26, 8 }
  0x1e   : > { %1580 = sst [smem:[#allocation14_spill]] %s1378_s30 }
  0x1f   : > { %p1384_p1 = por %p164_p0, %p163_p13  ;;  %186 = sbr.rel (%p821_p2) target bundleno = 56 (0x38), region = 16 }
  0x24   : > { %189 = sbr.rel (!%p1347_p5) target bundleno = 48 (0x30), region = 20  ;;  %s191_s5 = sand.u32 (%p1347_p5), 1, %s1224_s21  }
  0x25   : > { %s979_s7 = sshll.u32 (%p1347_p5), %s1236_s24, 3  ;;  %s822_s9 = sshll.u32 (%p1347_p5), %s191_s5, 4 }
  0x26   : > { %s1582_s0 = sld [smem:[#allocation15_spill]] (%p1347_p5)  ;;  %s193_s27 = scalar_lea.vmem (%p1347_p5), [#allocation3], %s822_s9 }
  0x2c   : > { %s199_s29 = scalar_lea.vmem %s1582_s0, %s979_s7 }
  0x2d   : > { %v230_v0 = vld [vmem:[%s199_s29] sm:$0xff]  ;;  %v232_v1 = vld [vmem:[%s199_s29 + $0x10] sm:$0xff] }
  0x2e   : > { %231 = vst [vmem:[%s193_s27] sm:$0xff] %v230_v0 }
  0x2f   : > { %233 = vst [vmem:[%s193_s27 + $0x8] sm:$0xff] %v232_v1 }
  0x30 PF: > { %s240_s6 = sand.u32 1, %s1216_s19   ;;  %s827_s28 = sshll.u32 %s1240_s25, 1 }
  0x31   : > { %s825_s8 = sshll.u32 %s240_s6, 8  ;;  %s980_s21 = sshll.u32 %s1236_s24, 8 }
  0x32   : > { %s250_s12 = sadd.s32 %s980_s21, %s827_s28  ;;  %s244_s5 = scalar_lea.vmem [#allocation4], %s825_s8 }
  0x33   : > { %s255_s30 = sshll.u32 %s244_s5, 4  ;;  %s829_s16 = sshll.u32 %s250_s12, 2  ;;  %s256_s30 = int_to_ptr.vmem [resolvable:$true] %s255_s30 }
  0x34   : > { %s252_s29 = scalar_lea.hbm %s1561_s1, %s829_s16  ;;  %s241_s14 = scalar_lea.sflag [#allocation5], %s240_s6 }
  0x35   : > { %s253_s9 = sshll.u32 %s252_s29, 4  ;;  %s1246_s27 = smov 512   ;;  %s254_s9 = int_to_ptr.hbm [resolvable:$true] %s253_s9 }
  0x36   : > { %s1247_s0 = smov 128   ;;  %s1248_s4 = smov 8  }
  0x37   : > { %1016 = dma.hbm_to_vmem [thread:$0]  (%p1363_p9), %s254_s9, 4096, %s256_s30, %s241_s14, %s1246_s27, %s1247_s0, %s1248_s4  }
  0x38 PF: > { %p830_p3 = scmp.ge.s32.totalorder %s1244_s26, 1  ;;  %p279_p4 = scmp.lt.s32.totalorder %s1244_s26, 9 }
  0x3a   : > { %p280_p5 = pnand %p830_p3, %p279_p4 }
  0x3b   : > { %s286_s21 = sand.u32 (!%p280_p5), 1, %s1220_s20   ;;  %s292_s16 = sand.u32 (!%p280_p5), 1, %s1212_s18  }
  0x3c   : > { %283 = sbr.rel (%p280_p5) target bundleno = 286 (0x11e), region = 70  ;;  %s831_s28 = sshll.u32 (!%p280_p5), %s286_s21, 4 }
  0x3d   : > { %s832_s8 = sshll.u32 (!%p280_p5), %s292_s16, 8  ;;  %s1408_s12 = scalar_lea.vmem (!%p280_p5), [#allocation3], %s831_s28 }
  0x3e   : > { %s293_s6 = scalar_lea.sflag (!%p280_p5), [#allocation5], %s292_s16  ;;  %s1410_s5 = scalar_lea.vmem (!%p280_p5), [#allocation4], %s832_s8 }
  0x41   : > { %1195 = dma.done.wait (%p1372_p12), %s293_s6, 4096  }
  0x42   : > { %1197 = vsyncadd (%p1372_p12), %s293_s6, 4294963200  ;;  %s330_s0 = sand.u32 1, %s1200_s15   ;;  %s834_s4 = sshll.u32 %s1232_s23, 1 }
  0x43   : > { %s833_s11 = sshll.u32 %s330_s0, 5  ;;  %p338_p6 = scmp.lt.s32.totalorder %s834_s4, 7 }
  0x44   : > { %s1428_s13 = scalar_lea.vmem [#allocation6], %s833_s11  ;;  %p836_p7 = scmp.ne.s32.totalorder %s1228_s22, 0 }
  0x45   : > { %s1605_s4 = smov (!%p338_p6, %s834_s4), 7 }
  0x46   : > { %s340_s7 = scalar_lea.vmem %s1562_s2, %s1605_s4  ;;  %s345_s9 = scalar_lea.vmem %s1563_s3, %s1605_s4 }
  0x47   : > { %352 = sbr.rel (%p836_p7) target bundleno = 81 (0x51), region = 82 }
  0x4c   : > { %v1249_v2 = vmov 0.0  }
  0x4d   : > { %353 = vst [vmem:[#allocation2 + $0x10] sm:$0xff] %v1249_v2 }
  0x4e   : > { %354 = vst [vmem:[#allocation2] sm:$0xff] %v1249_v2 }
  0x4f   : > { %355 = vst [vmem:[#allocation2 + $0x18] sm:$0xff] %v1249_v2 }
  0x50   : > { %356 = vst [vmem:[#allocation2 + $0x8] sm:$0xff] %v1249_v2 }
  0x51 PF: > { %v903_v3 = vld [vmem:[%s1410_s5 + $0x70] sm:$0xf]  ;;  %v998_v4 = vld [vmem:[%s1410_s5 + $0x74] sm:$0xf0]  ;;  %v997_v8 = vld [vmem:[%s1410_s5 + $0x74] sm:$0xf] }
  0x52   : > { %v967_v5 = vld [vmem:[%s1410_s5 + $0xf0] sm:$0xf]  ;;  %v904_v6 = vor.u32 %v998_v4, %v903_v3  ;;  %v1014_v7 = vld [vmem:[%s1410_s5 + $0xf4] sm:$0xf0]  ;;  %v905_v9 = vld [vmem:[%s1410_s5 + $0x78] sm:$0xf0] }
  0x53   : > { %v968_v10 = vor.u32 %v1014_v7, %v967_v5  ;;  %v908_v11 = vor.u32 %v997_v8, %v905_v9  ;;  %v1013_v12 = vld [vmem:[%s1410_s5 + $0xf4] sm:$0xf]  ;;  %v969_v13 = vld [vmem:[%s1410_s5 + $0xf8] sm:$0xf0]  ;;  %v895_v14 = vld [vmem:[%s1410_s5 + $0x60] sm:$0xf] }
  0x54   : > { %565 = vmatpush.bf16.msra.mxu0 %v904_v6  ;;  %v972_v15 = vor.u32 %v1013_v12, %v969_v13  ;;  %v996_v16 = vld [vmem:[%s1410_s5 + $0x64] sm:$0xf0]  ;;  %v959_v17 = vld [vmem:[%s1410_s5 + $0xe0] sm:$0xf]  ;;  %v995_v21 = vld [vmem:[%s1410_s5 + $0x64] sm:$0xf] }
  0x55   : > { %v1012_v18 = vld [vmem:[%s1410_s5 + $0xe4] sm:$0xf0]  ;;  %579 = vmatpush.bf16.msra.mxu1 %v968_v10  ;;  %593 = vmatpush.bf16.msra.mxu2 %v908_v11  ;;  %v896_v19 = vor.u32 %v996_v16, %v895_v14  ;;  %v897_v22 = vld [vmem:[%s1410_s5 + $0x68] sm:$0xf0]  ;;  %v1011_v23 = vld [vmem:[%s1410_s5 + $0xe4] sm:$0xf] }
  0x56   : > { %v960_v20 = vor.u32 %v1012_v18, %v959_v17  ;;  %607 = vmatpush.bf16.msra.mxu3 %v972_v15  ;;  %v900_v24 = vor.u32 %v995_v21, %v897_v22  ;;  %v961_v25 = vld [vmem:[%s1410_s5 + $0xe8] sm:$0xf0]  ;;  %v887_v26 = vld [vmem:[%s1410_s5 + $0x50] sm:$0xf]  ;;  %v994_v27 = vld [vmem:[%s1410_s5 + $0x54] sm:$0xf0] }
  0x57   : > { %v964_v28 = vor.u32 %v1011_v23, %v961_v25  ;;  %v951_v29 = vld [vmem:[%s1410_s5 + $0xd0] sm:$0xf]  ;;  %v1010_v30 = vld [vmem:[%s1410_s5 + $0xd4] sm:$0xf0]  ;;  %v993_v31 = vld [vmem:[%s1410_s5 + $0x54] sm:$0xf]  ;;  %v888_v32 = vor.u32 %v994_v27, %v887_v26 }
  0x58   : > { %566 = vmatpush.bf16.msra.mxu0 %v896_v19  ;;  %v889_v33 = vld [vmem:[%s1410_s5 + $0x58] sm:$0xf0]  ;;  %v1009_v34 = vld [vmem:[%s1410_s5 + $0xd4] sm:$0xf]  ;;  %v952_v36 = vor.u32 %v1010_v30, %v951_v29  ;;  %v879_v38 = vld [vmem:[%s1410_s5 + $0x40] sm:$0xf] }
  0x59   : > { %v953_v35 = vld [vmem:[%s1410_s5 + $0xd8] sm:$0xf0]  ;;  %580 = vmatpush.bf16.msra.mxu1 %v960_v20  ;;  %594 = vmatpush.bf16.msra.mxu2 %v900_v24  ;;  %v892_v37 = vor.u32 %v993_v31, %v889_v33  ;;  %v992_v39 = vld [vmem:[%s1410_s5 + $0x44] sm:$0xf0]  ;;  %v943_v40 = vld [vmem:[%s1410_s5 + $0xc0] sm:$0xf] }
  0x5a   : > { %608 = vmatpush.bf16.msra.mxu3 %v964_v28  ;;  %v956_v41 = vor.u32 %v1009_v34, %v953_v35  ;;  %v1008_v42 = vld [vmem:[%s1410_s5 + $0xc4] sm:$0xf0]  ;;  %v991_v43 = vld [vmem:[%s1410_s5 + $0x44] sm:$0xf]  ;;  %v881_v44 = vld [vmem:[%s1410_s5 + $0x48] sm:$0xf0]  ;;  %v880_v47 = vor.u32 %v992_v39, %v879_v38 }
  0x5b   : > { %v1007_v45 = vld [vmem:[%s1410_s5 + $0xc4] sm:$0xf]  ;;  %v945_v46 = vld [vmem:[%s1410_s5 + $0xc8] sm:$0xf0]  ;;  %v944_v48 = vor.u32 %v1008_v42, %v943_v40  ;;  %v884_v49 = vor.u32 %v991_v43, %v881_v44  ;;  %v871_v50 = vld [vmem:[%s1410_s5 + $0x30] sm:$0xf] }
  0x5c   : > { %567 = vmatpush.bf16.msra.mxu0 %v888_v32  ;;  %v990_v51 = vld [vmem:[%s1410_s5 + $0x34] sm:$0xf0]  ;;  %v935_v52 = vld [vmem:[%s1410_s5 + $0xb0] sm:$0xf]  ;;  %v948_v53 = vor.u32 %v1007_v45, %v945_v46  ;;  %v989_v55 = vld [vmem:[%s1410_s5 + $0x34] sm:$0xf] }
  0x5d   : > { %581 = vmatpush.bf16.msra.mxu1 %v952_v36  ;;  %595 = vmatpush.bf16.msra.mxu2 %v892_v37  ;;  %v1006_v54 = vld [vmem:[%s1410_s5 + $0xb4] sm:$0xf0]  ;;  %v873_v56 = vld [vmem:[%s1410_s5 + $0x38] sm:$0xf0]  ;;  %v1005_v57 = vld [vmem:[%s1410_s5 + $0xb4] sm:$0xf]  ;;  %v872_v59 = vor.u32 %v990_v51, %v871_v50 }
  0x5e   : > { %609 = vmatpush.bf16.msra.mxu3 %v956_v41  ;;  %v937_v58 = vld [vmem:[%s1410_s5 + $0xb8] sm:$0xf0]  ;;  %v936_v60 = vor.u32 %v1006_v54, %v935_v52  ;;  %v876_v61 = vor.u32 %v989_v55, %v873_v56  ;;  %v863_v62 = vld [vmem:[%s1410_s5 + $0x20] sm:$0xf]  ;;  %v988_v63 = vld [vmem:[%s1410_s5 + $0x24] sm:$0xf0] }
  0x5f   : > { %v927_v0 = vld [vmem:[%s1410_s5 + $0xa0] sm:$0xf]  ;;  %v940_v1 = vor.u32 %v1005_v57, %v937_v58  ;;  %v1004_v2 = vld [vmem:[%s1410_s5 + $0xa4] sm:$0xf0]  ;;  %v987_v3 = vld [vmem:[%s1410_s5 + $0x24] sm:$0xf]  ;;  %v864_v7 = vor.u32 %v988_v63, %v863_v62 }
  0x60   : > { %568 = vmatpush.bf16.msra.mxu0 %v880_v47  ;;  %v865_v4 = vld [vmem:[%s1410_s5 + $0x28] sm:$0xf0]  ;;  %v1003_v5 = vld [vmem:[%s1410_s5 + $0xa4] sm:$0xf]  ;;  %v928_v8 = vor.u32 %v1004_v2, %v927_v0  ;;  %v855_v10 = vld [vmem:[%s1410_s5 + $0x10] sm:$0xf] }
  0x61   : > { %582 = vmatpush.bf16.msra.mxu1 %v944_v48  ;;  %596 = vmatpush.bf16.msra.mxu2 %v884_v49  ;;  %v929_v6 = vld [vmem:[%s1410_s5 + $0xa8] sm:$0xf0]  ;;  %v868_v9 = vor.u32 %v987_v3, %v865_v4  ;;  %v986_v11 = vld [vmem:[%s1410_s5 + $0x14] sm:$0xf0]  ;;  %v919_v12 = vld [vmem:[%s1410_s5 + $0x90] sm:$0xf] }
  0x62   : > { %610 = vmatpush.bf16.msra.mxu3 %v948_v53  ;;  %v932_v13 = vor.u32 %v1003_v5, %v929_v6  ;;  %v1002_v14 = vld [vmem:[%s1410_s5 + $0x94] sm:$0xf0]  ;;  %v985_v15 = vld [vmem:[%s1410_s5 + $0x14] sm:$0xf]  ;;  %v857_v16 = vld [vmem:[%s1410_s5 + $0x18] sm:$0xf0]  ;;  %v856_v19 = vor.u32 %v986_v11, %v855_v10 }
  0x63   : > { %v1001_v17 = vld [vmem:[%s1410_s5 + $0x94] sm:$0xf]  ;;  %v921_v18 = vld [vmem:[%s1410_s5 + $0x98] sm:$0xf0]  ;;  %v920_v20 = vor.u32 %v1002_v14, %v919_v12  ;;  %v860_v21 = vor.u32 %v985_v15, %v857_v16  ;;  %v847_v22 = vld [vmem:[%s1410_s5] sm:$0xf] }
  0x64   : > { %569 = vmatpush.bf16.msra.mxu0 %v872_v59  ;;  %v984_v23 = vld [vmem:[%s1410_s5 + $0x4] sm:$0xf0]  ;;  %v911_v24 = vld [vmem:[%s1410_s5 + $0x80] sm:$0xf]  ;;  %v924_v25 = vor.u32 %v1001_v17, %v921_v18  ;;  %v983_v27 = vld [vmem:[%s1410_s5 + $0x4] sm:$0xf] }
  0x65   : > { %583 = vmatpush.bf16.msra.mxu1 %v936_v60  ;;  %597 = vmatpush.bf16.msra.mxu2 %v876_v61  ;;  %v1000_v26 = vld [vmem:[%s1410_s5 + $0x84] sm:$0xf0]  ;;  %v849_v28 = vld [vmem:[%s1410_s5 + $0x8] sm:$0xf0]  ;;  %v999_v29 = vld [vmem:[%s1410_s5 + $0x84] sm:$0xf]  ;;  %v848_v31 = vor.u32 %v984_v23, %v847_v22 }
  0x66   : > { %611 = vmatpush.bf16.msra.mxu3 %v940_v1  ;;  %v913_v30 = vld [vmem:[%s1410_s5 + $0x88] sm:$0xf0]  ;;  %v839_v32 = vld [vmem:[%s1408_s12] sm:$0xf]  ;;  %v982_v33 = vld [vmem:[%s1408_s12 + $0x4] sm:$0xf0]  ;;  %v912_v34 = vor.u32 %v1000_v26, %v911_v24  ;;  %v852_v35 = vor.u32 %v983_v27, %v849_v28 }
  0x67   : > { %v981_v36 = vld [vmem:[%s1408_s12 + $0x4] sm:$0xf]  ;;  %v841_v37 = vld [vmem:[%s1408_s12 + $0x8] sm:$0xf0]  ;;  %v916_v38 = vor.u32 %v999_v29, %v913_v30  ;;  %v840_v39 = vor.u32 %v982_v33, %v839_v32  ;;  %p973_p8 = scmp.ne.s32.totalorder %s1228_s22, 1 }
  0x68   : > { %570 = vmatpush.bf16.msra.mxu0 %v864_v7  ;;  %v844_v40 = vor.u32 %v981_v36, %v841_v37  ;;  %v357_v42 = vld [vmem:[#allocation2 + $0x10] sm:$0xff]  ;;  %v358_v47 = vld [vmem:[#allocation2] sm:$0xff]  ;;  %v359_v51 = vld [vmem:[#allocation2 + $0x18] sm:$0xff] }
  0x69   : > { %584 = vmatpush.bf16.msra.mxu1 %v928_v8  ;;  %598 = vmatpush.bf16.msra.mxu2 %v868_v9  ;;  %v360_v57 = vld [vmem:[#allocation2 + $0x8] sm:$0xff] }
  0x6a   : > { %612 = vmatpush.bf16.msra.mxu3 %v932_v13 }
  0x6c   : > { %571 = vmatpush.bf16.msra.mxu0 %v856_v19 }
  0x6d   : > { %585 = vmatpush.bf16.msra.mxu1 %v920_v20  ;;  %599 = vmatpush.bf16.msra.mxu2 %v860_v21 }
  0x6e   : > { %613 = vmatpush.bf16.msra.mxu3 %v924_v25 }
  0x70   : > { %572 = vmatpush.bf16.msra.mxu0 %v848_v31 }
  0x71   : > { %586 = vmatpush.bf16.msra.mxu1 %v912_v34  ;;  %600 = vmatpush.bf16.msra.mxu2 %v852_v35 }
  0x72   : > { %614 = vmatpush.bf16.msra.mxu3 %v916_v38 }
  0x73   : > { %573 = vmatmul.bf16.vlgmr.msra.gmra.mxu0 %v840_v39 }
  0x74   : > { %587 = vmatmul.bf16.vlgmr.msra.gmra.mxu1 %v844_v40  ;;  %601 = vmatmul.bf16.vlgmr.msra.gmra.mxu2 %v840_v39 }
  0x75   : > { %615 = vmatmul.bf16.vlgmr.msra.gmra.mxu3 %v844_v40 }
  0xf0   : > { %v574_v41 = vpop.f32.mrf.mxu0 }
  0xf1   : > { %v588_v43 = vpop.f32.mrf.mxu1 }
  0xf2   : > { %v589_v44 = vadd.f32 %v588_v43, %v574_v41 }
  0xf4   : > { %v621_v45 = vadd.f32 %v589_v44, %v357_v42 }
  0xf6   : > { %625 = vst [vmem:[#allocation2 + $0x10] sm:$0xff] %v621_v45 }
  0xf7   : > { %v602_v46 = vpop.f32.mrf.mxu2 }
  0xf8   : > { %v616_v48 = vpop.f32.mrf.mxu3  ;;  %v576_v49 = vpop.f32.mrf.mxu0 }
  0xf9   : > { %v617_v50 = vadd.f32 %v616_v48, %v602_v46  ;;  %v590_v52 = vpop.f32.mrf.mxu1 }
  0xfa   : > { %v591_v53 = vadd.f32 %v590_v52, %v576_v49 }
  0xfb   : > { %v622_v54 = vadd.f32 %v617_v50, %v358_v47 }
  0xfc   : > { %v623_v55 = vadd.f32 %v591_v53, %v359_v51 }
  0xfd   : > { %626 = vst [vmem:[#allocation2] sm:$0xff] %v622_v54 }
  0xfe   : > { %627 = vst [vmem:[#allocation2 + $0x18] sm:$0xff] %v623_v55 }
  0xff   : > { %v604_v56 = vpop.f32.mrf.mxu2 }
 0x100   : > { %v618_v58 = vpop.f32.mrf.mxu3 }
 0x101   : > { %v619_v59 = vadd.f32 %v618_v58, %v604_v56  ;;  %632 = sbr.rel (%p973_p8) target bundleno = 274 (0x112), region = 86 }
 0x103   : > { %v624_v60 = vadd.f32 %v619_v59, %v360_v57 }
 0x105   : > { %628 = vst [vmem:[#allocation2 + $0x8] sm:$0xff] %v624_v60 }
 0x106   : > { %v633_v61 = vld [vmem:[#allocation2 + $0x10] sm:$0xff]  ;;  %v637_v62 = vld [vmem:[%s340_s7] sm:$0x3]  ;;  %v635_v5 = vld [vmem:[#allocation2 + $0x18] sm:$0xff] }
 0x107   : > { %v647_v63 = vld [vmem:[%s345_s9] sm:$0x3]  ;;  %v639_v0 = vperm.slane %v637_v62, 0  ;;  %v640_v3 = vperm.slane %v637_v62, 1 }
 0x108   : > { %v649_v1 = vperm.slane %v647_v63, 0  ;;  %v634_v2 = vld [vmem:[#allocation2] sm:$0xff]  ;;  %v650_v4 = vperm.slane %v647_v63, 1 }
 0x109   : > { %v643_v7 = vmul.f32 %v639_v0, %v633_v61  ;;  %v644_v8 = vmul.f32 %v640_v3, %v634_v2  ;;  %v645_v9 = vmul.f32 %v639_v0, %v635_v5 }
 0x10b   : > { %v653_v11 = vadd.f32 %v649_v1, %v643_v7  ;;  %v654_v12 = vadd.f32 %v650_v4, %v644_v8  ;;  %v655_v13 = vadd.f32 %v649_v1, %v645_v9 }
 0x10c   : > { %v636_v6 = vld [vmem:[#allocation2 + $0x8] sm:$0xff] }
 0x10d   : > { %v646_v10 = vmul.f32 %v640_v3, %v636_v6  ;;  %657 = vst [vmem:[%s1428_s13] sm:$0xff] %v653_v11 }
 0x10e   : > { %658 = vst [vmem:[%s1428_s13 + $0x8] sm:$0xff] %v654_v12 }
 0x10f   : > { %v656_v14 = vadd.f32 %v650_v4, %v646_v10  ;;  %659 = vst [vmem:[%s1428_s13 + $0x10] sm:$0xff] %v655_v13 }
 0x111   : > { %660 = vst [vmem:[%s1428_s13 + $0x18] sm:$0xff] %v656_v14 }
 0x112 PF: > { %667 = sbr.rel (!%p1384_p1) target bundleno = 286 (0x11e), region = 90  ;;  %s1015_s22 = sshll.u32 (%p1384_p1), %s1232_s23, 4 }
 0x113   : > { %s1583_s8 = sld [smem:[#allocation16_spill]] (%p1384_p1) }
 0x114   : > { %v686_v15 = vld [vmem:[%s1428_s13] sm:$0xff] (%p1384_p1) }
 0x115   : > { %v688_v16 = vld [vmem:[%s1428_s13 + $0x8] sm:$0xff] (%p1384_p1) }
 0x116   : > { %v690_v17 = vld [vmem:[%s1428_s13 + $0x10] sm:$0xff] (%p1384_p1) }
 0x118   : > { %v692_v18 = vld [vmem:[%s1428_s13 + $0x18] sm:$0xff] }
 0x119   : > { %s673_s12 = scalar_lea.vmem %s1583_s8, %s1015_s22 }
 0x11a   : > { %687 = vst [vmem:[%s673_s12] sm:$0xff] %v686_v15 }
 0x11b   : > { %689 = vst [vmem:[%s673_s12 + $0x8] sm:$0xff] %v688_v16 }
 0x11c   : > { %691 = vst [vmem:[%s673_s12 + $0x40] sm:$0xff] %v690_v17 }
 0x11d   : > { %693 = vst [vmem:[%s673_s12 + $0x48] sm:$0xff] %v692_v18 }
 0x11e PF: > { %s17_s26 = sadd.s32 1, %s1244_s26   ;;  %s1584_s15 = sld [smem:[#allocation8_spill]] }
 0x11f   : > { %p14_p9 = scmp.ge.s32.totalorder %s17_s26, 10   ;;  %s1585_s16 = sld [smem:[#allocation14_spill]] }
 0x120   : > { %s1586_s23 = sld [smem:[#allocation13_spill]]  ;;  %s1591_s17 = smov %s1212_s18 }
 0x121   : > { %s1587_s20 = sld [smem:[#allocation9_spill]]  ;;  %s1592_s18 = smov %s1216_s19 }
 0x122   : > { %s1588_s21 = sld [smem:[#allocation12_spill]]  ;;  %s1594_s22 = smov %s1236_s24 }
 0x123   : > { %s1589_s6 = sld [smem:[#allocation10_spill]] }
 0x124   : > { %s1590_s5 = sld [smem:[#allocation11_spill]] }
 0x126   : > { %s1593_s19 = smov %s1586_s23  ;;  %s1595_s23 = smov %s1240_s25 }
 0x127   :  { %16 = sbr.rel (!%p14_p9) target bundleno = 10 (0xa), region = 159 }
 0x129   : > { %s1596_s24 = smov %s1589_s6 }
 0x12a   : > { %s1597_s25 = smov %s1590_s5 }
 0x12c   :  { %709 = vsyncpa [#allocation5], 1 }
 0x12d   :  { %711 = vsyncpa [#allocation5 + $0x1], 1 }

// kernel: attend_crnn_forward.23
= control target key start
LH: loop header
LB: loop body
LE: loop exit
PB: predicated region body
PF: predicated region fallthrough
CT: control target
= control target key end

     0   :  { %9 = vsyncpa [#allocation3], 0  ;;  %s698_s15 = smov [#allocation2]   ;;  %s699_s17 = smov 1024   ;;  %s832_s0 = inlined_call_operand.vmem [shape: f32[5,2,1024], index: 0, kind: input, shape index: {}]   ;;  %s833_s1 = inlined_call_operand.hbm [shape: f32[128,1024], index: 1, kind: input, shape index: {}]   ;;  %s834_s2 = inlined_call_operand.vmem [shape: f32[5,2,128], index: 2, kind: output, shape index: {0}]   ;;  %s835_s3 = inlined_call_operand.vmem [shape: f32[5,2,128], index: 3, kind: output, shape index: {1}]  }
   0x1   :  { %s16_s14 = sshll.u32 %s833_s1, 4  ;;  %s18_s16 = sshll.u32 %s698_s15, 4  ;;  %s17_s14 = int_to_ptr.hbm [resolvable:$true] %s16_s14  ;;  %s19_s16 = int_to_ptr.vmem [resolvable:$true] %s18_s16 }
   0x2   :  { %s700_s18 = smov 64  }
   0x3   :  { %24 = dma.hbm_to_vmem [thread:$0]  %s17_s14, 16384, %s19_s16, [#allocation3], %s699_s17, %s699_s17, %s700_s18  }
   0x4   :  { %676 = dma.done.wait [#allocation3], 16384  }
   0x5   :  { %677 = vsyncadd [#allocation3], 4294950912  ;;  %v724_v0 = vmov 0.0   ;;  %v726_v1 = vmov 0.0   ;;  %v728_v2 = vmov 0.0   ;;  %v730_v3 = vmov 0.0  }
   0x6   :  { %s732_s19 = smov 0  }
   0x7 LB: > { %v106_v4 = vld [vmem:[#allocation2 + $0x3d0] sm:$0xff]  ;;  %v107_v5 = vld [vmem:[#allocation2 + $0x3d8] sm:$0xff]  ;;  %v105_v10 = vld [vmem:[#allocation2 + $0x3c8] sm:$0xff]  ;;  %s555_s1 = sshll.u32 %s696_s19, 4  ;;  %vm195_vm0 = vcmask 1041408   ;;  %vm197_vm1 = vcmask 1045508   ;;  %s696_s19 = sphi %s732_s19, %s34_s19   ;;  %v692_v3 = vphi %v730_v3, %v810_v3   ;;  %v688_v2 = vphi %v728_v2, %v802_v2   ;;  %v684_v1 = vphi %v726_v1, %v502_v1   ;;  %v680_v0 = vphi %v724_v0, %v500_v0  }
   0x8   : > { %v102_v6 = vld [vmem:[#allocation2 + $0x390] sm:$0xff]  ;;  %148 = vmatpush.msra.mxu2 %v106_v4  ;;  %168 = vmatpush.msra.mxu3 %v107_v5  ;;  %v103_v7 = vld [vmem:[#allocation2 + $0x398] sm:$0xff]  ;;  %v104_v11 = vld [vmem:[#allocation2 + $0x3c0] sm:$0xff]  ;;  %s42_s22 = scalar_lea.vmem %s832_s0, %s555_s1  ;;  %vm199_vm2 = vcmask 1043456   ;;  %s39_s23 = ssub.s32 4, %s696_s19 }
   0x9   : > { %v98_v8 = vld [vmem:[#allocation2 + $0x350] sm:$0xff]  ;;  %v99_v9 = vld [vmem:[#allocation2 + $0x358] sm:$0xff]  ;;  %v101_v12 = vld [vmem:[#allocation2 + $0x388] sm:$0xff]  ;;  %128 = vmatpush.msra.mxu1 %v105_v10  ;;  %108 = vmatpush.msra.mxu0 %v104_v11  ;;  %s772_s24 = sshll.u32 %s39_s23, 4  ;;  %s553_s28 = sshll.u32 %s696_s19, 1 }
   0xa   : > { %149 = vmatpush.msra.mxu2 %v102_v6  ;;  %169 = vmatpush.msra.mxu3 %v103_v7  ;;  %v94_v13 = vld [vmem:[#allocation2 + $0x310] sm:$0xff]  ;;  %v95_v14 = vld [vmem:[#allocation2 + $0x318] sm:$0xff]  ;;  %v100_v15 = vld [vmem:[#allocation2 + $0x380] sm:$0xff]  ;;  %s205_s27 = scalar_lea.vmem %s832_s0, %s772_s24  ;;  %s504_s4 = scalar_lea.vmem %s834_s2, %s553_s28 }
   0xb   : > { %v97_v16 = vld [vmem:[#allocation2 + $0x348] sm:$0xff]  ;;  %v96_v17 = vld [vmem:[#allocation2 + $0x340] sm:$0xff]  ;;  %129 = vmatpush.msra.mxu1 %v101_v12  ;;  %v90_v18 = vld [vmem:[#allocation2 + $0x2d0] sm:$0xff]  ;;  %109 = vmatpush.msra.mxu0 %v100_v15  ;;  %s554_s5 = sshll.u32 %s39_s23, 1  ;;  %s34_s19 = sadd.s32 1, %s696_s19  }
   0xc   : > { %150 = vmatpush.msra.mxu2 %v98_v8  ;;  %170 = vmatpush.msra.mxu3 %v99_v9  ;;  %v91_v19 = vld [vmem:[#allocation2 + $0x2d8] sm:$0xff]  ;;  %v93_v20 = vld [vmem:[#allocation2 + $0x308] sm:$0xff]  ;;  %v92_v21 = vld [vmem:[#allocation2 + $0x300] sm:$0xff]  ;;  %s507_s8 = scalar_lea.vmem %s835_s3, %s554_s5  ;;  %p31_p0 = scmp.ge.s32.totalorder %s34_s19, 5  }
   0xd   : > { %130 = vmatpush.msra.mxu1 %v97_v16  ;;  %v86_v22 = vld [vmem:[#allocation2 + $0x290] sm:$0xff]  ;;  %v87_v23 = vld [vmem:[#allocation2 + $0x298] sm:$0xff]  ;;  %110 = vmatpush.msra.mxu0 %v96_v17  ;;  %v89_v24 = vld [vmem:[#allocation2 + $0x2c8] sm:$0xff] }
   0xe   : > { %151 = vmatpush.msra.mxu2 %v94_v13  ;;  %171 = vmatpush.msra.mxu3 %v95_v14  ;;  %v88_v25 = vld [vmem:[#allocation2 + $0x2c0] sm:$0xff]  ;;  %v82_v26 = vld [vmem:[#allocation2 + $0x250] sm:$0xff]  ;;  %v83_v27 = vld [vmem:[#allocation2 + $0x258] sm:$0xff] }
   0xf   : > { %131 = vmatpush.msra.mxu1 %v93_v20  ;;  %111 = vmatpush.msra.mxu0 %v92_v21  ;;  %v85_v28 = vld [vmem:[#allocation2 + $0x288] sm:$0xff]  ;;  %v84_v29 = vld [vmem:[#allocation2 + $0x280] sm:$0xff]  ;;  %v78_v30 = vld [vmem:[#allocation2 + $0x210] sm:$0xff] }
  0x10   : > { %152 = vmatpush.msra.mxu2 %v90_v18  ;;  %172 = vmatpush.msra.mxu3 %v91_v19  ;;  %v79_v31 = vld [vmem:[#allocation2 + $0x218] sm:$0xff]  ;;  %v81_v32 = vld [vmem:[#allocation2 + $0x248] sm:$0xff]  ;;  %v80_v33 = vld [vmem:[#allocation2 + $0x240] sm:$0xff] }
  0x11   : > { %132 = vmatpush.msra.mxu1 %v89_v24  ;;  %112 = vmatpush.msra.mxu0 %v88_v25  ;;  %v74_v34 = vld [vmem:[#allocation2 + $0x1d0] sm:$0xff]  ;;  %v75_v35 = vld [vmem:[#allocation2 + $0x1d8] sm:$0xff]  ;;  %v77_v36 = vld [vmem:[#allocation2 + $0x208] sm:$0xff] }
  0x12   : > { %153 = vmatpush.msra.mxu2 %v86_v22  ;;  %173 = vmatpush.msra.mxu3 %v87_v23  ;;  %v76_v37 = vld [vmem:[#allocation2 + $0x200] sm:$0xff]  ;;  %v70_v38 = vld [vmem:[#allocation2 + $0x190] sm:$0xff]  ;;  %v71_v39 = vld [vmem:[#allocation2 + $0x198] sm:$0xff] }
  0x13   : > { %133 = vmatpush.msra.mxu1 %v85_v28  ;;  %113 = vmatpush.msra.mxu0 %v84_v29  ;;  %v73_v40 = vld [vmem:[#allocation2 + $0x1c8] sm:$0xff]  ;;  %v72_v41 = vld [vmem:[#allocation2 + $0x1c0] sm:$0xff]  ;;  %v66_v42 = vld [vmem:[#allocation2 + $0x150] sm:$0xff] }
  0x14   : > { %154 = vmatpush.msra.mxu2 %v82_v26  ;;  %174 = vmatpush.msra.mxu3 %v83_v27  ;;  %v67_v43 = vld [vmem:[#allocation2 + $0x158] sm:$0xff]  ;;  %v69_v44 = vld [vmem:[#allocation2 + $0x188] sm:$0xff]  ;;  %v68_v45 = vld [vmem:[#allocation2 + $0x180] sm:$0xff] }
  0x15   : > { %134 = vmatpush.msra.mxu1 %v81_v32  ;;  %114 = vmatpush.msra.mxu0 %v80_v33  ;;  %v62_v46 = vld [vmem:[#allocation2 + $0x110] sm:$0xff]  ;;  %v63_v47 = vld [vmem:[#allocation2 + $0x118] sm:$0xff]  ;;  %v65_v48 = vld [vmem:[#allocation2 + $0x148] sm:$0xff] }
  0x16   : > { %155 = vmatpush.msra.mxu2 %v78_v30  ;;  %175 = vmatpush.msra.mxu3 %v79_v31  ;;  %v64_v49 = vld [vmem:[#allocation2 + $0x140] sm:$0xff]  ;;  %v58_v50 = vld [vmem:[#allocation2 + $0xd0] sm:$0xff]  ;;  %v59_v51 = vld [vmem:[#allocation2 + $0xd8] sm:$0xff] }
  0x17   : > { %135 = vmatpush.msra.mxu1 %v77_v36  ;;  %115 = vmatpush.msra.mxu0 %v76_v37  ;;  %v61_v52 = vld [vmem:[#allocation2 + $0x108] sm:$0xff]  ;;  %v60_v53 = vld [vmem:[#allocation2 + $0x100] sm:$0xff]  ;;  %v54_v54 = vld [vmem:[#allocation2 + $0x90] sm:$0xff] }
  0x18   : > { %156 = vmatpush.msra.mxu2 %v74_v34  ;;  %176 = vmatpush.msra.mxu3 %v75_v35  ;;  %v55_v55 = vld [vmem:[#allocation2 + $0x98] sm:$0xff]  ;;  %v57_v56 = vld [vmem:[#allocation2 + $0xc8] sm:$0xff]  ;;  %v56_v57 = vld [vmem:[#allocation2 + $0xc0] sm:$0xff] }
  0x19   : > { %136 = vmatpush.msra.mxu1 %v73_v40  ;;  %116 = vmatpush.msra.mxu0 %v72_v41  ;;  %v50_v58 = vld [vmem:[#allocation2 + $0x50] sm:$0xff]  ;;  %v51_v59 = vld [vmem:[#allocation2 + $0x58] sm:$0xff]  ;;  %v53_v60 = vld [vmem:[#allocation2 + $0x88] sm:$0xff] }
  0x1a   : > { %157 = vmatpush.msra.mxu2 %v70_v38  ;;  %177 = vmatpush.msra.mxu3 %v71_v39  ;;  %v52_v61 = vld [vmem:[#allocation2 + $0x80] sm:$0xff]  ;;  %v46_v62 = vld [vmem:[#allocation2 + $0x10] sm:$0xff]  ;;  %v47_v63 = vld [vmem:[#allocation2 + $0x18] sm:$0xff] }
  0x1b   : > { %137 = vmatpush.msra.mxu1 %v69_v44  ;;  %117 = vmatpush.msra.mxu0 %v68_v45  ;;  %v269_v4 = vld [vmem:[#allocation2 + $0x3f0] sm:$0xff]  ;;  %v270_v5 = vld [vmem:[#allocation2 + $0x3f8] sm:$0xff]  ;;  %v49_v6 = vld [vmem:[#allocation2 + $0x48] sm:$0xff] }
  0x1c   : > { %158 = vmatpush.msra.mxu2 %v66_v42  ;;  %178 = vmatpush.msra.mxu3 %v67_v43  ;;  %v48_v7 = vld [vmem:[#allocation2 + $0x40] sm:$0xff]  ;;  %v265_v8 = vld [vmem:[#allocation2 + $0x3b0] sm:$0xff]  ;;  %v266_v9 = vld [vmem:[#allocation2 + $0x3b8] sm:$0xff] }
  0x1d   : > { %138 = vmatpush.msra.mxu1 %v65_v48  ;;  %118 = vmatpush.msra.mxu0 %v64_v49  ;;  %v45_v10 = vld [vmem:[#allocation2 + $0x8] sm:$0xff]  ;;  %v44_v11 = vld [vmem:[#allocation2] sm:$0xff]  ;;  %v261_v12 = vld [vmem:[#allocation2 + $0x370] sm:$0xff] }
  0x1e   : > { %159 = vmatpush.msra.mxu2 %v62_v46  ;;  %179 = vmatpush.msra.mxu3 %v63_v47  ;;  %v262_v13 = vld [vmem:[#allocation2 + $0x378] sm:$0xff]  ;;  %v268_v14 = vld [vmem:[#allocation2 + $0x3e8] sm:$0xff]  ;;  %v257_v15 = vld [vmem:[#allocation2 + $0x330] sm:$0xff] }
  0x1f   : > { %139 = vmatpush.msra.mxu1 %v61_v52  ;;  %119 = vmatpush.msra.mxu0 %v60_v53  ;;  %v258_v16 = vld [vmem:[#allocation2 + $0x338] sm:$0xff]  ;;  %v267_v17 = vld [vmem:[#allocation2 + $0x3e0] sm:$0xff]  ;;  %v264_v18 = vld [vmem:[#allocation2 + $0x3a8] sm:$0xff] }
  0x20   : > { %160 = vmatpush.msra.mxu2 %v58_v50  ;;  %180 = vmatpush.msra.mxu3 %v59_v51  ;;  %v253_v19 = vld [vmem:[#allocation2 + $0x2f0] sm:$0xff]  ;;  %v254_v20 = vld [vmem:[#allocation2 + $0x2f8] sm:$0xff]  ;;  %v263_v21 = vld [vmem:[#allocation2 + $0x3a0] sm:$0xff] }
  0x21   : > { %140 = vmatpush.msra.mxu1 %v57_v56  ;;  %120 = vmatpush.msra.mxu0 %v56_v57  ;;  %v260_v22 = vld [vmem:[#allocation2 + $0x368] sm:$0xff]  ;;  %v249_v23 = vld [vmem:[#allocation2 + $0x2b0] sm:$0xff]  ;;  %v250_v24 = vld [vmem:[#allocation2 + $0x2b8] sm:$0xff] }
  0x22   : > { %161 = vmatpush.msra.mxu2 %v54_v54  ;;  %181 = vmatpush.msra.mxu3 %v55_v55  ;;  %v259_v25 = vld [vmem:[#allocation2 + $0x360] sm:$0xff]  ;;  %v256_v26 = vld [vmem:[#allocation2 + $0x328] sm:$0xff]  ;;  %v245_v27 = vld [vmem:[#allocation2 + $0x270] sm:$0xff] }
  0x23   : > { %141 = vmatpush.msra.mxu1 %v53_v60  ;;  %121 = vmatpush.msra.mxu0 %v52_v61  ;;  %v255_v28 = vld [vmem:[#allocation2 + $0x320] sm:$0xff]  ;;  %v252_v29 = vld [vmem:[#allocation2 + $0x2e8] sm:$0xff]  ;;  %v241_v30 = vld [vmem:[#allocation2 + $0x230] sm:$0xff] }
  0x24   : > { %162 = vmatpush.msra.mxu2 %v50_v58  ;;  %182 = vmatpush.msra.mxu3 %v51_v59  ;;  %v242_v31 = vld [vmem:[#allocation2 + $0x238] sm:$0xff]  ;;  %v251_v32 = vld [vmem:[#allocation2 + $0x2e0] sm:$0xff]  ;;  %v248_v33 = vld [vmem:[#allocation2 + $0x2a8] sm:$0xff] }
  0x25   : > { %142 = vmatpush.msra.mxu1 %v49_v6  ;;  %122 = vmatpush.msra.mxu0 %v48_v7  ;;  %v237_v34 = vld [vmem:[#allocation2 + $0x1f0] sm:$0xff]  ;;  %v238_v35 = vld [vmem:[#allocation2 + $0x1f8] sm:$0xff]  ;;  %v247_v36 = vld [vmem:[#allocation2 + $0x2a0] sm:$0xff] }
  0x26   : > { %163 = vmatpush.msra.mxu2 %v46_v62  ;;  %183 = vmatpush.msra.mxu3 %v47_v63  ;;  %v244_v37 = vld [vmem:[#allocation2 + $0x268] sm:$0xff]  ;;  %v233_v38 = vld [vmem:[#allocation2 + $0x1b0] sm:$0xff]  ;;  %v234_v39 = vld [vmem:[#allocation2 + $0x1b8] sm:$0xff] }
  0x27   : > { %164 = vmatmul.f32.vlgmr.msra.gmra.mxu2 %v692_v3  ;;  %184 = vmatmul.f32.vlgmr.msra.gmra.mxu3 %v692_v3  ;;  %v243_v40 = vld [vmem:[#allocation2 + $0x260] sm:$0xff]  ;;  %v240_v41 = vld [vmem:[#allocation2 + $0x228] sm:$0xff]  ;;  %v229_v42 = vld [vmem:[#allocation2 + $0x170] sm:$0xff] }
  0x28   : > { %311 = vmatpush.msrb.mxu2 %v269_v4  ;;  %331 = vmatpush.msrb.mxu3 %v270_v5  ;;  %v230_v43 = vld [vmem:[#allocation2 + $0x178] sm:$0xff]  ;;  %v239_v44 = vld [vmem:[#allocation2 + $0x220] sm:$0xff]  ;;  %v236_v45 = vld [vmem:[#allocation2 + $0x1e8] sm:$0xff] }
  0x29   : > { %143 = vmatpush.msra.mxu1 %v45_v10  ;;  %123 = vmatpush.msra.mxu0 %v44_v11  ;;  %v225_v46 = vld [vmem:[#allocation2 + $0x130] sm:$0xff]  ;;  %v226_v47 = vld [vmem:[#allocation2 + $0x138] sm:$0xff]  ;;  %v235_v48 = vld [vmem:[#allocation2 + $0x1e0] sm:$0xff] }
  0x2a   : > { %312 = vmatpush.msrb.mxu2 %v265_v8  ;;  %332 = vmatpush.msrb.mxu3 %v266_v9  ;;  %v232_v49 = vld [vmem:[#allocation2 + $0x1a8] sm:$0xff]  ;;  %v221_v50 = vld [vmem:[#allocation2 + $0xf0] sm:$0xff]  ;;  %v222_v51 = vld [vmem:[#allocation2 + $0xf8] sm:$0xff] }
  0x2b   : > { %144 = vmatmul.f32.vlgmr.msra.gmra.mxu1 %v692_v3  ;;  %124 = vmatmul.f32.vlgmr.msra.gmra.mxu0 %v692_v3  ;;  %v246_v3 = vld [vmem:[#allocation2 + $0x278] sm:$0xff]  ;;  %v231_v52 = vld [vmem:[#allocation2 + $0x1a0] sm:$0xff]  ;;  %v228_v53 = vld [vmem:[#allocation2 + $0x168] sm:$0xff] }
  0x2c   : > { %313 = vmatpush.msrb.mxu2 %v261_v12  ;;  %333 = vmatpush.msrb.mxu3 %v262_v13  ;;  %v217_v54 = vld [vmem:[#allocation2 + $0xb0] sm:$0xff]  ;;  %v218_v55 = vld [vmem:[#allocation2 + $0xb8] sm:$0xff]  ;;  %v227_v56 = vld [vmem:[#allocation2 + $0x160] sm:$0xff] }
  0x2d   : > { %291 = vmatpush.msrb.mxu1 %v268_v14  ;;  %271 = vmatpush.msrb.mxu0 %v267_v17  ;;  %v224_v57 = vld [vmem:[#allocation2 + $0x128] sm:$0xff]  ;;  %v213_v58 = vld [vmem:[#allocation2 + $0x70] sm:$0xff]  ;;  %v214_v59 = vld [vmem:[#allocation2 + $0x78] sm:$0xff] }
  0x2e   : > { %314 = vmatpush.msrb.mxu2 %v257_v15  ;;  %334 = vmatpush.msrb.mxu3 %v258_v16  ;;  %v223_v60 = vld [vmem:[#allocation2 + $0x120] sm:$0xff]  ;;  %v220_v61 = vld [vmem:[#allocation2 + $0xe8] sm:$0xff]  ;;  %v209_v62 = vld [vmem:[#allocation2 + $0x30] sm:$0xff] }
  0x2f   : > { %292 = vmatpush.msrb.mxu1 %v264_v18  ;;  %272 = vmatpush.msrb.mxu0 %v263_v21  ;;  %v210_v63 = vld [vmem:[#allocation2 + $0x38] sm:$0xff]  ;;  %v219_v4 = vld [vmem:[#allocation2 + $0xe0] sm:$0xff]  ;;  %v216_v5 = vld [vmem:[#allocation2 + $0xa8] sm:$0xff] }
  0x30   : > { %315 = vmatpush.msrb.mxu2 %v253_v19  ;;  %335 = vmatpush.msrb.mxu3 %v254_v20  ;;  %v215_v6 = vld [vmem:[#allocation2 + $0xa0] sm:$0xff]  ;;  %v212_v7 = vld [vmem:[#allocation2 + $0x68] sm:$0xff] }
  0x31   : > { %293 = vmatpush.msrb.mxu1 %v260_v22  ;;  %273 = vmatpush.msrb.mxu0 %v259_v25  ;;  %v211_v8 = vld [vmem:[#allocation2 + $0x60] sm:$0xff]  ;;  %v208_v9 = vld [vmem:[#allocation2 + $0x28] sm:$0xff] }
  0x32   : > { %316 = vmatpush.msrb.mxu2 %v249_v23  ;;  %336 = vmatpush.msrb.mxu3 %v250_v24  ;;  %v207_v10 = vld [vmem:[#allocation2 + $0x20] sm:$0xff] }
  0x33   : > { %294 = vmatpush.msrb.mxu1 %v256_v26  ;;  %274 = vmatpush.msrb.mxu0 %v255_v28  ;;  %v43_v18 = vld [vmem:[%s42_s22] sm:$0xff] }
  0x34   : > { %317 = vmatpush.msrb.mxu2 %v245_v27  ;;  %337 = vmatpush.msrb.mxu3 %v246_v3 }
  0x35   : > { %295 = vmatpush.msrb.mxu1 %v252_v29  ;;  %275 = vmatpush.msrb.mxu0 %v251_v32 }
  0x36   : > { %318 = vmatpush.msrb.mxu2 %v241_v30  ;;  %338 = vmatpush.msrb.mxu3 %v242_v31 }
  0x37   : > { %296 = vmatpush.msrb.mxu1 %v248_v33  ;;  %276 = vmatpush.msrb.mxu0 %v247_v36 }
  0x38   : > { %319 = vmatpush.msrb.mxu2 %v237_v34  ;;  %339 = vmatpush.msrb.mxu3 %v238_v35 }
  0x39   : > { %297 = vmatpush.msrb.mxu1 %v244_v37  ;;  %277 = vmatpush.msrb.mxu0 %v243_v40 }
  0x3a   : > { %320 = vmatpush.msrb.mxu2 %v233_v38  ;;  %340 = vmatpush.msrb.mxu3 %v234_v39 }
  0x3b   : > { %298 = vmatpush.msrb.mxu1 %v240_v41  ;;  %278 = vmatpush.msrb.mxu0 %v239_v44 }
  0x3c   : > { %321 = vmatpush.msrb.mxu2 %v229_v42  ;;  %341 = vmatpush.msrb.mxu3 %v230_v43 }
  0x3d   : > { %299 = vmatpush.msrb.mxu1 %v236_v45  ;;  %279 = vmatpush.msrb.mxu0 %v235_v48 }
  0x3e   : > { %322 = vmatpush.msrb.mxu2 %v225_v46  ;;  %342 = vmatpush.msrb.mxu3 %v226_v47 }
  0x3f   : > { %300 = vmatpush.msrb.mxu1 %v232_v49  ;;  %280 = vmatpush.msrb.mxu0 %v231_v52 }
  0x40   : > { %323 = vmatpush.msrb.mxu2 %v221_v50  ;;  %343 = vmatpush.msrb.mxu3 %v222_v51 }
  0x41   : > { %301 = vmatpush.msrb.mxu1 %v228_v53  ;;  %281 = vmatpush.msrb.mxu0 %v227_v56 }
  0x42   : > { %324 = vmatpush.msrb.mxu2 %v217_v54  ;;  %344 = vmatpush.msrb.mxu3 %v218_v55 }
  0x43   : > { %302 = vmatpush.msrb.mxu1 %v224_v57  ;;  %282 = vmatpush.msrb.mxu0 %v223_v60 }
  0x44   : > { %325 = vmatpush.msrb.mxu2 %v213_v58  ;;  %345 = vmatpush.msrb.mxu3 %v214_v59 }
  0x45   : > { %303 = vmatpush.msrb.mxu1 %v220_v61  ;;  %283 = vmatpush.msrb.mxu0 %v219_v4  ;;  %v206_v4 = vld [vmem:[%s205_s27 + $0x8] sm:$0xff] }
  0x46   : > { %326 = vmatpush.msrb.mxu2 %v209_v62  ;;  %346 = vmatpush.msrb.mxu3 %v210_v63 }
  0x47   : > { %327 = vmatmul.f32.vlgmr.msrb.gmra.mxu2 %v684_v1  ;;  %347 = vmatmul.f32.vlgmr.msrb.gmra.mxu3 %v684_v1 }
  0x48   : > { %304 = vmatpush.msrb.mxu1 %v216_v5  ;;  %284 = vmatpush.msrb.mxu0 %v215_v6 }
  0x4a   : > { %305 = vmatpush.msrb.mxu1 %v212_v7  ;;  %285 = vmatpush.msrb.mxu0 %v211_v8 }
  0x4c   : > { %306 = vmatpush.msrb.mxu1 %v208_v9  ;;  %286 = vmatpush.msrb.mxu0 %v207_v10 }
  0x4d   : > { %307 = vmatmul.f32.vlgmr.msrb.gmra.mxu1 %v684_v1  ;;  %287 = vmatmul.f32.vlgmr.msrb.gmra.mxu0 %v684_v1 }
  0xa8   : > { %v145_v11 = vpop.f32.mrf.mxu1  ;;  %v125_v16 = vpop.f32.mrf.mxu0 }
  0xa9   : > { %v192_v13 = vrot.slane %v145_v11, 6 }
  0xaa   : > { %v165_v12 = vpop.f32.mrf.mxu2  ;;  %v185_v15 = vpop.f32.mrf.mxu3 }
  0xab   : > { %v193_v14 = vrot.slane %v165_v12, 4  ;;  %v194_v17 = vrot.slane %v185_v15, 2  ;;  %v196_v19 = vsel %vm195_vm0, %v125_v16, %v192_v13 }
  0xad   : > { %v198_v1 = vsel %vm197_vm1, %v193_v14, %v194_v17 }
  0xae   : > { %v200_v20 = vsel %vm199_vm2, %v196_v19, %v198_v1 }
  0xaf   : > { %v202_v21 = vadd.f32 %v200_v20, %v43_v18 }
  0xb1   : > { %v547_v22 = vmul.f32 -1.442695, %v202_v21  ;;  %v383_v23 = vrot.slane %v202_v21, 2  ;;  %v407_v24 = vrot.slane %v202_v21, 6  ;;  %v404_v32 = vrot.slane %v202_v21, 4 }
  0xb3   : > { %600 = vpow2.f32 %v547_v22  ;;  %v548_v25 = vmul.f32 -1.442695, %v383_v23  ;;  %v549_v26 = vmul.f32 -1.442695, %v407_v24 }
  0xb5   : > { %602 = vpow2.f32 %v548_v25 }
  0xb6   : > { %604 = vpow2.f32 %v549_v26 }
  0xb9   : > { %v601_v27 = vpop.eup %600 }
  0xba   : > { %v366_v3 = vadd.f32 1.0, %v601_v27 }
  0xbb   : > { %v603_v28 = vpop.eup %602 }
  0xbc   : > { %v605_v29 = vpop.eup %604  ;;  %606 = vrcp.f32 %v366_v3  ;;  %v388_v30 = vadd.f32 1.0, %v603_v28  ;;  %v378_v35 = vand.u32 2147483648, %v366_v3  ;;  %vm372_vm3 = vweird.f32 %v366_v3 }
  0xbd   : > { %v764_v31 = vadd.f32 1.0, %v605_v29  ;;  %v376_v38 = vand.u32 2147483647, %v366_v3 }
  0xbe   : > { %608 = vrcp.f32 %v388_v30  ;;  %v379_v42 = vor.u32 1.1754944e-38, %v378_v35  ;;  %v400_v43 = vand.u32 2147483648, %v388_v30  ;;  %vm394_vm6 = vweird.f32 %v388_v30 }
  0xbf   : > { %610 = vrcp.f32 %v764_v31  ;;  %v398_v47 = vand.u32 2147483647, %v388_v30  ;;  %vm377_vm8 = vcmp.eq.f32.partialorder %v376_v38, 8.507059e+37  ;;  %vm418_vm11 = vweird.f32 %v764_v31 }
  0xc0   : > { %612 = vtanh.f32 %v404_v32  ;;  %v401_v58 = vor.u32 1.1754944e-38, %v400_v43  ;;  %v422_v13 = vand.u32 2147483647, %v764_v31  ;;  %v424_v14 = vand.u32 2147483648, %v764_v31 }
  0xc1   : > { %vm399_vm10 = vcmp.eq.f32.partialorder %v398_v47, 8.507059e+37 }
  0xc2   : > { %v607_v33 = vpop.eup %606  ;;  %v425_v21 = vor.u32 1.1754944e-38, %v424_v14  ;;  %vm423_vm14 = vcmp.eq.f32.partialorder %v422_v13, 8.507059e+37 }
  0xc3   : > { %v368_v34 = vmul.f32 %v607_v33, %v366_v3  ;;  %vm373_vm4 = vweird.f32 %v607_v33 }
  0xc4   : > { %v609_v36 = vpop.eup %608  ;;  %vm776_vm5 = vmor %vm372_vm3, %vm373_vm4 }
  0xc5   : > { %v369_v37 = vsub.f32 1.0, %v368_v34  ;;  %v768_v39 = vpop.eup %610  ;;  %v390_v40 = vmul.f32 %v609_v36, %v388_v30  ;;  %vm395_vm7 = vweird.f32 %v609_v36 }
  0xc6   : > { %v414_v44 = vmul.f32 %v768_v39, %v764_v31  ;;  %v613_v51 = vpop.eup %612  ;;  %vm786_vm9 = vmor %vm394_vm6, %vm395_vm7  ;;  %vm419_vm12 = vweird.f32 %v768_v39 }
  0xc7   : > { %v370_v41 = vmul.f32 %v607_v33, %v369_v37  ;;  %v391_v46 = vsub.f32 1.0, %v390_v40  ;;  %vm420_vm13 = vmor %vm418_vm11, %vm419_vm12 }
  0xc8   : > { %v415_v49 = vsub.f32 1.0, %v414_v44 }
  0xc9   : > { %v371_v48 = vadd.f32 %v607_v33, %v370_v41  ;;  %v392_v52 = vmul.f32 %v609_v36, %v391_v46 }
  0xca   : > { %v328_v50 = vpop.f32.mrf.mxu2  ;;  %v308_v53 = vpop.f32.mrf.mxu1  ;;  %v416_v5 = vmul.f32 %v768_v39, %v415_v49 }
  0xcb   : > { %v356_v54 = vrot.slane %v328_v50, 4  ;;  %v348_v55 = vpop.f32.mrf.mxu3  ;;  %v375_v56 = vsel %vm776_vm5, %v607_v33, %v371_v48  ;;  %v355_v59 = vrot.slane %v308_v53, 6  ;;  %v288_v61 = vpop.f32.mrf.mxu0  ;;  %v393_v63 = vadd.f32 %v609_v36, %v392_v52 }
  0xcc   : > { %v357_v60 = vrot.slane %v348_v55, 2  ;;  %v380_v62 = vsel %vm377_vm8, %v379_v42, %v375_v56  ;;  %v417_v16 = vadd.f32 %v768_v39, %v416_v5 }
  0xcd   : > { %v358_v7 = vsel %vm195_vm0, %v288_v61, %v355_v59  ;;  %v397_v8 = vsel %vm786_vm9, %v609_v36, %v393_v63  ;;  %v429_v9 = vmul.f32 %v613_v51, %v380_v62 }
  0xce   : > { %v359_v6 = vsel %vm197_vm1, %v356_v54, %v357_v60  ;;  %v402_v11 = vsel %vm399_vm10, %v401_v58, %v397_v8  ;;  %v421_v22 = vsel %vm420_vm13, %v768_v39, %v417_v16 }
  0xcf   : > { %v360_v10 = vsel %vm199_vm2, %v358_v7, %v359_v6  ;;  %v428_v15 = vmul.f32 %v688_v2, %v402_v11  ;;  %v426_v23 = vsel %vm423_vm14, %v425_v21, %v421_v22 }
  0xd0   : > { %v362_v12 = vadd.f32 %v360_v10, %v206_v4 }
  0xd1   : > { %v802_v2 = vadd.f32 %v429_v9, %v428_v15  }
  0xd2   : > { %v550_v17 = vmul.f32 -1.442695, %v362_v12  ;;  %v453_v18 = vrot.slane %v362_v12, 2  ;;  %v477_v19 = vrot.slane %v362_v12, 6  ;;  %v474_v35 = vrot.slane %v362_v12, 4 }
  0xd4   : > { %614 = vpow2.f32 %v550_v17  ;;  %v551_v1 = vmul.f32 -1.442695, %v453_v18  ;;  %v552_v20 = vmul.f32 -1.442695, %v477_v19 }
  0xd5   : > { %616 = vtanh.f32 %v802_v2 }
  0xd6   : > { %618 = vpow2.f32 %v551_v1 }
  0xd7   : > { %620 = vpow2.f32 %v552_v20 }
  0xda   : > { %v615_v24 = vpop.eup %614 }
  0xdb   : > { %v617_v25 = vpop.eup %616  ;;  %v436_v26 = vadd.f32 1.0, %v615_v24 }
  0xdc   : > { %v619_v27 = vpop.eup %618  ;;  %v810_v3 = vmul.f32 %v617_v25, %v426_v23  }
  0xdd   : > { %622 = vrcp.f32 %v436_v26  ;;  %v621_v28 = vpop.eup %620  ;;  %v458_v29 = vadd.f32 1.0, %v619_v27  ;;  %v448_v39 = vand.u32 2147483648, %v436_v26  ;;  %v446_v41 = vand.u32 2147483647, %v436_v26 }
  0xde   : > { %505 = vst [vmem:[%s504_s4] sm:$0x3] %v810_v3  ;;  %v482_v30 = vadd.f32 1.0, %v621_v28  ;;  %vm442_vm0 = vweird.f32 %v436_v26 }
  0xdf   : > { %624 = vrcp.f32 %v458_v29  ;;  %v470_v44 = vand.u32 2147483648, %v458_v29  ;;  %v468_v46 = vand.u32 2147483647, %v458_v29  ;;  %v449_v48 = vor.u32 1.1754944e-38, %v448_v39 }
  0xe0   : > { %626 = vrcp.f32 %v482_v30  ;;  %vm447_vm3 = vcmp.eq.f32.partialorder %v446_v41, 8.507059e+37  ;;  %vm464_vm4 = vweird.f32 %v458_v29  ;;  %v494_v60 = vand.u32 2147483648, %v482_v30 }
  0xe1   : > { %628 = vtanh.f32 %v474_v35  ;;  %v471_v52 = vor.u32 1.1754944e-38, %v470_v44  ;;  %vm469_vm6 = vcmp.eq.f32.partialorder %v468_v46, 8.507059e+37  ;;  %vm488_vm8 = vweird.f32 %v482_v30 }
  0xe2   : > { %v492_v61 = vand.u32 2147483647, %v482_v30  ;;  %v495_v63 = vor.u32 1.1754944e-38, %v494_v60 }
  0xe3   : > { %v623_v31 = vpop.eup %622 }
  0xe4   : > { %v438_v32 = vmul.f32 %v623_v31, %v436_v26  ;;  %vm443_vm15 = vweird.f32 %v623_v31  ;;  %vm493_vm10 = vcmp.eq.f32.partialorder %v492_v61, 8.507059e+37 }
  0xe5   : > { %v625_v33 = vpop.eup %624  ;;  %vm444_vm1 = vmor %vm442_vm0, %vm443_vm15 }
  0xe6   : > { %v439_v34 = vsub.f32 1.0, %v438_v32  ;;  %v627_v36 = vpop.eup %626  ;;  %v460_v37 = vmul.f32 %v625_v33, %v458_v29  ;;  %vm465_vm2 = vweird.f32 %v625_v33 }
  0xe7   : > { %v484_v40 = vmul.f32 %v627_v36, %v482_v30  ;;  %vm466_vm5 = vmor %vm464_vm4, %vm465_vm2  ;;  %v629_v54 = vpop.eup %628  ;;  %vm489_vm7 = vweird.f32 %v627_v36 }
  0xe8   : > { %v440_v38 = vmul.f32 %v623_v31, %v439_v34  ;;  %v461_v42 = vsub.f32 1.0, %v460_v37  ;;  %vm490_vm9 = vmor %vm488_vm8, %vm489_vm7 }
  0xe9   : > { %v485_v49 = vsub.f32 1.0, %v484_v40 }
  0xea   : > { %v441_v43 = vadd.f32 %v623_v31, %v440_v38  ;;  %v462_v45 = vmul.f32 %v625_v33, %v461_v42 }
  0xeb   : > { %v486_v56 = vmul.f32 %v627_v36, %v485_v49 }
  0xec   : > { %v445_v47 = vsel %vm444_vm1, %v623_v31, %v441_v43  ;;  %v463_v50 = vadd.f32 %v625_v33, %v462_v45 }
  0xed   : > { %v450_v51 = vsel %vm447_vm3, %v449_v48, %v445_v47  ;;  %v487_v59 = vadd.f32 %v627_v36, %v486_v56 }
  0xee   : > { %v467_v53 = vsel %vm466_vm5, %v625_v33, %v463_v50  ;;  %v499_v58 = vmul.f32 %v629_v54, %v450_v51 }
  0xef   : > { %v472_v55 = vsel %vm469_vm6, %v471_v52, %v467_v53  ;;  %v491_v62 = vsel %vm490_vm9, %v627_v36, %v487_v59 }
  0xf0   : > { %v498_v57 = vmul.f32 %v680_v0, %v472_v55  ;;  %v496_v5 = vsel %vm493_vm10, %v495_v63, %v491_v62 }
  0xf2   : > { %v500_v0 = vadd.f32 %v499_v58, %v498_v57  }
  0xf4   : > { %630 = vtanh.f32 %v500_v0 }
  0xf9   :  { %33 = sbr.rel (!%p31_p0) target bundleno = 7 (0x7), region = 51 }
  0xfa   : > { %v631_v4 = vpop.eup %630 }
  0xfb   : > { %v502_v1 = vmul.f32 %v631_v4, %v496_v5  }
  0xfd   : > { %508 = vst [vmem:[%s507_s8] sm:$0x3] %v502_v1 }
  0xfe   :  { %517 = vsyncpa [#allocation3], 1 }

// kernel: attend_crnn_forward.24
= control target key start
LH: loop header
LB: loop body
LE: loop exit
PB: predicated region body
PF: predicated region fallthrough
CT: control target
= control target key end

     0   :  { %s409_s1 = inlined_call_operand.vmem [shape: bf16[256,128], index: 1, kind: input, shape index: {}]   ;;  %s410_s0 = inlined_call_operand.vmem [shape: bf16[16,256], index: 0, kind: input, shape index: {}]   ;;  %s411_s2 = inlined_call_operand.vmem [shape: f32[1,128], index: 2, kind: input, shape index: {}]   ;;  %s412_s3 = inlined_call_operand.vmem [shape: f32[1,128], index: 3, kind: input, shape index: {}]   ;;  %s413_s4 = inlined_call_operand.vmem [shape: f32[16,128], index: 4, kind: output, shape index: {}]  }
   0x1   :  { %v301_v0 = vld [vmem:[%s409_s1 + $0x38] sm:$0xff]  ;;  %v300_v2 = vld [vmem:[%s409_s1 + $0x30] sm:$0xff]  ;;  %v299_v4 = vld [vmem:[%s409_s1 + $0x28] sm:$0xff] }
   0x2   :  { %v309_v1 = vld [vmem:[%s409_s1 + $0x78] sm:$0xff]  ;;  %165 = vmatpush.bf16.msra.mxu0 %v301_v0  ;;  %v308_v3 = vld [vmem:[%s409_s1 + $0x70] sm:$0xff]  ;;  %v307_v5 = vld [vmem:[%s409_s1 + $0x68] sm:$0xff] }
   0x3   :  { %179 = vmatpush.bf16.msra.mxu1 %v309_v1  ;;  %v298_v6 = vld [vmem:[%s409_s1 + $0x20] sm:$0xff]  ;;  %v297_v8 = vld [vmem:[%s409_s1 + $0x18] sm:$0xff]  ;;  %v296_v10 = vld [vmem:[%s409_s1 + $0x10] sm:$0xff] }
   0x4   :  { %v306_v7 = vld [vmem:[%s409_s1 + $0x60] sm:$0xff]  ;;  %v305_v9 = vld [vmem:[%s409_s1 + $0x58] sm:$0xff]  ;;  %v304_v11 = vld [vmem:[%s409_s1 + $0x50] sm:$0xff] }
   0x5   :  { %v295_v12 = vld [vmem:[%s409_s1 + $0x8] sm:$0xff]  ;;  %v294_v14 = vld [vmem:[%s409_s1] sm:$0xff] }
   0x6   :  { %166 = vmatpush.bf16.msra.mxu0 %v300_v2  ;;  %v303_v13 = vld [vmem:[%s409_s1 + $0x48] sm:$0xff]  ;;  %v302_v15 = vld [vmem:[%s409_s1 + $0x40] sm:$0xff] }
   0x7   :  { %180 = vmatpush.bf16.msra.mxu1 %v308_v3  ;;  %v222_v16 = vld [vmem:[%s410_s0] sm:$0xf]  ;;  %v293_v17 = vld [vmem:[%s410_s0 + $0x4] sm:$0xf0]  ;;  %v292_v18 = vld [vmem:[%s410_s0 + $0x4] sm:$0xf] }
   0x8   :  { %v224_v19 = vld [vmem:[%s410_s0 + $0x8] sm:$0xf0]  ;;  %v223_v20 = vor.u32 %v293_v17, %v222_v16  ;;  %v310_v22 = vld [vmem:[%s411_s2] ss:$0 sm:$0xff] }
   0x9   :  { %v227_v21 = vor.u32 %v292_v18, %v224_v19  ;;  %v311_v26 = vld [vmem:[%s412_s3] ss:$0 sm:$0xff] }
   0xa   :  { %167 = vmatpush.bf16.msra.mxu0 %v299_v4 }
   0xb   :  { %181 = vmatpush.bf16.msra.mxu1 %v307_v5 }
   0xe   :  { %168 = vmatpush.bf16.msra.mxu0 %v298_v6 }
   0xf   :  { %182 = vmatpush.bf16.msra.mxu1 %v306_v7 }
  0x12   :  { %169 = vmatpush.bf16.msra.mxu0 %v297_v8 }
  0x13   :  { %183 = vmatpush.bf16.msra.mxu1 %v305_v9 }
  0x16   :  { %170 = vmatpush.bf16.msra.mxu0 %v296_v10 }
  0x17   :  { %184 = vmatpush.bf16.msra.mxu1 %v304_v11 }
  0x1a   :  { %171 = vmatpush.bf16.msra.mxu0 %v295_v12 }
  0x1b   :  { %185 = vmatpush.bf16.msra.mxu1 %v303_v13 }
  0x1e   :  { %172 = vmatpush.bf16.msra.mxu0 %v294_v14 }
  0x1f   :  { %186 = vmatpush.bf16.msra.mxu1 %v302_v15 }
  0x21   :  { %173 = vmatmul.bf16.vlgmr.msra.gmra.mxu0 %v223_v20 }
  0x22   :  { %187 = vmatmul.bf16.vlgmr.msra.gmra.mxu1 %v227_v21 }
  0x9e   :  { %v174_v23 = vpop.f32.mrf.mxu0 }
  0x9f   :  { %v188_v24 = vpop.f32.mrf.mxu1 }
  0xa0   :  { %v189_v25 = vadd.f32 %v188_v24, %v174_v23 }
  0xa2   :  { %v206_v27 = vmul.f32 %v310_v22, %v189_v25 }
  0xa4   :  { %v212_v28 = vadd.f32 %v311_v26, %v206_v27 }
  0xa6   :  { %214 = vst [vmem:[%s413_s4] sm:$0xff] %v212_v28  ;;  %v176_v29 = vpop.f32.mrf.mxu0 }
  0xa7   :  { %v190_v30 = vpop.f32.mrf.mxu1 }
  0xa8   :  { %v191_v31 = vadd.f32 %v190_v30, %v176_v29 }
  0xaa   :  { %v207_v32 = vmul.f32 %v310_v22, %v191_v31 }
  0xac   :  { %v213_v33 = vadd.f32 %v311_v26, %v207_v32 }
  0xae   :  { %215 = vst [vmem:[%s413_s4 + $0x8] sm:$0xff] %v213_v33 }

// kernel: attend_crnn_forward.25
= control target key start
LH: loop header
LB: loop body
LE: loop exit
PB: predicated region body
PF: predicated region fallthrough
CT: control target
= control target key end

     0   :  { %s824_s15 = smov 0   ;;  %s826_s16 = smov 0   ;;  %s925_s0 = inlined_call_operand.vmem [shape: bf16[16,128], index: 0, kind: input, shape index: {}]   ;;  %s926_s1 = inlined_call_operand.vmem [shape: bf16[128,384], index: 1, kind: input, shape index: {}]   ;;  %s927_s2 = inlined_call_operand.vmem [shape: f32[1,384], index: 2, kind: input, shape index: {}]   ;;  %s928_s3 = inlined_call_operand.vmem [shape: f32[1,384], index: 3, kind: input, shape index: {}]   ;;  %s929_s4 = inlined_call_operand.vmem [shape: f32[16,384], index: 4, kind: output, shape index: {}]  }
   0x1   :  { %s828_s17 = smov 0   ;;  %s830_s18 = smov 0  }
   0x2   :  { %s832_s19 = smov 0  }
   0x3 LB: > { %s29_s20 = sadd.s32 1, %s793_s18  ;;  %s658_s21 = sadd.s32 4294967295, %s797_s19   ;;  %s797_s19 = sphi %s832_s19, %s14_s19   ;;  %s793_s18 = sphi %s830_s18, %s934_s18   ;;  %s789_s17 = sphi %s828_s17, %s933_s17   ;;  %s785_s16 = sphi %s826_s16, %s932_s16   ;;  %s781_s15 = sphi %s824_s15, %s931_s15  }
   0x4   : > { %p31_p0 = scmp.ge.s32.totalorder %s29_s20, 3  ;;  %p77_p1 = scmp.ne.s32.totalorder %s785_s16, %s781_s15 }
   0x5   : > { %p78_p2 = scmp.eq.s32.totalorder %s797_s19, 0  ;;  %p161_p4 = scmp.eq.s32.totalorder %s658_s21, 2 }
   0x6   : > { %s936_s20 = smov (%p31_p0, %s29_s20), 0  ;;  %s70_s23 = sadd.s32 1, %s785_s16 }
   0x7   : > { %p79_p3 = por %p78_p2, %p77_p1  ;;  %s66_s22 = ssub.s32 %s793_s18, %s936_s20 }
   0x8   : > { %p68_p5 = scmp.eq.s32.totalorder %s66_s22, 0  ;;  %p859_p6 = por %p161_p4, %p77_p1 }
   0x9   : > { %p662_p7 = scmp.ge.s32.totalorder %s797_s19, 3 }
   0xa   : > { %s864_s25 = scalar_select %p68_p5, %s785_s16, %s70_s23  }
   0xb   : > { %195 = sbr.rel (%p662_p7) target bundleno = 36 (0x24), region = 20 }
  0x10   : > { %198 = sbr.rel (!%p79_p3) target bundleno = 36 (0x24), region = 24  ;;  %s200_s26 = sand.u32 (%p79_p3), 1, %s785_s16  }
  0x11   : > { %s664_s27 = sshll.u32 (%p79_p3), %s793_s18, 2  ;;  %s663_s28 = sshll.u32 (%p79_p3), %s200_s26, 6 }
  0x12   : > { %s872_s5 = scalar_lea.vmem (%p79_p3), %s926_s1, %s664_s27  ;;  %s202_s6 = scalar_lea.vmem (%p79_p3), [#allocation3], %s663_s28 }
  0x13   : > { %v224_v0 = vld [vmem:[%s872_s5] sm:$0xf] (%p79_p3)  ;;  %v226_v1 = vld [vmem:[%s872_s5 + $0xc] sm:$0xf] (%p79_p3)  ;;  %v228_v2 = vld [vmem:[%s872_s5 + $0x18] sm:$0xf] (%p79_p3) }
  0x14   : > { %225 = vst [vmem:[%s202_s6] sm:$0xf] (%p79_p3), %v224_v0  ;;  %v230_v3 = vld [vmem:[%s872_s5 + $0x24] sm:$0xf] (%p79_p3)  ;;  %v232_v4 = vld [vmem:[%s872_s5 + $0x30] sm:$0xf] (%p79_p3) }
  0x15   : > { %227 = vst [vmem:[%s202_s6 + $0x4] sm:$0xf] %v226_v1  ;;  %v234_v5 = vld [vmem:[%s872_s5 + $0x3c] sm:$0xf]  ;;  %v236_v6 = vld [vmem:[%s872_s5 + $0x48] sm:$0xf] }
  0x16   : > { %229 = vst [vmem:[%s202_s6 + $0x8] sm:$0xf] %v228_v2  ;;  %v238_v7 = vld [vmem:[%s872_s5 + $0x54] sm:$0xf]  ;;  %v240_v8 = vld [vmem:[%s872_s5 + $0x60] sm:$0xf] }
  0x17   : > { %231 = vst [vmem:[%s202_s6 + $0xc] sm:$0xf] %v230_v3  ;;  %v242_v9 = vld [vmem:[%s872_s5 + $0x6c] sm:$0xf]  ;;  %v244_v10 = vld [vmem:[%s872_s5 + $0x78] sm:$0xf] }
  0x18   : > { %233 = vst [vmem:[%s202_s6 + $0x10] sm:$0xf] %v232_v4  ;;  %v246_v11 = vld [vmem:[%s872_s5 + $0x84] sm:$0xf]  ;;  %v248_v12 = vld [vmem:[%s872_s5 + $0x90] sm:$0xf] }
  0x19   : > { %235 = vst [vmem:[%s202_s6 + $0x14] sm:$0xf] %v234_v5  ;;  %v250_v13 = vld [vmem:[%s872_s5 + $0x9c] sm:$0xf]  ;;  %v252_v14 = vld [vmem:[%s872_s5 + $0xa8] sm:$0xf] }
  0x1a   : > { %237 = vst [vmem:[%s202_s6 + $0x18] sm:$0xf] %v236_v6  ;;  %v254_v15 = vld [vmem:[%s872_s5 + $0xb4] sm:$0xf] }
  0x1b   : > { %239 = vst [vmem:[%s202_s6 + $0x1c] sm:$0xf] %v238_v7 }
  0x1c   : > { %241 = vst [vmem:[%s202_s6 + $0x20] sm:$0xf] %v240_v8 }
  0x1d   : > { %243 = vst [vmem:[%s202_s6 + $0x24] sm:$0xf] %v242_v9 }
  0x1e   : > { %245 = vst [vmem:[%s202_s6 + $0x28] sm:$0xf] %v244_v10 }
  0x1f   : > { %247 = vst [vmem:[%s202_s6 + $0x2c] sm:$0xf] %v246_v11 }
  0x20   : > { %249 = vst [vmem:[%s202_s6 + $0x30] sm:$0xf] %v248_v12 }
  0x21   : > { %251 = vst [vmem:[%s202_s6 + $0x34] sm:$0xf] %v250_v13 }
  0x22   : > { %253 = vst [vmem:[%s202_s6 + $0x38] sm:$0xf] %v252_v14 }
  0x23   : > { %255 = vst [vmem:[%s202_s6 + $0x3c] sm:$0xf] %v254_v15 }
  0x24 PF: > { %p665_p8 = scmp.ge.s32.totalorder %s797_s19, 1  ;;  %p322_p9 = scmp.lt.s32.totalorder %s797_s19, 4 }
  0x26   : > { %p323_p10 = pnand %p665_p8, %p322_p9 }
  0x27   : > { %s329_s7 = sand.u32 (!%p323_p10), 1, %s781_s15   ;;  %p377_p11 = scmp.lt.s32.totalorder (!%p323_p10), %s789_s17, 2 }
  0x28   : > { %326 = sbr.rel (%p323_p10) target bundleno = 224 (0xe0), region = 73  ;;  %s666_s8 = sshll.u32 (!%p323_p10), %s329_s7, 6 }
  0x29   : > { %s331_s9 = scalar_lea.vmem (!%p323_p10), [#allocation3], %s666_s8  ;;  %s667_s26 = sshll.u32 (!%p323_p10), %s329_s7, 4 }
  0x2a   : > { %s366_s27 = scalar_lea.vmem (!%p323_p10), [#allocation4], %s667_s26 }
  0x2d   : > { %v716_v16 = vld [vmem:[%s331_s9 + $0x38] sm:$0xff]  ;;  %s378_s10 = scalar_select %p377_p11, %s789_s17, 2  ;;  %v715_v17 = vld [vmem:[%s331_s9 + $0x30] sm:$0xff]  ;;  %v714_v18 = vld [vmem:[%s331_s9 + $0x28] sm:$0xff] }
  0x2e   : > { %464 = vmatpush.bf16.msra.mxu0 %v716_v16  ;;  %v713_v19 = vld [vmem:[%s331_s9 + $0x20] sm:$0xff]  ;;  %v712_v20 = vld [vmem:[%s331_s9 + $0x18] sm:$0xff]  ;;  %v711_v21 = vld [vmem:[%s331_s9 + $0x10] sm:$0xff]  ;;  %s705_s28 = sshll.u32 (%p859_p6), %s789_s17, 3 }
  0x2f   : > { %s379_s13 = scalar_lea.vmem %s927_s2, %s378_s10  ;;  %s382_s22 = scalar_lea.vmem %s928_s3, %s378_s10  ;;  %v710_v22 = vld [vmem:[%s331_s9 + $0x8] sm:$0xff]  ;;  %v709_v23 = vld [vmem:[%s331_s9] sm:$0xff] }
  0x30   : > { %v708_v24 = vld [vmem:[%s925_s0] sm:$0xff]  ;;  %s512_s5 = scalar_lea.vmem (%p859_p6), %s929_s4, %s705_s28 }
  0x31   : > { %v757_v25 = vld [vmem:[%s379_s13] ss:$0 sm:$0xff] }
  0x32   : > { %465 = vmatpush.bf16.msra.mxu0 %v715_v17  ;;  %v758_v26 = vld [vmem:[%s382_s22] ss:$0 sm:$0xff] }
  0x36   : > { %466 = vmatpush.bf16.msra.mxu0 %v714_v18 }
  0x3a   : > { %467 = vmatpush.bf16.msra.mxu0 %v713_v19 }
  0x3e   : > { %468 = vmatpush.bf16.msra.mxu0 %v712_v20 }
  0x42   : > { %469 = vmatpush.bf16.msra.mxu0 %v711_v21 }
  0x46   : > { %470 = vmatpush.bf16.msra.mxu0 %v710_v22 }
  0x4a   : > { %471 = vmatpush.bf16.msra.mxu0 %v709_v23 }
  0x4d   : > { %472 = vmatmul.bf16.vlgmr.msra.gmra.mxu0 %v708_v24 }
  0xca   : > { %v473_v27 = vpop.f32.mrf.mxu0 }
  0xcb   : > { %v491_v28 = vmul.f32 %v757_v25, %v473_v27 }
  0xcd   : > { %v497_v29 = vadd.f32 %v758_v26, %v491_v28 }
  0xcf   : > { %499 = vst [vmem:[%s366_s27] sm:$0xff] %v497_v29 }
  0xd2   : > { %v475_v30 = vpop.f32.mrf.mxu0 }
  0xd3   : > { %v492_v31 = vmul.f32 %v757_v25, %v475_v30  ;;  %507 = sbr.rel (!%p859_p6) target bundleno = 224 (0xe0), region = 89 }
  0xd5   : > { %v498_v32 = vadd.f32 %v758_v26, %v492_v31 }
  0xd6   : > { %v543_v33 = vld [vmem:[%s366_s27] sm:$0xff] (%p859_p6) }
  0xd7   : > { %500 = vst [vmem:[%s366_s27 + $0x8] sm:$0xff] %v498_v32 }
  0xd8   : > { %544 = vst [vmem:[%s512_s5] sm:$0xff] %v543_v33 }
  0xde   : > { %v545_v34 = vld [vmem:[%s366_s27 + $0x8] sm:$0xff] }
  0xdf   : > { %546 = vst [vmem:[%s512_s5 + $0x18] sm:$0xff] %v545_v34 }
  0xe0 PF: > { %s14_s19 = sadd.s32 1, %s797_s19   ;;  %s931_s15 = smov %s785_s16 }
  0xe1   : > { %p11_p12 = scmp.ge.s32.totalorder %s14_s19, 5   ;;  %s932_s16 = smov %s864_s25 }
  0xe2   : > { %s933_s17 = smov %s793_s18  ;;  %s934_s18 = smov %s936_s20 }
  0xe3   :  { %13 = sbr.rel (!%p11_p12) target bundleno = 3 (0x3), region = 167 }

// kernel: attend_crnn_forward.26
= control target key start
LH: loop header
LB: loop body
LE: loop exit
PB: predicated region body
PF: predicated region fallthrough
CT: control target
= control target key end

     0   :  { %vm58_vm0 = vcmask 36864   ;;  %vm85_vm1 = vcmask 1044480   ;;  %vm81_vm2 = vcmask 39936   ;;  %vm135_vm3 = vcmask 258048   ;;  %s211_s0 = inlined_call_operand.vmem [shape: f32[2,5,384], index: 0, kind: input, shape index: {}]   ;;  %s212_s2 = inlined_call_operand.vmem [shape: f32[2,5,5], index: 2, kind: output, shape index: {1}]   ;;  %s213_s1 = inlined_call_operand.vmem [shape: f32[2,5,32], index: 1, kind: output, shape index: {0}]  }
   0x1   :  { %v12_v0 = vld [vmem:[%s211_s0 + $0x8] sm:$0x1f]  ;;  %v13_v1 = vld [vmem:[%s211_s0 + $0x20] sm:$0x1f]  ;;  %v11_v3 = vld [vmem:[%s211_s0 + $0x18] sm:$0x1f] }
   0x2   :  { %31 = vmatpush.xpose.msra.mxu0 %v12_v0  ;;  %v10_v2 = vld [vmem:[%s211_s0] sm:$0x1f]  ;;  %51 = vmatpush.xpose.msra.mxu1 %v13_v1  ;;  %v14_v20 = vld [vmem:[%s211_s0 + $0x10] sm:$0x1f]  ;;  %v15_v21 = vld [vmem:[%s211_s0 + $0x28] sm:$0x1f] }
   0x3   :  { %148 = vmatpush.msk.msra.mxu2 %vm85_vm1, %v14_v20  ;;  %150 = vmatpush.msk.msra.mxu3 %vm85_vm1, %v15_v21 }
   0x5   :  { %32 = vmatmul.f32.vlgmr.msra.gmra.mxu0 %v10_v2  ;;  %52 = vmatmul.f32.vlgmr.msra.gmra.mxu1 %v11_v3 }
  0x82   :  { %v33_v4 = vpop.f32.mrf.mxu0  ;;  %v53_v6 = vpop.f32.mrf.mxu1 }
  0x83   :  { %v56_v5 = vmul.f32 0.17677669, %v33_v4  ;;  %v57_v8 = vmul.f32 0.17677669, %v53_v6 }
  0x85   :  { %v59_v7 = vsel %vm58_vm0, %v56_v5, -inf  ;;  %v62_v9 = vsel %vm58_vm0, %v57_v8, -inf }
  0x86   :  { %60 = vmax.xlane.f32.xlu0 %v59_v7 }
  0x8e   :  { %63 = vmax.xlane.f32.xlu0 %v62_v9 }
  0xf9   :  { %v61_v10 = vpop.xlane.xlu0 %60 }
  0xfa   :  { %v65_v11 = vsub.f32 %v56_v5, %v61_v10 }
  0xfc   :  { %v67_v12 = vmul.f32 1.442695, %v65_v11 }
  0xfe   :  { %152 = vpow2.f32 %v67_v12 }
 0x101   :  { %v64_v13 = vpop.xlane.xlu0 %63 }
 0x102   :  { %v66_v14 = vsub.f32 %v57_v8, %v64_v13 }
 0x104   :  { %v153_v15 = vpop.eup %152  ;;  %v69_v16 = vmul.f32 1.442695, %v66_v14 }
 0x105   :  { %v71_v17 = vsel %vm58_vm0, %v153_v15, 0.0 }
 0x106   :  { %154 = vpow2.f32 %v69_v16  ;;  %72 = vadd.xlane.f32.xlu1 %v71_v17 }
 0x10c   :  { %v155_v18 = vpop.eup %154 }
 0x10d   :  { %v74_v19 = vsel %vm58_vm0, %v155_v18, 0.0 }
 0x10e   :  { %75 = vadd.xlane.f32.xlu1 %v74_v19 }
 0x179   :  { %v73_v22 = vpop.xlane.xlu1 %72 }
 0x17a   :  { %156 = vrcp.f32 %v73_v22 }
 0x180   :  { %v157_v23 = vpop.eup %156 }
 0x181   :  { %v76_v24 = vpop.xlane.xlu1 %75  ;;  %v79_v25 = vmul.f32 %v157_v23, %v153_v15 }
 0x182   :  { %158 = vrcp.f32 %v76_v24 }
 0x183   :  { %149 = vmatmul.msk.f32.vlgmr.msra.gmra.mxu2 %vm81_vm2, %v79_v25  ;;  %138 = vst.msk [vmem:[%s212_s2] sm:$0x1f] %vm58_vm0, %v79_v25 }
 0x188   :  { %v159_v26 = vpop.eup %158 }
 0x189   :  { %v80_v27 = vmul.f32 %v159_v26, %v155_v18 }
 0x18b   :  { %151 = vmatmul.msk.f32.vlgmr.msra.gmra.mxu3 %vm81_vm2, %v80_v27  ;;  %139 = vst.msk [vmem:[%s212_s2 + $0x8] sm:$0x1f] %vm58_vm0, %v80_v27 }
 0x206   :  { %v106_v28 = vpop.f32.mrf.mxu2 }
 0x207   :  { %136 = vst.msk [vmem:[%s213_s1] sm:$0x1f] %vm135_vm3, %v106_v28 }
 0x20e   :  { %v132_v29 = vpop.f32.mrf.mxu3 }
 0x20f   :  { %137 = vst.msk [vmem:[%s213_s1 + $0x8] sm:$0x1f] %vm135_vm3, %v132_v29 }

// kernel: attend_crnn_forward.27
= control target key start
LH: loop header
LB: loop body
LE: loop exit
PB: predicated region body
PF: predicated region fallthrough
CT: control target
= control target key end

     0   :  { %s928_s15 = smov 0   ;;  %s930_s16 = smov 0   ;;  %s1066_s0 = inlined_call_operand.vmem [shape: bf16[16,128], index: 0, kind: input, shape index: {}]   ;;  %s1067_s1 = inlined_call_operand.vmem [shape: bf16[128,1024], index: 1, kind: input, shape index: {}]   ;;  %s1068_s2 = inlined_call_operand.vmem [shape: f32[1,1024], index: 2, kind: input, shape index: {}]   ;;  %s1069_s3 = inlined_call_operand.vmem [shape: f32[1,1024], index: 3, kind: input, shape index: {}]   ;;  %s1070_s4 = inlined_call_operand.vmem [shape: f32[16,1024], index: 4, kind: output, shape index: {}]  }
   0x1   :  { %s932_s17 = smov 0   ;;  %s934_s18 = smov 0  }
   0x2   :  { %s936_s19 = smov 0  }
   0x3 LB: > { %s29_s20 = sadd.s32 1, %s897_s18  ;;  %s718_s21 = sadd.s32 4294967295, %s901_s19   ;;  %s901_s19 = sphi %s936_s19, %s14_s19   ;;  %s897_s18 = sphi %s934_s18, %s1075_s18   ;;  %s893_s17 = sphi %s932_s17, %s1074_s17   ;;  %s889_s16 = sphi %s930_s16, %s1073_s16   ;;  %s885_s15 = sphi %s928_s15, %s1072_s15  }
   0x4   : > { %p31_p0 = scmp.ge.s32.totalorder %s29_s20, 4  ;;  %p77_p1 = scmp.ne.s32.totalorder %s889_s16, %s885_s15 }
   0x5   : > { %p78_p2 = scmp.eq.s32.totalorder %s901_s19, 0  ;;  %p161_p4 = scmp.eq.s32.totalorder %s718_s21, 3 }
   0x6   : > { %s1077_s20 = smov (%p31_p0, %s29_s20), 0  ;;  %s70_s23 = sadd.s32 1, %s889_s16 }
   0x7   : > { %p79_p3 = por %p78_p2, %p77_p1  ;;  %s66_s22 = ssub.s32 %s897_s18, %s1077_s20 }
   0x8   : > { %p68_p5 = scmp.eq.s32.totalorder %s66_s22, 0  ;;  %p963_p6 = por %p161_p4, %p77_p1 }
   0x9   : > { %p722_p7 = scmp.ge.s32.totalorder %s901_s19, 4 }
   0xa   : > { %s968_s25 = scalar_select %p68_p5, %s889_s16, %s70_s23  }
   0xb   : > { %195 = sbr.rel (%p722_p7) target bundleno = 36 (0x24), region = 20 }
  0x10   : > { %198 = sbr.rel (!%p79_p3) target bundleno = 36 (0x24), region = 24  ;;  %s200_s26 = sand.u32 (%p79_p3), 1, %s889_s16  }
  0x11   : > { %s804_s27 = sshll.u32 (%p79_p3), %s897_s18, 3  ;;  %s723_s28 = sshll.u32 (%p79_p3), %s200_s26, 7 }
  0x12   : > { %s976_s5 = scalar_lea.vmem (%p79_p3), %s1067_s1, %s804_s27  ;;  %s202_s6 = scalar_lea.vmem (%p79_p3), [#allocation3], %s723_s28 }
  0x13   : > { %v267_v0 = vld [vmem:[%s976_s5] sm:$0xff] (%p79_p3) }
  0x14   : > { %v269_v1 = vld [vmem:[%s976_s5 + $0x20] sm:$0xff] (%p79_p3)  ;;  %268 = vst [vmem:[%s202_s6] sm:$0xff] (%p79_p3), %v267_v0 }
  0x15   : > { %v271_v2 = vld [vmem:[%s976_s5 + $0x40] sm:$0xff]  ;;  %270 = vst [vmem:[%s202_s6 + $0x8] sm:$0xff] %v269_v1 }
  0x16   : > { %v273_v3 = vld [vmem:[%s976_s5 + $0x60] sm:$0xff]  ;;  %272 = vst [vmem:[%s202_s6 + $0x10] sm:$0xff] %v271_v2 }
  0x17   : > { %v275_v4 = vld [vmem:[%s976_s5 + $0x80] sm:$0xff]  ;;  %274 = vst [vmem:[%s202_s6 + $0x18] sm:$0xff] %v273_v3 }
  0x18   : > { %v277_v5 = vld [vmem:[%s976_s5 + $0xa0] sm:$0xff]  ;;  %276 = vst [vmem:[%s202_s6 + $0x20] sm:$0xff] %v275_v4 }
  0x19   : > { %v279_v6 = vld [vmem:[%s976_s5 + $0xc0] sm:$0xff]  ;;  %278 = vst [vmem:[%s202_s6 + $0x28] sm:$0xff] %v277_v5 }
  0x1a   : > { %v281_v7 = vld [vmem:[%s976_s5 + $0xe0] sm:$0xff]  ;;  %280 = vst [vmem:[%s202_s6 + $0x30] sm:$0xff] %v279_v6 }
  0x1b   : > { %v283_v8 = vld [vmem:[%s976_s5 + $0x100] sm:$0xff]  ;;  %282 = vst [vmem:[%s202_s6 + $0x38] sm:$0xff] %v281_v7 }
  0x1c   : > { %v285_v9 = vld [vmem:[%s976_s5 + $0x120] sm:$0xff]  ;;  %284 = vst [vmem:[%s202_s6 + $0x40] sm:$0xff] %v283_v8 }
  0x1d   : > { %v287_v10 = vld [vmem:[%s976_s5 + $0x140] sm:$0xff]  ;;  %286 = vst [vmem:[%s202_s6 + $0x48] sm:$0xff] %v285_v9 }
  0x1e   : > { %v289_v11 = vld [vmem:[%s976_s5 + $0x160] sm:$0xff]  ;;  %288 = vst [vmem:[%s202_s6 + $0x50] sm:$0xff] %v287_v10 }
  0x1f   : > { %v291_v12 = vld [vmem:[%s976_s5 + $0x180] sm:$0xff]  ;;  %290 = vst [vmem:[%s202_s6 + $0x58] sm:$0xff] %v289_v11 }
  0x20   : > { %v293_v13 = vld [vmem:[%s976_s5 + $0x1a0] sm:$0xff]  ;;  %292 = vst [vmem:[%s202_s6 + $0x60] sm:$0xff] %v291_v12 }
  0x21   : > { %v295_v14 = vld [vmem:[%s976_s5 + $0x1c0] sm:$0xff]  ;;  %294 = vst [vmem:[%s202_s6 + $0x68] sm:$0xff] %v293_v13 }
  0x22   : > { %v297_v15 = vld [vmem:[%s976_s5 + $0x1e0] sm:$0xff]  ;;  %296 = vst [vmem:[%s202_s6 + $0x70] sm:$0xff] %v295_v14 }
  0x23   : > { %298 = vst [vmem:[%s202_s6 + $0x78] sm:$0xff] %v297_v15 }
  0x24 PF: > { %p726_p8 = scmp.ge.s32.totalorder %s901_s19, 1  ;;  %p319_p9 = scmp.lt.s32.totalorder %s901_s19, 5 }
  0x26   : > { %p320_p10 = pnand %p726_p8, %p319_p9 }
  0x27   : > { %s326_s7 = sand.u32 (!%p320_p10), 1, %s885_s15   ;;  %s729_s12 = sshll.u32 (!%p320_p10), %s893_s17, 1 }
  0x28   : > { %323 = sbr.rel (%p320_p10) target bundleno = 227 (0xe3), region = 70  ;;  %s727_s8 = sshll.u32 (!%p320_p10), %s326_s7, 7 }
  0x29   : > { %s999_s9 = scalar_lea.vmem (!%p320_p10), [#allocation3], %s727_s8  ;;  %p378_p11 = scmp.lt.s32.totalorder (!%p320_p10), %s729_s12, 7 }
  0x2a   : > { %s728_s27 = sshll.u32 (!%p320_p10), %s326_s7, 5 }
  0x2b   : > { %s365_s28 = scalar_lea.vmem (!%p320_p10), [#allocation4], %s728_s27 }
  0x2d   : > { %v793_v16 = vld [vmem:[%s999_s9 + $0x70] sm:$0xf]  ;;  %v821_v17 = vld [vmem:[%s999_s9 + $0x74] sm:$0xf0]  ;;  %v820_v18 = vld [vmem:[%s999_s9 + $0x74] sm:$0xf] }
  0x2e   : > { %v794_v19 = vor.u32 %v821_v17, %v793_v16  ;;  %v795_v20 = vld [vmem:[%s999_s9 + $0x78] sm:$0xf0]  ;;  %v785_v21 = vld [vmem:[%s999_s9 + $0x60] sm:$0xf]  ;;  %v819_v22 = vld [vmem:[%s999_s9 + $0x64] sm:$0xf0] }
  0x2f   : > { %v798_v23 = vor.u32 %v820_v18, %v795_v20  ;;  %v818_v24 = vld [vmem:[%s999_s9 + $0x64] sm:$0xf]  ;;  %v787_v25 = vld [vmem:[%s999_s9 + $0x68] sm:$0xf0]  ;;  %v786_v26 = vor.u32 %v819_v22, %v785_v21  ;;  %v777_v28 = vld [vmem:[%s999_s9 + $0x50] sm:$0xf] }
  0x30   : > { %505 = vmatpush.bf16.msra.mxu0 %v794_v19  ;;  %v790_v27 = vor.u32 %v818_v24, %v787_v25  ;;  %v817_v29 = vld [vmem:[%s999_s9 + $0x54] sm:$0xf0]  ;;  %v816_v30 = vld [vmem:[%s999_s9 + $0x54] sm:$0xf]  ;;  %v779_v31 = vld [vmem:[%s999_s9 + $0x58] sm:$0xf0] }
  0x31   : > { %519 = vmatpush.bf16.msra.mxu1 %v798_v23  ;;  %v778_v32 = vor.u32 %v817_v29, %v777_v28  ;;  %v782_v33 = vor.u32 %v816_v30, %v779_v31  ;;  %v769_v34 = vld [vmem:[%s999_s9 + $0x40] sm:$0xf]  ;;  %v815_v35 = vld [vmem:[%s999_s9 + $0x44] sm:$0xf0]  ;;  %v814_v36 = vld [vmem:[%s999_s9 + $0x44] sm:$0xf] }
  0x32   : > { %v771_v37 = vld [vmem:[%s999_s9 + $0x48] sm:$0xf0]  ;;  %v770_v38 = vor.u32 %v815_v35, %v769_v34  ;;  %v761_v40 = vld [vmem:[%s999_s9 + $0x30] sm:$0xf]  ;;  %v813_v41 = vld [vmem:[%s999_s9 + $0x34] sm:$0xf0] }
  0x33   : > { %v774_v39 = vor.u32 %v814_v36, %v771_v37  ;;  %v812_v42 = vld [vmem:[%s999_s9 + $0x34] sm:$0xf]  ;;  %v763_v43 = vld [vmem:[%s999_s9 + $0x38] sm:$0xf0]  ;;  %v762_v44 = vor.u32 %v813_v41, %v761_v40  ;;  %v753_v46 = vld [vmem:[%s999_s9 + $0x20] sm:$0xf] }
  0x34   : > { %506 = vmatpush.bf16.msra.mxu0 %v786_v26  ;;  %v766_v45 = vor.u32 %v812_v42, %v763_v43  ;;  %v811_v47 = vld [vmem:[%s999_s9 + $0x24] sm:$0xf0]  ;;  %v810_v48 = vld [vmem:[%s999_s9 + $0x24] sm:$0xf]  ;;  %v755_v49 = vld [vmem:[%s999_s9 + $0x28] sm:$0xf0] }
  0x35   : > { %520 = vmatpush.bf16.msra.mxu1 %v790_v27  ;;  %v754_v50 = vor.u32 %v811_v47, %v753_v46  ;;  %v758_v51 = vor.u32 %v810_v48, %v755_v49  ;;  %v745_v52 = vld [vmem:[%s999_s9 + $0x10] sm:$0xf]  ;;  %v809_v53 = vld [vmem:[%s999_s9 + $0x14] sm:$0xf0]  ;;  %v808_v54 = vld [vmem:[%s999_s9 + $0x14] sm:$0xf] }
  0x36   : > { %v747_v55 = vld [vmem:[%s999_s9 + $0x18] sm:$0xf0]  ;;  %v746_v56 = vor.u32 %v809_v53, %v745_v52  ;;  %v737_v58 = vld [vmem:[%s999_s9] sm:$0xf]  ;;  %v807_v59 = vld [vmem:[%s999_s9 + $0x4] sm:$0xf0] }
  0x37   : > { %v750_v57 = vor.u32 %v808_v54, %v747_v55  ;;  %v806_v60 = vld [vmem:[%s999_s9 + $0x4] sm:$0xf]  ;;  %v739_v61 = vld [vmem:[%s999_s9 + $0x8] sm:$0xf0]  ;;  %v738_v62 = vor.u32 %v807_v59, %v737_v58  ;;  %s1079_s12 = smov (!%p378_p11, %s729_s12), 7  ;;  %s822_s15 = sshll.u32 (%p963_p6), %s893_s17, 4 }
  0x38   : > { %507 = vmatpush.bf16.msra.mxu0 %v778_v32  ;;  %v742_v63 = vor.u32 %v806_v60, %v739_v61  ;;  %v805_v0 = vld [vmem:[%s1066_s0] sm:$0xff]  ;;  %s380_s21 = scalar_lea.vmem %s1068_s2, %s1079_s12  ;;  %s385_s26 = scalar_lea.vmem %s1069_s3, %s1079_s12 }
  0x39   : > { %521 = vmatpush.bf16.msra.mxu1 %v782_v33  ;;  %v548_v1 = vld [vmem:[%s380_s21] sm:$0x3]  ;;  %s584_s5 = scalar_lea.vmem (%p963_p6), %s1070_s4, %s822_s15 }
  0x3a   : > { %v558_v2 = vld [vmem:[%s385_s26] sm:$0x3]  ;;  %v550_v3 = vperm.slane %v548_v1, 0  ;;  %v551_v4 = vperm.slane %v548_v1, 1 }
  0x3b   : > { %v560_v5 = vperm.slane %v558_v2, 0  ;;  %v561_v7 = vperm.slane %v558_v2, 1 }
  0x3c   : > { %508 = vmatpush.bf16.msra.mxu0 %v770_v38 }
  0x3d   : > { %522 = vmatpush.bf16.msra.mxu1 %v774_v39 }
  0x40   : > { %509 = vmatpush.bf16.msra.mxu0 %v762_v44 }
  0x41   : > { %523 = vmatpush.bf16.msra.mxu1 %v766_v45 }
  0x44   : > { %510 = vmatpush.bf16.msra.mxu0 %v754_v50 }
  0x45   : > { %524 = vmatpush.bf16.msra.mxu1 %v758_v51 }
  0x48   : > { %511 = vmatpush.bf16.msra.mxu0 %v746_v56 }
  0x49   : > { %525 = vmatpush.bf16.msra.mxu1 %v750_v57 }
  0x4c   : > { %512 = vmatpush.bf16.msra.mxu0 %v738_v62 }
  0x4d   : > { %526 = vmatpush.bf16.msra.mxu1 %v742_v63 }
  0x4f   : > { %513 = vmatmul.bf16.vlgmr.msra.gmra.mxu0 %v805_v0 }
  0x50   : > { %527 = vmatmul.bf16.vlgmr.msra.gmra.mxu1 %v805_v0 }
  0xcc   : > { %v514_v6 = vpop.f32.mrf.mxu0 }
  0xcd   : > { %v554_v8 = vmul.f32 %v550_v3, %v514_v6  ;;  %v528_v9 = vpop.f32.mrf.mxu1 }
  0xce   : > { %v555_v10 = vmul.f32 %v551_v4, %v528_v9 }
  0xcf   : > { %v564_v11 = vadd.f32 %v560_v5, %v554_v8 }
  0xd0   : > { %v565_v12 = vadd.f32 %v561_v7, %v555_v10 }
  0xd1   : > { %568 = vst [vmem:[%s365_s28] sm:$0xff] %v564_v11 }
  0xd2   : > { %569 = vst [vmem:[%s365_s28 + $0x8] sm:$0xff] %v565_v12 }
  0xd4   : > { %v516_v13 = vpop.f32.mrf.mxu0 }
  0xd5   : > { %v556_v14 = vmul.f32 %v550_v3, %v516_v13  ;;  %v530_v15 = vpop.f32.mrf.mxu1 }
  0xd6   : > { %v557_v16 = vmul.f32 %v551_v4, %v530_v15  ;;  %578 = sbr.rel (!%p963_p6) target bundleno = 227 (0xe3), region = 86 }
  0xd7   : > { %v566_v17 = vadd.f32 %v560_v5, %v556_v14 }
  0xd8   : > { %v567_v18 = vadd.f32 %v561_v7, %v557_v16  ;;  %v597_v19 = vld [vmem:[%s365_s28] sm:$0xff] (%p963_p6) }
  0xd9   : > { %570 = vst [vmem:[%s365_s28 + $0x10] sm:$0xff] %v566_v17  ;;  %v599_v20 = vld [vmem:[%s365_s28 + $0x8] sm:$0xff] (%p963_p6) }
  0xda   : > { %571 = vst [vmem:[%s365_s28 + $0x18] sm:$0xff] %v567_v18 }
  0xdb   : > { %598 = vst [vmem:[%s584_s5] sm:$0xff] %v597_v19 }
  0xdc   : > { %600 = vst [vmem:[%s584_s5 + $0x8] sm:$0xff] %v599_v20 }
  0xe0   : > { %v601_v21 = vld [vmem:[%s365_s28 + $0x10] sm:$0xff] }
  0xe1   : > { %v603_v22 = vld [vmem:[%s365_s28 + $0x18] sm:$0xff]  ;;  %602 = vst [vmem:[%s584_s5 + $0x40] sm:$0xff] %v601_v21 }
  0xe2   : > { %604 = vst [vmem:[%s584_s5 + $0x48] sm:$0xff] %v603_v22 }
  0xe3 PF: > { %s14_s19 = sadd.s32 1, %s901_s19   ;;  %s1072_s15 = smov %s889_s16 }
  0xe4   : > { %p11_p12 = scmp.ge.s32.totalorder %s14_s19, 6   ;;  %s1073_s16 = smov %s968_s25 }
  0xe5   : > { %s1074_s17 = smov %s897_s18  ;;  %s1075_s18 = smov %s1077_s20 }
  0xe6   :  { %13 = sbr.rel (!%p11_p12) target bundleno = 3 (0x3), region = 149 }

// kernel: attend_crnn_forward.28
= control target key start
LH: loop header
LB: loop body
LE: loop exit
PB: predicated region body
PF: predicated region fallthrough
CT: control target
= control target key end

     0   :  { %v672_v0 = vmov 0.0   ;;  %v674_v1 = vmov 0.0   ;;  %v676_v2 = vmov 0.0   ;;  %v678_v3 = vmov 0.0   ;;  %s680_s12 = smov 0   ;;  %s1164_s0 = inlined_call_operand.vmem [shape: f32[5,2,1024], index: 0, kind: input, shape index: {}]   ;;  %s1165_s1 = inlined_call_operand.vmem [shape: f32[128,1024], index: 1, kind: input, shape index: {}]   ;;  %s1166_s2 = inlined_call_operand.vmem [shape: f32[5,2,128], index: 2, kind: output, shape index: {0}]   ;;  %s1167_s3 = inlined_call_operand.vmem [shape: f32[5,2,128], index: 3, kind: output, shape index: {1}]  }
   0x1 LB: > { %v90_v4 = vld [vmem:[%s1165_s1 + $0x3d0] sm:$0xff]  ;;  %v91_v5 = vld [vmem:[%s1165_s1 + $0x3d8] sm:$0xff]  ;;  %v89_v10 = vld [vmem:[%s1165_s1 + $0x3c8] sm:$0xff]  ;;  %s538_s8 = sshll.u32 %s650_s12, 4  ;;  %vm179_vm0 = vcmask 1041408   ;;  %vm181_vm1 = vcmask 1045508   ;;  %s650_s12 = sphi %s680_s12, %s18_s12   ;;  %v646_v3 = vphi %v678_v3, %v1142_v3   ;;  %v642_v2 = vphi %v676_v2, %v1134_v2   ;;  %v638_v1 = vphi %v674_v1, %v486_v1   ;;  %v634_v0 = vphi %v672_v0, %v484_v0  }
   0x2   : > { %v86_v6 = vld [vmem:[%s1165_s1 + $0x390] sm:$0xff]  ;;  %132 = vmatpush.msra.mxu2 %v90_v4  ;;  %152 = vmatpush.msra.mxu3 %v91_v5  ;;  %v87_v7 = vld [vmem:[%s1165_s1 + $0x398] sm:$0xff]  ;;  %v88_v11 = vld [vmem:[%s1165_s1 + $0x3c0] sm:$0xff]  ;;  %s26_s11 = scalar_lea.vmem %s1164_s0, %s538_s8  ;;  %vm183_vm2 = vcmask 1043456   ;;  %s23_s13 = ssub.s32 4, %s650_s12 }
   0x3   : > { %v82_v8 = vld [vmem:[%s1165_s1 + $0x350] sm:$0xff]  ;;  %v83_v9 = vld [vmem:[%s1165_s1 + $0x358] sm:$0xff]  ;;  %v85_v12 = vld [vmem:[%s1165_s1 + $0x388] sm:$0xff]  ;;  %112 = vmatpush.msra.mxu1 %v89_v10  ;;  %92 = vmatpush.msra.mxu0 %v88_v11  ;;  %s1104_s14 = sshll.u32 %s23_s13, 4  ;;  %s536_s18 = sshll.u32 %s650_s12, 1 }
   0x4   : > { %133 = vmatpush.msra.mxu2 %v86_v6  ;;  %153 = vmatpush.msra.mxu3 %v87_v7  ;;  %v78_v13 = vld [vmem:[%s1165_s1 + $0x310] sm:$0xff]  ;;  %v79_v14 = vld [vmem:[%s1165_s1 + $0x318] sm:$0xff]  ;;  %v84_v15 = vld [vmem:[%s1165_s1 + $0x380] sm:$0xff]  ;;  %s189_s17 = scalar_lea.vmem %s1164_s0, %s1104_s14  ;;  %s488_s21 = scalar_lea.vmem %s1166_s2, %s536_s18 }
   0x5   : > { %v81_v16 = vld [vmem:[%s1165_s1 + $0x348] sm:$0xff]  ;;  %v80_v17 = vld [vmem:[%s1165_s1 + $0x340] sm:$0xff]  ;;  %113 = vmatpush.msra.mxu1 %v85_v12  ;;  %v74_v18 = vld [vmem:[%s1165_s1 + $0x2d0] sm:$0xff]  ;;  %93 = vmatpush.msra.mxu0 %v84_v15  ;;  %s537_s22 = sshll.u32 %s23_s13, 1  ;;  %s18_s12 = sadd.s32 1, %s650_s12  }
   0x6   : > { %134 = vmatpush.msra.mxu2 %v82_v8  ;;  %154 = vmatpush.msra.mxu3 %v83_v9  ;;  %v75_v19 = vld [vmem:[%s1165_s1 + $0x2d8] sm:$0xff]  ;;  %v77_v20 = vld [vmem:[%s1165_s1 + $0x308] sm:$0xff]  ;;  %v76_v21 = vld [vmem:[%s1165_s1 + $0x300] sm:$0xff]  ;;  %s491_s25 = scalar_lea.vmem %s1167_s3, %s537_s22  ;;  %p15_p0 = scmp.ge.s32.totalorder %s18_s12, 5  }
   0x7   : > { %114 = vmatpush.msra.mxu1 %v81_v16  ;;  %v70_v22 = vld [vmem:[%s1165_s1 + $0x290] sm:$0xff]  ;;  %v71_v23 = vld [vmem:[%s1165_s1 + $0x298] sm:$0xff]  ;;  %94 = vmatpush.msra.mxu0 %v80_v17  ;;  %v73_v24 = vld [vmem:[%s1165_s1 + $0x2c8] sm:$0xff] }
   0x8   : > { %135 = vmatpush.msra.mxu2 %v78_v13  ;;  %155 = vmatpush.msra.mxu3 %v79_v14  ;;  %v72_v25 = vld [vmem:[%s1165_s1 + $0x2c0] sm:$0xff]  ;;  %v66_v26 = vld [vmem:[%s1165_s1 + $0x250] sm:$0xff]  ;;  %v67_v27 = vld [vmem:[%s1165_s1 + $0x258] sm:$0xff] }
   0x9   : > { %115 = vmatpush.msra.mxu1 %v77_v20  ;;  %95 = vmatpush.msra.mxu0 %v76_v21  ;;  %v69_v28 = vld [vmem:[%s1165_s1 + $0x288] sm:$0xff]  ;;  %v68_v29 = vld [vmem:[%s1165_s1 + $0x280] sm:$0xff]  ;;  %v62_v30 = vld [vmem:[%s1165_s1 + $0x210] sm:$0xff] }
   0xa   : > { %136 = vmatpush.msra.mxu2 %v74_v18  ;;  %156 = vmatpush.msra.mxu3 %v75_v19  ;;  %v63_v31 = vld [vmem:[%s1165_s1 + $0x218] sm:$0xff]  ;;  %v65_v32 = vld [vmem:[%s1165_s1 + $0x248] sm:$0xff]  ;;  %v64_v33 = vld [vmem:[%s1165_s1 + $0x240] sm:$0xff] }
   0xb   : > { %116 = vmatpush.msra.mxu1 %v73_v24  ;;  %96 = vmatpush.msra.mxu0 %v72_v25  ;;  %v58_v34 = vld [vmem:[%s1165_s1 + $0x1d0] sm:$0xff]  ;;  %v59_v35 = vld [vmem:[%s1165_s1 + $0x1d8] sm:$0xff]  ;;  %v61_v36 = vld [vmem:[%s1165_s1 + $0x208] sm:$0xff] }
   0xc   : > { %137 = vmatpush.msra.mxu2 %v70_v22  ;;  %157 = vmatpush.msra.mxu3 %v71_v23  ;;  %v60_v37 = vld [vmem:[%s1165_s1 + $0x200] sm:$0xff]  ;;  %v54_v38 = vld [vmem:[%s1165_s1 + $0x190] sm:$0xff]  ;;  %v55_v39 = vld [vmem:[%s1165_s1 + $0x198] sm:$0xff] }
   0xd   : > { %117 = vmatpush.msra.mxu1 %v69_v28  ;;  %97 = vmatpush.msra.mxu0 %v68_v29  ;;  %v57_v40 = vld [vmem:[%s1165_s1 + $0x1c8] sm:$0xff]  ;;  %v56_v41 = vld [vmem:[%s1165_s1 + $0x1c0] sm:$0xff]  ;;  %v50_v42 = vld [vmem:[%s1165_s1 + $0x150] sm:$0xff] }
   0xe   : > { %138 = vmatpush.msra.mxu2 %v66_v26  ;;  %158 = vmatpush.msra.mxu3 %v67_v27  ;;  %v51_v43 = vld [vmem:[%s1165_s1 + $0x158] sm:$0xff]  ;;  %v53_v44 = vld [vmem:[%s1165_s1 + $0x188] sm:$0xff]  ;;  %v52_v45 = vld [vmem:[%s1165_s1 + $0x180] sm:$0xff] }
   0xf   : > { %118 = vmatpush.msra.mxu1 %v65_v32  ;;  %98 = vmatpush.msra.mxu0 %v64_v33  ;;  %v46_v46 = vld [vmem:[%s1165_s1 + $0x110] sm:$0xff]  ;;  %v47_v47 = vld [vmem:[%s1165_s1 + $0x118] sm:$0xff]  ;;  %v49_v48 = vld [vmem:[%s1165_s1 + $0x148] sm:$0xff] }
  0x10   : > { %139 = vmatpush.msra.mxu2 %v62_v30  ;;  %159 = vmatpush.msra.mxu3 %v63_v31  ;;  %v48_v49 = vld [vmem:[%s1165_s1 + $0x140] sm:$0xff]  ;;  %v42_v50 = vld [vmem:[%s1165_s1 + $0xd0] sm:$0xff]  ;;  %v43_v51 = vld [vmem:[%s1165_s1 + $0xd8] sm:$0xff] }
  0x11   : > { %119 = vmatpush.msra.mxu1 %v61_v36  ;;  %99 = vmatpush.msra.mxu0 %v60_v37  ;;  %v45_v52 = vld [vmem:[%s1165_s1 + $0x108] sm:$0xff]  ;;  %v44_v53 = vld [vmem:[%s1165_s1 + $0x100] sm:$0xff]  ;;  %v38_v54 = vld [vmem:[%s1165_s1 + $0x90] sm:$0xff] }
  0x12   : > { %140 = vmatpush.msra.mxu2 %v58_v34  ;;  %160 = vmatpush.msra.mxu3 %v59_v35  ;;  %v39_v55 = vld [vmem:[%s1165_s1 + $0x98] sm:$0xff]  ;;  %v41_v56 = vld [vmem:[%s1165_s1 + $0xc8] sm:$0xff]  ;;  %v40_v57 = vld [vmem:[%s1165_s1 + $0xc0] sm:$0xff] }
  0x13   : > { %120 = vmatpush.msra.mxu1 %v57_v40  ;;  %100 = vmatpush.msra.mxu0 %v56_v41  ;;  %v34_v58 = vld [vmem:[%s1165_s1 + $0x50] sm:$0xff]  ;;  %v35_v59 = vld [vmem:[%s1165_s1 + $0x58] sm:$0xff]  ;;  %v37_v60 = vld [vmem:[%s1165_s1 + $0x88] sm:$0xff] }
  0x14   : > { %141 = vmatpush.msra.mxu2 %v54_v38  ;;  %161 = vmatpush.msra.mxu3 %v55_v39  ;;  %v36_v61 = vld [vmem:[%s1165_s1 + $0x80] sm:$0xff]  ;;  %v30_v62 = vld [vmem:[%s1165_s1 + $0x10] sm:$0xff]  ;;  %v31_v63 = vld [vmem:[%s1165_s1 + $0x18] sm:$0xff] }
  0x15   : > { %121 = vmatpush.msra.mxu1 %v53_v44  ;;  %101 = vmatpush.msra.mxu0 %v52_v45  ;;  %v253_v4 = vld [vmem:[%s1165_s1 + $0x3f0] sm:$0xff]  ;;  %v254_v5 = vld [vmem:[%s1165_s1 + $0x3f8] sm:$0xff]  ;;  %v33_v6 = vld [vmem:[%s1165_s1 + $0x48] sm:$0xff] }
  0x16   : > { %142 = vmatpush.msra.mxu2 %v50_v42  ;;  %162 = vmatpush.msra.mxu3 %v51_v43  ;;  %v32_v7 = vld [vmem:[%s1165_s1 + $0x40] sm:$0xff]  ;;  %v249_v8 = vld [vmem:[%s1165_s1 + $0x3b0] sm:$0xff]  ;;  %v250_v9 = vld [vmem:[%s1165_s1 + $0x3b8] sm:$0xff] }
  0x17   : > { %122 = vmatpush.msra.mxu1 %v49_v48  ;;  %102 = vmatpush.msra.mxu0 %v48_v49  ;;  %v29_v10 = vld [vmem:[%s1165_s1 + $0x8] sm:$0xff]  ;;  %v28_v11 = vld [vmem:[%s1165_s1] sm:$0xff]  ;;  %v245_v12 = vld [vmem:[%s1165_s1 + $0x370] sm:$0xff] }
  0x18   : > { %143 = vmatpush.msra.mxu2 %v46_v46  ;;  %163 = vmatpush.msra.mxu3 %v47_v47  ;;  %v246_v13 = vld [vmem:[%s1165_s1 + $0x378] sm:$0xff]  ;;  %v252_v14 = vld [vmem:[%s1165_s1 + $0x3e8] sm:$0xff]  ;;  %v241_v15 = vld [vmem:[%s1165_s1 + $0x330] sm:$0xff] }
  0x19   : > { %123 = vmatpush.msra.mxu1 %v45_v52  ;;  %103 = vmatpush.msra.mxu0 %v44_v53  ;;  %v242_v16 = vld [vmem:[%s1165_s1 + $0x338] sm:$0xff]  ;;  %v251_v17 = vld [vmem:[%s1165_s1 + $0x3e0] sm:$0xff]  ;;  %v248_v18 = vld [vmem:[%s1165_s1 + $0x3a8] sm:$0xff] }
  0x1a   : > { %144 = vmatpush.msra.mxu2 %v42_v50  ;;  %164 = vmatpush.msra.mxu3 %v43_v51  ;;  %v237_v19 = vld [vmem:[%s1165_s1 + $0x2f0] sm:$0xff]  ;;  %v238_v20 = vld [vmem:[%s1165_s1 + $0x2f8] sm:$0xff]  ;;  %v247_v21 = vld [vmem:[%s1165_s1 + $0x3a0] sm:$0xff] }
  0x1b   : > { %124 = vmatpush.msra.mxu1 %v41_v56  ;;  %104 = vmatpush.msra.mxu0 %v40_v57  ;;  %v233_v22 = vld [vmem:[%s1165_s1 + $0x2b0] sm:$0xff]  ;;  %v234_v23 = vld [vmem:[%s1165_s1 + $0x2b8] sm:$0xff]  ;;  %v243_v24 = vld [vmem:[%s1165_s1 + $0x360] sm:$0xff] }
  0x1c   : > { %145 = vmatpush.msra.mxu2 %v38_v54  ;;  %165 = vmatpush.msra.mxu3 %v39_v55  ;;  %v240_v25 = vld [vmem:[%s1165_s1 + $0x328] sm:$0xff]  ;;  %v229_v26 = vld [vmem:[%s1165_s1 + $0x270] sm:$0xff]  ;;  %v230_v27 = vld [vmem:[%s1165_s1 + $0x278] sm:$0xff] }
  0x1d   : > { %125 = vmatpush.msra.mxu1 %v37_v60  ;;  %105 = vmatpush.msra.mxu0 %v36_v61  ;;  %v239_v28 = vld [vmem:[%s1165_s1 + $0x320] sm:$0xff]  ;;  %v236_v29 = vld [vmem:[%s1165_s1 + $0x2e8] sm:$0xff]  ;;  %v225_v30 = vld [vmem:[%s1165_s1 + $0x230] sm:$0xff] }
  0x1e   : > { %146 = vmatpush.msra.mxu2 %v34_v58  ;;  %166 = vmatpush.msra.mxu3 %v35_v59  ;;  %v226_v31 = vld [vmem:[%s1165_s1 + $0x238] sm:$0xff]  ;;  %v235_v32 = vld [vmem:[%s1165_s1 + $0x2e0] sm:$0xff]  ;;  %v232_v33 = vld [vmem:[%s1165_s1 + $0x2a8] sm:$0xff] }
  0x1f   : > { %126 = vmatpush.msra.mxu1 %v33_v6  ;;  %106 = vmatpush.msra.mxu0 %v32_v7  ;;  %v221_v34 = vld [vmem:[%s1165_s1 + $0x1f0] sm:$0xff]  ;;  %v222_v35 = vld [vmem:[%s1165_s1 + $0x1f8] sm:$0xff]  ;;  %v231_v36 = vld [vmem:[%s1165_s1 + $0x2a0] sm:$0xff] }
  0x20   : > { %147 = vmatpush.msra.mxu2 %v30_v62  ;;  %167 = vmatpush.msra.mxu3 %v31_v63  ;;  %v228_v37 = vld [vmem:[%s1165_s1 + $0x268] sm:$0xff]  ;;  %v217_v38 = vld [vmem:[%s1165_s1 + $0x1b0] sm:$0xff]  ;;  %v218_v39 = vld [vmem:[%s1165_s1 + $0x1b8] sm:$0xff] }
  0x21   : > { %148 = vmatmul.f32.vlgmr.msra.gmra.mxu2 %v646_v3  ;;  %168 = vmatmul.f32.vlgmr.msra.gmra.mxu3 %v646_v3  ;;  %v227_v40 = vld [vmem:[%s1165_s1 + $0x260] sm:$0xff]  ;;  %v224_v41 = vld [vmem:[%s1165_s1 + $0x228] sm:$0xff]  ;;  %v213_v42 = vld [vmem:[%s1165_s1 + $0x170] sm:$0xff] }
  0x22   : > { %295 = vmatpush.msrb.mxu2 %v253_v4  ;;  %315 = vmatpush.msrb.mxu3 %v254_v5  ;;  %v214_v43 = vld [vmem:[%s1165_s1 + $0x178] sm:$0xff]  ;;  %v223_v44 = vld [vmem:[%s1165_s1 + $0x220] sm:$0xff]  ;;  %v220_v45 = vld [vmem:[%s1165_s1 + $0x1e8] sm:$0xff] }
  0x23   : > { %127 = vmatpush.msra.mxu1 %v29_v10  ;;  %107 = vmatpush.msra.mxu0 %v28_v11  ;;  %v209_v46 = vld [vmem:[%s1165_s1 + $0x130] sm:$0xff]  ;;  %v210_v47 = vld [vmem:[%s1165_s1 + $0x138] sm:$0xff]  ;;  %v219_v48 = vld [vmem:[%s1165_s1 + $0x1e0] sm:$0xff] }
  0x24   : > { %296 = vmatpush.msrb.mxu2 %v249_v8  ;;  %316 = vmatpush.msrb.mxu3 %v250_v9  ;;  %v216_v49 = vld [vmem:[%s1165_s1 + $0x1a8] sm:$0xff]  ;;  %v205_v50 = vld [vmem:[%s1165_s1 + $0xf0] sm:$0xff]  ;;  %v206_v51 = vld [vmem:[%s1165_s1 + $0xf8] sm:$0xff] }
  0x25   : > { %128 = vmatmul.f32.vlgmr.msra.gmra.mxu1 %v646_v3  ;;  %108 = vmatmul.f32.vlgmr.msra.gmra.mxu0 %v646_v3  ;;  %v244_v3 = vld [vmem:[%s1165_s1 + $0x368] sm:$0xff]  ;;  %v215_v52 = vld [vmem:[%s1165_s1 + $0x1a0] sm:$0xff]  ;;  %v201_v54 = vld [vmem:[%s1165_s1 + $0xb0] sm:$0xff] }
  0x26   : > { %297 = vmatpush.msrb.mxu2 %v245_v12  ;;  %317 = vmatpush.msrb.mxu3 %v246_v13  ;;  %v212_v53 = vld [vmem:[%s1165_s1 + $0x168] sm:$0xff]  ;;  %v202_v55 = vld [vmem:[%s1165_s1 + $0xb8] sm:$0xff]  ;;  %v211_v56 = vld [vmem:[%s1165_s1 + $0x160] sm:$0xff] }
  0x27   : > { %275 = vmatpush.msrb.mxu1 %v252_v14  ;;  %255 = vmatpush.msrb.mxu0 %v251_v17  ;;  %v208_v57 = vld [vmem:[%s1165_s1 + $0x128] sm:$0xff]  ;;  %v197_v58 = vld [vmem:[%s1165_s1 + $0x70] sm:$0xff]  ;;  %v198_v59 = vld [vmem:[%s1165_s1 + $0x78] sm:$0xff] }
  0x28   : > { %298 = vmatpush.msrb.mxu2 %v241_v15  ;;  %318 = vmatpush.msrb.mxu3 %v242_v16  ;;  %v207_v60 = vld [vmem:[%s1165_s1 + $0x120] sm:$0xff]  ;;  %v204_v61 = vld [vmem:[%s1165_s1 + $0xe8] sm:$0xff]  ;;  %v193_v62 = vld [vmem:[%s1165_s1 + $0x30] sm:$0xff] }
  0x29   : > { %276 = vmatpush.msrb.mxu1 %v248_v18  ;;  %256 = vmatpush.msrb.mxu0 %v247_v21  ;;  %v194_v63 = vld [vmem:[%s1165_s1 + $0x38] sm:$0xff]  ;;  %v203_v4 = vld [vmem:[%s1165_s1 + $0xe0] sm:$0xff]  ;;  %v200_v5 = vld [vmem:[%s1165_s1 + $0xa8] sm:$0xff] }
  0x2a   : > { %299 = vmatpush.msrb.mxu2 %v237_v19  ;;  %319 = vmatpush.msrb.mxu3 %v238_v20  ;;  %v199_v6 = vld [vmem:[%s1165_s1 + $0xa0] sm:$0xff]  ;;  %v196_v7 = vld [vmem:[%s1165_s1 + $0x68] sm:$0xff] }
  0x2b   : > { %277 = vmatpush.msrb.mxu1 %v244_v3  ;;  %257 = vmatpush.msrb.mxu0 %v243_v24  ;;  %v195_v8 = vld [vmem:[%s1165_s1 + $0x60] sm:$0xff]  ;;  %v192_v9 = vld [vmem:[%s1165_s1 + $0x28] sm:$0xff] }
  0x2c   : > { %300 = vmatpush.msrb.mxu2 %v233_v22  ;;  %320 = vmatpush.msrb.mxu3 %v234_v23  ;;  %v191_v10 = vld [vmem:[%s1165_s1 + $0x20] sm:$0xff] }
  0x2d   : > { %278 = vmatpush.msrb.mxu1 %v240_v25  ;;  %258 = vmatpush.msrb.mxu0 %v239_v28  ;;  %v27_v18 = vld [vmem:[%s26_s11] sm:$0xff] }
  0x2e   : > { %301 = vmatpush.msrb.mxu2 %v229_v26  ;;  %321 = vmatpush.msrb.mxu3 %v230_v27 }
  0x2f   : > { %279 = vmatpush.msrb.mxu1 %v236_v29  ;;  %259 = vmatpush.msrb.mxu0 %v235_v32 }
  0x30   : > { %302 = vmatpush.msrb.mxu2 %v225_v30  ;;  %322 = vmatpush.msrb.mxu3 %v226_v31 }
  0x31   : > { %280 = vmatpush.msrb.mxu1 %v232_v33  ;;  %260 = vmatpush.msrb.mxu0 %v231_v36 }
  0x32   : > { %303 = vmatpush.msrb.mxu2 %v221_v34  ;;  %323 = vmatpush.msrb.mxu3 %v222_v35 }
  0x33   : > { %281 = vmatpush.msrb.mxu1 %v228_v37  ;;  %261 = vmatpush.msrb.mxu0 %v227_v40 }
  0x34   : > { %304 = vmatpush.msrb.mxu2 %v217_v38  ;;  %324 = vmatpush.msrb.mxu3 %v218_v39 }
  0x35   : > { %282 = vmatpush.msrb.mxu1 %v224_v41  ;;  %262 = vmatpush.msrb.mxu0 %v223_v44 }
  0x36   : > { %305 = vmatpush.msrb.mxu2 %v213_v42  ;;  %325 = vmatpush.msrb.mxu3 %v214_v43 }
  0x37   : > { %283 = vmatpush.msrb.mxu1 %v220_v45  ;;  %263 = vmatpush.msrb.mxu0 %v219_v48 }
  0x38   : > { %306 = vmatpush.msrb.mxu2 %v209_v46  ;;  %326 = vmatpush.msrb.mxu3 %v210_v47 }
  0x39   : > { %284 = vmatpush.msrb.mxu1 %v216_v49  ;;  %264 = vmatpush.msrb.mxu0 %v215_v52 }
  0x3a   : > { %307 = vmatpush.msrb.mxu2 %v205_v50  ;;  %327 = vmatpush.msrb.mxu3 %v206_v51 }
  0x3b   : > { %285 = vmatpush.msrb.mxu1 %v212_v53  ;;  %265 = vmatpush.msrb.mxu0 %v211_v56 }
  0x3c   : > { %308 = vmatpush.msrb.mxu2 %v201_v54  ;;  %328 = vmatpush.msrb.mxu3 %v202_v55 }
  0x3d   : > { %286 = vmatpush.msrb.mxu1 %v208_v57  ;;  %266 = vmatpush.msrb.mxu0 %v207_v60 }
  0x3e   : > { %309 = vmatpush.msrb.mxu2 %v197_v58  ;;  %329 = vmatpush.msrb.mxu3 %v198_v59 }
  0x3f   : > { %287 = vmatpush.msrb.mxu1 %v204_v61  ;;  %267 = vmatpush.msrb.mxu0 %v203_v4  ;;  %v190_v4 = vld [vmem:[%s189_s17 + $0x8] sm:$0xff] }
  0x40   : > { %310 = vmatpush.msrb.mxu2 %v193_v62  ;;  %330 = vmatpush.msrb.mxu3 %v194_v63 }
  0x41   : > { %311 = vmatmul.f32.vlgmr.msrb.gmra.mxu2 %v638_v1  ;;  %331 = vmatmul.f32.vlgmr.msrb.gmra.mxu3 %v638_v1 }
  0x42   : > { %288 = vmatpush.msrb.mxu1 %v200_v5  ;;  %268 = vmatpush.msrb.mxu0 %v199_v6 }
  0x44   : > { %289 = vmatpush.msrb.mxu1 %v196_v7  ;;  %269 = vmatpush.msrb.mxu0 %v195_v8 }
  0x46   : > { %290 = vmatpush.msrb.mxu1 %v192_v9  ;;  %270 = vmatpush.msrb.mxu0 %v191_v10 }
  0x47   : > { %291 = vmatmul.f32.vlgmr.msrb.gmra.mxu1 %v638_v1  ;;  %271 = vmatmul.f32.vlgmr.msrb.gmra.mxu0 %v638_v1 }
  0xa2   : > { %v129_v11 = vpop.f32.mrf.mxu1  ;;  %v109_v16 = vpop.f32.mrf.mxu0 }
  0xa3   : > { %v176_v13 = vrot.slane %v129_v11, 6 }
  0xa4   : > { %v149_v12 = vpop.f32.mrf.mxu2  ;;  %v169_v15 = vpop.f32.mrf.mxu3 }
  0xa5   : > { %v177_v14 = vrot.slane %v149_v12, 4  ;;  %v178_v17 = vrot.slane %v169_v15, 2  ;;  %v180_v19 = vsel %vm179_vm0, %v109_v16, %v176_v13 }
  0xa7   : > { %v182_v1 = vsel %vm181_vm1, %v177_v14, %v178_v17 }
  0xa8   : > { %v184_v20 = vsel %vm183_vm2, %v180_v19, %v182_v1 }
  0xa9   : > { %v186_v21 = vadd.f32 %v184_v20, %v27_v18 }
  0xab   : > { %v530_v3 = vmul.f32 -1.442695, %v186_v21  ;;  %v367_v22 = vrot.slane %v186_v21, 2  ;;  %v391_v23 = vrot.slane %v186_v21, 6  ;;  %v388_v32 = vrot.slane %v186_v21, 4 }
  0xad   : > { %580 = vpow2.f32 %v530_v3  ;;  %v531_v24 = vmul.f32 -1.442695, %v367_v22  ;;  %v532_v25 = vmul.f32 -1.442695, %v391_v23 }
  0xaf   : > { %582 = vpow2.f32 %v531_v24 }
  0xb0   : > { %584 = vpow2.f32 %v532_v25 }
  0xb3   : > { %v581_v26 = vpop.eup %580 }
  0xb4   : > { %v350_v27 = vadd.f32 1.0, %v581_v26 }
  0xb5   : > { %v583_v28 = vpop.eup %582 }
  0xb6   : > { %v585_v29 = vpop.eup %584  ;;  %586 = vrcp.f32 %v350_v27  ;;  %v372_v30 = vadd.f32 1.0, %v583_v28  ;;  %v362_v35 = vand.u32 2147483648, %v350_v27  ;;  %vm356_vm3 = vweird.f32 %v350_v27 }
  0xb7   : > { %v1096_v31 = vadd.f32 1.0, %v585_v29  ;;  %v360_v38 = vand.u32 2147483647, %v350_v27 }
  0xb8   : > { %588 = vrcp.f32 %v372_v30  ;;  %v363_v42 = vor.u32 1.1754944e-38, %v362_v35  ;;  %v384_v43 = vand.u32 2147483648, %v372_v30  ;;  %vm378_vm6 = vweird.f32 %v372_v30 }
  0xb9   : > { %590 = vrcp.f32 %v1096_v31  ;;  %v382_v47 = vand.u32 2147483647, %v372_v30  ;;  %vm361_vm8 = vcmp.eq.f32.partialorder %v360_v38, 8.507059e+37  ;;  %vm402_vm11 = vweird.f32 %v1096_v31 }
  0xba   : > { %592 = vtanh.f32 %v388_v32  ;;  %v385_v58 = vor.u32 1.1754944e-38, %v384_v43  ;;  %v406_v13 = vand.u32 2147483647, %v1096_v31  ;;  %v408_v14 = vand.u32 2147483648, %v1096_v31 }
  0xbb   : > { %vm383_vm10 = vcmp.eq.f32.partialorder %v382_v47, 8.507059e+37 }
  0xbc   : > { %v587_v33 = vpop.eup %586  ;;  %v409_v21 = vor.u32 1.1754944e-38, %v408_v14  ;;  %vm407_vm14 = vcmp.eq.f32.partialorder %v406_v13, 8.507059e+37 }
  0xbd   : > { %v352_v34 = vmul.f32 %v587_v33, %v350_v27  ;;  %vm357_vm4 = vweird.f32 %v587_v33 }
  0xbe   : > { %v589_v36 = vpop.eup %588  ;;  %vm1108_vm5 = vmor %vm356_vm3, %vm357_vm4 }
  0xbf   : > { %v353_v37 = vsub.f32 1.0, %v352_v34  ;;  %v1100_v39 = vpop.eup %590  ;;  %v374_v40 = vmul.f32 %v589_v36, %v372_v30  ;;  %vm379_vm7 = vweird.f32 %v589_v36 }
  0xc0   : > { %v398_v44 = vmul.f32 %v1100_v39, %v1096_v31  ;;  %v593_v51 = vpop.eup %592  ;;  %vm1118_vm9 = vmor %vm378_vm6, %vm379_vm7  ;;  %vm403_vm12 = vweird.f32 %v1100_v39 }
  0xc1   : > { %v354_v41 = vmul.f32 %v587_v33, %v353_v37  ;;  %v375_v46 = vsub.f32 1.0, %v374_v40  ;;  %vm404_vm13 = vmor %vm402_vm11, %vm403_vm12 }
  0xc2   : > { %v399_v49 = vsub.f32 1.0, %v398_v44 }
  0xc3   : > { %v355_v48 = vadd.f32 %v587_v33, %v354_v41  ;;  %v376_v52 = vmul.f32 %v589_v36, %v375_v46 }
  0xc4   : > { %v312_v50 = vpop.f32.mrf.mxu2  ;;  %v292_v53 = vpop.f32.mrf.mxu1  ;;  %v400_v5 = vmul.f32 %v1100_v39, %v399_v49 }
  0xc5   : > { %v340_v54 = vrot.slane %v312_v50, 4  ;;  %v332_v55 = vpop.f32.mrf.mxu3  ;;  %v359_v56 = vsel %vm1108_vm5, %v587_v33, %v355_v48  ;;  %v339_v59 = vrot.slane %v292_v53, 6  ;;  %v272_v61 = vpop.f32.mrf.mxu0  ;;  %v377_v63 = vadd.f32 %v589_v36, %v376_v52 }
  0xc6   : > { %v341_v60 = vrot.slane %v332_v55, 2  ;;  %v364_v62 = vsel %vm361_vm8, %v363_v42, %v359_v56  ;;  %v401_v16 = vadd.f32 %v1100_v39, %v400_v5 }
  0xc7   : > { %v342_v7 = vsel %vm179_vm0, %v272_v61, %v339_v59  ;;  %v381_v8 = vsel %vm1118_vm9, %v589_v36, %v377_v63  ;;  %v413_v9 = vmul.f32 %v593_v51, %v364_v62 }
  0xc8   : > { %v343_v6 = vsel %vm181_vm1, %v340_v54, %v341_v60  ;;  %v386_v11 = vsel %vm383_vm10, %v385_v58, %v381_v8  ;;  %v405_v3 = vsel %vm404_vm13, %v1100_v39, %v401_v16 }
  0xc9   : > { %v344_v10 = vsel %vm183_vm2, %v342_v7, %v343_v6  ;;  %v412_v15 = vmul.f32 %v642_v2, %v386_v11  ;;  %v410_v22 = vsel %vm407_vm14, %v409_v21, %v405_v3 }
  0xca   : > { %v346_v12 = vadd.f32 %v344_v10, %v190_v4 }
  0xcb   : > { %v1134_v2 = vadd.f32 %v413_v9, %v412_v15  }
  0xcc   : > { %v533_v17 = vmul.f32 -1.442695, %v346_v12  ;;  %v437_v18 = vrot.slane %v346_v12, 2  ;;  %v461_v19 = vrot.slane %v346_v12, 6  ;;  %v458_v34 = vrot.slane %v346_v12, 4 }
  0xce   : > { %594 = vpow2.f32 %v533_v17  ;;  %v534_v1 = vmul.f32 -1.442695, %v437_v18  ;;  %v535_v20 = vmul.f32 -1.442695, %v461_v19 }
  0xcf   : > { %596 = vtanh.f32 %v1134_v2 }
  0xd0   : > { %598 = vpow2.f32 %v534_v1 }
  0xd1   : > { %600 = vpow2.f32 %v535_v20 }
  0xd4   : > { %v595_v23 = vpop.eup %594 }
  0xd5   : > { %v597_v24 = vpop.eup %596  ;;  %v420_v25 = vadd.f32 1.0, %v595_v23 }
  0xd6   : > { %v599_v26 = vpop.eup %598  ;;  %v1142_v3 = vmul.f32 %v597_v24, %v410_v22  }
  0xd7   : > { %602 = vrcp.f32 %v420_v25  ;;  %v601_v27 = vpop.eup %600  ;;  %v442_v28 = vadd.f32 1.0, %v599_v26  ;;  %v432_v38 = vand.u32 2147483648, %v420_v25  ;;  %v430_v40 = vand.u32 2147483647, %v420_v25 }
  0xd8   : > { %489 = vst [vmem:[%s488_s21] sm:$0x3] %v1142_v3  ;;  %v466_v29 = vadd.f32 1.0, %v601_v27  ;;  %vm426_vm0 = vweird.f32 %v420_v25 }
  0xd9   : > { %604 = vrcp.f32 %v442_v28  ;;  %v454_v43 = vand.u32 2147483648, %v442_v28  ;;  %v452_v45 = vand.u32 2147483647, %v442_v28  ;;  %v433_v47 = vor.u32 1.1754944e-38, %v432_v38 }
  0xda   : > { %606 = vrcp.f32 %v466_v29  ;;  %vm431_vm3 = vcmp.eq.f32.partialorder %v430_v40, 8.507059e+37  ;;  %vm448_vm4 = vweird.f32 %v442_v28  ;;  %v478_v59 = vand.u32 2147483648, %v466_v29 }
  0xdb   : > { %608 = vtanh.f32 %v458_v34  ;;  %v455_v51 = vor.u32 1.1754944e-38, %v454_v43  ;;  %vm453_vm6 = vcmp.eq.f32.partialorder %v452_v45, 8.507059e+37  ;;  %vm472_vm8 = vweird.f32 %v466_v29 }
  0xdc   : > { %v476_v60 = vand.u32 2147483647, %v466_v29  ;;  %v479_v62 = vor.u32 1.1754944e-38, %v478_v59 }
  0xdd   : > { %v603_v30 = vpop.eup %602 }
  0xde   : > { %v422_v31 = vmul.f32 %v603_v30, %v420_v25  ;;  %vm427_vm15 = vweird.f32 %v603_v30  ;;  %vm477_vm10 = vcmp.eq.f32.partialorder %v476_v60, 8.507059e+37 }
  0xdf   : > { %v605_v32 = vpop.eup %604  ;;  %vm428_vm1 = vmor %vm426_vm0, %vm427_vm15 }
  0xe0   : > { %v423_v33 = vsub.f32 1.0, %v422_v31  ;;  %v607_v35 = vpop.eup %606  ;;  %v444_v36 = vmul.f32 %v605_v32, %v442_v28  ;;  %vm449_vm2 = vweird.f32 %v605_v32 }
  0xe1   : > { %v468_v39 = vmul.f32 %v607_v35, %v466_v29  ;;  %vm450_vm5 = vmor %vm448_vm4, %vm449_vm2  ;;  %v609_v53 = vpop.eup %608  ;;  %vm473_vm7 = vweird.f32 %v607_v35 }
  0xe2   : > { %v424_v37 = vmul.f32 %v603_v30, %v423_v33  ;;  %v445_v41 = vsub.f32 1.0, %v444_v36  ;;  %vm474_vm9 = vmor %vm472_vm8, %vm473_vm7 }
  0xe3   : > { %v469_v48 = vsub.f32 1.0, %v468_v39 }
  0xe4   : > { %v425_v42 = vadd.f32 %v603_v30, %v424_v37  ;;  %v446_v44 = vmul.f32 %v605_v32, %v445_v41 }
  0xe5   : > { %v470_v55 = vmul.f32 %v607_v35, %v469_v48 }
  0xe6   : > { %v429_v46 = vsel %vm428_vm1, %v603_v30, %v425_v42  ;;  %v447_v49 = vadd.f32 %v605_v32, %v446_v44 }
  0xe7   : > { %v434_v50 = vsel %vm431_vm3, %v433_v47, %v429_v46  ;;  %v471_v58 = vadd.f32 %v607_v35, %v470_v55 }
  0xe8   : > { %v451_v52 = vsel %vm450_vm5, %v605_v32, %v447_v49  ;;  %v483_v57 = vmul.f32 %v609_v53, %v434_v50 }
  0xe9   : > { %v456_v54 = vsel %vm453_vm6, %v455_v51, %v451_v52  ;;  %v475_v61 = vsel %vm474_vm9, %v607_v35, %v471_v58 }
  0xea   : > { %v482_v56 = vmul.f32 %v634_v0, %v456_v54  ;;  %v480_v4 = vsel %vm477_vm10, %v479_v62, %v475_v61 }
  0xec   : > { %v484_v0 = vadd.f32 %v483_v57, %v482_v56  }
  0xee   : > { %610 = vtanh.f32 %v484_v0 }
  0xf3   :  { %17 = sbr.rel (!%p15_p0) target bundleno = 1 (0x1), region = 47 }
  0xf4   : > { %v611_v63 = vpop.eup %610 }
  0xf5   : > { %v486_v1 = vmul.f32 %v611_v63, %v480_v4  }
  0xf7   : > { %492 = vst [vmem:[%s491_s25] sm:$0x3] %v486_v1 }

</bundles_post_ra>
